<compile_context>
chip_gen: v6e
topology: v6e:2x2x1
jax: 0.10.0
libtpu: 0.0.40
codegen_flags: <defaults>
</compile_context>

<pallas_src>
import functools

import numpy as np
import jax
import jax.numpy as jnp
from jax.experimental import pallas as pl
from jax.experimental.pallas import tpu as pltpu


def _round_up(a, b):
    return (a + b - 1) // b * b


def _vmem_capacity_bytes():
    """Best-effort per-core VMEM capacity; conservative 64 MiB fallback."""
    try:
        return int(pltpu.get_tpu_info().vmem_capacity_bytes)
    except Exception:
        return 64 * 1024 * 1024


def _choose_k_block(n_freq, col_cap):
    """Pick (TK, n_kj) with Kp = n_kj * TK, TK a multiple of 128.

    Minimizes n_kj first (grid steps / frame re-reads), then wasted padded columns,
    preferring wider blocks on ties.  Never collapses to TK=128 when a wider block
    with a little padding keeps n_kj the same (perf-review guard).
    """
    kp0 = _round_up(n_freq, 128)
    col_cap = max(128, (col_cap // 128) * 128)
    if kp0 <= col_cap:
        return kp0, 1
    best = None
    for tk in range(col_cap, 127, -128):
        n = -(-kp0 // tk)
        key = (n, n * tk - kp0, -tk)
        if best is None or key < best[0]:
            best = (key, tk, n)
    return best[1], best[2]


# ----------------------------------------------------------------------------
# Pallas kernel: per-scale STFT magnitudes + L1 partial sums
# ----------------------------------------------------------------------------
def _stft_loss_kernel(xy_ref, cs_ref, log_ref, mag_ref, log_acc, mag_acc,
                      *, clamp_eps, pow_, tm, tk):
    kj = pl.program_id(0)          # frequency-block index (outer)
    mi = pl.program_id(1)          # M-tile index (innermost -> basis block stays resident)

    @pl.when(jnp.logical_and(kj == 0, mi == 0))
    def _():
        log_acc[...] = jnp.zeros_like(log_acc)
        mag_acc[...] = jnp.zeros_like(mag_acc)

    xy = xy_ref[...]                                   # (2, tm, Wp) bf16: x rows | y rows
    xy2 = xy.reshape(2 * tm, xy.shape[-1])             # (2*tm, Wp), layout-free merge
    cs = cs_ref[...]                                   # (Wp, 2*tk) bf16: [hann*cos | -hann*sin]

    # One fused matmul: x and y share the RHS weight push, cos and sin share the LHS stream.
    reim = jnp.dot(xy2, cs, preferred_element_type=jnp.float32)   # (2*tm, 2*tk) f32
    re = reim[:, :tk]
    im = reim[:, tk:]

    p2 = re * re + im * im                             # |STFT|^2
    mag = jnp.sqrt(p2)
    # log10(clamp(mag, eps) ** pow) == 0.5 * pow * log10(max(|S|^2, eps^2))
    logm = (0.5 * pow_) * jnp.log10(jnp.maximum(p2, clamp_eps * clamp_eps))

    # Elementwise accumulation (VPU only); full reduction deferred to the last step.
    log_acc[...] += jnp.abs(logm[:tm] - logm[tm:])
    mag_acc[...] += jnp.abs(mag[:tm] - mag[tm:])

    @pl.when(jnp.logical_and(kj == pl.num_programs(0) - 1,
                             mi == pl.num_programs(1) - 1))
    def _():
        log_ref[...] = jnp.sum(log_acc[...], keepdims=True)
        mag_ref[...] = jnp.sum(mag_acc[...], keepdims=True)


# ----------------------------------------------------------------------------
# Glue (framing, DFT basis, padding) in plain JAX / numpy
# ----------------------------------------------------------------------------
def _frame(signal, win, hop):
    """torch.stft(center=True, pad_mode='reflect') framing.

    signal: (B, C, T) -> (B*C*n_frames, win), n_frames.
    Uses hop-sized chunk slices + concat (no XLA gather).
    """
    B, C, T = signal.shape
    pad = win // 2
    sig = jnp.pad(signal, ((0, 0), (0, 0), (pad, pad)), mode="reflect")
    L = sig.shape[-1]
    n_frames = 1 + (L - win) // hop
    if win % hop == 0:
        ratio = win // hop                       # 4 for hop = win // 4
        n_chunks = n_frames - 1 + ratio
        ch = sig[..., : n_chunks * hop].reshape(B, C, n_chunks, hop)
        frames = jnp.concatenate(
            [ch[:, :, s:s + n_frames, :] for s in range(ratio)], axis=-1)
    else:  # fallback (not hit for hop = win // 4)
        starts = np.arange(n_frames) * hop
        idx = starts[:, None] + np.arange(win)[None, :]
        frames = sig[:, :, idx]
    return frames.reshape(B * C * n_frames, win), n_frames


def _dft_basis(win):
    """Periodic Hann window folded into the real-FFT cos/sin basis."""
    n_freq = win // 2 + 1
    n = np.arange(win)
    k = np.arange(n_freq)
    window = 0.5 - 0.5 * np.cos(2.0 * np.pi * n / win)       # periodic hann
    ang = 2.0 * np.pi * np.outer(n, k) / win
    cos_b = (window[:, None] * np.cos(ang)).astype(np.float32)
    sin_b = (-window[:, None] * np.sin(ang)).astype(np.float32)
    return cos_b, sin_b, n_freq


def _stft_scale_sums(x_frames, y_frames, cos_b, sin_b, *, clamp_eps, pow_,
                     tm_max=256, k_block_cap=None):
    """Run the Pallas kernel for one STFT scale; return (sum_log_l1, sum_mag_l1)."""
    M, W = x_frames.shape
    K = cos_b.shape[1]

    Wp = _round_up(W, 128)            # lane-dense contraction dim (small windows)

    vmem_cap = _vmem_capacity_bytes()
    vmem_limit = max(48 * 2**20, min(96 * 2**20, vmem_cap * 3 // 4))
    if k_block_cap is None:
        # keep the double-buffered bf16 basis block around vmem_cap/6
        k_block_cap = max(256, vmem_cap // (48 * Wp))
    TK, n_kj = _choose_k_block(K, k_block_cap)
    Kp = n_kj * TK

    tm = min(tm_max, _round_up(M, 8))
    n_mi = -(-M // tm)
    Mp = n_mi * tm

    # Zero padding is loss-neutral: padded rows/cols produce identical x/y terms.
    xfp = jnp.pad(x_frames, ((0, Mp - M), (0, Wp - W)))
    yfp = jnp.pad(y_frames, ((0, Mp - M), (0, Wp - W)))
    xy = jnp.stack([xfp, yfp], axis=0).astype(jnp.bfloat16)     # (2, Mp, Wp) bf16

    # Per-K-block interleave of [cos | sin] so each (Wp, 2*TK) block is one RHS.
    cosp = np.pad(cos_b, ((0, Wp - W), (0, Kp - K)))
    sinp = np.pad(sin_b, ((0, Wp - W), (0, Kp - K)))
    cs_np = np.concatenate([cosp.reshape(Wp, n_kj, TK),
                            sinp.reshape(Wp, n_kj, TK)], axis=-1).reshape(Wp, 2 * Kp)
    cs = jnp.asarray(cs_np, dtype=jnp.bfloat16)                 # (Wp, 2*Kp) bf16

    kernel = functools.partial(_stft_loss_kernel, clamp_eps=clamp_eps,
                               pow_=pow_, tm=tm, tk=TK)

    log_p, mag_p = pl.pallas_call(
        kernel,
        out_shape=(jax.ShapeDtypeStruct((1, 1), jnp.float32),
                   jax.ShapeDtypeStruct((1, 1), jnp.float32)),
        grid_spec=pltpu.PrefetchScalarGridSpec(
            num_scalar_prefetch=0,
            grid=(n_kj, n_mi),                 # K-blocks outer, M-tiles innermost
            in_specs=[
                pl.BlockSpec((2, tm, Wp), lambda j, i: (0, i, 0)),
                pl.BlockSpec((Wp, 2 * TK), lambda j, i: (0, j)),   # resident across i
            ],
            out_specs=(
                pl.BlockSpec((1, 1), lambda j, i: (0, 0)),
                pl.BlockSpec((1, 1), lambda j, i: (0, 0)),
            ),
            scratch_shapes=[pltpu.VMEM((tm, TK), jnp.float32),
                            pltpu.VMEM((tm, TK), jnp.float32)],
        ),
        compiler_params=pltpu.CompilerParams(
            dimension_semantics=("arbitrary", "arbitrary"),
            vmem_limit_bytes=vmem_limit),
    )(xy, cs)
    return log_p[0, 0], mag_p[0, 0]


def multi_scale_stft_loss(x, y, window_lengths=(2048, 512), *,
                          clamp_eps=1e-5, mag_weight=1.0, log_weight=1.0,
                          pow_=2.0, k_block_cap=None):
    """Equivalent of MultiScaleSTFTLoss.forward with L1Loss (mean reduction)."""
    loss = jnp.float32(0.0)
    for w in window_lengths:
        hop = w // 4
        cos_b, sin_b, n_freq = _dft_basis(w)
        x_frames, _ = _frame(x, w, hop)
        y_frames, _ = _frame(y, w, hop)
        n_elem = x_frames.shape[0] * n_freq   # B*C*n_frames*n_freq (unpadded)
        sum_log, sum_mag = _stft_scale_sums(
            x_frames, y_frames, cos_b, sin_b, clamp_eps=clamp_eps, pow_=pow_,
            k_block_cap=k_block_cap)
        loss = loss + log_weight * (sum_log / n_elem)
        loss = loss + mag_weight * (sum_mag / n_elem)
    return loss


# ----------------------------------------------------------------------------
# Pure-JAX reference (FFT based) for correctness check
# ----------------------------------------------------------------------------
def _reference_loss(x, y, window_lengths, *, clamp_eps=1e-5, mag_weight=1.0,
                    log_weight=1.0, pow_=2.0):
    loss = 0.0
    for w in window_lengths:
        hop = w // 4
        n = np.arange(w)
        window = jnp.asarray(0.5 - 0.5 * np.cos(2.0 * np.pi * n / w),
                             dtype=jnp.float32)
        xf, _ = _frame(x, w, hop)
        yf, _ = _frame(y, w, hop)
        mag_x = jnp.abs(jnp.fft.rfft(xf * window[None, :], axis=-1))
        mag_y = jnp.abs(jnp.fft.rfft(yf * window[None, :], axis=-1))
        log_x = jnp.log10(jnp.maximum(mag_x, clamp_eps) ** pow_)
        log_y = jnp.log10(jnp.maximum(mag_y, clamp_eps) ** pow_)
        loss = loss + log_weight * jnp.mean(jnp.abs(log_x - log_y))
        loss = loss + mag_weight * jnp.mean(jnp.abs(mag_x - mag_y))
    return loss


if __name__ == "__main__":
    key = jax.random.PRNGKey(0)
    kx, ky = jax.random.split(key)

    # Small (batch, channels, time) audio; scaled-down window lengths (constructor arg).
    # k_block_cap=512 (a v7x-safe setting) forces the K-split path for the 1024 window
    # on every chip, while the 32 window covers the single-block + M-tiling paths.
    B, C, T = 2, 4, 640
    window_lengths = (1024, 32)

    x = 0.1 * jax.random.normal(kx, (B, C, T), dtype=jnp.float32)
    y = 0.1 * jax.random.normal(ky, (B, C, T), dtype=jnp.float32)

    loss_fn = jax.jit(functools.partial(multi_scale_stft_loss,
                                        window_lengths=window_lengths,
                                        k_block_cap=512))
    loss = jax.block_until_ready(loss_fn(x, y))

    ref = jax.block_until_ready(_reference_loss(x, y, window_lengths))
    assert np.isfinite(float(loss))
    assert abs(float(loss) - float(ref)) <= 1e-2 * max(1.0, abs(float(ref))), \
        (float(loss), float(ref))

    print("KERNEL_OK")
</pallas_src>

<mosaic_0001>
module attributes {stable_mosaic.version = 11 : i64} {
  func.func @_stft_loss_kernel(%arg0: i32, %arg1: i32, %arg2: memref<2x256x128xbf16, #tpu.memory_space<vmem>>, %arg3: memref<128x256xbf16, #tpu.memory_space<vmem>>, %arg4: memref<1x1xf32, #tpu.memory_space<vmem>>, %arg5: memref<1x1xf32, #tpu.memory_space<vmem>>, %arg6: memref<256x128xf32, #tpu.memory_space<vmem>>, %arg7: memref<256x128xf32, #tpu.memory_space<vmem>>) attributes {dimension_semantics = [#tpu.dimension_semantics<arbitrary>, #tpu.dimension_semantics<arbitrary>], iteration_bounds = array<i64: 1, 3>, scalar_prefetch = 0 : i64, scratch_operands = 2 : i64, tpu.core_type = #tpu.core_type<tc>, window_params = [{transform_indices = @transform_0, window_bounds = array<i64: 2, 256, 128>}, {transform_indices = @transform_1, window_bounds = array<i64: 128, 256>}, {pipeline_mode = #tpu.pipeline_mode<synchronous>, transform_indices = @transform_2, window_bounds = array<i64: 1, 1>}, {pipeline_mode = #tpu.pipeline_mode<synchronous>, transform_indices = @transform_3, window_bounds = array<i64: 1, 1>}]} {
    %c0_i32 = arith.constant 0 : i32
    %0 = arith.cmpi eq, %arg0, %c0_i32 : i32
    %c0_i32_0 = arith.constant 0 : i32
    %1 = arith.cmpi eq, %arg1, %c0_i32_0 : i32
    %2 = arith.andi %0, %1 : i1
    %3 = arith.extui %2 : i1 to i32
    %c0_i32_1 = arith.constant 0 : i32
    %4 = arith.cmpi ne, %3, %c0_i32_1 : i32
    scf.if %4 {
      %cst_19 = arith.constant 0.000000e+00 : f32
      %41 = vector.broadcast %cst_19 : f32 to vector<256x128xf32>
      %c0_20 = arith.constant 0 : index
      %c0_21 = arith.constant 0 : index
      %42 = vector.load %arg6[%c0_20, %c0_21] : memref<256x128xf32, #tpu.memory_space<vmem>>, vector<256x128xf32>
      tpu.vector_store %arg6[%c0_20, %c0_21], %41 {strides = array<i32>} : memref<256x128xf32, #tpu.memory_space<vmem>>, vector<256x128xf32>,
      %cst_22 = arith.constant 0.000000e+00 : f32
      %43 = vector.broadcast %cst_22 : f32 to vector<256x128xf32>
      %c0_23 = arith.constant 0 : index
      %c0_24 = arith.constant 0 : index
      %44 = vector.load %arg7[%c0_23, %c0_24] : memref<256x128xf32, #tpu.memory_space<vmem>>, vector<256x128xf32>
      tpu.vector_store %arg7[%c0_23, %c0_24], %43 {strides = array<i32>} : memref<256x128xf32, #tpu.memory_space<vmem>>, vector<256x128xf32>,
    } else {
    }
    %c0 = arith.constant 0 : index
    %c0_2 = arith.constant 0 : index
    %c0_3 = arith.constant 0 : index
    %5 = vector.load %arg2[%c0, %c0_2, %c0_3] : memref<2x256x128xbf16, #tpu.memory_space<vmem>>, vector<2x256x128xbf16>
    %6 = vector.shape_cast %5 : vector<2x256x128xbf16> to vector<512x128xbf16>
    %c0_4 = arith.constant 0 : index
    %c0_5 = arith.constant 0 : index
    %7 = vector.load %arg3[%c0_4, %c0_5] : memref<128x256xbf16, #tpu.memory_space<vmem>>, vector<128x256xbf16>
    %cst = arith.constant dense<0.000000e+00> : vector<512x256xf32>
    %8 = tpu.matmul %6, %7, %cst {dimension_numbers = #tpu.dot_dimension_numbers<[1], [0], [0], [1], [0, 0, 1, 1], [], []>} : vector<512x128xbf16>, vector<128x256xbf16>, vector<512x256xf32> -> vector<512x256xf32>
    %9 = vector.extract_strided_slice %8 {offsets = [0, 0], sizes = [512, 128], strides = [1, 1]} : vector<512x256xf32> to vector<512x128xf32>
    %10 = vector.extract_strided_slice %8 {offsets = [0, 128], sizes = [512, 128], strides = [1, 1]} : vector<512x256xf32> to vector<512x128xf32>
    %11 = arith.mulf %9, %9 : vector<512x128xf32>
    %12 = arith.mulf %10, %10 : vector<512x128xf32>
    %13 = arith.addf %11, %12 : vector<512x128xf32>
    %14 = math.sqrt %13 : vector<512x128xf32>
    %cst_6 = arith.constant 1.000000e-10 : f32
    %15 = vector.broadcast %cst_6 : f32 to vector<512x128xf32>
    %16 = arith.maximumf %13, %15 : vector<512x128xf32>
    %17 = math.log %16 : vector<512x128xf32>
    %cst_7 = arith.constant 0.434294492 : f32
    %18 = vector.broadcast %cst_7 : f32 to vector<512x128xf32>
    %19 = arith.mulf %17, %18 : vector<512x128xf32>
    %cst_8 = arith.constant 1.000000e+00 : f32
    %20 = vector.broadcast %cst_8 : f32 to vector<512x128xf32>
    %21 = arith.mulf %20, %19 : vector<512x128xf32>
    %c0_9 = arith.constant 0 : index
    %c0_10 = arith.constant 0 : index
    %22 = vector.load %arg6[%c0_9, %c0_10] : memref<256x128xf32, #tpu.memory_space<vmem>>, vector<256x128xf32>
    %23 = vector.extract_strided_slice %21 {offsets = [0, 0], sizes = [256, 128], strides = [1, 1]} : vector<512x128xf32> to vector<256x128xf32>
    %24 = vector.extract_strided_slice %21 {offsets = [256, 0], sizes = [256, 128], strides = [1, 1]} : vector<512x128xf32> to vector<256x128xf32>
    %25 = arith.subf %23, %24 : vector<256x128xf32>
    %26 = math.absf %25 : vector<256x128xf32>
    %27 = arith.addf %22, %26 : vector<256x128xf32>
    %c0_11 = arith.constant 0 : index
    %c0_12 = arith.constant 0 : index
    %28 = vector.load %arg6[%c0_11, %c0_12] : memref<256x128xf32, #tpu.memory_space<vmem>>, vector<256x128xf32>
    tpu.vector_store %arg6[%c0_11, %c0_12], %27 {strides = array<i32>} : memref<256x128xf32, #tpu.memory_space<vmem>>, vector<256x128xf32>,
    %c0_13 = arith.constant 0 : index
    %c0_14 = arith.constant 0 : index
    %29 = vector.load %arg7[%c0_13, %c0_14] : memref<256x128xf32, #tpu.memory_space<vmem>>, vector<256x128xf32>
    %30 = vector.extract_strided_slice %14 {offsets = [0, 0], sizes = [256, 128], strides = [1, 1]} : vector<512x128xf32> to vector<256x128xf32>
    %31 = vector.extract_strided_slice %14 {offsets = [256, 0], sizes = [256, 128], strides = [1, 1]} : vector<512x128xf32> to vector<256x128xf32>
    %32 = arith.subf %30, %31 : vector<256x128xf32>
    %33 = math.absf %32 : vector<256x128xf32>
    %34 = arith.addf %29, %33 : vector<256x128xf32>
    %c0_15 = arith.constant 0 : index
    %c0_16 = arith.constant 0 : index
    %35 = vector.load %arg7[%c0_15, %c0_16] : memref<256x128xf32, #tpu.memory_space<vmem>>, vector<256x128xf32>
    tpu.vector_store %arg7[%c0_15, %c0_16], %34 {strides = array<i32>} : memref<256x128xf32, #tpu.memory_space<vmem>>, vector<256x128xf32>,
    %c0_i32_17 = arith.constant 0 : i32
    %36 = arith.cmpi eq, %arg0, %c0_i32_17 : i32
    %c2_i32 = arith.constant 2 : i32
    %37 = arith.cmpi eq, %arg1, %c2_i32 : i32
    %38 = arith.andi %36, %37 : i1
    %39 = arith.extui %38 : i1 to i32
    %c0_i32_18 = arith.constant 0 : i32
    %40 = arith.cmpi ne, %39, %c0_i32_18 : i32
    scf.if %40 {
      %c0_19 = arith.constant 0 : index
      %c0_20 = arith.constant 0 : index
      %41 = vector.load %arg6[%c0_19, %c0_20] : memref<256x128xf32, #tpu.memory_space<vmem>>, vector<256x128xf32>
      %42 = vector.shape_cast %41 : vector<256x128xf32> to vector<1x256x128xf32>
      %cst_21 = arith.constant dense<0.000000e+00> : vector<1xf32>
      %43 = vector.multi_reduction <add>, %42, %cst_21 [1, 2] : vector<1x256x128xf32> to vector<1xf32>
      %44 = vector.shape_cast %43 : vector<1xf32> to vector<1x1x1xf32>
      %45 = vector.extract %44[0, 0, 0] : f32 from vector<1x1x1xf32>
      %46 = vector.broadcast %45 : f32 to vector<1x1xf32>
      %c0_22 = arith.constant 0 : index
      %c0_23 = arith.constant 0 : index
      %47 = vector.load %arg4[%c0_22, %c0_23] : memref<1x1xf32, #tpu.memory_space<vmem>>, vector<1x1xf32>
      tpu.vector_store %arg4[%c0_22, %c0_23], %46 {strides = array<i32>} : memref<1x1xf32, #tpu.memory_space<vmem>>, vector<1x1xf32>,
      %c0_24 = arith.constant 0 : index
      %c0_25 = arith.constant 0 : index
      %48 = vector.load %arg7[%c0_24, %c0_25] : memref<256x128xf32, #tpu.memory_space<vmem>>, vector<256x128xf32>
      %49 = vector.shape_cast %48 : vector<256x128xf32> to vector<1x256x128xf32>
      %cst_26 = arith.constant dense<0.000000e+00> : vector<1xf32>
      %50 = vector.multi_reduction <add>, %49, %cst_26 [1, 2] : vector<1x256x128xf32> to vector<1xf32>
      %51 = vector.shape_cast %50 : vector<1xf32> to vector<1x1x1xf32>
      %52 = vector.extract %51[0, 0, 0] : f32 from vector<1x1x1xf32>
      %53 = vector.broadcast %52 : f32 to vector<1x1xf32>
      %c0_27 = arith.constant 0 : index
      %c0_28 = arith.constant 0 : index
      %54 = vector.load %arg5[%c0_27, %c0_28] : memref<1x1xf32, #tpu.memory_space<vmem>>, vector<1x1xf32>
      tpu.vector_store %arg5[%c0_27, %c0_28], %53 {strides = array<i32>} : memref<1x1xf32, #tpu.memory_space<vmem>>, vector<1x1xf32>,
    } else {
    }
    return
  }
  func.func @transform_0(%arg0: i32, %arg1: i32) -> (i32, i32, i32) {
    %c0_i32 = arith.constant 0 : i32
    %c0_i32_0 = arith.constant 0 : i32
    %c0_i32_1 = arith.constant 0 : i32
    return %c0_i32, %arg1, %c0_i32_0 : i32, i32, i32
  }
  func.func @transform_1(%arg0: i32, %arg1: i32) -> (i32, i32) {
    %c0_i32 = arith.constant 0 : i32
    %c0_i32_0 = arith.constant 0 : i32
    return %c0_i32, %arg0 : i32, i32
  }
  func.func @transform_2(%arg0: i32, %arg1: i32) -> (i32, i32) {
    %c0_i32 = arith.constant 0 : i32
    %c0_i32_0 = arith.constant 0 : i32
    %c0_i32_1 = arith.constant 0 : i32
    return %c0_i32, %c0_i32_0 : i32, i32
  }
  func.func @transform_3(%arg0: i32, %arg1: i32) -> (i32, i32) {
    %c0_i32 = arith.constant 0 : i32
    %c0_i32_0 = arith.constant 0 : i32
    %c0_i32_1 = arith.constant 0 : i32
    return %c0_i32, %c0_i32_0 : i32, i32
  }
}

module attributes {stable_mosaic.version = 11 : i64} {
  func.func @_stft_loss_kernel(%arg0: i32, %arg1: i32, %arg2: memref<2x24x1024xbf16, #tpu.memory_space<vmem>>, %arg3: memref<1024x768xbf16, #tpu.memory_space<vmem>>, %arg4: memref<1x1xf32, #tpu.memory_space<vmem>>, %arg5: memref<1x1xf32, #tpu.memory_space<vmem>>, %arg6: memref<24x384xf32, #tpu.memory_space<vmem>>, %arg7: memref<24x384xf32, #tpu.memory_space<vmem>>) attributes {dimension_semantics = [#tpu.dimension_semantics<arbitrary>, #tpu.dimension_semantics<arbitrary>], iteration_bounds = array<i64: 2, 1>, scalar_prefetch = 0 : i64, scratch_operands = 2 : i64, tpu.core_type = #tpu.core_type<tc>, window_params = [{transform_indices = @transform_0, window_bounds = array<i64: 2, 24, 1024>}, {transform_indices = @transform_1, window_bounds = array<i64: 1024, 768>}, {pipeline_mode = #tpu.pipeline_mode<synchronous>, transform_indices = @transform_2, window_bounds = array<i64: 1, 1>}, {pipeline_mode = #tpu.pipeline_mode<synchronous>, transform_indices = @transform_3, window_bounds = array<i64: 1, 1>}]} {
    %c0_i32 = arith.constant 0 : i32
    %0 = arith.cmpi eq, %arg0, %c0_i32 : i32
    %c0_i32_0 = arith.constant 0 : i32
    %1 = arith.cmpi eq, %arg1, %c0_i32_0 : i32
    %2 = arith.andi %0, %1 : i1
    %3 = arith.extui %2 : i1 to i32
    %c0_i32_1 = arith.constant 0 : i32
    %4 = arith.cmpi ne, %3, %c0_i32_1 : i32
    scf.if %4 {
      %cst_19 = arith.constant 0.000000e+00 : f32
      %41 = vector.broadcast %cst_19 : f32 to vector<24x384xf32>
      %c0_20 = arith.constant 0 : index
      %c0_21 = arith.constant 0 : index
      %42 = vector.load %arg6[%c0_20, %c0_21] : memref<24x384xf32, #tpu.memory_space<vmem>>, vector<24x384xf32>
      tpu.vector_store %arg6[%c0_20, %c0_21], %41 {strides = array<i32>} : memref<24x384xf32, #tpu.memory_space<vmem>>, vector<24x384xf32>,
      %cst_22 = arith.constant 0.000000e+00 : f32
      %43 = vector.broadcast %cst_22 : f32 to vector<24x384xf32>
      %c0_23 = arith.constant 0 : index
      %c0_24 = arith.constant 0 : index
      %44 = vector.load %arg7[%c0_23, %c0_24] : memref<24x384xf32, #tpu.memory_space<vmem>>, vector<24x384xf32>
      tpu.vector_store %arg7[%c0_23, %c0_24], %43 {strides = array<i32>} : memref<24x384xf32, #tpu.memory_space<vmem>>, vector<24x384xf32>,
    } else {
    }
    %c0 = arith.constant 0 : index
    %c0_2 = arith.constant 0 : index
    %c0_3 = arith.constant 0 : index
    %5 = vector.load %arg2[%c0, %c0_2, %c0_3] : memref<2x24x1024xbf16, #tpu.memory_space<vmem>>, vector<2x24x1024xbf16>
    %6 = vector.shape_cast %5 : vector<2x24x1024xbf16> to vector<48x1024xbf16>
    %c0_4 = arith.constant 0 : index
    %c0_5 = arith.constant 0 : index
    %7 = vector.load %arg3[%c0_4, %c0_5] : memref<1024x768xbf16, #tpu.memory_space<vmem>>, vector<1024x768xbf16>
    %cst = arith.constant dense<0.000000e+00> : vector<48x768xf32>
    %8 = tpu.matmul %6, %7, %cst {dimension_numbers = #tpu.dot_dimension_numbers<[1], [0], [0], [1], [0, 0, 1, 1], [], []>} : vector<48x1024xbf16>, vector<1024x768xbf16>, vector<48x768xf32> -> vector<48x768xf32>
    %9 = vector.extract_strided_slice %8 {offsets = [0, 0], sizes = [48, 384], strides = [1, 1]} : vector<48x768xf32> to vector<48x384xf32>
    %10 = vector.extract_strided_slice %8 {offsets = [0, 384], sizes = [48, 384], strides = [1, 1]} : vector<48x768xf32> to vector<48x384xf32>
    %11 = arith.mulf %9, %9 : vector<48x384xf32>
    %12 = arith.mulf %10, %10 : vector<48x384xf32>
    %13 = arith.addf %11, %12 : vector<48x384xf32>
    %14 = math.sqrt %13 : vector<48x384xf32>
    %cst_6 = arith.constant 1.000000e-10 : f32
    %15 = vector.broadcast %cst_6 : f32 to vector<48x384xf32>
    %16 = arith.maximumf %13, %15 : vector<48x384xf32>
    %17 = math.log %16 : vector<48x384xf32>
    %cst_7 = arith.constant 0.434294492 : f32
    %18 = vector.broadcast %cst_7 : f32 to vector<48x384xf32>
    %19 = arith.mulf %17, %18 : vector<48x384xf32>
    %cst_8 = arith.constant 1.000000e+00 : f32
    %20 = vector.broadcast %cst_8 : f32 to vector<48x384xf32>
    %21 = arith.mulf %20, %19 : vector<48x384xf32>
    %c0_9 = arith.constant 0 : index
    %c0_10 = arith.constant 0 : index
    %22 = vector.load %arg6[%c0_9, %c0_10] : memref<24x384xf32, #tpu.memory_space<vmem>>, vector<24x384xf32>
    %23 = vector.extract_strided_slice %21 {offsets = [0, 0], sizes = [24, 384], strides = [1, 1]} : vector<48x384xf32> to vector<24x384xf32>
    %24 = vector.extract_strided_slice %21 {offsets = [24, 0], sizes = [24, 384], strides = [1, 1]} : vector<48x384xf32> to vector<24x384xf32>
    %25 = arith.subf %23, %24 : vector<24x384xf32>
    %26 = math.absf %25 : vector<24x384xf32>
    %27 = arith.addf %22, %26 : vector<24x384xf32>
    %c0_11 = arith.constant 0 : index
    %c0_12 = arith.constant 0 : index
    %28 = vector.load %arg6[%c0_11, %c0_12] : memref<24x384xf32, #tpu.memory_space<vmem>>, vector<24x384xf32>
    tpu.vector_store %arg6[%c0_11, %c0_12], %27 {strides = array<i32>} : memref<24x384xf32, #tpu.memory_space<vmem>>, vector<24x384xf32>,
    %c0_13 = arith.constant 0 : index
    %c0_14 = arith.constant 0 : index
    %29 = vector.load %arg7[%c0_13, %c0_14] : memref<24x384xf32, #tpu.memory_space<vmem>>, vector<24x384xf32>
    %30 = vector.extract_strided_slice %14 {offsets = [0, 0], sizes = [24, 384], strides = [1, 1]} : vector<48x384xf32> to vector<24x384xf32>
    %31 = vector.extract_strided_slice %14 {offsets = [24, 0], sizes = [24, 384], strides = [1, 1]} : vector<48x384xf32> to vector<24x384xf32>
    %32 = arith.subf %30, %31 : vector<24x384xf32>
    %33 = math.absf %32 : vector<24x384xf32>
    %34 = arith.addf %29, %33 : vector<24x384xf32>
    %c0_15 = arith.constant 0 : index
    %c0_16 = arith.constant 0 : index
    %35 = vector.load %arg7[%c0_15, %c0_16] : memref<24x384xf32, #tpu.memory_space<vmem>>, vector<24x384xf32>
    tpu.vector_store %arg7[%c0_15, %c0_16], %34 {strides = array<i32>} : memref<24x384xf32, #tpu.memory_space<vmem>>, vector<24x384xf32>,
    %c1_i32 = arith.constant 1 : i32
    %36 = arith.cmpi eq, %arg0, %c1_i32 : i32
    %c0_i32_17 = arith.constant 0 : i32
    %37 = arith.cmpi eq, %arg1, %c0_i32_17 : i32
    %38 = arith.andi %36, %37 : i1
    %39 = arith.extui %38 : i1 to i32
    %c0_i32_18 = arith.constant 0 : i32
    %40 = arith.cmpi ne, %39, %c0_i32_18 : i32
    scf.if %40 {
      %c0_19 = arith.constant 0 : index
      %c0_20 = arith.constant 0 : index
      %41 = vector.load %arg6[%c0_19, %c0_20] : memref<24x384xf32, #tpu.memory_space<vmem>>, vector<24x384xf32>
      %42 = vector.shape_cast %41 : vector<24x384xf32> to vector<1x24x384xf32>
      %cst_21 = arith.constant dense<0.000000e+00> : vector<1xf32>
      %43 = vector.multi_reduction <add>, %42, %cst_21 [1, 2] : vector<1x24x384xf32> to vector<1xf32>
      %44 = vector.shape_cast %43 : vector<1xf32> to vector<1x1x1xf32>
      %45 = vector.extract %44[0, 0, 0] : f32 from vector<1x1x1xf32>
      %46 = vector.broadcast %45 : f32 to vector<1x1xf32>
      %c0_22 = arith.constant 0 : index
      %c0_23 = arith.constant 0 : index
      %47 = vector.load %arg4[%c0_22, %c0_23] : memref<1x1xf32, #tpu.memory_space<vmem>>, vector<1x1xf32>
      tpu.vector_store %arg4[%c0_22, %c0_23], %46 {strides = array<i32>} : memref<1x1xf32, #tpu.memory_space<vmem>>, vector<1x1xf32>,
      %c0_24 = arith.constant 0 : index
      %c0_25 = arith.constant 0 : index
      %48 = vector.load %arg7[%c0_24, %c0_25] : memref<24x384xf32, #tpu.memory_space<vmem>>, vector<24x384xf32>
      %49 = vector.shape_cast %48 : vector<24x384xf32> to vector<1x24x384xf32>
      %cst_26 = arith.constant dense<0.000000e+00> : vector<1xf32>
      %50 = vector.multi_reduction <add>, %49, %cst_26 [1, 2] : vector<1x24x384xf32> to vector<1xf32>
      %51 = vector.shape_cast %50 : vector<1xf32> to vector<1x1x1xf32>
      %52 = vector.extract %51[0, 0, 0] : f32 from vector<1x1x1xf32>
      %53 = vector.broadcast %52 : f32 to vector<1x1xf32>
      %c0_27 = arith.constant 0 : index
      %c0_28 = arith.constant 0 : index
      %54 = vector.load %arg5[%c0_27, %c0_28] : memref<1x1xf32, #tpu.memory_space<vmem>>, vector<1x1xf32>
      tpu.vector_store %arg5[%c0_27, %c0_28], %53 {strides = array<i32>} : memref<1x1xf32, #tpu.memory_space<vmem>>, vector<1x1xf32>,
    } else {
    }
    return
  }
  func.func @transform_0(%arg0: i32, %arg1: i32) -> (i32, i32, i32) {
    %c0_i32 = arith.constant 0 : i32
    %c0_i32_0 = arith.constant 0 : i32
    %c0_i32_1 = arith.constant 0 : i32
    return %c0_i32, %arg1, %c0_i32_0 : i32, i32, i32
  }
  func.func @transform_1(%arg0: i32, %arg1: i32) -> (i32, i32) {
    %c0_i32 = arith.constant 0 : i32
    %c0_i32_0 = arith.constant 0 : i32
    return %c0_i32, %arg0 : i32, i32
  }
  func.func @transform_2(%arg0: i32, %arg1: i32) -> (i32, i32) {
    %c0_i32 = arith.constant 0 : i32
    %c0_i32_0 = arith.constant 0 : i32
    %c0_i32_1 = arith.constant 0 : i32
    return %c0_i32, %c0_i32_0 : i32, i32
  }
  func.func @transform_3(%arg0: i32, %arg1: i32) -> (i32, i32) {
    %c0_i32 = arith.constant 0 : i32
    %c0_i32_0 = arith.constant 0 : i32
    %c0_i32_1 = arith.constant 0 : i32
    return %c0_i32, %c0_i32_0 : i32, i32
  }
}

</mosaic_0001>

<bundles_post_ra>
// kernel: multi_scale_stft_loss.3
= control target key start
LH: loop header
LB: loop body
LE: loop exit
PB: predicated region body
PF: predicated region fallthrough
CT: control target
= control target key end

     0   :  { %9 = vsyncpa [#allocation6], 0  ;;  %s4471_s0 = inlined_call_operand.vmem [shape: bf16[2,768,128], index: 0, kind: input, shape index: {}]   ;;  %s4472_s1 = inlined_call_operand.vmem [shape: bf16[128,256], index: 1, kind: input, shape index: {}]   ;;  %s4473_s2 = inlined_call_operand.hbm [shape: f32[1,1], index: 2, kind: output, shape index: {0}]   ;;  %s4474_s3 = inlined_call_operand.hbm [shape: f32[1,1], index: 3, kind: output, shape index: {1}]  }
   0x1   :  { %10 = vsyncpa [#allocation8], 0  ;;  %s3307_s12 = smov 0   ;;  %s3309_s13 = smov 0  }
   0x2   :  { %s3311_s14 = smov 0   ;;  %s3313_s15 = smov 0  }
   0x3   :  { %s3315_s16 = smov 0  }
   0x4 LB: > { %s2731_s17 = sadd.s32 4294967295, %s3281_s16   ;;  %s25_s18 = sadd.s32 1, %s3277_s15  ;;  %s3281_s16 = sphi %s3315_s16, %s16_s16   ;;  %s3277_s15 = sphi %s3313_s15, %s4479_s15   ;;  %s3273_s14 = sphi %s3311_s14, %s4478_s14   ;;  %s3269_s13 = sphi %s3309_s13, %s4477_s13   ;;  %s3265_s12 = sphi %s3307_s12, %s4476_s12  }
   0x5   : > { %p26_p0 = scmp.ge.s32.totalorder %s25_s18, 3  ;;  %p42_p1 = scmp.ne.s32.totalorder %s3269_s13, %s3265_s12 }
   0x6   : > { %p43_p2 = scmp.eq.s32.totalorder %s3281_s16, 0  ;;  %s35_s20 = sadd.s32 1, %s3269_s13 }
   0x7   : > { %s4481_s18 = smov (%p26_p0, %s25_s18), 0  ;;  %p2734_p5 = scmp.ge.s32.totalorder %s3281_s16, 3 }
   0x8   : > { %p44_p3 = por %p43_p2, %p42_p1  ;;  %s32_s19 = ssub.s32 %s3277_s15, %s4481_s18 }
   0x9   : > { %p33_p4 = scmp.eq.s32.totalorder %s32_s19, 0  ;;  %145 = sbr.rel (%p2734_p5) target bundleno = 34 (0x22), region = 20 }
   0xb   : > { %s3343_s21 = scalar_select %p33_p4, %s3269_s13, %s35_s20  }
   0xe   : > { %148 = sbr.rel (!%p44_p3) target bundleno = 34 (0x22), region = 24  ;;  %s150_s22 = sand.u32 (%p44_p3), 1, %s3269_s13  }
   0xf   : > { %s2796_s23 = sshll.u32 (%p44_p3), %s3277_s15, 7  ;;  %s2735_s24 = sshll.u32 (%p44_p3), %s150_s22, 8 }
  0x10   : > { %s3351_s27 = scalar_lea.vmem (%p44_p3), %s4471_s0, %s2796_s23  ;;  %s3356_s28 = scalar_lea.vmem (%p44_p3), [#allocation4], %s2735_s24 }
  0x11   : > { %v172_v0 = vld [vmem:[%s3351_s27] sm:$0xff] (%p44_p3)   ;;  %v176_v1 = vld [vmem:[%s3351_s27 + $0x8] sm:$0xff] (%p44_p3)   ;;  %v180_v2 = vld [vmem:[%s3351_s27 + $0x10] sm:$0xff] (%p44_p3)  }
  0x12   : > { %173 = vst [vmem:[%s3356_s28] sm:$0xff] (%p44_p3), %v172_v0   ;;  %177 = vst [vmem:[%s3356_s28 + $0x8] sm:$0xff] (%p44_p3), %v176_v1   ;;  %v184_v3 = vld [vmem:[%s3351_s27 + $0x18] sm:$0xff] (%p44_p3)   ;;  %v188_v4 = vld [vmem:[%s3351_s27 + $0x20] sm:$0xff] (%p44_p3)  }
  0x13   : > { %181 = vst [vmem:[%s3356_s28 + $0x10] sm:$0xff] %v180_v2   ;;  %v192_v5 = vld [vmem:[%s3351_s27 + $0x28] sm:$0xff]   ;;  %185 = vst [vmem:[%s3356_s28 + $0x18] sm:$0xff] %v184_v3   ;;  %v196_v6 = vld [vmem:[%s3351_s27 + $0x30] sm:$0xff]  }
  0x14   : > { %189 = vst [vmem:[%s3356_s28 + $0x20] sm:$0xff] %v188_v4   ;;  %193 = vst [vmem:[%s3356_s28 + $0x28] sm:$0xff] %v192_v5   ;;  %v200_v7 = vld [vmem:[%s3351_s27 + $0x38] sm:$0xff]   ;;  %v204_v8 = vld [vmem:[%s3351_s27 + $0x40] sm:$0xff]  }
  0x15   : > { %197 = vst [vmem:[%s3356_s28 + $0x30] sm:$0xff] %v196_v6   ;;  %201 = vst [vmem:[%s3356_s28 + $0x38] sm:$0xff] %v200_v7   ;;  %v208_v9 = vld [vmem:[%s3351_s27 + $0x48] sm:$0xff]   ;;  %v212_v10 = vld [vmem:[%s3351_s27 + $0x50] sm:$0xff]  }
  0x16   : > { %205 = vst [vmem:[%s3356_s28 + $0x40] sm:$0xff] %v204_v8   ;;  %v216_v11 = vld [vmem:[%s3351_s27 + $0x58] sm:$0xff]   ;;  %209 = vst [vmem:[%s3356_s28 + $0x48] sm:$0xff] %v208_v9   ;;  %v220_v12 = vld [vmem:[%s3351_s27 + $0x60] sm:$0xff]  }
  0x17   : > { %213 = vst [vmem:[%s3356_s28 + $0x50] sm:$0xff] %v212_v10   ;;  %217 = vst [vmem:[%s3356_s28 + $0x58] sm:$0xff] %v216_v11   ;;  %v224_v13 = vld [vmem:[%s3351_s27 + $0x68] sm:$0xff]   ;;  %v228_v14 = vld [vmem:[%s3351_s27 + $0x70] sm:$0xff]  }
  0x18   : > { %221 = vst [vmem:[%s3356_s28 + $0x60] sm:$0xff] %v220_v12   ;;  %225 = vst [vmem:[%s3356_s28 + $0x68] sm:$0xff] %v224_v13   ;;  %v232_v15 = vld [vmem:[%s3351_s27 + $0x78] sm:$0xff]   ;;  %v236_v16 = vld [vmem:[%s3351_s27 + $0x180] sm:$0xff]  }
  0x19   : > { %229 = vst [vmem:[%s3356_s28 + $0x70] sm:$0xff] %v228_v14   ;;  %v240_v17 = vld [vmem:[%s3351_s27 + $0x188] sm:$0xff]   ;;  %233 = vst [vmem:[%s3356_s28 + $0x78] sm:$0xff] %v232_v15   ;;  %v244_v18 = vld [vmem:[%s3351_s27 + $0x190] sm:$0xff]  }
  0x1a   : > { %237 = vst [vmem:[%s3356_s28 + $0x80] sm:$0xff] %v236_v16   ;;  %241 = vst [vmem:[%s3356_s28 + $0x88] sm:$0xff] %v240_v17   ;;  %v248_v19 = vld [vmem:[%s3351_s27 + $0x198] sm:$0xff]   ;;  %v252_v20 = vld [vmem:[%s3351_s27 + $0x1a0] sm:$0xff]  }
  0x1b   : > { %245 = vst [vmem:[%s3356_s28 + $0x90] sm:$0xff] %v244_v18   ;;  %249 = vst [vmem:[%s3356_s28 + $0x98] sm:$0xff] %v248_v19   ;;  %v256_v21 = vld [vmem:[%s3351_s27 + $0x1a8] sm:$0xff]   ;;  %v260_v22 = vld [vmem:[%s3351_s27 + $0x1b0] sm:$0xff]  }
  0x1c   : > { %253 = vst [vmem:[%s3356_s28 + $0xa0] sm:$0xff] %v252_v20   ;;  %v264_v23 = vld [vmem:[%s3351_s27 + $0x1b8] sm:$0xff]   ;;  %257 = vst [vmem:[%s3356_s28 + $0xa8] sm:$0xff] %v256_v21   ;;  %v268_v24 = vld [vmem:[%s3351_s27 + $0x1c0] sm:$0xff]  }
  0x1d   : > { %261 = vst [vmem:[%s3356_s28 + $0xb0] sm:$0xff] %v260_v22   ;;  %265 = vst [vmem:[%s3356_s28 + $0xb8] sm:$0xff] %v264_v23   ;;  %v272_v25 = vld [vmem:[%s3351_s27 + $0x1c8] sm:$0xff]   ;;  %v276_v26 = vld [vmem:[%s3351_s27 + $0x1d0] sm:$0xff]  }
  0x1e   : > { %269 = vst [vmem:[%s3356_s28 + $0xc0] sm:$0xff] %v268_v24   ;;  %273 = vst [vmem:[%s3356_s28 + $0xc8] sm:$0xff] %v272_v25   ;;  %v280_v27 = vld [vmem:[%s3351_s27 + $0x1d8] sm:$0xff]   ;;  %v284_v28 = vld [vmem:[%s3351_s27 + $0x1e0] sm:$0xff]  }
  0x1f   : > { %277 = vst [vmem:[%s3356_s28 + $0xd0] sm:$0xff] %v276_v26   ;;  %v288_v29 = vld [vmem:[%s3351_s27 + $0x1e8] sm:$0xff]   ;;  %281 = vst [vmem:[%s3356_s28 + $0xd8] sm:$0xff] %v280_v27   ;;  %v292_v30 = vld [vmem:[%s3351_s27 + $0x1f0] sm:$0xff]  }
  0x20   : > { %285 = vst [vmem:[%s3356_s28 + $0xe0] sm:$0xff] %v284_v28   ;;  %289 = vst [vmem:[%s3356_s28 + $0xe8] sm:$0xff] %v288_v29   ;;  %v296_v31 = vld [vmem:[%s3351_s27 + $0x1f8] sm:$0xff]  }
  0x21   : > { %293 = vst [vmem:[%s3356_s28 + $0xf0] sm:$0xff] %v292_v30   ;;  %297 = vst [vmem:[%s3356_s28 + $0xf8] sm:$0xff] %v296_v31  }
  0x22 PF: > { %p2738_p6 = scmp.ge.s32.totalorder %s3281_s16, 1  ;;  %p450_p7 = scmp.lt.s32.totalorder %s3281_s16, 4 }
  0x24   : > { %p451_p8 = pnand %p2738_p6, %p450_p7 }
  0x25   : > { %s457_s29 = sand.u32 (!%p451_p8), 1, %s3265_s12   ;;  %p489_p9 = scmp.eq.s32.totalorder (!%p451_p8), %s3273_s14, 0 }
  0x26   : > { %454 = sbr.rel (%p451_p8) target bundleno = 878 (0x36e), region = 65  ;;  %s2739_s30 = sshll.u32 (!%p451_p8), %s457_s29, 8 }
  0x27   : > { %s3423_s4 = scalar_lea.vmem (!%p451_p8), [#allocation4], %s2739_s30 }
  0x2b   : > { %493 = sbr.rel (!%p489_p9) target bundleno = 76 (0x4c), region = 73  ;;  %v3283_v32 = vmov (%p489_p9), 0.0  }
  0x2c   : > { %494 = vst [vmem:[#allocation2 + $0xb0] sm:$0xff] (%p489_p9), %v3283_v32  ;;  %495 = vst [vmem:[#allocation2] sm:$0xff] (%p489_p9), %v3283_v32 }
  0x2d   : > { %496 = vst [vmem:[#allocation2 + $0xd8] sm:$0xff] (%p489_p9), %v3283_v32  ;;  %497 = vst [vmem:[#allocation2 + $0x18] sm:$0xff] (%p489_p9), %v3283_v32 }
  0x2e   : > { %498 = vst [vmem:[#allocation2 + $0x50] sm:$0xff] (%p489_p9), %v3283_v32  ;;  %499 = vst [vmem:[#allocation2 + $0x68] sm:$0xff] (%p489_p9), %v3283_v32 }
  0x2f   : > { %500 = vst [vmem:[#allocation2 + $0x30] sm:$0xff] (%p489_p9), %v3283_v32  ;;  %501 = vst [vmem:[#allocation2 + $0x48] sm:$0xff] (%p489_p9), %v3283_v32 }
  0x30   : > { %502 = vst [vmem:[#allocation2 + $0x80] sm:$0xff] %v3283_v32  ;;  %503 = vst [vmem:[#allocation2 + $0x88] sm:$0xff] %v3283_v32 }
  0x31   : > { %504 = vst [vmem:[#allocation2 + $0xe8] sm:$0xff] %v3283_v32  ;;  %505 = vst [vmem:[#allocation2 + $0xb8] sm:$0xff] %v3283_v32 }
  0x32   : > { %506 = vst [vmem:[#allocation2 + $0x60] sm:$0xff] %v3283_v32  ;;  %507 = vst [vmem:[#allocation2 + $0xf0] sm:$0xff] %v3283_v32 }
  0x33   : > { %508 = vst [vmem:[#allocation2 + $0x8] sm:$0xff] %v3283_v32  ;;  %509 = vst [vmem:[#allocation2 + $0x78] sm:$0xff] %v3283_v32 }
  0x34   : > { %510 = vst [vmem:[#allocation2 + $0x38] sm:$0xff] %v3283_v32  ;;  %511 = vst [vmem:[#allocation2 + $0x58] sm:$0xff] %v3283_v32 }
  0x35   : > { %512 = vst [vmem:[#allocation2 + $0x40] sm:$0xff] %v3283_v32  ;;  %513 = vst [vmem:[#allocation2 + $0xc8] sm:$0xff] %v3283_v32 }
  0x36   : > { %514 = vst [vmem:[#allocation2 + $0xe0] sm:$0xff] %v3283_v32  ;;  %515 = vst [vmem:[#allocation2 + $0x90] sm:$0xff] %v3283_v32 }
  0x37   : > { %516 = vst [vmem:[#allocation2 + $0x70] sm:$0xff] %v3283_v32  ;;  %517 = vst [vmem:[#allocation2 + $0xc0] sm:$0xff] %v3283_v32 }
  0x38   : > { %518 = vst [vmem:[#allocation2 + $0xa8] sm:$0xff] %v3283_v32  ;;  %519 = vst [vmem:[#allocation2 + $0xd0] sm:$0xff] %v3283_v32 }
  0x39   : > { %520 = vst [vmem:[#allocation2 + $0x10] sm:$0xff] %v3283_v32  ;;  %521 = vst [vmem:[#allocation2 + $0x28] sm:$0xff] %v3283_v32 }
  0x3a   : > { %522 = vst [vmem:[#allocation2 + $0xa0] sm:$0xff] %v3283_v32  ;;  %523 = vst [vmem:[#allocation2 + $0xf8] sm:$0xff] %v3283_v32 }
  0x3b   : > { %524 = vst [vmem:[#allocation2 + $0x20] sm:$0xff] %v3283_v32  ;;  %525 = vst [vmem:[#allocation2 + $0x98] sm:$0xff] %v3283_v32 }
  0x3c   : > { %526 = vst [vmem:[#allocation3 + $0x80] sm:$0xff] %v3283_v32  ;;  %527 = vst [vmem:[#allocation3 + $0xc8] sm:$0xff] %v3283_v32 }
  0x3d   : > { %528 = vst [vmem:[#allocation3 + $0xe8] sm:$0xff] %v3283_v32  ;;  %529 = vst [vmem:[#allocation3 + $0x78] sm:$0xff] %v3283_v32 }
  0x3e   : > { %530 = vst [vmem:[#allocation3 + $0x8] sm:$0xff] %v3283_v32  ;;  %531 = vst [vmem:[#allocation3 + $0x90] sm:$0xff] %v3283_v32 }
  0x3f   : > { %532 = vst [vmem:[#allocation3 + $0x58] sm:$0xff] %v3283_v32  ;;  %533 = vst [vmem:[#allocation3 + $0xa8] sm:$0xff] %v3283_v32 }
  0x40   : > { %534 = vst [vmem:[#allocation3 + $0xd0] sm:$0xff] %v3283_v32  ;;  %535 = vst [vmem:[#allocation3 + $0xb0] sm:$0xff] %v3283_v32 }
  0x41   : > { %536 = vst [vmem:[#allocation3 + $0x38] sm:$0xff] %v3283_v32  ;;  %537 = vst [vmem:[#allocation3 + $0x40] sm:$0xff] %v3283_v32 }
  0x42   : > { %538 = vst [vmem:[#allocation3 + $0xe0] sm:$0xff] %v3283_v32  ;;  %539 = vst [vmem:[#allocation3 + $0x60] sm:$0xff] %v3283_v32 }
  0x43   : > { %540 = vst [vmem:[#allocation3 + $0x18] sm:$0xff] %v3283_v32  ;;  %541 = vst [vmem:[#allocation3 + $0x68] sm:$0xff] %v3283_v32 }
  0x44   : > { %542 = vst [vmem:[#allocation3 + $0x10] sm:$0xff] %v3283_v32  ;;  %543 = vst [vmem:[#allocation3 + $0x70] sm:$0xff] %v3283_v32 }
  0x45   : > { %544 = vst [vmem:[#allocation3 + $0x50] sm:$0xff] %v3283_v32  ;;  %545 = vst [vmem:[#allocation3 + $0xa0] sm:$0xff] %v3283_v32 }
  0x46   : > { %546 = vst [vmem:[#allocation3 + $0xd8] sm:$0xff] %v3283_v32  ;;  %547 = vst [vmem:[#allocation3 + $0x30] sm:$0xff] %v3283_v32 }
  0x47   : > { %548 = vst [vmem:[#allocation3 + $0x20] sm:$0xff] %v3283_v32  ;;  %549 = vst [vmem:[#allocation3 + $0xf0] sm:$0xff] %v3283_v32 }
  0x48   : > { %550 = vst [vmem:[#allocation3 + $0x88] sm:$0xff] %v3283_v32  ;;  %551 = vst [vmem:[#allocation3 + $0x48] sm:$0xff] %v3283_v32 }
  0x49   : > { %552 = vst [vmem:[#allocation3 + $0xf8] sm:$0xff] %v3283_v32  ;;  %553 = vst [vmem:[#allocation3 + $0xc0] sm:$0xff] %v3283_v32 }
  0x4a   : > { %554 = vst [vmem:[#allocation3 + $0xb8] sm:$0xff] %v3283_v32  ;;  %555 = vst [vmem:[#allocation3] sm:$0xff] %v3283_v32 }
  0x4b   : > { %556 = vst [vmem:[#allocation3 + $0x28] sm:$0xff] %v3283_v32  ;;  %557 = vst [vmem:[#allocation3 + $0x98] sm:$0xff] %v3283_v32 }
  0x4c PF: > { %v2875_v33 = vld [vmem:[%s4472_s1 + $0x74] ss:$8 sps:$4 sm:$0xff]   ;;  %v2877_v34 = vld [vmem:[%s4472_s1 + $0x70] ss:$8 sps:$4 sm:$0xff]   ;;  %v3284_v35 = vmov 0   ;;  %v2899_v50 = vld [vmem:[%s3423_s4] sm:$0xff]  }
  0x4d   : > { %942 = vmatprep.mubr.bf16.mxu0 %v3284_v35  ;;  %1102 = vmatprep.mubr.bf16.mxu1 %v3284_v35  ;;  %v2878_v36 = vld [vmem:[%s4472_s1 + $0x64] ss:$8 sps:$4 sm:$0xff]   ;;  %v2880_v37 = vld [vmem:[%s4472_s1 + $0x60] ss:$8 sps:$4 sm:$0xff]   ;;  %v2881_v38 = vld [vmem:[%s4472_s1 + $0x54] ss:$8 sps:$4 sm:$0xff]  }
  0x4e   : > { %910 = vmatprep.subr.bf16.mxu0 %v2875_v33  ;;  %2799 = vmatprep.subr.bf16.mxu1 %v2875_v33  ;;  %v2883_v39 = vld [vmem:[%s4472_s1 + $0x50] ss:$8 sps:$4 sm:$0xff]   ;;  %v2884_v40 = vld [vmem:[%s4472_s1 + $0x44] ss:$8 sps:$4 sm:$0xff]   ;;  %v2886_v41 = vld [vmem:[%s4472_s1 + $0x40] ss:$8 sps:$4 sm:$0xff]  }
  0x4f   : > { %911 = vmatpush1.bf16.msra.mxu0 %v2877_v34  ;;  %2807 = vmatpush1.bf16.msra.mxu1 %v2877_v34  ;;  %v2887_v42 = vld [vmem:[%s4472_s1 + $0x34] ss:$8 sps:$4 sm:$0xff]   ;;  %v2889_v43 = vld [vmem:[%s4472_s1 + $0x30] ss:$8 sps:$4 sm:$0xff]   ;;  %v2890_v44 = vld [vmem:[%s4472_s1 + $0x24] ss:$8 sps:$4 sm:$0xff]  }
  0x50   : > { %912 = vmatprep.subr.bf16.mxu0 %v2878_v36  ;;  %2800 = vmatprep.subr.bf16.mxu1 %v2878_v36  ;;  %v2892_v45 = vld [vmem:[%s4472_s1 + $0x20] ss:$8 sps:$4 sm:$0xff]   ;;  %v2893_v46 = vld [vmem:[%s4472_s1 + $0x14] ss:$8 sps:$4 sm:$0xff]   ;;  %v2895_v47 = vld [vmem:[%s4472_s1 + $0x10] ss:$8 sps:$4 sm:$0xff]  }
  0x51   : > { %v2896_v48 = vld [vmem:[%s4472_s1 + $0x4] ss:$8 sps:$4 sm:$0xff]   ;;  %v2898_v49 = vld [vmem:[%s4472_s1] ss:$8 sps:$4 sm:$0xff]   ;;  %v2903_v54 = vld [vmem:[%s3423_s4 + $0x10] sm:$0xff]   ;;  %p2479_p10 = scmp.eq.s32.totalorder %s3273_s14, 2 }
  0x52   : > { %v2900_v51 = vld [vmem:[%s3423_s4 + $0x80] sm:$0xff]   ;;  %v2901_v52 = vld [vmem:[%s3423_s4 + $0x8] sm:$0xff]   ;;  %v2904_v55 = vld [vmem:[%s3423_s4 + $0x90] sm:$0xff]  }
  0x53   : > { %913 = vmatpush1.bf16.msra.mxu0 %v2880_v37  ;;  %2808 = vmatpush1.bf16.msra.mxu1 %v2880_v37  ;;  %v2902_v53 = vld [vmem:[%s3423_s4 + $0x88] sm:$0xff]   ;;  %v2905_v56 = vld [vmem:[%s3423_s4 + $0x18] sm:$0xff]   ;;  %v2907_v58 = vld [vmem:[%s3423_s4 + $0x20] sm:$0xff]  }
  0x54   : > { %914 = vmatprep.subr.bf16.mxu0 %v2881_v38  ;;  %2801 = vmatprep.subr.bf16.mxu1 %v2881_v38  ;;  %v2906_v57 = vld [vmem:[%s3423_s4 + $0x98] sm:$0xff]   ;;  %v2908_v59 = vld [vmem:[%s3423_s4 + $0xa0] sm:$0xff]   ;;  %v2909_v60 = vld [vmem:[%s3423_s4 + $0x28] sm:$0xff]  }
  0x55   : > { %v2910_v61 = vld [vmem:[%s3423_s4 + $0xa8] sm:$0xff]   ;;  %v2911_v62 = vld [vmem:[%s3423_s4 + $0x30] sm:$0xff]   ;;  %v2913_v0 = vld [vmem:[%s3423_s4 + $0x38] sm:$0xff]  }
  0x56   : > { %v2912_v63 = vld [vmem:[%s3423_s4 + $0xb0] sm:$0xff]   ;;  %v2914_v1 = vld [vmem:[%s3423_s4 + $0xb8] sm:$0xff]   ;;  %v2915_v2 = vld [vmem:[%s3423_s4 + $0x40] sm:$0xff]  }
  0x57   : > { %915 = vmatpush1.bf16.msra.mxu0 %v2883_v39  ;;  %2809 = vmatpush1.bf16.msra.mxu1 %v2883_v39  ;;  %v2916_v3 = vld [vmem:[%s3423_s4 + $0xc0] sm:$0xff]   ;;  %v2917_v4 = vld [vmem:[%s3423_s4 + $0x48] sm:$0xff]   ;;  %v2919_v6 = vld [vmem:[%s3423_s4 + $0x50] sm:$0xff]  }
  0x58   : > { %916 = vmatprep.subr.bf16.mxu0 %v2884_v40  ;;  %2802 = vmatprep.subr.bf16.mxu1 %v2884_v40  ;;  %v2918_v5 = vld [vmem:[%s3423_s4 + $0xc8] sm:$0xff]   ;;  %v2920_v7 = vld [vmem:[%s3423_s4 + $0xd0] sm:$0xff]   ;;  %v2921_v8 = vld [vmem:[%s3423_s4 + $0x58] sm:$0xff]  }
  0x59   : > { %v2922_v9 = vld [vmem:[%s3423_s4 + $0xd8] sm:$0xff]   ;;  %v2923_v10 = vld [vmem:[%s3423_s4 + $0x60] sm:$0xff]   ;;  %v2925_v12 = vld [vmem:[%s3423_s4 + $0x68] sm:$0xff]  }
  0x5a   : > { %v2924_v11 = vld [vmem:[%s3423_s4 + $0xe0] sm:$0xff]   ;;  %v2926_v13 = vld [vmem:[%s3423_s4 + $0xe8] sm:$0xff]   ;;  %v2927_v14 = vld [vmem:[%s3423_s4 + $0x70] sm:$0xff]  }
  0x5b   : > { %917 = vmatpush1.bf16.msra.mxu0 %v2886_v41  ;;  %2810 = vmatpush1.bf16.msra.mxu1 %v2886_v41  ;;  %v2928_v15 = vld [vmem:[%s3423_s4 + $0xf0] sm:$0xff]   ;;  %v2929_v16 = vld [vmem:[%s3423_s4 + $0x78] sm:$0xff]  }
  0x5c   : > { %918 = vmatprep.subr.bf16.mxu0 %v2887_v42  ;;  %2803 = vmatprep.subr.bf16.mxu1 %v2887_v42  ;;  %v2930_v17 = vld [vmem:[%s3423_s4 + $0xf8] sm:$0xff]  }
  0x5f   : > { %919 = vmatpush1.bf16.msra.mxu0 %v2889_v43  ;;  %2811 = vmatpush1.bf16.msra.mxu1 %v2889_v43 }
  0x60   : > { %920 = vmatprep.subr.bf16.mxu0 %v2890_v44  ;;  %2804 = vmatprep.subr.bf16.mxu1 %v2890_v44 }
  0x63   : > { %921 = vmatpush1.bf16.msra.mxu0 %v2892_v45  ;;  %2812 = vmatpush1.bf16.msra.mxu1 %v2892_v45 }
  0x64   : > { %922 = vmatprep.subr.bf16.mxu0 %v2893_v46  ;;  %2805 = vmatprep.subr.bf16.mxu1 %v2893_v46 }
  0x67   : > { %923 = vmatpush1.bf16.msra.mxu0 %v2895_v47  ;;  %2813 = vmatpush1.bf16.msra.mxu1 %v2895_v47 }
  0x68   : > { %924 = vmatprep.subr.bf16.mxu0 %v2896_v48  ;;  %2806 = vmatprep.subr.bf16.mxu1 %v2896_v48 }
  0x6b   : > { %925 = vmatpush1.bf16.msra.mxu0 %v2898_v49  ;;  %2814 = vmatpush1.bf16.msra.mxu1 %v2898_v49 }
  0x6e   : > { %943 = vmatmul.mubr.bf16.vlgmr.msra.gmra.mxu0 %v2899_v50  ;;  %1103 = vmatmul.mubr.bf16.vlgmr.msra.gmra.mxu1 %v2900_v51 }
  0x6f   : > { %952 = vmatprep.mubr.bf16.mxu0 %v3284_v35  ;;  %1112 = vmatprep.mubr.bf16.mxu1 %v3284_v35 }
  0x76   : > { %953 = vmatmul.mubr.bf16.gmra.mxu0 %v2901_v52  ;;  %1113 = vmatmul.mubr.bf16.gmra.mxu1 %v2902_v53 }
  0x77   : > { %962 = vmatprep.mubr.bf16.mxu0 %v3284_v35  ;;  %1122 = vmatprep.mubr.bf16.mxu1 %v3284_v35 }
  0x7e   : > { %963 = vmatmul.mubr.bf16.gmra.mxu0 %v2903_v54  ;;  %1123 = vmatmul.mubr.bf16.gmra.mxu1 %v2904_v55 }
  0x7f   : > { %972 = vmatprep.mubr.bf16.mxu0 %v3284_v35  ;;  %1132 = vmatprep.mubr.bf16.mxu1 %v3284_v35 }
  0x86   : > { %973 = vmatmul.mubr.bf16.gmra.mxu0 %v2905_v56  ;;  %1133 = vmatmul.mubr.bf16.gmra.mxu1 %v2906_v57 }
  0x87   : > { %982 = vmatprep.mubr.bf16.mxu0 %v3284_v35  ;;  %1142 = vmatprep.mubr.bf16.mxu1 %v3284_v35 }
  0x8e   : > { %983 = vmatmul.mubr.bf16.gmra.mxu0 %v2907_v58  ;;  %1143 = vmatmul.mubr.bf16.gmra.mxu1 %v2908_v59 }
  0x8f   : > { %992 = vmatprep.mubr.bf16.mxu0 %v3284_v35  ;;  %1152 = vmatprep.mubr.bf16.mxu1 %v3284_v35 }
  0x96   : > { %993 = vmatmul.mubr.bf16.gmra.mxu0 %v2909_v60  ;;  %1153 = vmatmul.mubr.bf16.gmra.mxu1 %v2910_v61 }
  0x97   : > { %1002 = vmatprep.mubr.bf16.mxu0 %v3284_v35  ;;  %1162 = vmatprep.mubr.bf16.mxu1 %v3284_v35 }
  0x9e   : > { %1003 = vmatmul.mubr.bf16.gmra.mxu0 %v2911_v62  ;;  %1163 = vmatmul.mubr.bf16.gmra.mxu1 %v2912_v63 }
  0x9f   : > { %1012 = vmatprep.mubr.bf16.mxu0 %v3284_v35  ;;  %1172 = vmatprep.mubr.bf16.mxu1 %v3284_v35 }
  0xa6   : > { %1013 = vmatmul.mubr.bf16.gmra.mxu0 %v2913_v0  ;;  %1173 = vmatmul.mubr.bf16.gmra.mxu1 %v2914_v1 }
  0xa7   : > { %1022 = vmatprep.mubr.bf16.mxu0 %v3284_v35  ;;  %1182 = vmatprep.mubr.bf16.mxu1 %v3284_v35 }
  0xae   : > { %1023 = vmatmul.mubr.bf16.gmra.mxu0 %v2915_v2  ;;  %1183 = vmatmul.mubr.bf16.gmra.mxu1 %v2916_v3 }
  0xaf   : > { %1032 = vmatprep.mubr.bf16.mxu0 %v3284_v35  ;;  %1192 = vmatprep.mubr.bf16.mxu1 %v3284_v35 }
  0xb6   : > { %1033 = vmatmul.mubr.bf16.gmra.mxu0 %v2917_v4  ;;  %1193 = vmatmul.mubr.bf16.gmra.mxu1 %v2918_v5 }
  0xb7   : > { %1042 = vmatprep.mubr.bf16.mxu0 %v3284_v35  ;;  %1202 = vmatprep.mubr.bf16.mxu1 %v3284_v35 }
  0xbe   : > { %1043 = vmatmul.mubr.bf16.gmra.mxu0 %v2919_v6  ;;  %1203 = vmatmul.mubr.bf16.gmra.mxu1 %v2920_v7 }
  0xbf   : > { %1052 = vmatprep.mubr.bf16.mxu0 %v3284_v35  ;;  %1212 = vmatprep.mubr.bf16.mxu1 %v3284_v35 }
  0xc6   : > { %1053 = vmatmul.mubr.bf16.gmra.mxu0 %v2921_v8  ;;  %1213 = vmatmul.mubr.bf16.gmra.mxu1 %v2922_v9 }
  0xc7   : > { %1062 = vmatprep.mubr.bf16.mxu0 %v3284_v35  ;;  %1222 = vmatprep.mubr.bf16.mxu1 %v3284_v35 }
  0xce   : > { %1063 = vmatmul.mubr.bf16.gmra.mxu0 %v2923_v10  ;;  %1223 = vmatmul.mubr.bf16.gmra.mxu1 %v2924_v11 }
  0xcf   : > { %1072 = vmatprep.mubr.bf16.mxu0 %v3284_v35  ;;  %1232 = vmatprep.mubr.bf16.mxu1 %v3284_v35 }
  0xd6   : > { %1073 = vmatmul.mubr.bf16.gmra.mxu0 %v2925_v12  ;;  %1233 = vmatmul.mubr.bf16.gmra.mxu1 %v2926_v13 }
  0xd7   : > { %1082 = vmatprep.mubr.bf16.mxu0 %v3284_v35  ;;  %1242 = vmatprep.mubr.bf16.mxu1 %v3284_v35 }
  0xde   : > { %1083 = vmatmul.mubr.bf16.gmra.mxu0 %v2927_v14  ;;  %1243 = vmatmul.mubr.bf16.gmra.mxu1 %v2928_v15 }
  0xdf   : > { %1092 = vmatprep.mubr.bf16.mxu0 %v3284_v35  ;;  %1252 = vmatprep.mubr.bf16.mxu1 %v3284_v35 }
  0xe6   : > { %1093 = vmatmul.mubr.bf16.gmra.mxu0 %v2929_v16  ;;  %1253 = vmatmul.mubr.bf16.gmra.mxu1 %v2930_v17 }
 0x12e   : > { %v944_v18 = vpop.f32.mrf.mxu0  ;;  %v1104_v19 = vpop.f32.mrf.mxu1 }
 0x12f   : > { %v1263_v22 = vmul.f32 %v944_v18, %v944_v18  ;;  %v1295_v23 = vmul.f32 %v1104_v19, %v1104_v19 }
 0x130   : > { %v946_v20 = vpop.f32.mrf.mxu0  ;;  %v1106_v21 = vpop.f32.mrf.mxu1 }
 0x131   : > { %v1327_v24 = vmul.f32 %v946_v20, %v946_v20  ;;  %v1359_v25 = vmul.f32 %v1106_v21, %v1106_v21 }
 0x132   : > { %v948_v26 = vpop.f32.mrf.mxu0  ;;  %v1108_v27 = vpop.f32.mrf.mxu1 }
 0x133   : > { %v3601_v28 = vadd.f32 %v1327_v24, %v1263_v22  ;;  %v3603_v29 = vadd.f32 %v1359_v25, %v1295_v23  ;;  %v1264_v33 = vmul.f32 %v948_v26, %v948_v26  ;;  %v1296_v37 = vmul.f32 %v1108_v27, %v1108_v27 }
 0x134   : > { %v950_v30 = vpop.f32.mrf.mxu0  ;;  %v1110_v31 = vpop.f32.mrf.mxu1 }
 0x135   : > { %2931 = vrsqrt.f32 %v3601_v28  ;;  %v1903_v32 = vmax.f32 %v3601_v28, 1e-10  ;;  %v1935_v36 = vmax.f32 %v3603_v29, 1e-10  ;;  %v1328_v38 = vmul.f32 %v950_v30, %v950_v30  ;;  %v2319_v30 = vld [vmem:[#allocation3 + $0x80] sm:$0xff] }
 0x136   : > { %2933 = vrsqrt.f32 %v3603_v29  ;;  %v954_v34 = vpop.f32.mrf.mxu0  ;;  %v1114_v35 = vpop.f32.mrf.mxu1  ;;  %v1360_v39 = vmul.f32 %v1110_v31, %v1110_v31  ;;  %vm1457_vm0 = vcmp.eq.f32.partialorder %v3601_v28, inf  ;;  %vm1459_vm1 = vcmp.eq.f32.partialorder %v3601_v28, 0.0 }
 0x137   : > { %2935 = vlog2.f32 %v1903_v32  ;;  %v3609_v42 = vadd.f32 %v1328_v38, %v1264_v33  ;;  %v1265_v47 = vmul.f32 %v954_v34, %v954_v34  ;;  %v1297_v48 = vmul.f32 %v1114_v35, %v1114_v35 }
 0x138   : > { %v956_v40 = vpop.f32.mrf.mxu0  ;;  %v1116_v41 = vpop.f32.mrf.mxu1  ;;  %2937 = vlog2.f32 %v1935_v36  ;;  %v3611_v43 = vadd.f32 %v1360_v39, %v1296_v37  ;;  %v1460_v57 = vand.u32 2147483648, %v3601_v28  ;;  %vm1681_vm2 = vcmp.eq.f32.partialorder %v3603_v29, inf }
 0x139   : > { %v1329_v44 = vmul.f32 %v956_v40, %v956_v40  ;;  %v1361_v45 = vmul.f32 %v1116_v41, %v1116_v41  ;;  %2939 = vrsqrt.f32 %v3609_v42  ;;  %v1904_v50 = vmax.f32 %v3609_v42, 1e-10 }
 0x13a   : > { %v958_v46 = vpop.f32.mrf.mxu0  ;;  %v1118_v49 = vpop.f32.mrf.mxu1  ;;  %2941 = vrsqrt.f32 %v3611_v43  ;;  %v1936_v52 = vmax.f32 %v3611_v43, 1e-10  ;;  %vm1683_vm3 = vcmp.eq.f32.partialorder %v3603_v29, 0.0  ;;  %v1684_v61 = vand.u32 2147483648, %v3603_v29 }
 0x13b   : > { %v3617_v53 = vadd.f32 %v1329_v44, %v1265_v47  ;;  %v3619_v54 = vadd.f32 %v1361_v45, %v1297_v48  ;;  %2943 = vlog2.f32 %v1904_v50  ;;  %v1266_v58 = vmul.f32 %v958_v46, %v958_v46  ;;  %v2159_v45 = vld [vmem:[#allocation2 + $0xb0] sm:$0xff] }
 0x13c   : > { %v960_v51 = vpop.f32.mrf.mxu0  ;;  %2945 = vlog2.f32 %v1936_v52  ;;  %v1120_v59 = vpop.f32.mrf.mxu1  ;;  %vm1464_vm4 = vcmp.eq.f32.partialorder %v3609_v42, inf  ;;  %v1467_v1 = vand.u32 2147483648, %v3609_v42  ;;  %vm1466_vm5 = vcmp.eq.f32.partialorder %v3609_v42, 0.0 }
 0x13d   : > { %v1330_v55 = vmul.f32 %v960_v51, %v960_v51  ;;  %2947 = vrsqrt.f32 %v3617_v53  ;;  %v1905_v60 = vmax.f32 %v3617_v53, 1e-10  ;;  %v1937_v62 = vmax.f32 %v3619_v54, 1e-10 }
 0x13e   : > { %v964_v56 = vpop.f32.mrf.mxu0  ;;  %2949 = vrsqrt.f32 %v3619_v54  ;;  %v1362_v2 = vmul.f32 %v1120_v59, %v1120_v59  ;;  %vm1688_vm6 = vcmp.eq.f32.partialorder %v3611_v43, inf  ;;  %v1298_v6 = vmul.f32 %v1118_v49, %v1118_v49  ;;  %v1124_v9 = vpop.f32.mrf.mxu1 }
 0x13f   : > { %v3631_v63 = vadd.f32 %v1330_v55, %v1266_v58  ;;  %2951 = vlog2.f32 %v1905_v60  ;;  %vm1690_vm7 = vcmp.eq.f32.partialorder %v3611_v43, 0.0  ;;  %v1691_v12 = vand.u32 2147483648, %v3611_v43 }
 0x140   : > { %v966_v3 = vpop.f32.mrf.mxu0  ;;  %2953 = vlog2.f32 %v1937_v62  ;;  %v3646_v13 = vadd.f32 %v1362_v2, %v1298_v6  ;;  %vm1471_vm8 = vcmp.eq.f32.partialorder %v3617_v53, inf  ;;  %v1267_v21 = vmul.f32 %v964_v56, %v964_v56  ;;  %v1126_v26 = vpop.f32.mrf.mxu1  ;;  %v2320_v2 = vld [vmem:[#allocation3 + $0xc8] sm:$0xff] }
 0x141   : > { %2955 = vrsqrt.f32 %v3631_v63  ;;  %v1906_v8 = vmax.f32 %v3631_v63, 1e-10  ;;  %v1331_v14 = vmul.f32 %v966_v3, %v966_v3  ;;  %vm1473_vm9 = vcmp.eq.f32.partialorder %v3617_v53, 0.0 }
 0x142   : > { %v2932_v0 = vpop.eup %2931  ;;  %v1474_v25 = vand.u32 2147483648, %v3617_v53  ;;  %vm1695_vm10 = vcmp.eq.f32.partialorder %v3619_v54, inf  ;;  %v3660_v27 = vpop.f32.mrf.mxu0  ;;  %vm1697_vm11 = vcmp.eq.f32.partialorder %v3619_v54, 0.0  ;;  %v1938_v32 = vmax.f32 %v3646_v13, 1e-10 }
 0x143   : > { %v2934_v4 = vpop.eup %2933  ;;  %v1456_v5 = vmul.f32 %v2932_v0, %v3601_v28  ;;  %2957 = vlog2.f32 %v1906_v8  ;;  %v3665_v33 = vadd.f32 %v1331_v14, %v1267_v21  ;;  %v1698_v36 = vand.u32 2147483648, %v3619_v54 }
 0x144   : > { %v1680_v7 = vmul.f32 %v2934_v4, %v3603_v29  ;;  %v2936_v10 = vpop.eup %2935  ;;  %2959 = vrsqrt.f32 %v3646_v13  ;;  %v1299_v37 = vmul.f32 %v1124_v9, %v1124_v9  ;;  %vm1478_vm12 = vcmp.eq.f32.partialorder %v3631_v63, inf  ;;  %v3678_v50 = vpop.f32.mrf.mxu0 }
 0x145   : > { %v1458_v11 = vsel %vm1457_vm0, %v3601_v28, %v1456_v5  ;;  %v2938_v15 = vpop.eup %2937  ;;  %v1968_v17 = vmul.f32 0.6931472, %v2936_v10  ;;  %2961 = vlog2.f32 %v1938_v32  ;;  %v1363_v41 = vmul.f32 %v1126_v26, %v1126_v26 }
 0x146   : > { %v1461_v16 = vsel %vm1459_vm1, %v1460_v57, %v1458_v11  ;;  %v1682_v18 = vsel %vm1681_vm2, %v3603_v29, %v1680_v7  ;;  %v2032_v20 = vmul.f32 0.6931472, %v2938_v15  ;;  %v2940_v22 = vpop.eup %2939  ;;  %vm1480_vm13 = vcmp.eq.f32.partialorder %v3631_v63, 0.0  ;;  %v1128_v57 = vpop.f32.mrf.mxu1 }
 0x147   : > { %v1685_v19 = vsel %vm1683_vm3, %v1684_v61, %v1682_v18  ;;  %v2095_v23 = vmul.f32 0.4342945, %v1968_v17  ;;  %v2942_v28 = vpop.eup %2941  ;;  %v1463_v31 = vmul.f32 %v2940_v22, %v3609_v42  ;;  %2963 = vrsqrt.f32 %v3665_v33  ;;  %v3693_v9 = vpop.f32.mrf.mxu0  ;;  %v2160_v17 = vld [vmem:[#allocation2] sm:$0xff] }
 0x148   : > { %v2351_v24 = vsub.f32 %v1461_v16, %v1685_v19  ;;  %v2127_v29 = vmul.f32 0.4342945, %v2032_v20  ;;  %v1687_v35 = vmul.f32 %v2942_v28, %v3611_v43  ;;  %v2944_v38 = vpop.eup %2943  ;;  %v1481_v61 = vand.u32 2147483648, %v3631_v63  ;;  %v1130_v16 = vpop.f32.mrf.mxu1 }
 0x149   : > { %v1465_v40 = vsel %vm1464_vm4, %v3609_v42, %v1463_v31  ;;  %v2946_v44 = vpop.eup %2945  ;;  %v1970_v48 = vmul.f32 0.6931472, %v2944_v38  ;;  %v3687_v3 = vadd.f32 %v1363_v41, %v1299_v37  ;;  %v1907_v8 = vmax.f32 %v3665_v33, 1e-10 }
 0x14a   : > { %v2383_v34 = vand.u32 2147483647, %v2351_v24  ;;  %v2191_v39 = vsub.f32 %v2095_v23, %v2127_v29  ;;  %v1468_v47 = vsel %vm1466_vm5, %v1467_v1, %v1465_v40  ;;  %v1689_v49 = vsel %vm1688_vm6, %v3611_v43, %v1687_v35  ;;  %v2948_v51 = vpop.eup %2947  ;;  %v2161_v35 = vld [vmem:[#allocation2 + $0xd8] sm:$0xff] }
 0x14b   : > { %v1692_v55 = vsel %vm1690_vm7, %v1691_v12, %v1689_v49  ;;  %v2034_v56 = vmul.f32 0.6931472, %v2946_v44  ;;  %v2950_v42 = vpop.eup %2949  ;;  %v2096_v58 = vmul.f32 0.4342945, %v1970_v48  ;;  %v1470_v60 = vmul.f32 %v2948_v51, %v3617_v53 }
 0x14c   : > { %v2415_v46 = vadd.f32 %v2383_v34, %v2319_v30  ;;  %v2223_v52 = vand.u32 2147483647, %v2191_v39  ;;  %v2352_v59 = vsub.f32 %v1468_v47, %v1692_v55  ;;  %v2952_v62 = vpop.eup %2951  ;;  %v1694_v43 = vmul.f32 %v2950_v42, %v3619_v54  ;;  %v1134_v34 = vpop.f32.mrf.mxu1 }
 0x14d   : > { %v2128_v1 = vmul.f32 0.4342945, %v2034_v56  ;;  %v2954_v4 = vpop.eup %2953  ;;  %v1472_v6 = vsel %vm1471_vm8, %v3617_v53, %v1470_v60  ;;  %v1972_v7 = vmul.f32 0.6931472, %v2952_v62  ;;  %2965 = vlog2.f32 %v1907_v8 }
 0x14e   : > { %2447 = vst [vmem:[#allocation3 + $0x80] sm:$0xff] %v2415_v46  ;;  %v2255_v0 = vadd.f32 %v2223_v52, %v2159_v45  ;;  %v2384_v5 = vand.u32 2147483647, %v2352_v59  ;;  %v2956_v10 = vpop.eup %2955  ;;  %v1475_v12 = vsel %vm1473_vm9, %v1474_v25, %v1472_v6  ;;  %v1696_v14 = vsel %vm1695_vm10, %v3619_v54, %v1694_v43  ;;  %v2321_v25 = vld [vmem:[#allocation3 + $0xe8] sm:$0xff]  ;;  %v976_v54 = vpop.f32.mrf.mxu0 }
 0x14f   : > { %v2192_v11 = vsub.f32 %v2096_v58, %v2128_v1  ;;  %v2036_v15 = vmul.f32 0.6931472, %v2954_v4  ;;  %v2097_v19 = vmul.f32 0.4342945, %v1972_v7  ;;  %v1699_v20 = vsel %vm1697_vm11, %v1698_v36, %v1696_v14  ;;  %v1136_v56 = vpop.f32.mrf.mxu1 }
 0x150   : > { %2287 = vst [vmem:[#allocation2 + $0xb0] sm:$0xff] %v2255_v0  ;;  %v2416_v18 = vadd.f32 %v2384_v5, %v2320_v2  ;;  %v1477_v21 = vmul.f32 %v2956_v10, %v3631_v63  ;;  %v2958_v22 = vpop.eup %2957  ;;  %v2353_v26 = vsub.f32 %v1475_v12, %v1699_v20  ;;  %vm1702_vm14 = vcmp.eq.f32.partialorder %v3646_v13, inf  ;;  %v978_v51 = vpop.f32.mrf.mxu0  ;;  %v2162_v5 = vld [vmem:[#allocation2 + $0x18] sm:$0xff] }
 0x151   : > { %v2224_v23 = vand.u32 2147483647, %v2192_v11  ;;  %v2129_v24 = vmul.f32 0.4342945, %v2036_v15  ;;  %v2960_v53 = vpop.eup %2959  ;;  %v1974_v29 = vmul.f32 0.6931472, %v2958_v22  ;;  %2967 = vrsqrt.f32 %v3687_v3  ;;  %v1138_v4 = vpop.f32.mrf.mxu1 }
 0x152   : > { %2448 = vst [vmem:[#allocation3 + $0xc8] sm:$0xff] %v2416_v18  ;;  %v1479_v28 = vsel %vm1478_vm12, %v3631_v63, %v1477_v21  ;;  %v2385_v32 = vand.u32 2147483647, %v2353_v26  ;;  %vm1704_vm15 = vcmp.eq.f32.partialorder %v3646_v13, 0.0  ;;  %v1701_v37 = vmul.f32 %v2960_v53, %v3646_v13  ;;  %v2962_v46 = vpop.eup %2961  ;;  %v980_v1 = vpop.f32.mrf.mxu0 }
 0x153   : > { %v2256_v30 = vadd.f32 %v2224_v23, %v2160_v17  ;;  %v2193_v31 = vsub.f32 %v2097_v19, %v2129_v24  ;;  %v1482_v36 = vsel %vm1480_vm13, %v1481_v61, %v1479_v28  ;;  %v1705_v38 = vand.u32 2147483648, %v3646_v13  ;;  %v2322_v61 = vld [vmem:[#allocation3 + $0x78] sm:$0xff]  ;;  %v1140_v20 = vpop.f32.mrf.mxu1 }
 0x154   : > { %v1268_v39 = vmul.f32 %v3660_v27, %v3660_v27  ;;  %v2417_v41 = vadd.f32 %v2385_v32, %v2321_v25  ;;  %v2098_v44 = vmul.f32 0.4342945, %v1974_v29  ;;  %v1939_v45 = vmax.f32 %v3687_v3, 1e-10  ;;  %v2964_v42 = vpop.eup %2963  ;;  %v984_v17 = vpop.f32.mrf.mxu0 }
 0x155   : > { %2288 = vst [vmem:[#allocation2] sm:$0xff] %v2256_v30  ;;  %v2225_v40 = vand.u32 2147483647, %v2193_v31  ;;  %v1703_v47 = vsel %vm1702_vm14, %v3646_v13, %v1701_v37  ;;  %v1300_v63 = vmul.f32 %v1128_v57, %v1128_v57  ;;  %v1332_v48 = vmul.f32 %v3678_v50, %v3678_v50  ;;  %v1144_v31 = vpop.f32.mrf.mxu1 }
 0x156   : > { %v1364_v49 = vmul.f32 %v1130_v16, %v1130_v16  ;;  %2449 = vst [vmem:[#allocation3 + $0xe8] sm:$0xff] %v2417_v41  ;;  %v1706_v27 = vsel %vm1704_vm15, %v1705_v38, %v1703_v47  ;;  %v2038_v55 = vmul.f32 0.6931472, %v2962_v46  ;;  %2969 = vlog2.f32 %v1939_v45 }
 0x157   : > { %v2257_v52 = vadd.f32 %v2225_v40, %v2161_v35  ;;  %v2354_v58 = vsub.f32 %v1482_v36, %v1706_v27  ;;  %v3723_v59 = vadd.f32 %v1332_v48, %v1268_v39  ;;  %v1484_v50 = vmul.f32 %v2964_v42, %v3665_v33  ;;  %v2323_v40 = vld [vmem:[#allocation3 + $0x8] sm:$0xff] }
 0x158   : > { %v3725_v60 = vadd.f32 %v1364_v49, %v1300_v63  ;;  %v2130_v57 = vmul.f32 0.4342945, %v2038_v55  ;;  %v1333_v0 = vmul.f32 %v976_v54, %v976_v54  ;;  %v1365_v13 = vmul.f32 %v1136_v56, %v1136_v56  ;;  %v986_v54 = vpop.f32.mrf.mxu0  ;;  %v1146_v49 = vpop.f32.mrf.mxu1 }
 0x159   : > { %2289 = vst [vmem:[#allocation2 + $0xd8] sm:$0xff] %v2257_v52  ;;  %v2386_v62 = vand.u32 2147483647, %v2354_v58  ;;  %2971 = vrsqrt.f32 %v3723_v59  ;;  %v1908_v43 = vmax.f32 %v3723_v59, 1e-10  ;;  %v1269_v7 = vmul.f32 %v3693_v9, %v3693_v9 }
 0x15a   : > { %v2194_v2 = vsub.f32 %v2098_v44, %v2130_v57  ;;  %2973 = vrsqrt.f32 %v3725_v60  ;;  %v1301_v8 = vmul.f32 %v1134_v34, %v1134_v34  ;;  %vm1485_vm0 = vcmp.eq.f32.partialorder %v3665_v33, inf  ;;  %v2966_v11 = vpop.eup %2965  ;;  %v2163_v57 = vld [vmem:[#allocation2 + $0x50] sm:$0xff] }
 0x15b   : > { %v2418_v6 = vadd.f32 %v2386_v62, %v2322_v61  ;;  %vm1487_vm1 = vcmp.eq.f32.partialorder %v3665_v33, 0.0  ;;  %2975 = vlog2.f32 %v1908_v43  ;;  %v1486_v12 = vsel %vm1485_vm0, %v3665_v33, %v1484_v50 }
 0x15c   : > { %v2226_v10 = vand.u32 2147483647, %v2194_v2  ;;  %v1940_v14 = vmax.f32 %v3725_v60, 1e-10  ;;  %v3737_v15 = vadd.f32 %v1333_v0, %v1269_v7  ;;  %v3739_v16 = vadd.f32 %v1365_v13, %v1301_v8  ;;  %v3778_v0 = vpop.f32.mrf.mxu0  ;;  %v1148_v8 = vpop.f32.mrf.mxu1 }
 0x15d   : > { %2450 = vst [vmem:[#allocation3 + $0x78] sm:$0xff] %v2418_v6  ;;  %v1488_v19 = vand.u32 2147483648, %v3665_v33  ;;  %vm1709_vm2 = vcmp.eq.f32.partialorder %v3687_v3, inf  ;;  %vm1711_vm3 = vcmp.eq.f32.partialorder %v3687_v3, 0.0  ;;  %v1712_v22 = vand.u32 2147483648, %v3687_v3 }
 0x15e   : > { %v2968_v18 = vpop.eup %2967  ;;  %v2258_v9 = vadd.f32 %v2226_v10, %v2162_v5  ;;  %2977 = vlog2.f32 %v1940_v14  ;;  %v1334_v23 = vmul.f32 %v980_v1, %v980_v1  ;;  %v1976_v26 = vmul.f32 0.6931472, %v2966_v11 }
 0x15f   : > { %v1708_v21 = vmul.f32 %v2968_v18, %v3687_v3  ;;  %v1489_v24 = vsel %vm1487_vm1, %v1488_v19, %v1486_v12  ;;  %vm1492_vm4 = vcmp.eq.f32.partialorder %v3723_v59, inf  ;;  %2979 = vrsqrt.f32 %v3737_v15  ;;  %v990_v18 = vpop.f32.mrf.mxu0  ;;  %v2324_v19 = vld [vmem:[#allocation3 + $0x90] sm:$0xff] }
 0x160   : > { %2290 = vst [vmem:[#allocation2 + $0x18] sm:$0xff] %v2258_v9  ;;  %v1909_v53 = vmax.f32 %v3737_v15, 1e-10  ;;  %vm1494_vm5 = vcmp.eq.f32.partialorder %v3723_v59, 0.0  ;;  %v1495_v28 = vand.u32 2147483648, %v3723_v59  ;;  %2981 = vrsqrt.f32 %v3739_v16 }
 0x161   : > { %v1710_v25 = vsel %vm1709_vm2, %v3687_v3, %v1708_v21  ;;  %v1270_v29 = vmul.f32 %v978_v51, %v978_v51  ;;  %vm1716_vm6 = vcmp.eq.f32.partialorder %v3725_v60, inf  ;;  %v1941_v30 = vmax.f32 %v3739_v16, 1e-10 }
 0x162   : > { %v1713_v33 = vsel %vm1711_vm3, %v1712_v22, %v1710_v25  ;;  %2983 = vlog2.f32 %v1909_v53  ;;  %v1302_v35 = vmul.f32 %v1138_v4, %v1138_v4  ;;  %v1366_v37 = vmul.f32 %v1140_v20, %v1140_v20 }
 0x163   : > { %v2970_v32 = vpop.eup %2969  ;;  %v2355_v34 = vsub.f32 %v1489_v24, %v1713_v33  ;;  %v3759_v36 = vadd.f32 %v1334_v23, %v1270_v29  ;;  %v2099_v38 = vmul.f32 0.4342945, %v1976_v26  ;;  %2985 = vlog2.f32 %v1941_v30  ;;  %v1150_v29 = vpop.f32.mrf.mxu1 }
 0x164   : > { %v2040_v39 = vmul.f32 0.6931472, %v2970_v32  ;;  %v1335_v41 = vmul.f32 %v986_v54, %v986_v54  ;;  %vm1718_vm7 = vcmp.eq.f32.partialorder %v3725_v60, 0.0  ;;  %v1271_v3 = vmul.f32 %v984_v17, %v984_v17 }
 0x165   : > { %v2387_v44 = vand.u32 2147483647, %v2355_v34  ;;  %2987 = vrsqrt.f32 %v3759_v36  ;;  %v1719_v47 = vand.u32 2147483648, %v3725_v60  ;;  %v1910_v63 = vmax.f32 %v3759_v36, 1e-10  ;;  %v3809_v34 = vpop.f32.mrf.mxu0 }
 0x166   : > { %v2972_v45 = vpop.eup %2971  ;;  %v2131_v46 = vmul.f32 0.4342945, %v2040_v39  ;;  %v3765_v48 = vadd.f32 %v1366_v37, %v1302_v35  ;;  %vm1499_vm8 = vcmp.eq.f32.partialorder %v3737_v15, inf  ;;  %v3769_v27 = vadd.f32 %v1335_v41, %v1271_v3  ;;  %v2164_v37 = vld [vmem:[#allocation2 + $0x68] sm:$0xff] }
 0x167   : > { %v2419_v51 = vadd.f32 %v2387_v44, %v2323_v40  ;;  %v1491_v52 = vmul.f32 %v2972_v45, %v3723_v59  ;;  %v2974_v55 = vpop.eup %2973  ;;  %vm1501_vm9 = vcmp.eq.f32.partialorder %v3737_v15, 0.0  ;;  %v1502_v42 = vand.u32 2147483648, %v3737_v15  ;;  %v2325_v45 = vld [vmem:[#allocation3 + $0x58] sm:$0xff] }
 0x168   : > { %v2195_v56 = vsub.f32 %v2099_v38, %v2131_v46  ;;  %2989 = vlog2.f32 %v1910_v63  ;;  %v2976_v58 = vpop.eup %2975  ;;  %v1715_v50 = vmul.f32 %v2974_v55, %v3725_v60  ;;  %v1367_v62 = vmul.f32 %v1146_v49, %v1146_v49  ;;  %v3817_v49 = vpop.f32.mrf.mxu1 }
 0x169   : > { %2451 = vst [vmem:[#allocation3 + $0x8] sm:$0xff] %v2419_v51  ;;  %v1493_v61 = vsel %vm1492_vm4, %v3723_v59, %v1491_v52  ;;  %2991 = vrsqrt.f32 %v3765_v48  ;;  %v1978_v2 = vmul.f32 0.6931472, %v2976_v58  ;;  %v1942_v43 = vmax.f32 %v3765_v48, 1e-10 }
 0x16a   : > { %v2227_v13 = vand.u32 2147483647, %v2195_v56  ;;  %v1496_v1 = vsel %vm1494_vm5, %v1495_v28, %v1493_v61  ;;  %v1717_v4 = vsel %vm1716_vm6, %v3725_v60, %v1715_v50  ;;  %vm1723_vm10 = vcmp.eq.f32.partialorder %v3739_v16, inf }
 0x16b   : > { %vm1725_vm11 = vcmp.eq.f32.partialorder %v3739_v16, 0.0  ;;  %2993 = vrsqrt.f32 %v3769_v27  ;;  %v2978_v5 = vpop.eup %2977  ;;  %v1720_v7 = vsel %vm1718_vm7, %v1719_v47, %v1717_v4  ;;  %v1303_v59 = vmul.f32 %v1144_v31, %v1144_v31 }
 0x16c   : > { %v2259_v6 = vadd.f32 %v2227_v13, %v2163_v57  ;;  %2995 = vlog2.f32 %v1942_v43  ;;  %v2980_v10 = vpop.eup %2979  ;;  %v2100_v11 = vmul.f32 0.4342945, %v1978_v2  ;;  %v2042_v12 = vmul.f32 0.6931472, %v2978_v5 }
 0x16d   : > { %v2356_v14 = vsub.f32 %v1496_v1, %v1720_v7  ;;  %v1911_v17 = vmax.f32 %v3769_v27, 1e-10  ;;  %v2982_v9 = vpop.eup %2981  ;;  %v1498_v20 = vmul.f32 %v2980_v10, %v3737_v15  ;;  %v1726_v21 = vand.u32 2147483648, %v3739_v16  ;;  %v1156_v7 = vpop.f32.mrf.mxu1 }
 0x16e   : > { %2291 = vst [vmem:[#allocation2 + $0x50] sm:$0xff] %v2259_v6  ;;  %vm1506_vm12 = vcmp.eq.f32.partialorder %v3759_v36, inf  ;;  %v3795_v60 = vadd.f32 %v1367_v62, %v1303_v59  ;;  %v2132_v23 = vmul.f32 0.4342945, %v2042_v12  ;;  %v1722_v26 = vmul.f32 %v2982_v9, %v3739_v16  ;;  %v2165_v62 = vld [vmem:[#allocation2 + $0x30] sm:$0xff] }
 0x16f   : > { %v2984_v22 = vpop.eup %2983  ;;  %v2388_v24 = vand.u32 2147483647, %v2356_v14  ;;  %vm1508_vm13 = vcmp.eq.f32.partialorder %v3759_v36, 0.0  ;;  %2997 = vlog2.f32 %v1911_v17  ;;  %v1500_v53 = vsel %vm1499_vm8, %v3737_v15, %v1498_v20 }
 0x170   : > { %v1980_v25 = vmul.f32 0.6931472, %v2984_v22  ;;  %v1509_v28 = vand.u32 2147483648, %v3759_v36  ;;  %2999 = vrsqrt.f32 %v3795_v60  ;;  %v2986_v54 = vpop.eup %2985  ;;  %v2196_v33 = vsub.f32 %v2100_v11, %v2132_v23  ;;  %v2326_v23 = vld [vmem:[#allocation3 + $0xa8] sm:$0xff] }
 0x171   : > { %v2420_v30 = vadd.f32 %v2388_v24, %v2324_v19  ;;  %v1503_v31 = vsel %vm1501_vm9, %v1502_v42, %v1500_v53  ;;  %v1724_v32 = vsel %vm1723_vm10, %v3739_v16, %v1722_v26  ;;  %v2044_v40 = vmul.f32 0.6931472, %v2986_v54  ;;  %v996_v42 = vpop.f32.mrf.mxu0  ;;  %v1158_v26 = vpop.f32.mrf.mxu1 }
 0x172   : > { %v2988_v35 = vpop.eup %2987  ;;  %v2101_v38 = vmul.f32 0.4342945, %v1980_v25  ;;  %v1727_v39 = vsel %vm1725_vm11, %v1726_v21, %v1724_v32  ;;  %vm1730_vm14 = vcmp.eq.f32.partialorder %v3765_v48, inf  ;;  %v2228_v41 = vand.u32 2147483647, %v2196_v33  ;;  %v2166_v32 = vld [vmem:[#allocation2 + $0x48] sm:$0xff] }
 0x173   : > { %2452 = vst [vmem:[#allocation3 + $0x90] sm:$0xff] %v2420_v30  ;;  %v2357_v44 = vsub.f32 %v1503_v31, %v1727_v39  ;;  %v1505_v15 = vmul.f32 %v2988_v35, %v3759_v36  ;;  %vm1732_vm15 = vcmp.eq.f32.partialorder %v3765_v48, 0.0  ;;  %v2133_v3 = vmul.f32 0.4342945, %v2044_v40  ;;  %v998_v11 = vpop.f32.mrf.mxu0 }
 0x174   : > { %v1943_v46 = vmax.f32 %v3795_v60, 1e-10  ;;  %v1336_v47 = vmul.f32 %v990_v18, %v990_v18  ;;  %v1368_v63 = vmul.f32 %v1150_v29, %v1150_v29  ;;  %v2260_v51 = vadd.f32 %v2228_v41, %v2164_v37 }
 0x175   : > { %v2990_v16 = vpop.eup %2989  ;;  %v2389_v52 = vand.u32 2147483647, %v2357_v44  ;;  %v1507_v55 = vsel %vm1506_vm12, %v3759_v36, %v1505_v15  ;;  %v1272_v56 = vmul.f32 %v3778_v0, %v3778_v0  ;;  %v2197_v57 = vsub.f32 %v2101_v38, %v2133_v3  ;;  %v1000_v29 = vpop.f32.mrf.mxu0 }
 0x176   : > { %v2992_v58 = vpop.eup %2991  ;;  %v1982_v61 = vmul.f32 0.6931472, %v2990_v16  ;;  %3001 = vlog2.f32 %v1943_v46  ;;  %v1304_v50 = vmul.f32 %v1148_v8, %v1148_v8  ;;  %2292 = vst [vmem:[#allocation2 + $0x68] sm:$0xff] %v2260_v51  ;;  %v1733_v2 = vand.u32 2147483648, %v3765_v48  ;;  %v2327_v16 = vld [vmem:[#allocation3 + $0xd0] sm:$0xff] }
 0x177   : > { %v2421_v13 = vadd.f32 %v2389_v52, %v2325_v45  ;;  %v1729_v1 = vmul.f32 %v2992_v58, %v3765_v48  ;;  %v3826_v43 = vadd.f32 %v1336_v47, %v1272_v56  ;;  %v2229_v5 = vand.u32 2147483647, %v2197_v57  ;;  %v1004_v15 = vpop.f32.mrf.mxu0 }
 0x178   : > { %v2994_v4 = vpop.eup %2993  ;;  %v1510_v0 = vsel %vm1508_vm13, %v1509_v28, %v1507_v55  ;;  %vm1513_vm0 = vcmp.eq.f32.partialorder %v3769_v27, inf  ;;  %v3831_v6 = vadd.f32 %v1368_v63, %v1304_v50  ;;  %vm1515_vm1 = vcmp.eq.f32.partialorder %v3769_v27, 0.0 }
 0x179   : > { %v2996_v59 = vpop.eup %2995  ;;  %2453 = vst [vmem:[#allocation3 + $0x58] sm:$0xff] %v2421_v13  ;;  %v1731_v8 = vsel %vm1730_vm14, %v3765_v48, %v1729_v1  ;;  %v1512_v10 = vmul.f32 %v2994_v4, %v3769_v27  ;;  %3003 = vrsqrt.f32 %v3826_v43  ;;  %v2261_v36 = vadd.f32 %v2229_v5, %v2165_v62  ;;  %v1006_v58 = vpop.f32.mrf.mxu0 }
 0x17a   : > { %v2102_v12 = vmul.f32 0.4342945, %v1982_v61  ;;  %v1734_v14 = vsel %vm1732_vm15, %v1733_v2, %v1731_v8  ;;  %v2046_v17 = vmul.f32 0.6931472, %v2996_v59  ;;  %v1912_v19 = vmax.f32 %v3826_v43, 1e-10 }
 0x17b   : > { %v2358_v18 = vsub.f32 %v1510_v0, %v1734_v14  ;;  %v1514_v9 = vsel %vm1513_vm0, %v3769_v27, %v1512_v10  ;;  %v1337_v20 = vmul.f32 %v996_v42, %v996_v42  ;;  %2293 = vst [vmem:[#allocation2 + $0x30] sm:$0xff] %v2261_v36  ;;  %v1516_v24 = vand.u32 2147483648, %v3769_v27  ;;  %v1160_v27 = vpop.f32.mrf.mxu1  ;;  %v2167_v8 = vld [vmem:[#allocation2 + $0x80] sm:$0xff] }
 0x17c   : > { %v2998_v21 = vpop.eup %2997  ;;  %v2134_v22 = vmul.f32 0.4342945, %v2046_v17  ;;  %vm1737_vm2 = vcmp.eq.f32.partialorder %v3795_v60, inf  ;;  %3005 = vrsqrt.f32 %v3831_v6  ;;  %v1740_v25 = vand.u32 2147483648, %v3795_v60 }
 0x17d   : > { %v3000_v48 = vpop.eup %2999  ;;  %v2390_v53 = vand.u32 2147483647, %v2358_v18  ;;  %3007 = vlog2.f32 %v1912_v19  ;;  %v1273_v28 = vmul.f32 %v3809_v34, %v3809_v34  ;;  %v1517_v33 = vsel %vm1515_vm1, %v1516_v24, %v1514_v9  ;;  %v1164_v1 = vpop.f32.mrf.mxu1 }
 0x17e   : > { %v2198_v54 = vsub.f32 %v2102_v12, %v2134_v22  ;;  %v1736_v30 = vmul.f32 %v3000_v48, %v3795_v60  ;;  %v1944_v31 = vmax.f32 %v3831_v6, 1e-10  ;;  %v1984_v37 = vmul.f32 0.6931472, %v2998_v21  ;;  %v1008_v12 = vpop.f32.mrf.mxu0 }
 0x17f   : > { %v2422_v35 = vadd.f32 %v2390_v53, %v2326_v23  ;;  %v3853_v38 = vadd.f32 %v1337_v20, %v1273_v28  ;;  %v1369_v39 = vmul.f32 %v1156_v7, %v1156_v7  ;;  %vm1739_vm3 = vcmp.eq.f32.partialorder %v3795_v60, 0.0  ;;  %v1166_v9 = vpop.f32.mrf.mxu1 }
 0x180   : > { %v2230_v40 = vand.u32 2147483647, %v2198_v54  ;;  %v1738_v34 = vsel %vm1737_vm2, %v3795_v60, %v1736_v30  ;;  %3009 = vlog2.f32 %v1944_v31  ;;  %v1305_v44 = vmul.f32 %v3817_v49, %v3817_v49 }
 0x181   : > { %2454 = vst [vmem:[#allocation3 + $0xa8] sm:$0xff] %v2422_v35  ;;  %v1741_v41 = vsel %vm1739_vm3, %v1740_v25, %v1738_v34  ;;  %3011 = vrsqrt.f32 %v3853_v38  ;;  %v1913_v46 = vmax.f32 %v3853_v38, 1e-10  ;;  %v2103_v63 = vmul.f32 0.4342945, %v1984_v37  ;;  %v1168_v34 = vpop.f32.mrf.mxu1 }
 0x182   : > { %v2262_v3 = vadd.f32 %v2230_v40, %v2166_v32  ;;  %v2359_v45 = vsub.f32 %v1517_v33, %v1741_v41  ;;  %v3863_v51 = vadd.f32 %v1369_v39, %v1305_v44  ;;  %v1338_v60 = vmul.f32 %v1000_v29, %v1000_v29  ;;  %v1010_v29 = vpop.f32.mrf.mxu0  ;;  %v2328_v32 = vld [vmem:[#allocation3 + $0xb0] sm:$0xff] }
 0x183   : > { %v3002_v47 = vpop.eup %3001  ;;  %v1370_v52 = vmul.f32 %v1160_v27, %v1160_v27  ;;  %3013 = vlog2.f32 %v1913_v46  ;;  %v1274_v42 = vmul.f32 %v998_v11, %v998_v11  ;;  %vm1520_vm4 = vcmp.eq.f32.partialorder %v3826_v43, inf }
 0x184   : > { %2294 = vst [vmem:[#allocation2 + $0x48] sm:$0xff] %v2262_v3  ;;  %v2048_v55 = vmul.f32 0.6931472, %v3002_v47  ;;  %v2391_v56 = vand.u32 2147483647, %v2359_v45  ;;  %vm1522_vm5 = vcmp.eq.f32.partialorder %v3826_v43, 0.0  ;;  %3015 = vrsqrt.f32 %v3863_v51  ;;  %v3910_v3 = vpop.f32.mrf.mxu0 }
 0x185   : > { %v1306_v49 = vmul.f32 %v1158_v26, %v1158_v26  ;;  %v1945_v62 = vmax.f32 %v3863_v51, 1e-10  ;;  %v3869_v13 = vadd.f32 %v1338_v60, %v1274_v42  ;;  %v1523_v4 = vand.u32 2147483648, %v3826_v43 }
 0x186   : > { %v3004_v57 = vpop.eup %3003  ;;  %v2135_v61 = vmul.f32 0.4342945, %v2048_v55  ;;  %v2423_v50 = vadd.f32 %v2391_v56, %v2327_v16  ;;  %vm1744_vm6 = vcmp.eq.f32.partialorder %v3831_v6, inf  ;;  %vm1746_vm7 = vcmp.eq.f32.partialorder %v3831_v6, 0.0  ;;  %v2168_v16 = vld [vmem:[#allocation2 + $0x88] sm:$0xff] }
 0x187   : > { %v1519_v2 = vmul.f32 %v3004_v57, %v3826_v43  ;;  %v3874_v5 = vadd.f32 %v1370_v52, %v1306_v49  ;;  %v1747_v7 = vand.u32 2147483648, %v3831_v6  ;;  %3017 = vlog2.f32 %v1945_v62  ;;  %v1170_v49 = vpop.f32.mrf.mxu1  ;;  %v1016_v62 = vpop.f32.mrf.mxu0 }
 0x188   : > { %v2199_v0 = vsub.f32 %v2103_v63, %v2135_v61  ;;  %2455 = vst [vmem:[#allocation3 + $0xd0] sm:$0xff] %v2423_v50  ;;  %3019 = vrsqrt.f32 %v3869_v13  ;;  %v1914_v11 = vmax.f32 %v3869_v13, 1e-10  ;;  %v1339_v36 = vmul.f32 %v1006_v58, %v1006_v58 }
 0x189   : > { %v3006_v59 = vpop.eup %3005  ;;  %v1521_v10 = vsel %vm1520_vm4, %v3826_v43, %v1519_v2  ;;  %vm1527_vm8 = vcmp.eq.f32.partialorder %v3853_v38, inf  ;;  %3021 = vrsqrt.f32 %v3874_v5  ;;  %vm1529_vm9 = vcmp.eq.f32.partialorder %v3853_v38, 0.0 }
 0x18a   : > { %v3008_v14 = vpop.eup %3007  ;;  %v2231_v17 = vand.u32 2147483647, %v2199_v0  ;;  %v1743_v18 = vmul.f32 %v3006_v59, %v3831_v6  ;;  %v1524_v19 = vsel %vm1522_vm5, %v1523_v4, %v1521_v10  ;;  %3023 = vlog2.f32 %v1914_v11 }
 0x18b   : > { %v1986_v20 = vmul.f32 0.6931472, %v3008_v14  ;;  %v1275_v21 = vmul.f32 %v1004_v15, %v1004_v15  ;;  %v1530_v24 = vand.u32 2147483648, %v3853_v38  ;;  %v1946_v26 = vmax.f32 %v3874_v5, 1e-10 }
 0x18c   : > { %v2263_v22 = vadd.f32 %v2231_v17, %v2167_v8  ;;  %v1745_v23 = vsel %vm1744_vm6, %v3831_v6, %v1743_v18  ;;  %v1307_v43 = vmul.f32 %v1164_v1, %v1164_v1  ;;  %v1371_v28 = vmul.f32 %v1166_v9, %v1166_v9  ;;  %v1174_v18 = vpop.f32.mrf.mxu1 }
 0x18d   : > { %v3010_v48 = vpop.eup %3009  ;;  %v1748_v53 = vsel %vm1746_vm7, %v1747_v7, %v1745_v23  ;;  %v3896_v25 = vadd.f32 %v1339_v36, %v1275_v21  ;;  %v2104_v33 = vmul.f32 0.4342945, %v1986_v20  ;;  %3025 = vlog2.f32 %v1946_v26  ;;  %v3935_v21 = vpop.f32.mrf.mxu0 }
 0x18e   : > { %v3012_v54 = vpop.eup %3011  ;;  %2295 = vst [vmem:[#allocation2 + $0x80] sm:$0xff] %v2263_v22  ;;  %v2050_v30 = vmul.f32 0.6931472, %v3010_v48  ;;  %v2360_v31 = vsub.f32 %v1524_v19, %v1748_v53  ;;  %vm1751_vm10 = vcmp.eq.f32.partialorder %v3863_v51, inf  ;;  %vm1753_vm11 = vcmp.eq.f32.partialorder %v3863_v51, 0.0  ;;  %v2169_v53 = vld [vmem:[#allocation2 + $0xe8] sm:$0xff] }
 0x18f   : > { %v1526_v35 = vmul.f32 %v3012_v54, %v3853_v38  ;;  %3027 = vrsqrt.f32 %v3896_v25  ;;  %v1754_v39 = vand.u32 2147483648, %v3863_v51  ;;  %v3903_v40 = vadd.f32 %v1371_v28, %v1307_v43 }
 0x190   : > { %v2136_v6 = vmul.f32 0.4342945, %v2050_v30  ;;  %v2392_v37 = vand.u32 2147483647, %v2360_v31  ;;  %v3014_v27 = vpop.eup %3013  ;;  %vm1534_vm12 = vcmp.eq.f32.partialorder %v3869_v13, inf  ;;  %v1340_v15 = vmul.f32 %v1010_v29, %v1010_v29 }
 0x191   : > { %v1528_v41 = vsel %vm1527_vm8, %v3853_v38, %v1526_v35  ;;  %v1915_v44 = vmax.f32 %v3896_v25, 1e-10  ;;  %v3016_v45 = vpop.eup %3015  ;;  %v1988_v63 = vmul.f32 0.6931472, %v3014_v27  ;;  %vm1536_vm13 = vcmp.eq.f32.partialorder %v3869_v13, 0.0  ;;  %v2330_v35 = vld [vmem:[#allocation3 + $0x40] sm:$0xff] }
 0x192   : > { %v2200_v46 = vsub.f32 %v2104_v33, %v2136_v6  ;;  %v2424_v47 = vadd.f32 %v2392_v37, %v2328_v32  ;;  %v1750_v60 = vmul.f32 %v3016_v45, %v3863_v51  ;;  %v1537_v52 = vand.u32 2147483648, %v3869_v13  ;;  %v1176_v32 = vpop.f32.mrf.mxu1 }
 0x193   : > { %3029 = vlog2.f32 %v1915_v44  ;;  %v1276_v55 = vmul.f32 %v1008_v12, %v1008_v12  ;;  %v1531_v42 = vsel %vm1529_vm9, %v1530_v24, %v1528_v41  ;;  %vm1758_vm14 = vcmp.eq.f32.partialorder %v3874_v5, inf  ;;  %v2329_v12 = vld [vmem:[#allocation3 + $0x38] sm:$0xff] }
 0x194   : > { %v2232_v56 = vand.u32 2147483647, %v2200_v46  ;;  %2456 = vst [vmem:[#allocation3 + $0xb0] sm:$0xff] %v2424_v47  ;;  %3031 = vrsqrt.f32 %v3903_v40  ;;  %v3018_v58 = vpop.eup %3017  ;;  %v1752_v57 = vsel %vm1751_vm10, %v3863_v51, %v1750_v60  ;;  %vm1760_vm15 = vcmp.eq.f32.partialorder %v3874_v5, 0.0 }
 0x195   : > { %v1947_v61 = vmax.f32 %v3903_v40, 1e-10  ;;  %v3924_v50 = vadd.f32 %v1340_v15, %v1276_v55  ;;  %v3020_v1 = vpop.eup %3019  ;;  %v2105_v2 = vmul.f32 0.4342945, %v1988_v63  ;;  %v1755_v4 = vsel %vm1753_vm11, %v1754_v39, %v1752_v57 }
 0x196   : > { %v2264_v38 = vadd.f32 %v2232_v56, %v2168_v16  ;;  %v2052_v0 = vmul.f32 0.6931472, %v3018_v58  ;;  %v3022_v7 = vpop.eup %3021  ;;  %v2361_v59 = vsub.f32 %v1531_v42, %v1755_v4  ;;  %v1533_v8 = vmul.f32 %v3020_v1, %v3869_v13  ;;  %v2170_v56 = vld [vmem:[#allocation2 + $0xb8] sm:$0xff] }
 0x197   : > { %3033 = vlog2.f32 %v1947_v61  ;;  %v1372_v10 = vmul.f32 %v1170_v49, %v1170_v49  ;;  %v3024_v11 = vpop.eup %3023  ;;  %v1757_v14 = vmul.f32 %v3022_v7, %v3874_v5  ;;  %v1761_v17 = vand.u32 2147483648, %v3874_v5 }
 0x198   : > { %2296 = vst [vmem:[#allocation2 + $0x88] sm:$0xff] %v2264_v38  ;;  %v2137_v36 = vmul.f32 0.4342945, %v2052_v0  ;;  %3035 = vrsqrt.f32 %v3924_v50  ;;  %v2393_v51 = vand.u32 2147483647, %v2361_v59  ;;  %v1535_v9 = vsel %vm1534_vm12, %v3869_v13, %v1533_v8 }
 0x199   : > { %v1990_v19 = vmul.f32 0.6931472, %v3024_v11  ;;  %v1308_v20 = vmul.f32 %v1168_v34, %v1168_v34  ;;  %v1538_v23 = vsel %vm1536_vm13, %v1537_v52, %v1535_v9  ;;  %v1759_v24 = vsel %vm1758_vm14, %v3874_v5, %v1757_v14  ;;  %v1020_v5 = vpop.f32.mrf.mxu0  ;;  %v1178_v52 = vpop.f32.mrf.mxu1 }
 0x19a   : > { %v2201_v22 = vsub.f32 %v2105_v2, %v2137_v36  ;;  %v1916_v26 = vmax.f32 %v3924_v50, 1e-10  ;;  %v3026_v48 = vpop.eup %3025  ;;  %v2425_v43 = vadd.f32 %v2393_v51, %v2329_v12  ;;  %v1762_v29 = vsel %vm1760_vm15, %v1761_v17, %v1759_v24  ;;  %v2331_v17 = vld [vmem:[#allocation3 + $0xe0] sm:$0xff] }
 0x19b   : > { %v2106_v28 = vmul.f32 0.4342945, %v1990_v19  ;;  %v3945_v54 = vadd.f32 %v1372_v10, %v1308_v20  ;;  %v2054_v31 = vmul.f32 0.6931472, %v3026_v48  ;;  %v2362_v13 = vsub.f32 %v1538_v23, %v1762_v29  ;;  %v3959_v58 = vpop.f32.mrf.mxu0  ;;  %v1180_v7 = vpop.f32.mrf.mxu1  ;;  %v2171_v29 = vld [vmem:[#allocation2 + $0x60] sm:$0xff] }
 0x19c   : > { %v3028_v33 = vpop.eup %3027  ;;  %v2233_v30 = vand.u32 2147483647, %v2201_v22  ;;  %3037 = vlog2.f32 %v1916_v26  ;;  %2457 = vst [vmem:[#allocation3 + $0x38] sm:$0xff] %v2425_v43  ;;  %vm1541_vm0 = vcmp.eq.f32.partialorder %v3896_v25, inf  ;;  %vm1543_vm1 = vcmp.eq.f32.partialorder %v3896_v25, 0.0 }
 0x19d   : > { %v1540_v6 = vmul.f32 %v3028_v33, %v3896_v25  ;;  %3039 = vrsqrt.f32 %v3945_v54  ;;  %v2138_v39 = vmul.f32 0.4342945, %v2054_v31  ;;  %v2394_v34 = vand.u32 2147483647, %v2362_v13  ;;  %v1026_v11 = vpop.f32.mrf.mxu0  ;;  %v1184_v23 = vpop.f32.mrf.mxu1 }
 0x19e   : > { %v2265_v37 = vadd.f32 %v2233_v30, %v2169_v53  ;;  %v1544_v27 = vand.u32 2147483648, %v3896_v25  ;;  %v1948_v44 = vmax.f32 %v3945_v54, 1e-10  ;;  %v1277_v15 = vmul.f32 %v3910_v3, %v3910_v3 }
 0x19f   : > { %v1542_v41 = vsel %vm1541_vm0, %v3896_v25, %v1540_v6  ;;  %v1341_v45 = vmul.f32 %v1016_v62, %v1016_v62  ;;  %v2202_v47 = vsub.f32 %v2106_v28, %v2138_v39  ;;  %v2426_v63 = vadd.f32 %v2394_v34, %v2330_v35  ;;  %v1028_v43 = vpop.f32.mrf.mxu0 }
 0x1a0   : > { %v3030_v46 = vpop.eup %3029  ;;  %2297 = vst [vmem:[#allocation2 + $0xe8] sm:$0xff] %v2265_v37  ;;  %v1309_v16 = vmul.f32 %v1174_v18, %v1174_v18  ;;  %v1373_v60 = vmul.f32 %v1176_v32, %v1176_v32  ;;  %vm1765_vm2 = vcmp.eq.f32.partialorder %v3903_v40, inf  ;;  %3041 = vlog2.f32 %v1948_v44 }
 0x1a1   : > { %v3032_v55 = vpop.eup %3031  ;;  %v1992_v42 = vmul.f32 0.6931472, %v3030_v46  ;;  %v3957_v49 = vadd.f32 %v1341_v45, %v1277_v15  ;;  %v2234_v57 = vand.u32 2147483647, %v2202_v47  ;;  %2458 = vst [vmem:[#allocation3 + $0x40] sm:$0xff] %v2426_v63  ;;  %vm1767_vm3 = vcmp.eq.f32.partialorder %v3903_v40, 0.0 }
 0x1a2   : > { %v1764_v3 = vmul.f32 %v3032_v55, %v3903_v40  ;;  %v3963_v61 = vadd.f32 %v1373_v60, %v1309_v16  ;;  %v1545_v62 = vsel %vm1543_vm1, %v1544_v27, %v1542_v41  ;;  %v1768_v1 = vand.u32 2147483648, %v3903_v40  ;;  %v1030_v27 = vpop.f32.mrf.mxu0  ;;  %v2332_v16 = vld [vmem:[#allocation3 + $0x60] sm:$0xff] }
 0x1a3   : > { %vm1548_vm4 = vcmp.eq.f32.partialorder %v3924_v50, inf  ;;  %3043 = vrsqrt.f32 %v3957_v49  ;;  %v2266_v2 = vadd.f32 %v2234_v57, %v2170_v56  ;;  %vm1550_vm5 = vcmp.eq.f32.partialorder %v3924_v50, 0.0 }
 0x1a4   : > { %v3034_v38 = vpop.eup %3033  ;;  %v1766_v4 = vsel %vm1765_vm2, %v3903_v40, %v1764_v3  ;;  %v1917_v0 = vmax.f32 %v3957_v49, 1e-10  ;;  %v2107_v8 = vmul.f32 0.4342945, %v1992_v42  ;;  %3045 = vrsqrt.f32 %v3963_v61 }
 0x1a5   : > { %v3036_v59 = vpop.eup %3035  ;;  %v1769_v10 = vsel %vm1767_vm3, %v1768_v1, %v1766_v4  ;;  %v2056_v25 = vmul.f32 0.6931472, %v3034_v38  ;;  %2298 = vst [vmem:[#allocation2 + $0xb8] sm:$0xff] %v2266_v2  ;;  %v1551_v14 = vand.u32 2147483648, %v3924_v50  ;;  %v1949_v18 = vmax.f32 %v3963_v61, 1e-10 }
 0x1a6   : > { %v2363_v36 = vsub.f32 %v1545_v62, %v1769_v10  ;;  %v1547_v12 = vmul.f32 %v3036_v59, %v3924_v50  ;;  %3047 = vlog2.f32 %v1917_v0  ;;  %v1278_v51 = vmul.f32 %v3935_v21, %v3935_v21 }
 0x1a7   : > { %v2139_v40 = vmul.f32 0.4342945, %v2056_v25  ;;  %v1342_v9 = vmul.f32 %v1020_v5, %v1020_v5  ;;  %vm1772_vm6 = vcmp.eq.f32.partialorder %v3945_v54, inf  ;;  %v1310_v20 = vmul.f32 %v1178_v52, %v1178_v52  ;;  %v1186_v5 = vpop.f32.mrf.mxu1 }
 0x1a8   : > { %v2395_v19 = vand.u32 2147483647, %v2363_v36  ;;  %v1374_v22 = vmul.f32 %v1180_v7, %v1180_v7  ;;  %v1549_v48 = vsel %vm1548_vm4, %v3924_v50, %v1547_v12  ;;  %3049 = vlog2.f32 %v1949_v18 }
 0x1a9   : > { %v3038_v24 = vpop.eup %3037  ;;  %v2203_v26 = vsub.f32 %v2107_v8, %v2139_v40  ;;  %v3983_v53 = vadd.f32 %v1342_v9, %v1278_v51  ;;  %vm1774_vm7 = vcmp.eq.f32.partialorder %v3945_v54, 0.0  ;;  %v1775_v32 = vand.u32 2147483648, %v3945_v54  ;;  %v1188_v56 = vpop.f32.mrf.mxu1  ;;  %v2172_v8 = vld [vmem:[#allocation2 + $0xf0] sm:$0xff] }
 0x1aa   : > { %v3040_v28 = vpop.eup %3039  ;;  %v2427_v21 = vadd.f32 %v2395_v19, %v2331_v17  ;;  %v1994_v33 = vmul.f32 0.6931472, %v3038_v24  ;;  %v3986_v30 = vadd.f32 %v1374_v22, %v1310_v20  ;;  %v1552_v35 = vsel %vm1550_vm5, %v1551_v14, %v1549_v48  ;;  %v1034_v51 = vpop.f32.mrf.mxu0  ;;  %v2333_v24 = vld [vmem:[#allocation3 + $0x18] sm:$0xff] }
 0x1ab   : > { %v2235_v31 = vand.u32 2147483647, %v2203_v26  ;;  %v1771_v13 = vmul.f32 %v3040_v28, %v3945_v54  ;;  %3051 = vrsqrt.f32 %v3983_v53  ;;  %vm1555_vm8 = vcmp.eq.f32.partialorder %v3957_v49, inf  ;;  %v1190_v36 = vpop.f32.mrf.mxu1 }
 0x1ac   : > { %2459 = vst [vmem:[#allocation3 + $0xe0] sm:$0xff] %v2427_v21  ;;  %vm1557_vm9 = vcmp.eq.f32.partialorder %v3957_v49, 0.0  ;;  %v1918_v6 = vmax.f32 %v3983_v53, 1e-10  ;;  %v1558_v34 = vand.u32 2147483648, %v3957_v49  ;;  %3053 = vrsqrt.f32 %v3986_v30 }
 0x1ad   : > { %v2267_v37 = vadd.f32 %v2235_v31, %v2171_v29  ;;  %v1773_v39 = vsel %vm1772_vm6, %v3945_v54, %v1771_v13  ;;  %v3042_v41 = vpop.eup %3041  ;;  %v2108_v50 = vmul.f32 0.4342945, %v1994_v33  ;;  %vm1779_vm10 = vcmp.eq.f32.partialorder %v3963_v61, inf }
 0x1ae   : > { %v1776_v44 = vsel %vm1774_vm7, %v1775_v32, %v1773_v39  ;;  %3055 = vlog2.f32 %v1918_v6  ;;  %v2058_v15 = vmul.f32 0.6931472, %v3042_v41  ;;  %v1950_v46 = vmax.f32 %v3986_v30, 1e-10  ;;  %v1036_v32 = vpop.f32.mrf.mxu0 }
 0x1af   : > { %2299 = vst [vmem:[#allocation2 + $0x60] sm:$0xff] %v2267_v37  ;;  %v2364_v45 = vsub.f32 %v1552_v35, %v1776_v44  ;;  %v1343_v47 = vmul.f32 %v1026_v11, %v1026_v11  ;;  %v1279_v60 = vmul.f32 %v3959_v58, %v3959_v58  ;;  %v1311_v52 = vmul.f32 %v1184_v23, %v1184_v23 }
 0x1b0   : > { %v3044_v63 = vpop.eup %3043  ;;  %v1375_v55 = vmul.f32 %v1186_v5, %v1186_v5  ;;  %v1344_v42 = vmul.f32 %v1030_v27, %v1030_v27  ;;  %v2140_v54 = vmul.f32 0.4342945, %v2058_v15  ;;  %3057 = vlog2.f32 %v1950_v46 }
 0x1b1   : > { %v2396_v57 = vand.u32 2147483647, %v2364_v45  ;;  %v1554_v3 = vmul.f32 %v3044_v63, %v3957_v49  ;;  %v3046_v62 = vpop.eup %3045  ;;  %vm1781_vm11 = vcmp.eq.f32.partialorder %v3963_v61, 0.0  ;;  %v4009_v1 = vadd.f32 %v1343_v47, %v1279_v60 }
 0x1b2   : > { %v4011_v38 = vadd.f32 %v1375_v55, %v1311_v52  ;;  %v1280_v2 = vmul.f32 %v1028_v43, %v1028_v43  ;;  %v2204_v0 = vsub.f32 %v2108_v50, %v2140_v54  ;;  %v1778_v59 = vmul.f32 %v3046_v62, %v3963_v61  ;;  %v1194_v43 = vpop.f32.mrf.mxu1 }
 0x1b3   : > { %v3048_v4 = vpop.eup %3047  ;;  %v2428_v58 = vadd.f32 %v2396_v57, %v2332_v16  ;;  %v1556_v7 = vsel %vm1555_vm8, %v3957_v49, %v1554_v3  ;;  %v1782_v11 = vand.u32 2147483648, %v3963_v61  ;;  %3059 = vrsqrt.f32 %v4009_v1  ;;  %v1038_v16 = vpop.f32.mrf.mxu0 }
 0x1b4   : > { %v1559_v10 = vsel %vm1557_vm9, %v1558_v34, %v1556_v7  ;;  %v1996_v25 = vmul.f32 0.6931472, %v3048_v4  ;;  %v2236_v12 = vand.u32 2147483647, %v2204_v0  ;;  %v1780_v14 = vsel %vm1779_vm10, %v3963_v61, %v1778_v59  ;;  %v2173_v34 = vld [vmem:[#allocation2 + $0x8] sm:$0xff]  ;;  %v1196_v15 = vpop.f32.mrf.mxu1 }
 0x1b5   : > { %2460 = vst [vmem:[#allocation3 + $0x60] sm:$0xff] %v2428_v58  ;;  %vm1562_vm12 = vcmp.eq.f32.partialorder %v3983_v53, inf  ;;  %v4025_v40 = vadd.f32 %v1344_v42, %v1280_v2  ;;  %v3050_v17 = vpop.eup %3049  ;;  %v1783_v49 = vsel %vm1781_vm11, %v1782_v11, %v1780_v14  ;;  %vm1564_vm13 = vcmp.eq.f32.partialorder %v3983_v53, 0.0 }
 0x1b6   : > { %v1919_v18 = vmax.f32 %v4009_v1, 1e-10  ;;  %3061 = vrsqrt.f32 %v4011_v38  ;;  %v2268_v9 = vadd.f32 %v2236_v12, %v2172_v8  ;;  %v2109_v19 = vmul.f32 0.4342945, %v1996_v25  ;;  %v1198_v3 = vpop.f32.mrf.mxu1  ;;  %v1040_v8 = vpop.f32.mrf.mxu0  ;;  %v2174_v12 = vld [vmem:[#allocation2 + $0x78] sm:$0xff] }
 0x1b7   : > { %v2060_v20 = vmul.f32 0.6931472, %v3050_v17  ;;  %v2365_v22 = vsub.f32 %v1559_v10, %v1783_v49  ;;  %v1565_v26 = vand.u32 2147483648, %v3983_v53  ;;  %v1951_v48 = vmax.f32 %v4011_v38, 1e-10 }
 0x1b8   : > { %v3052_v23 = vpop.eup %3051  ;;  %3063 = vlog2.f32 %v1919_v18  ;;  %v1376_v61 = vmul.f32 %v1190_v36, %v1190_v36  ;;  %2300 = vst [vmem:[#allocation2 + $0xf0] sm:$0xff] %v2268_v9  ;;  %vm1786_vm14 = vcmp.eq.f32.partialorder %v3986_v30, inf  ;;  %v1789_v31 = vand.u32 2147483648, %v3986_v30  ;;  %v1200_v18 = vpop.f32.mrf.mxu1 }
 0x1b9   : > { %v2141_v28 = vmul.f32 0.4342945, %v2060_v20  ;;  %v2397_v29 = vand.u32 2147483647, %v2365_v22  ;;  %v1561_v21 = vmul.f32 %v3052_v23, %v3983_v53  ;;  %3065 = vrsqrt.f32 %v4025_v40  ;;  %v3054_v33 = vpop.eup %3053 }
 0x1ba   : > { %3067 = vlog2.f32 %v1951_v48  ;;  %v1312_v13 = vmul.f32 %v1188_v56, %v1188_v56  ;;  %v1785_v39 = vmul.f32 %v3054_v33, %v3986_v30  ;;  %v1920_v50 = vmax.f32 %v4025_v40, 1e-10  ;;  %v2334_v56 = vld [vmem:[#allocation3 + $0x68] sm:$0xff] }
 0x1bb   : > { %v3056_v35 = vpop.eup %3055  ;;  %v2205_v6 = vsub.f32 %v2109_v19, %v2141_v28  ;;  %v2429_v5 = vadd.f32 %v2397_v29, %v2333_v24  ;;  %v1563_v37 = vsel %vm1562_vm12, %v3983_v53, %v1561_v21  ;;  %vm1788_vm15 = vcmp.eq.f32.partialorder %v3986_v30, 0.0  ;;  %v1044_v29 = vpop.f32.mrf.mxu0 }
 0x1bc   : > { %v1566_v27 = vsel %vm1564_vm13, %v1565_v26, %v1563_v37  ;;  %v1998_v41 = vmul.f32 0.6931472, %v3056_v35  ;;  %v4045_v44 = vadd.f32 %v1376_v61, %v1312_v13  ;;  %v1787_v46 = vsel %vm1786_vm14, %v3986_v30, %v1785_v39  ;;  %v1204_v13 = vpop.f32.mrf.mxu1 }
 0x1bd   : > { %v2237_v45 = vand.u32 2147483647, %v2205_v6  ;;  %2461 = vst [vmem:[#allocation3 + $0x18] sm:$0xff] %v2429_v5  ;;  %vm1569_vm0 = vcmp.eq.f32.partialorder %v4009_v1, inf  ;;  %v3058_v47 = vpop.eup %3057  ;;  %v1790_v53 = vsel %vm1788_vm15, %v1789_v31, %v1787_v46  ;;  %vm1571_vm1 = vcmp.eq.f32.partialorder %v4009_v1, 0.0 }
 0x1be   : > { %v2110_v63 = vmul.f32 0.4342945, %v1998_v41  ;;  %3069 = vlog2.f32 %v1920_v50  ;;  %v2062_v52 = vmul.f32 0.6931472, %v3058_v47  ;;  %v2366_v55 = vsub.f32 %v1566_v27, %v1790_v53  ;;  %v1046_v50 = vpop.f32.mrf.mxu0  ;;  %v2175_v53 = vld [vmem:[#allocation2 + $0x38] sm:$0xff] }
 0x1bf   : > { %v2269_v60 = vadd.f32 %v2237_v45, %v2173_v34  ;;  %3071 = vrsqrt.f32 %v4045_v44  ;;  %v1572_v42 = vand.u32 2147483648, %v4009_v1  ;;  %v1952_v54 = vmax.f32 %v4045_v44, 1e-10 }
 0x1c0   : > { %v1281_v30 = vmul.f32 %v1034_v51, %v1034_v51  ;;  %v1345_v57 = vmul.f32 %v1036_v32, %v1036_v32  ;;  %v3060_v62 = vpop.eup %3059  ;;  %v2142_v2 = vmul.f32 0.4342945, %v2062_v52  ;;  %v2398_v4 = vand.u32 2147483647, %v2366_v55  ;;  %v2335_v32 = vld [vmem:[#allocation3 + $0x10] sm:$0xff] }
 0x1c1   : > { %2301 = vst [vmem:[#allocation2 + $0x8] sm:$0xff] %v2269_v60  ;;  %v1313_v0 = vmul.f32 %v1194_v43, %v1194_v43  ;;  %v1377_v58 = vmul.f32 %v1196_v15, %v1196_v15  ;;  %v1568_v7 = vmul.f32 %v3060_v62, %v4009_v1  ;;  %vm1793_vm2 = vcmp.eq.f32.partialorder %v4011_v38, inf }
 0x1c2   : > { %3073 = vlog2.f32 %v1952_v54  ;;  %v4058_v59 = vadd.f32 %v1345_v57, %v1281_v30  ;;  %v2206_v25 = vsub.f32 %v2110_v63, %v2142_v2  ;;  %v2430_v11 = vadd.f32 %v2398_v4, %v2334_v56  ;;  %v1206_v63 = vpop.f32.mrf.mxu1  ;;  %v1048_v2 = vpop.f32.mrf.mxu0 }
 0x1c3   : > { %v3062_v10 = vpop.eup %3061  ;;  %vm1795_vm3 = vcmp.eq.f32.partialorder %v4011_v38, 0.0  ;;  %v4061_v36 = vadd.f32 %v1377_v58, %v1313_v0  ;;  %v1570_v14 = vsel %vm1569_vm0, %v4009_v1, %v1568_v7  ;;  %v1796_v49 = vand.u32 2147483648, %v4011_v38 }
 0x1c4   : > { %v1792_v17 = vmul.f32 %v3062_v10, %v4011_v38  ;;  %3075 = vrsqrt.f32 %v4058_v59  ;;  %v2238_v9 = vand.u32 2147483647, %v2206_v25  ;;  %2462 = vst [vmem:[#allocation3 + $0x68] sm:$0xff] %v2430_v11  ;;  %v1573_v19 = vsel %vm1571_vm1, %v1572_v42, %v1570_v14  ;;  %v2336_v11 = vld [vmem:[#allocation3 + $0x70] sm:$0xff] }
 0x1c5   : > { %v3064_v51 = vpop.eup %3063  ;;  %vm1576_vm4 = vcmp.eq.f32.partialorder %v4025_v40, inf  ;;  %v1346_v20 = vmul.f32 %v1040_v8, %v1040_v8  ;;  %v1921_v26 = vmax.f32 %v4058_v59, 1e-10  ;;  %3077 = vrsqrt.f32 %v4061_v36 }
 0x1c6   : > { %v3066_v22 = vpop.eup %3065  ;;  %v2000_v23 = vmul.f32 0.6931472, %v3064_v51  ;;  %v1794_v24 = vsel %vm1793_vm2, %v4011_v38, %v1792_v17  ;;  %v2270_v61 = vadd.f32 %v2238_v9, %v2174_v12  ;;  %v1282_v28 = vmul.f32 %v1038_v16, %v1038_v16  ;;  %v1208_v9 = vpop.f32.mrf.mxu1 }
 0x1c7   : > { %v3068_v48 = vpop.eup %3067  ;;  %v1797_v43 = vsel %vm1795_vm3, %v1796_v49, %v1794_v24  ;;  %v1575_v1 = vmul.f32 %v3066_v22, %v4025_v40  ;;  %3079 = vlog2.f32 %v1921_v26  ;;  %vm1578_vm5 = vcmp.eq.f32.partialorder %v4025_v40, 0.0  ;;  %v2176_v26 = vld [vmem:[#allocation2 + $0x58] sm:$0xff] }
 0x1c8   : > { %v2111_v21 = vmul.f32 0.4342945, %v2000_v23  ;;  %v2064_v33 = vmul.f32 0.6931472, %v3068_v48  ;;  %v2367_v31 = vsub.f32 %v1573_v19, %v1797_v43  ;;  %2302 = vst [vmem:[#allocation2 + $0x78] sm:$0xff] %v2270_v61  ;;  %v1579_v35 = vand.u32 2147483648, %v4025_v40  ;;  %v1050_v19 = vpop.f32.mrf.mxu0 }
 0x1c9   : > { %vm1800_vm6 = vcmp.eq.f32.partialorder %v4045_v44, inf  ;;  %v1953_v38 = vmax.f32 %v4061_v36, 1e-10  ;;  %vm1802_vm7 = vcmp.eq.f32.partialorder %v4045_v44, 0.0  ;;  %v4085_v37 = vadd.f32 %v1346_v20, %v1282_v28 }
 0x1ca   : > { %v2143_v6 = vmul.f32 0.4342945, %v2064_v33  ;;  %v2399_v5 = vand.u32 2147483647, %v2367_v31  ;;  %v1577_v34 = vsel %vm1576_vm4, %v4025_v40, %v1575_v1  ;;  %v1314_v27 = vmul.f32 %v1198_v3, %v1198_v3  ;;  %v1054_v31 = vpop.f32.mrf.mxu0 }
 0x1cb   : > { %v3070_v39 = vpop.eup %3069  ;;  %3081 = vlog2.f32 %v1953_v38  ;;  %v1378_v41 = vmul.f32 %v1200_v18, %v1200_v18  ;;  %v1803_v60 = vand.u32 2147483648, %v4045_v44  ;;  %vm1583_vm8 = vcmp.eq.f32.partialorder %v4058_v59, inf }
 0x1cc   : > { %v3072_v15 = vpop.eup %3071  ;;  %v2207_v45 = vsub.f32 %v2111_v21, %v2143_v6  ;;  %v2431_v46 = vadd.f32 %v2399_v5, %v2335_v32  ;;  %v2002_v47 = vmul.f32 0.6931472, %v3070_v39  ;;  %3083 = vrsqrt.f32 %v4085_v37  ;;  %v2337_v39 = vld [vmem:[#allocation3 + $0x50] sm:$0xff] }
 0x1cd   : > { %v1799_v16 = vmul.f32 %v3072_v15, %v4045_v44  ;;  %vm1585_vm9 = vcmp.eq.f32.partialorder %v4058_v59, 0.0  ;;  %v1580_v55 = vsel %vm1578_vm5, %v1579_v35, %v1577_v34  ;;  %v1922_v56 = vmax.f32 %v4085_v37, 1e-10 }
 0x1ce   : > { %v2239_v52 = vand.u32 2147483647, %v2207_v45  ;;  %2463 = vst [vmem:[#allocation3 + $0x10] sm:$0xff] %v2431_v46  ;;  %v4098_v42 = vadd.f32 %v1378_v41, %v1314_v27  ;;  %v2112_v30 = vmul.f32 0.4342945, %v2002_v47  ;;  %v1347_v3 = vmul.f32 %v1046_v50, %v1046_v50 }
 0x1cf   : > { %v3074_v54 = vpop.eup %3073  ;;  %v1801_v57 = vsel %vm1800_vm6, %v4045_v44, %v1799_v16  ;;  %v1379_v62 = vmul.f32 %v1206_v63, %v1206_v63  ;;  %3085 = vlog2.f32 %v1922_v56  ;;  %v1283_v8 = vmul.f32 %v1044_v29, %v1044_v29 }
 0x1d0   : > { %v2271_v4 = vadd.f32 %v2239_v52, %v2175_v53  ;;  %v1804_v0 = vsel %vm1802_vm7, %v1803_v60, %v1801_v57  ;;  %v2066_v40 = vmul.f32 0.6931472, %v3074_v54  ;;  %3087 = vrsqrt.f32 %v4098_v42  ;;  %v1056_v53 = vpop.f32.mrf.mxu0 }
 0x1d1   : > { %v3076_v58 = vpop.eup %3075  ;;  %v2368_v7 = vsub.f32 %v1580_v55, %v1804_v0  ;;  %v1315_v10 = vmul.f32 %v1204_v13, %v1204_v13  ;;  %v1586_v14 = vand.u32 2147483648, %v4058_v59  ;;  %v1954_v17 = vmax.f32 %v4098_v42, 1e-10 }
 0x1d2   : > { %2303 = vst [vmem:[#allocation2 + $0x38] sm:$0xff] %v2271_v4  ;;  %v2144_v25 = vmul.f32 0.4342945, %v2066_v40  ;;  %v1582_v12 = vmul.f32 %v3076_v58, %v4058_v59  ;;  %v3078_v44 = vpop.eup %3077  ;;  %vm1807_vm10 = vcmp.eq.f32.partialorder %v4061_v36, inf  ;;  %v4111_v18 = vadd.f32 %v1347_v3, %v1283_v8  ;;  %v2177_v3 = vld [vmem:[#allocation2 + $0x40] sm:$0xff] }
 0x1d3   : > { %v2400_v49 = vand.u32 2147483647, %v2368_v7  ;;  %v4113_v51 = vadd.f32 %v1379_v62, %v1315_v10  ;;  %v1806_v23 = vmul.f32 %v3078_v44, %v4061_v36  ;;  %3089 = vlog2.f32 %v1954_v17  ;;  %v1058_v17 = vpop.f32.mrf.mxu0 }
 0x1d4   : > { %v2208_v20 = vsub.f32 %v2112_v30, %v2144_v25  ;;  %v1584_v22 = vsel %vm1583_vm8, %v4058_v59, %v1582_v12  ;;  %v3080_v24 = vpop.eup %3079  ;;  %v1810_v43 = vand.u32 2147483648, %v4061_v36  ;;  %3091 = vrsqrt.f32 %v4111_v18  ;;  %v1210_v59 = vpop.f32.mrf.mxu1 }
 0x1d5   : > { %v2432_v48 = vadd.f32 %v2400_v49, %v2336_v11  ;;  %v1587_v61 = vsel %vm1585_vm9, %v1586_v14, %v1584_v22  ;;  %v2004_v28 = vmul.f32 0.6931472, %v3080_v24  ;;  %v1808_v29 = vsel %vm1807_vm10, %v4061_v36, %v1806_v23 }
 0x1d6   : > { %v2240_v1 = vand.u32 2147483647, %v2208_v20  ;;  %vm1809_vm11 = vcmp.eq.f32.partialorder %v4061_v36, 0.0  ;;  %vm1590_vm12 = vcmp.eq.f32.partialorder %v4085_v37, inf  ;;  %v1923_v33 = vmax.f32 %v4111_v18, 1e-10  ;;  %v1214_v63 = vpop.f32.mrf.mxu1 }
 0x1d7   : > { %2464 = vst [vmem:[#allocation3 + $0x70] sm:$0xff] %v2432_v48  ;;  %v1811_v21 = vsel %vm1809_vm11, %v1810_v43, %v1808_v29  ;;  %3093 = vrsqrt.f32 %v4113_v51  ;;  %vm1592_vm13 = vcmp.eq.f32.partialorder %v4085_v37, 0.0  ;;  %v1593_v38 = vand.u32 2147483648, %v4085_v37  ;;  %v1060_v29 = vpop.f32.mrf.mxu0 }
 0x1d8   : > { %v3082_v13 = vpop.eup %3081  ;;  %v2272_v32 = vadd.f32 %v2240_v1, %v2176_v26  ;;  %v2369_v35 = vsub.f32 %v1587_v61, %v1811_v21  ;;  %v2113_v5 = vmul.f32 0.4342945, %v2004_v28  ;;  %3095 = vlog2.f32 %v1923_v33  ;;  %v1216_v58 = vpop.f32.mrf.mxu1  ;;  %v2338_v61 = vld [vmem:[#allocation3 + $0xa0] sm:$0xff] }
 0x1d9   : > { %v3084_v6 = vpop.eup %3083  ;;  %v2068_v36 = vmul.f32 0.6931472, %v3082_v13  ;;  %v1284_v34 = vmul.f32 %v1048_v2, %v1048_v2  ;;  %v1955_v50 = vmax.f32 %v4113_v51, 1e-10  ;;  %v1348_v15 = vmul.f32 %v1050_v19, %v1050_v19 }
 0x1da   : > { %2304 = vst [vmem:[#allocation2 + $0x58] sm:$0xff] %v2272_v32  ;;  %v2401_v27 = vand.u32 2147483647, %v2369_v35  ;;  %v1589_v41 = vmul.f32 %v3084_v6, %v4085_v37  ;;  %vm1814_vm14 = vcmp.eq.f32.partialorder %v4098_v42, inf  ;;  %v1316_v46 = vmul.f32 %v1208_v9, %v1208_v9  ;;  %v1218_v24 = vpop.f32.mrf.mxu1  ;;  %v2178_v32 = vld [vmem:[#allocation2 + $0xc8] sm:$0xff] }
 0x1db   : > { %v2145_v45 = vmul.f32 0.4342945, %v2068_v36  ;;  %v1380_v47 = vmul.f32 %v1210_v59, %v1210_v59  ;;  %vm1816_vm15 = vcmp.eq.f32.partialorder %v4098_v42, 0.0  ;;  %3097 = vlog2.f32 %v1955_v50  ;;  %v1064_v50 = vpop.f32.mrf.mxu0 }
 0x1dc   : > { %v2433_v16 = vadd.f32 %v2401_v27, %v2337_v39  ;;  %v4136_v60 = vadd.f32 %v1348_v15, %v1284_v34  ;;  %v3086_v52 = vpop.eup %3085  ;;  %v1591_v56 = vsel %vm1590_vm12, %v4085_v37, %v1589_v41  ;;  %v1817_v54 = vand.u32 2147483648, %v4098_v42  ;;  %v1220_v36 = vpop.f32.mrf.mxu1 }
 0x1dd   : > { %v2209_v55 = vsub.f32 %v2113_v5, %v2145_v45  ;;  %v4142_v30 = vadd.f32 %v1380_v47, %v1316_v46  ;;  %v3088_v57 = vpop.eup %3087  ;;  %v2006_v62 = vmul.f32 0.6931472, %v3086_v52  ;;  %vm1597_vm0 = vcmp.eq.f32.partialorder %v4111_v18, inf  ;;  %v2339_v47 = vld [vmem:[#allocation3 + $0xd8] sm:$0xff] }
 0x1de   : > { %2465 = vst [vmem:[#allocation3 + $0x50] sm:$0xff] %v2433_v16  ;;  %3099 = vrsqrt.f32 %v4136_v60  ;;  %v1349_v2 = vmul.f32 %v1056_v53, %v1056_v53  ;;  %v1813_v0 = vmul.f32 %v3088_v57, %v4098_v42  ;;  %vm1599_vm1 = vcmp.eq.f32.partialorder %v4111_v18, 0.0 }
 0x1df   : > { %v2241_v4 = vand.u32 2147483647, %v2209_v55  ;;  %v1924_v40 = vmax.f32 %v4136_v60, 1e-10  ;;  %v1594_v7 = vsel %vm1592_vm13, %v1593_v38, %v1591_v56  ;;  %v1600_v8 = vand.u32 2147483648, %v4111_v18  ;;  %v4183_v56 = vpop.f32.mrf.mxu1 }
 0x1e0   : > { %3101 = vrsqrt.f32 %v4142_v30  ;;  %v1285_v10 = vmul.f32 %v1054_v31, %v1054_v31  ;;  %v3090_v25 = vpop.eup %3089  ;;  %v2114_v12 = vmul.f32 0.4342945, %v2006_v62  ;;  %v1815_v14 = vsel %vm1814_vm14, %v4098_v42, %v1813_v0 }
 0x1e1   : > { %v2273_v11 = vadd.f32 %v2241_v4, %v2177_v3  ;;  %3103 = vlog2.f32 %v1924_v40  ;;  %v3092_v44 = vpop.eup %3091  ;;  %v1818_v49 = vsel %vm1816_vm15, %v1817_v54, %v1815_v14  ;;  %v2070_v37 = vmul.f32 0.6931472, %v3090_v25  ;;  %v1066_v40 = vpop.f32.mrf.mxu0  ;;  %v2179_v25 = vld [vmem:[#allocation2 + $0xe0] sm:$0xff] }
 0x1e2   : > { %v1956_v9 = vmax.f32 %v4142_v30, 1e-10  ;;  %v4159_v19 = vadd.f32 %v1349_v2, %v1285_v10  ;;  %v2370_v20 = vsub.f32 %v1594_v7, %v1818_v49  ;;  %v1596_v22 = vmul.f32 %v3092_v44, %v4111_v18 }
 0x1e3   : > { %2305 = vst [vmem:[#allocation2 + $0x40] sm:$0xff] %v2273_v11  ;;  %vm1821_vm2 = vcmp.eq.f32.partialorder %v4113_v51, inf  ;;  %v1381_v23 = vmul.f32 %v1216_v58, %v1216_v58  ;;  %v2146_v48 = vmul.f32 0.4342945, %v2070_v37  ;;  %vm1823_vm3 = vcmp.eq.f32.partialorder %v4113_v51, 0.0 }
 0x1e4   : > { %v3094_v26 = vpop.eup %3093  ;;  %3105 = vlog2.f32 %v1956_v9  ;;  %v1317_v42 = vmul.f32 %v1214_v63, %v1214_v63  ;;  %v2402_v43 = vand.u32 2147483647, %v2370_v20  ;;  %v1598_v1 = vsel %vm1597_vm0, %v4111_v18, %v1596_v22 }
 0x1e5   : > { %v1820_v28 = vmul.f32 %v3094_v26, %v4113_v51  ;;  %3107 = vrsqrt.f32 %v4159_v19  ;;  %v3096_v21 = vpop.eup %3095  ;;  %v2210_v33 = vsub.f32 %v2114_v12, %v2146_v48  ;;  %v1601_v59 = vsel %vm1599_vm1, %v1600_v8, %v1598_v1 }
 0x1e6   : > { %v1824_v31 = vand.u32 2147483648, %v4113_v51  ;;  %v1925_v13 = vmax.f32 %v4159_v19, 1e-10  ;;  %v2434_v35 = vadd.f32 %v2402_v43, %v2338_v61  ;;  %v2008_v38 = vmul.f32 0.6931472, %v3096_v21  ;;  %v2340_v43 = vld [vmem:[#allocation3 + $0x30] sm:$0xff] }
 0x1e7   : > { %v1822_v6 = vsel %vm1821_vm2, %v4113_v51, %v1820_v28  ;;  %v4176_v5 = vadd.f32 %v1381_v23, %v1317_v42  ;;  %v2242_v39 = vand.u32 2147483647, %v2210_v33  ;;  %vm1604_vm4 = vcmp.eq.f32.partialorder %v4136_v60, inf  ;;  %v1068_v23 = vpop.f32.mrf.mxu0 }
 0x1e8   : > { %v1825_v34 = vsel %vm1823_vm3, %v1824_v31, %v1822_v6  ;;  %3109 = vlog2.f32 %v1925_v13  ;;  %v3098_v18 = vpop.eup %3097  ;;  %2466 = vst [vmem:[#allocation3 + $0xa0] sm:$0xff] %v2434_v35  ;;  %v1286_v41 = vmul.f32 %v1058_v17, %v1058_v17  ;;  %v2115_v45 = vmul.f32 0.4342945, %v2008_v38  ;;  %v1226_v17 = vpop.f32.mrf.mxu1 }
 0x1e9   : > { %v2371_v27 = vsub.f32 %v1601_v59, %v1825_v34  ;;  %3111 = vrsqrt.f32 %v4176_v5  ;;  %v2274_v15 = vadd.f32 %v2242_v39, %v2178_v32  ;;  %v2072_v46 = vmul.f32 0.6931472, %v3098_v18  ;;  %v1070_v35 = vpop.f32.mrf.mxu0  ;;  %v2180_v34 = vld [vmem:[#allocation2 + $0x90] sm:$0xff] }
 0x1ea   : > { %v1318_v63 = vmul.f32 %v1218_v24, %v1218_v24  ;;  %v1957_v51 = vmax.f32 %v4176_v5, 1e-10  ;;  %v1350_v52 = vmul.f32 %v1060_v29, %v1060_v29  ;;  %v1382_v55 = vmul.f32 %v1220_v36, %v1220_v36 }
 0x1eb   : > { %v3100_v53 = vpop.eup %3099  ;;  %v2403_v16 = vand.u32 2147483647, %v2371_v27  ;;  %2306 = vst [vmem:[#allocation2 + $0xc8] sm:$0xff] %v2274_v15  ;;  %v2147_v54 = vmul.f32 0.4342945, %v2072_v46  ;;  %vm1606_vm5 = vcmp.eq.f32.partialorder %v4136_v60, 0.0  ;;  %v1351_v37 = vmul.f32 %v1066_v40, %v1066_v40 }
 0x1ec   : > { %v1603_v57 = vmul.f32 %v3100_v53, %v4136_v60  ;;  %v1607_v3 = vand.u32 2147483648, %v4136_v60  ;;  %3113 = vlog2.f32 %v1957_v51  ;;  %v4188_v4 = vadd.f32 %v1350_v52, %v1286_v41 }
 0x1ed   : > { %v3102_v62 = vpop.eup %3101  ;;  %v2435_v2 = vadd.f32 %v2403_v16, %v2339_v47  ;;  %v4190_v0 = vadd.f32 %v1382_v55, %v1318_v63  ;;  %v2211_v7 = vsub.f32 %v2115_v45, %v2147_v54  ;;  %vm1828_vm6 = vcmp.eq.f32.partialorder %v4142_v30, inf  ;;  %v1074_v16 = vpop.f32.mrf.mxu0 }
 0x1ee   : > { %v3104_v58 = vpop.eup %3103  ;;  %v1605_v8 = vsel %vm1604_vm4, %v4136_v60, %v1603_v57  ;;  %v1827_v10 = vmul.f32 %v3102_v62, %v4142_v30  ;;  %v1831_v14 = vand.u32 2147483648, %v4142_v30  ;;  %3115 = vrsqrt.f32 %v4188_v4 }
 0x1ef   : > { %2467 = vst [vmem:[#allocation3 + $0xd8] sm:$0xff] %v2435_v2  ;;  %v1608_v11 = vsel %vm1606_vm5, %v1607_v3, %v1605_v8  ;;  %v2010_v12 = vmul.f32 0.6931472, %v3104_v58  ;;  %v2243_v44 = vand.u32 2147483647, %v2211_v7  ;;  %vm1830_vm7 = vcmp.eq.f32.partialorder %v4142_v30, 0.0 }
 0x1f0   : > { %v1829_v49 = vsel %vm1828_vm6, %v4142_v30, %v1827_v10  ;;  %v1926_v20 = vmax.f32 %v4188_v4, 1e-10  ;;  %3117 = vrsqrt.f32 %v4190_v0  ;;  %v1287_v22 = vmul.f32 %v1064_v50, %v1064_v50  ;;  %v1228_v30 = vpop.f32.mrf.mxu1  ;;  %v2341_v2 = vld [vmem:[#allocation3 + $0x20] sm:$0xff] }
 0x1f1   : > { %v3106_v60 = vpop.eup %3105  ;;  %v1832_v9 = vsel %vm1830_vm7, %v1831_v14, %v1829_v49  ;;  %v2275_v26 = vadd.f32 %v2243_v44, %v2179_v25  ;;  %v2116_v48 = vmul.f32 0.4342945, %v2010_v12  ;;  %vm1611_vm8 = vcmp.eq.f32.partialorder %v4159_v19, inf }
 0x1f2   : > { %v3108_v24 = vpop.eup %3107  ;;  %v2074_v61 = vmul.f32 0.6931472, %v3106_v60  ;;  %v2372_v42 = vsub.f32 %v1608_v11, %v1832_v9  ;;  %vm1613_vm9 = vcmp.eq.f32.partialorder %v4159_v19, 0.0  ;;  %3119 = vlog2.f32 %v1926_v20  ;;  %v1230_v50 = vpop.f32.mrf.mxu1  ;;  %v2181_v20 = vld [vmem:[#allocation2 + $0x70] sm:$0xff] }
 0x1f3   : > { %v1610_v1 = vmul.f32 %v3108_v24, %v4159_v19  ;;  %2307 = vst [vmem:[#allocation2 + $0xe0] sm:$0xff] %v2275_v26  ;;  %v1958_v21 = vmax.f32 %v4190_v0, 1e-10  ;;  %v4207_v33 = vadd.f32 %v1351_v37, %v1287_v22  ;;  %v1614_v13 = vand.u32 2147483648, %v4159_v19  ;;  %v1076_v11 = vpop.f32.mrf.mxu0 }
 0x1f4   : > { %v2148_v28 = vmul.f32 0.4342945, %v2074_v61  ;;  %v2404_v29 = vand.u32 2147483647, %v2372_v42  ;;  %vm1835_vm10 = vcmp.eq.f32.partialorder %v4176_v5, inf  ;;  %v1383_v32 = vmul.f32 %v1226_v17, %v1226_v17  ;;  %v1234_v25 = vpop.f32.mrf.mxu1 }
 0x1f5   : > { %v3110_v59 = vpop.eup %3109  ;;  %v1612_v31 = vsel %vm1611_vm8, %v4159_v19, %v1610_v1  ;;  %vm1837_vm11 = vcmp.eq.f32.partialorder %v4176_v5, 0.0  ;;  %v1838_v39 = vand.u32 2147483648, %v4176_v5  ;;  %3121 = vlog2.f32 %v1958_v21 }
 0x1f6   : > { %v3112_v38 = vpop.eup %3111  ;;  %v2212_v6 = vsub.f32 %v2116_v48, %v2148_v28  ;;  %v2436_v36 = vadd.f32 %v2404_v29, %v2340_v43  ;;  %v2012_v18 = vmul.f32 0.6931472, %v3110_v59  ;;  %v1319_v41 = vmul.f32 %v4183_v56, %v4183_v56  ;;  %v1236_v42 = vpop.f32.mrf.mxu1  ;;  %v2342_v59 = vld [vmem:[#allocation3 + $0xf0] sm:$0xff] }
 0x1f7   : > { %v1834_v27 = vmul.f32 %v3112_v38, %v4176_v5  ;;  %v1615_v45 = vsel %vm1613_vm9, %v1614_v13, %v1612_v31  ;;  %vm1618_vm12 = vcmp.eq.f32.partialorder %v4188_v4, inf  ;;  %3123 = vrsqrt.f32 %v4207_v33 }
 0x1f8   : > { %v2244_v15 = vand.u32 2147483647, %v2212_v6  ;;  %2468 = vst [vmem:[#allocation3 + $0x30] sm:$0xff] %v2436_v36  ;;  %v1927_v47 = vmax.f32 %v4207_v33, 1e-10  ;;  %v4225_v63 = vadd.f32 %v1383_v32, %v1319_v41  ;;  %v1352_v53 = vmul.f32 %v1070_v35, %v1070_v35 }
 0x1f9   : > { %v1836_v46 = vsel %vm1835_vm10, %v4176_v5, %v1834_v27  ;;  %v3114_v51 = vpop.eup %3113  ;;  %v1288_v55 = vmul.f32 %v1068_v23, %v1068_v23  ;;  %v1384_v56 = vmul.f32 %v1230_v50, %v1230_v50  ;;  %v2117_v54 = vmul.f32 0.4342945, %v2012_v18 }
 0x1fa   : > { %v2276_v52 = vadd.f32 %v2244_v15, %v2180_v34  ;;  %v1839_v19 = vsel %vm1837_vm11, %v1838_v39, %v1836_v46  ;;  %v2076_v57 = vmul.f32 0.6931472, %v3114_v51  ;;  %3125 = vlog2.f32 %v1927_v47  ;;  %v1238_v39 = vpop.f32.mrf.mxu1 }
 0x1fb   : > { %v2373_v3 = vsub.f32 %v1615_v45, %v1839_v19  ;;  %v3116_v62 = vpop.eup %3115  ;;  %vm1620_vm13 = vcmp.eq.f32.partialorder %v4188_v4, 0.0  ;;  %3127 = vrsqrt.f32 %v4225_v63  ;;  %v1959_v40 = vmax.f32 %v4225_v63, 1e-10 }
 0x1fc   : > { %2308 = vst [vmem:[#allocation2 + $0x90] sm:$0xff] %v2276_v52  ;;  %v1320_v58 = vmul.f32 %v1228_v30, %v1228_v30  ;;  %v2149_v7 = vmul.f32 0.4342945, %v2076_v57  ;;  %v1617_v5 = vmul.f32 %v3116_v62, %v4188_v4  ;;  %v4233_v10 = vadd.f32 %v1352_v53, %v1288_v55  ;;  %v1078_v30 = vpop.f32.mrf.mxu0  ;;  %v1240_v55 = vpop.f32.mrf.mxu1 }
 0x1fd   : > { %v2405_v8 = vand.u32 2147483647, %v2373_v3  ;;  %v3118_v12 = vpop.eup %3117  ;;  %v1621_v14 = vand.u32 2147483648, %v4188_v4  ;;  %vm1842_vm14 = vcmp.eq.f32.partialorder %v4190_v0, inf  ;;  %3129 = vlog2.f32 %v1959_v40 }
 0x1fe   : > { %v4237_v17 = vadd.f32 %v1384_v56, %v1320_v58  ;;  %v2213_v44 = vsub.f32 %v2117_v54, %v2149_v7  ;;  %v1619_v37 = vsel %vm1618_vm12, %v4188_v4, %v1617_v5  ;;  %v1841_v60 = vmul.f32 %v3118_v12, %v4190_v0  ;;  %v1080_v27 = vpop.f32.mrf.mxu0  ;;  %v2182_v56 = vld [vmem:[#allocation2 + $0xc0] sm:$0xff] }
 0x1ff   : > { %v2437_v49 = vadd.f32 %v2405_v8, %v2341_v2  ;;  %v3120_v9 = vpop.eup %3119  ;;  %v1622_v22 = vsel %vm1620_vm13, %v1621_v14, %v1619_v37  ;;  %v1845_v23 = vand.u32 2147483648, %v4190_v0  ;;  %3131 = vrsqrt.f32 %v4233_v10 }
 0x200   : > { %v1353_v24 = vmul.f32 %v1076_v11, %v1076_v11  ;;  %v2245_v26 = vand.u32 2147483647, %v2213_v44  ;;  %v2014_v48 = vmul.f32 0.6931472, %v3120_v9  ;;  %v1843_v61 = vsel %vm1842_vm14, %v4190_v0, %v1841_v60  ;;  %v4276_v58 = vpop.f32.mrf.mxu0 }
 0x201   : > { %2469 = vst [vmem:[#allocation3 + $0x20] sm:$0xff] %v2437_v49  ;;  %vm1844_vm15 = vcmp.eq.f32.partialorder %v4190_v0, 0.0  ;;  %v1928_v1 = vmax.f32 %v4233_v10, 1e-10  ;;  %3133 = vrsqrt.f32 %v4237_v17  ;;  %v1289_v4 = vmul.f32 %v1074_v16, %v1074_v16  ;;  %v1244_v49 = vpop.f32.mrf.mxu1 }
 0x202   : > { %v1846_v43 = vsel %vm1844_vm15, %v1845_v23, %v1843_v61  ;;  %v2277_v28 = vadd.f32 %v2245_v26, %v2181_v20  ;;  %vm1625_vm0 = vcmp.eq.f32.partialorder %v4207_v33, inf  ;;  %vm1627_vm1 = vcmp.eq.f32.partialorder %v4207_v33, 0.0  ;;  %v3122_v21 = vpop.eup %3121 }
 0x203   : > { %v2374_v29 = vsub.f32 %v1622_v22, %v1846_v43  ;;  %v1628_v31 = vand.u32 2147483648, %v4207_v33  ;;  %3135 = vlog2.f32 %v1928_v1  ;;  %v1960_v0 = vmax.f32 %v4237_v17, 1e-10  ;;  %v2343_v22 = vld [vmem:[#allocation3 + $0x88] sm:$0xff] }
 0x204   : > { %v4257_v13 = vadd.f32 %v1353_v24, %v1289_v4  ;;  %v3124_v32 = vpop.eup %3123  ;;  %2309 = vst [vmem:[#allocation2 + $0x70] sm:$0xff] %v2277_v28  ;;  %v2118_v35 = vmul.f32 0.4342945, %v2014_v48  ;;  %v2078_v38 = vmul.f32 0.6931472, %v3122_v21  ;;  %v1385_v36 = vmul.f32 %v1236_v42, %v1236_v42  ;;  %v2183_v43 = vld [vmem:[#allocation2 + $0xa8] sm:$0xff] }
 0x205   : > { %v2406_v6 = vand.u32 2147483647, %v2374_v29  ;;  %v1624_v34 = vmul.f32 %v3124_v32, %v4207_v33  ;;  %vm1849_vm2 = vcmp.eq.f32.partialorder %v4225_v63, inf  ;;  %3137 = vlog2.f32 %v1960_v0  ;;  %v1246_v29 = vpop.f32.mrf.mxu1 }
 0x206   : > { %v1321_v18 = vmul.f32 %v1234_v25, %v1234_v25  ;;  %v2150_v41 = vmul.f32 0.4342945, %v2078_v38  ;;  %vm1851_vm3 = vcmp.eq.f32.partialorder %v4225_v63, 0.0  ;;  %3139 = vrsqrt.f32 %v4257_v13 }
 0x207   : > { %v2438_v50 = vadd.f32 %v2406_v6, %v2342_v59  ;;  %v3126_v15 = vpop.eup %3125  ;;  %v1626_v45 = vsel %vm1625_vm0, %v4207_v33, %v1624_v34  ;;  %v1852_v46 = vand.u32 2147483648, %v4225_v63  ;;  %v1929_v47 = vmax.f32 %v4257_v13, 1e-10 }
 0x208   : > { %v4268_v53 = vadd.f32 %v1385_v36, %v1321_v18  ;;  %v3128_v16 = vpop.eup %3127  ;;  %v2214_v51 = vsub.f32 %v2118_v35, %v2150_v41  ;;  %v2016_v52 = vmul.f32 0.6931472, %v3126_v15  ;;  %vm1632_vm4 = vcmp.eq.f32.partialorder %v4233_v10, inf  ;;  %v2344_v18 = vld [vmem:[#allocation3 + $0x48] sm:$0xff] }
 0x209   : > { %2470 = vst [vmem:[#allocation3 + $0xf0] sm:$0xff] %v2438_v50  ;;  %v1354_v19 = vmul.f32 %v1080_v27, %v1080_v27  ;;  %v1848_v54 = vmul.f32 %v3128_v16, %v4225_v63  ;;  %vm1634_vm5 = vcmp.eq.f32.partialorder %v4233_v10, 0.0  ;;  %3141 = vlog2.f32 %v1929_v47  ;;  %v1248_v50 = vpop.f32.mrf.mxu1 }
 0x20a   : > { %v1290_v57 = vmul.f32 %v1078_v30, %v1078_v30  ;;  %v3130_v3 = vpop.eup %3129  ;;  %v2246_v62 = vand.u32 2147483647, %v2214_v51  ;;  %v1629_v2 = vsel %vm1627_vm1, %v1628_v31, %v1626_v45  ;;  %v2119_v40 = vmul.f32 0.4342945, %v2016_v52 }
 0x20b   : > { %3143 = vrsqrt.f32 %v4268_v53  ;;  %v1850_v7 = vsel %vm1849_vm2, %v4225_v63, %v1848_v54  ;;  %v2080_v8 = vmul.f32 0.6931472, %v3130_v3  ;;  %v1961_v5 = vmax.f32 %v4268_v53, 1e-10  ;;  %v1086_v63 = vpop.f32.mrf.mxu0 }
 0x20c   : > { %v4282_v25 = vadd.f32 %v1354_v19, %v1290_v57  ;;  %v3132_v11 = vpop.eup %3131  ;;  %v2278_v12 = vadd.f32 %v2246_v62, %v2182_v56  ;;  %v1853_v33 = vsel %vm1851_vm3, %v1852_v46, %v1850_v7  ;;  %v1635_v14 = vand.u32 2147483648, %v4233_v10  ;;  %v2184_v62 = vld [vmem:[#allocation2 + $0xd0] sm:$0xff] }
 0x20d   : > { %v1386_v44 = vmul.f32 %v1240_v55, %v1240_v55  ;;  %v2151_v37 = vmul.f32 0.4342945, %v2080_v8  ;;  %v2375_v60 = vsub.f32 %v1629_v2, %v1853_v33  ;;  %v1631_v9 = vmul.f32 %v3132_v11, %v4233_v10  ;;  %v1250_v8 = vpop.f32.mrf.mxu1 }
 0x20e   : > { %3145 = vlog2.f32 %v1961_v5  ;;  %v3134_v20 = vpop.eup %3133  ;;  %2310 = vst [vmem:[#allocation2 + $0xc0] sm:$0xff] %v2278_v12  ;;  %vm1856_vm6 = vcmp.eq.f32.partialorder %v4237_v17, inf  ;;  %vm1858_vm7 = vcmp.eq.f32.partialorder %v4237_v17, 0.0  ;;  %v1322_v23 = vmul.f32 %v1238_v39, %v1238_v39 }
 0x20f   : > { %3147 = vrsqrt.f32 %v4282_v25  ;;  %v2215_v24 = vsub.f32 %v2119_v40, %v2151_v37  ;;  %v2407_v26 = vand.u32 2147483647, %v2375_v60  ;;  %v1633_v48 = vsel %vm1632_vm4, %v4233_v10, %v1631_v9  ;;  %v1088_v10 = vpop.f32.mrf.mxu0 }
 0x210   : > { %v1855_v61 = vmul.f32 %v3134_v20, %v4237_v17  ;;  %v3136_v42 = vpop.eup %3135  ;;  %v1636_v1 = vsel %vm1634_vm5, %v1635_v14, %v1633_v48  ;;  %v1859_v4 = vand.u32 2147483648, %v4237_v17  ;;  %v1930_v30 = vmax.f32 %v4282_v25, 1e-10  ;;  %v2345_v48 = vld [vmem:[#allocation3 + $0xf8] sm:$0xff] }
 0x211   : > { %v4299_v28 = vadd.f32 %v1386_v44, %v1322_v23  ;;  %v2247_v21 = vand.u32 2147483647, %v2215_v24  ;;  %v2439_v59 = vadd.f32 %v2407_v26, %v2343_v22  ;;  %v2018_v31 = vmul.f32 0.6931472, %v3136_v42  ;;  %v1090_v55 = vpop.f32.mrf.mxu0  ;;  %v1254_v24 = vpop.f32.mrf.mxu1 }
 0x212   : > { %v1857_v0 = vsel %vm1856_vm6, %v4237_v17, %v1855_v61  ;;  %v3138_v32 = vpop.eup %3137  ;;  %vm1639_vm8 = vcmp.eq.f32.partialorder %v4257_v13, inf  ;;  %vm1641_vm9 = vcmp.eq.f32.partialorder %v4257_v13, 0.0  ;;  %3149 = vlog2.f32 %v1930_v30 }
 0x213   : > { %v1860_v35 = vsel %vm1858_vm7, %v1859_v4, %v1857_v0  ;;  %v3140_v38 = vpop.eup %3139  ;;  %v2279_v6 = vadd.f32 %v2247_v21, %v2183_v43  ;;  %2471 = vst [vmem:[#allocation3 + $0x88] sm:$0xff] %v2439_v59  ;;  %v2120_v36 = vmul.f32 0.4342945, %v2018_v31  ;;  %v2082_v39 = vmul.f32 0.6931472, %v3138_v32  ;;  %v2185_v31 = vld [vmem:[#allocation2 + $0x10] sm:$0xff] }
 0x214   : > { %v2376_v34 = vsub.f32 %v1636_v1, %v1860_v35  ;;  %v1638_v27 = vmul.f32 %v3140_v38, %v4257_v13  ;;  %v1642_v41 = vand.u32 2147483648, %v4257_v13  ;;  %3151 = vrsqrt.f32 %v4299_v28 }
 0x215   : > { %v1962_v17 = vmax.f32 %v4299_v28, 1e-10  ;;  %2311 = vst [vmem:[#allocation2 + $0xa8] sm:$0xff] %v2279_v6  ;;  %v2152_v15 = vmul.f32 0.4342945, %v2082_v39  ;;  %v1355_v46 = vmul.f32 %v1086_v63, %v1086_v63  ;;  %v1387_v47 = vmul.f32 %v1246_v29, %v1246_v29 }
 0x216   : > { %v2408_v45 = vand.u32 2147483647, %v2376_v34  ;;  %v3142_v16 = vpop.eup %3141  ;;  %v1640_v51 = vsel %vm1639_vm8, %v4257_v13, %v1638_v27  ;;  %v1291_v52 = vmul.f32 %v4276_v58, %v4276_v58  ;;  %v1323_v19 = vmul.f32 %v1244_v49, %v1244_v49  ;;  %v1094_v49 = vpop.f32.mrf.mxu0 }
 0x217   : > { %3153 = vlog2.f32 %v1962_v17  ;;  %v2216_v54 = vsub.f32 %v2120_v36, %v2152_v15  ;;  %v2020_v3 = vmul.f32 0.6931472, %v3142_v16  ;;  %vm1863_vm10 = vcmp.eq.f32.partialorder %v4268_v53, inf }
 0x218   : > { %v3144_v56 = vpop.eup %3143  ;;  %v2440_v57 = vadd.f32 %v2408_v45, %v2344_v18  ;;  %vm1865_vm11 = vcmp.eq.f32.partialorder %v4268_v53, 0.0  ;;  %v4320_v40 = vadd.f32 %v1355_v46, %v1291_v52  ;;  %v4322_v7 = vadd.f32 %v1387_v47, %v1323_v19  ;;  %v1096_v4 = vpop.f32.mrf.mxu0 }
 0x219   : > { %v1862_v2 = vmul.f32 %v3144_v56, %v4268_v53  ;;  %v2248_v5 = vand.u32 2147483647, %v2216_v54  ;;  %v1643_v58 = vsel %vm1641_vm9, %v1642_v41, %v1640_v51  ;;  %v1866_v11 = vand.u32 2147483648, %v4268_v53 }
 0x21a   : > { %2472 = vst [vmem:[#allocation3 + $0x48] sm:$0xff] %v2440_v57  ;;  %vm1646_vm12 = vcmp.eq.f32.partialorder %v4282_v25, inf  ;;  %v2121_v33 = vmul.f32 0.4342945, %v2020_v3  ;;  %3155 = vrsqrt.f32 %v4320_v40  ;;  %v1356_v44 = vmul.f32 %v1090_v55, %v1090_v55  ;;  %v1098_v27 = vpop.f32.mrf.mxu0 }
 0x21b   : > { %v3146_v12 = vpop.eup %3145  ;;  %v1864_v14 = vsel %vm1863_vm10, %v4268_v53, %v1862_v2  ;;  %v2280_v60 = vadd.f32 %v2248_v5, %v2184_v62  ;;  %v1388_v13 = vmul.f32 %v1250_v8, %v1250_v8  ;;  %v1931_v63 = vmax.f32 %v4320_v40, 1e-10  ;;  %v2346_v62 = vld [vmem:[#allocation3 + $0xc0] sm:$0xff] }
 0x21c   : > { %v3148_v37 = vpop.eup %3147  ;;  %v1867_v9 = vsel %vm1865_vm11, %v1866_v11, %v1864_v14  ;;  %v2084_v20 = vmul.f32 0.6931472, %v3146_v12  ;;  %3157 = vrsqrt.f32 %v4322_v7  ;;  %vm1648_vm13 = vcmp.eq.f32.partialorder %v4282_v25, 0.0  ;;  %v1100_v57 = vpop.f32.mrf.mxu0 }
 0x21d   : > { %v2377_v22 = vsub.f32 %v1643_v58, %v1867_v9  ;;  %v1645_v23 = vmul.f32 %v3148_v37, %v4282_v25  ;;  %2312 = vst [vmem:[#allocation2 + $0xd0] sm:$0xff] %v2280_v60  ;;  %v1292_v61 = vmul.f32 %v1088_v10, %v1088_v10  ;;  %v1324_v42 = vmul.f32 %v1248_v50, %v1248_v50  ;;  %v1256_v10 = vpop.f32.mrf.mxu1 }
 0x21e   : > { %v2153_v26 = vmul.f32 0.4342945, %v2084_v20  ;;  %v1649_v53 = vand.u32 2147483648, %v4282_v25  ;;  %3159 = vlog2.f32 %v1931_v63  ;;  %v1963_v1 = vmax.f32 %v4322_v7, 1e-10 }
 0x21f   : > { %v2409_v43 = vand.u32 2147483647, %v2377_v22  ;;  %v3150_v30 = vpop.eup %3149  ;;  %vm1870_vm14 = vcmp.eq.f32.partialorder %v4299_v28, inf  ;;  %v4339_v21 = vadd.f32 %v1356_v44, %v1292_v61  ;;  %v4341_v59 = vadd.f32 %v1388_v13, %v1324_v42  ;;  %v1258_v16 = vpop.f32.mrf.mxu1 }
 0x220   : > { %v2217_v29 = vsub.f32 %v2121_v33, %v2153_v26  ;;  %v1647_v32 = vsel %vm1646_vm12, %v4282_v25, %v1645_v23  ;;  %v2022_v35 = vmul.f32 0.6931472, %v3150_v30  ;;  %3161 = vlog2.f32 %v1963_v1  ;;  %v2186_v33 = vld [vmem:[#allocation2 + $0x28] sm:$0xff] }
 0x221   : > { %v2441_v0 = vadd.f32 %v2409_v43, %v2345_v48  ;;  %v3152_v38 = vpop.eup %3151  ;;  %vm1872_vm15 = vcmp.eq.f32.partialorder %v4299_v28, 0.0  ;;  %v1873_v36 = vand.u32 2147483648, %v4299_v28  ;;  %3163 = vrsqrt.f32 %v4339_v21  ;;  %v1260_v11 = vpop.f32.mrf.mxu1 }
 0x222   : > { %v2249_v6 = vand.u32 2147483647, %v2217_v29  ;;  %v1869_v39 = vmul.f32 %v3152_v38, %v4299_v28  ;;  %vm1653_vm0 = vcmp.eq.f32.partialorder %v4320_v40, inf  ;;  %v1932_v34 = vmax.f32 %v4339_v21, 1e-10 }
 0x223   : > { %2473 = vst [vmem:[#allocation3 + $0xf8] sm:$0xff] %v2441_v0  ;;  %v1293_v18 = vmul.f32 %v1094_v49, %v1094_v49  ;;  %v1650_v50 = vsel %vm1648_vm13, %v1649_v53, %v1647_v32  ;;  %3165 = vrsqrt.f32 %v4341_v59  ;;  %v1325_v15 = vmul.f32 %v1254_v24, %v1254_v24 }
 0x224   : > { %v3154_v41 = vpop.eup %3153  ;;  %v2281_v17 = vadd.f32 %v2249_v6, %v2185_v31  ;;  %v2122_v45 = vmul.f32 0.4342945, %v2022_v35  ;;  %v1871_v46 = vsel %vm1870_vm14, %v4299_v28, %v1869_v39  ;;  %3167 = vlog2.f32 %v1932_v34  ;;  %v2347_v31 = vld [vmem:[#allocation3 + $0xb8] sm:$0xff] }
 0x225   : > { %v2086_v47 = vmul.f32 0.6931472, %v3154_v41  ;;  %v1874_v51 = vsel %vm1872_vm15, %v1873_v36, %v1871_v46  ;;  %v1964_v52 = vmax.f32 %v4341_v59, 1e-10  ;;  %v1357_v19 = vmul.f32 %v1096_v4, %v1096_v4 }
 0x226   : > { %2313 = vst [vmem:[#allocation2 + $0x10] sm:$0xff] %v2281_v17  ;;  %v1389_v25 = vmul.f32 %v1256_v10, %v1256_v10  ;;  %v2378_v56 = vsub.f32 %v1650_v50, %v1874_v51  ;;  %vm1655_vm1 = vcmp.eq.f32.partialorder %v4320_v40, 0.0  ;;  %v1656_v54 = vand.u32 2147483648, %v4320_v40  ;;  %v2187_v50 = vld [vmem:[#allocation2 + $0xa0] sm:$0xff] }
 0x227   : > { %v2154_v55 = vmul.f32 0.4342945, %v2086_v47  ;;  %v3156_v3 = vpop.eup %3155  ;;  %vm1877_vm2 = vcmp.eq.f32.partialorder %v4322_v7, inf  ;;  %3169 = vlog2.f32 %v1964_v52  ;;  %v4364_v2 = vadd.f32 %v1357_v19, %v1293_v18 }
 0x228   : > { %v4366_v28 = vadd.f32 %v1389_v25, %v1325_v15  ;;  %v2410_v5 = vand.u32 2147483647, %v2378_v56  ;;  %v1652_v58 = vmul.f32 %v3156_v3, %v4320_v40  ;;  %vm1879_vm3 = vcmp.eq.f32.partialorder %v4322_v7, 0.0 }
 0x229   : > { %v2218_v8 = vsub.f32 %v2122_v45, %v2154_v55  ;;  %v3158_v12 = vpop.eup %3157  ;;  %v1880_v14 = vand.u32 2147483648, %v4322_v7  ;;  %vm1660_vm4 = vcmp.eq.f32.partialorder %v4339_v21, inf  ;;  %3171 = vrsqrt.f32 %v4364_v2  ;;  %v2348_v55 = vld [vmem:[#allocation3] sm:$0xff] }
 0x22a   : > { %v1358_v44 = vmul.f32 %v1100_v57, %v1100_v57  ;;  %v2442_v37 = vadd.f32 %v2410_v5, %v2346_v62  ;;  %v1654_v60 = vsel %vm1653_vm0, %v4320_v40, %v1652_v58  ;;  %v1876_v9 = vmul.f32 %v3158_v12, %v4322_v7 }
 0x22b   : > { %v2250_v49 = vand.u32 2147483647, %v2218_v8  ;;  %v3160_v20 = vpop.eup %3159  ;;  %v1657_v13 = vsel %vm1655_vm1, %v1656_v54, %v1654_v60  ;;  %v1933_v22 = vmax.f32 %v4364_v2, 1e-10  ;;  %3173 = vrsqrt.f32 %v4366_v28 }
 0x22c   : > { %v1390_v23 = vmul.f32 %v1260_v11, %v1260_v11  ;;  %2474 = vst [vmem:[#allocation3 + $0xc0] sm:$0xff] %v2442_v37  ;;  %v2024_v24 = vmul.f32 0.6931472, %v3160_v20  ;;  %v1878_v26 = vsel %vm1877_vm2, %v4322_v7, %v1876_v9  ;;  %v1294_v48 = vmul.f32 %v1098_v27, %v1098_v27 }
 0x22d   : > { %v2282_v63 = vadd.f32 %v2250_v49, %v2186_v33  ;;  %v3162_v61 = vpop.eup %3161  ;;  %v1881_v42 = vsel %vm1879_vm3, %v1880_v14, %v1878_v26  ;;  %3175 = vlog2.f32 %v1933_v22  ;;  %v1965_v40 = vmax.f32 %v4366_v28, 1e-10  ;;  %v2188_v33 = vld [vmem:[#allocation2 + $0xf8] sm:$0xff] }
 0x22e   : > { %v1326_v43 = vmul.f32 %v1258_v16, %v1258_v16  ;;  %v3164_v53 = vpop.eup %3163  ;;  %v2123_v1 = vmul.f32 0.4342945, %v2024_v24  ;;  %v2088_v4 = vmul.f32 0.6931472, %v3162_v61  ;;  %v2379_v30 = vsub.f32 %v1657_v13, %v1881_v42  ;;  %v2349_v24 = vld [vmem:[#allocation3 + $0x28] sm:$0xff] }
 0x22f   : > { %2314 = vst [vmem:[#allocation2 + $0x28] sm:$0xff] %v2282_v63  ;;  %v4387_v29 = vadd.f32 %v1358_v44, %v1294_v48  ;;  %v1659_v0 = vmul.f32 %v3164_v53, %v4339_v21  ;;  %vm1662_vm5 = vcmp.eq.f32.partialorder %v4339_v21, 0.0  ;;  %3177 = vlog2.f32 %v1965_v40 }
 0x230   : > { %v4391_v32 = vadd.f32 %v1390_v23, %v1326_v43  ;;  %v3166_v7 = vpop.eup %3165  ;;  %v2155_v35 = vmul.f32 0.4342945, %v2088_v4  ;;  %v2411_v10 = vand.u32 2147483647, %v2379_v30  ;;  %v1663_v38 = vand.u32 2147483648, %v4339_v21  ;;  %v2189_v30 = vld [vmem:[#allocation2 + $0x20] sm:$0xff] }
 0x231   : > { %3179 = vrsqrt.f32 %v4387_v29  ;;  %v3168_v6 = vpop.eup %3167  ;;  %v1661_v36 = vsel %vm1660_vm4, %v4339_v21, %v1659_v0  ;;  %v1883_v39 = vmul.f32 %v3166_v7, %v4341_v59  ;;  %vm1884_vm6 = vcmp.eq.f32.partialorder %v4341_v59, inf }
 0x232   : > { %v1887_v34 = vand.u32 2147483648, %v4341_v59  ;;  %v2219_v18 = vsub.f32 %v2123_v1, %v2155_v35  ;;  %v2443_v27 = vadd.f32 %v2411_v10, %v2347_v31  ;;  %v1664_v41 = vsel %vm1662_vm5, %v1663_v38, %v1661_v36 }
 0x233   : > { %v2026_v17 = vmul.f32 0.6931472, %v3168_v6  ;;  %v1885_v15 = vsel %vm1884_vm6, %v4341_v59, %v1883_v39  ;;  %vm1886_vm7 = vcmp.eq.f32.partialorder %v4341_v59, 0.0  ;;  %v1934_v45 = vmax.f32 %v4387_v29, 1e-10 }
 0x234   : > { %3181 = vrsqrt.f32 %v4391_v32  ;;  %v3170_v21 = vpop.eup %3169  ;;  %v2251_v46 = vand.u32 2147483647, %v2219_v18  ;;  %2475 = vst [vmem:[#allocation3 + $0xb8] sm:$0xff] %v2443_v27  ;;  %v1888_v47 = vsel %vm1886_vm7, %v1887_v34, %v1885_v15  ;;  %v1966_v56 = vmax.f32 %v4391_v32, 1e-10  ;;  %v2350_v18 = vld [vmem:[#allocation3 + $0x98] sm:$0xff] }
 0x235   : > { %v2124_v16 = vmul.f32 0.4342945, %v2026_v17  ;;  %v2090_v51 = vmul.f32 0.6931472, %v3170_v21  ;;  %v2380_v52 = vsub.f32 %v1664_v41, %v1888_v47  ;;  %3183 = vlog2.f32 %v1934_v45  ;;  %v2190_v15 = vld [vmem:[#allocation2 + $0x98] sm:$0xff] }
 0x236   : > { %v3172_v19 = vpop.eup %3171  ;;  %v2283_v25 = vadd.f32 %v2251_v46, %v2187_v50  ;;  %vm1667_vm8 = vcmp.eq.f32.partialorder %v4364_v2, inf  ;;  %vm1669_vm9 = vcmp.eq.f32.partialorder %v4364_v2, 0.0  ;;  %v1670_v62 = vand.u32 2147483648, %v4364_v2  ;;  %v2485_v46 = vld [vmem:[#allocation2] sm:$0xff] (%p2479_p10)  ;;  %v2486_v47 = vld [vmem:[#allocation2 + $0xd8] sm:$0xff] (%p2479_p10) }
 0x237   : > { %v2156_v54 = vmul.f32 0.4342945, %v2090_v51  ;;  %v2412_v57 = vand.u32 2147483647, %v2380_v52  ;;  %v1666_v59 = vmul.f32 %v3172_v19, %v4364_v2  ;;  %3185 = vlog2.f32 %v1966_v56  ;;  %v2487_v51 = vld [vmem:[#allocation2 + $0x18] sm:$0xff] (%p2479_p10)  ;;  %v2488_v19 = vld [vmem:[#allocation2 + $0x50] sm:$0xff] (%p2479_p10) }
 0x238   : > { %v3174_v3 = vpop.eup %3173  ;;  %2315 = vst [vmem:[#allocation2 + $0xa0] sm:$0xff] %v2283_v25  ;;  %vm1891_vm10 = vcmp.eq.f32.partialorder %v4366_v28, inf  ;;  %v1894_v44 = vand.u32 2147483648, %v4366_v28  ;;  %vm1893_vm11 = vcmp.eq.f32.partialorder %v4366_v28, 0.0  ;;  %vm1674_vm12 = vcmp.eq.f32.partialorder %v4387_v29, inf }
 0x239   : > { %v2220_v8 = vsub.f32 %v2124_v16, %v2156_v54  ;;  %v2444_v5 = vadd.f32 %v2412_v57, %v2348_v55  ;;  %v1668_v58 = vsel %vm1667_vm8, %v4364_v2, %v1666_v59  ;;  %v1890_v11 = vmul.f32 %v3174_v3, %v4366_v28  ;;  %v2489_v55 = vld [vmem:[#allocation2 + $0x68] sm:$0xff] (%p2479_p10)  ;;  %v2490_v54 = vld [vmem:[#allocation2 + $0x30] sm:$0xff] (%p2479_p10)  ;;  %v2559_v3 = vld [vmem:[#allocation3 + $0x80] sm:$0xff] (%p2479_p10) }
 0x23a   : > { %v3176_v12 = vpop.eup %3175  ;;  %v1671_v14 = vsel %vm1669_vm9, %v1670_v62, %v1668_v58  ;;  %vm1676_vm13 = vcmp.eq.f32.partialorder %v4387_v29, 0.0  ;;  %vm1898_vm14 = vcmp.eq.f32.partialorder %v4391_v32, inf  ;;  %v1901_v0 = vand.u32 2147483648, %v4391_v32  ;;  %v2491_v59 = vld [vmem:[#allocation2 + $0x48] sm:$0xff] (%p2479_p10)  ;;  %v2492_v58 = vld [vmem:[#allocation2 + $0x80] sm:$0xff] (%p2479_p10) }
 0x23b   : > { %v2252_v49 = vand.u32 2147483647, %v2220_v8  ;;  %2476 = vst [vmem:[#allocation3] sm:$0xff] %v2444_v5  ;;  %v2028_v37 = vmul.f32 0.6931472, %v3176_v12  ;;  %v1892_v60 = vsel %vm1891_vm10, %v4366_v28, %v1890_v11  ;;  %v1677_v28 = vand.u32 2147483648, %v4387_v29 }
 0x23c   : > { %v3178_v9 = vpop.eup %3177  ;;  %v1895_v20 = vsel %vm1893_vm11, %v1894_v44, %v1892_v60  ;;  %vm1900_vm15 = vcmp.eq.f32.partialorder %v4391_v32, 0.0  ;;  %v2560_v8 = vld [vmem:[#allocation3 + $0xc8] sm:$0xff] (%p2479_p10)  ;;  %vm2557_vm0 = vcmask (%p2479_p10), 0  }
 0x23d   : > { %v2284_v2 = vadd.f32 %v2252_v49, %v2188_v33  ;;  %v2125_v22 = vmul.f32 0.4342945, %v2028_v37  ;;  %v2092_v23 = vmul.f32 0.6931472, %v3178_v9  ;;  %v2381_v63 = vsub.f32 %v1671_v14, %v1895_v20  ;;  %v2561_v5 = vld [vmem:[#allocation3 + $0xe8] sm:$0xff] (%p2479_p10)  ;;  %v2562_v33 = vld [vmem:[#allocation3 + $0x78] sm:$0xff] (%p2479_p10) }
 0x23e   : > { %v3180_v13 = vpop.eup %3179  ;;  %v2591_v11 = vadd.f32 (%p2479_p10), %v2560_v8, %v2559_v3  ;;  %v2493_v14 = vld [vmem:[#allocation2 + $0x88] sm:$0xff] (%p2479_p10)  ;;  %v2507_v3 = vld [vmem:[#allocation2 + $0xc0] sm:$0xff] (%p2479_p10) }
 0x23f   : > { %v1673_v26 = vmul.f32 %v3180_v13, %v4387_v29  ;;  %2316 = vst [vmem:[#allocation2 + $0xf8] sm:$0xff] %v2284_v2  ;;  %v2157_v48 = vmul.f32 0.4342945, %v2092_v23  ;;  %v2413_v61 = vand.u32 2147483647, %v2381_v63  ;;  %v2563_v37 = vld [vmem:[#allocation3 + $0x8] sm:$0xff] (%p2479_p10) }
 0x240   : > { %v2592_v44 = vadd.f32 (%p2479_p10), %v2591_v11, %v2561_v5  ;;  %v2494_v60 = vld [vmem:[#allocation2 + $0xe8] sm:$0xff] (%p2479_p10)  ;;  %v2564_v13 = vld [vmem:[#allocation3 + $0x90] sm:$0xff] (%p2479_p10)  ;;  %v2495_v2 = vld [vmem:[#allocation2 + $0xb8] sm:$0xff] (%p2479_p10) }
 0x241   : > { %v3182_v42 = vpop.eup %3181  ;;  %v1675_v40 = vsel %vm1674_vm12, %v4387_v29, %v1673_v26  ;;  %v2221_v43 = vsub.f32 %v2125_v22, %v2157_v48  ;;  %v2445_v53 = vadd.f32 %v2413_v61, %v2349_v24  ;;  %v2565_v63 = vld [vmem:[#allocation3 + $0x58] sm:$0xff] (%p2479_p10)  ;;  %v2496_v24 = vld [vmem:[#allocation2 + $0x60] sm:$0xff] (%p2479_p10)  ;;  %v2566_v61 = vld [vmem:[#allocation3 + $0xa8] sm:$0xff] (%p2479_p10) }
 0x242   : > { %v1897_v1 = vmul.f32 %v3182_v42, %v4391_v32  ;;  %v3184_v4 = vpop.eup %3183  ;;  %v1678_v31 = vsel %vm1676_vm13, %v1677_v28, %v1675_v40  ;;  %v2593_v9 = vadd.f32 (%p2479_p10), %v2592_v44, %v2562_v33  ;;  %v2497_v42 = vld [vmem:[#allocation2 + $0xf0] sm:$0xff] (%p2479_p10)  ;;  %v2578_v33 = vld [vmem:[#allocation3 + $0xa0] sm:$0xff] (%p2479_p10) }
 0x243   : > { %v2253_v7 = vand.u32 2147483647, %v2221_v43  ;;  %2477 = vst [vmem:[#allocation3 + $0x28] sm:$0xff] %v2445_v53  ;;  %v2030_v35 = vmul.f32 0.6931472, %v3184_v4  ;;  %v2567_v43 = vld [vmem:[#allocation3 + $0xd0] sm:$0xff] (%p2479_p10) }
 0x244   : > { %v1899_v10 = vsel %vm1898_vm14, %v4391_v32, %v1897_v1  ;;  %v3186_v6 = vpop.eup %3185  ;;  %v2484_v32 = vld [vmem:[#allocation2 + $0xb0] sm:$0xff] (%p2479_p10)  ;;  %v2594_v22 = vadd.f32 (%p2479_p10), %v2593_v9, %v2563_v37  ;;  %v2498_v53 = vld [vmem:[#allocation2 + $0x8] sm:$0xff] (%p2479_p10)  ;;  %v2579_v37 = vld [vmem:[#allocation3 + $0xd8] sm:$0xff] (%p2479_p10) }
 0x245   : > { %v1902_v38 = vsel %vm1900_vm15, %v1901_v0, %v1899_v10  ;;  %v2285_v36 = vadd.f32 %v2253_v7, %v2189_v30  ;;  %v2126_v39 = vmul.f32 0.4342945, %v2030_v35  ;;  %v2094_v34 = vmul.f32 0.6931472, %v3186_v6  ;;  %v2568_v30 = vld [vmem:[#allocation3 + $0xb0] sm:$0xff] (%p2479_p10)  ;;  %v2569_v35 = vld [vmem:[#allocation3 + $0x38] sm:$0xff] (%p2479_p10) }
 0x246   : > { %v2382_v29 = vsub.f32 %v1678_v31, %v1902_v38  ;;  %v2516_v16 = vadd.f32 (%p2479_p10), %v2485_v46, %v2484_v32  ;;  %v2595_v26 = vadd.f32 (%p2479_p10), %v2594_v22, %v2564_v13  ;;  %v2499_v31 = vld [vmem:[#allocation2 + $0x78] sm:$0xff] (%p2479_p10)  ;;  %v2504_v46 = vld [vmem:[#allocation2 + $0xe0] sm:$0xff] (%p2479_p10)  ;;  %v2577_v5 = vld [vmem:[#allocation3 + $0x50] sm:$0xff] (%p2479_p10) }
 0x247   : > { %2317 = vst [vmem:[#allocation2 + $0x20] sm:$0xff] %v2285_v36  ;;  %v2158_v41 = vmul.f32 0.4342945, %v2094_v34  ;;  %v2500_v10 = vld [vmem:[#allocation2 + $0x38] sm:$0xff] (%p2479_p10)  ;;  %v2570_v36 = vld [vmem:[#allocation3 + $0x40] sm:$0xff] (%p2479_p10)  ;;  %v2580_v13 = vld [vmem:[#allocation3 + $0x30] sm:$0xff] (%p2479_p10) }
 0x248   : > { %v2414_v27 = vand.u32 2147483647, %v2382_v29  ;;  %v2517_v52 = vadd.f32 (%p2479_p10), %v2516_v16, %v2486_v47  ;;  %v2596_v40 = vadd.f32 (%p2479_p10), %v2595_v26, %v2565_v63  ;;  %v2501_v29 = vld [vmem:[#allocation2 + $0x58] sm:$0xff] (%p2479_p10)  ;;  %v2581_v63 = vld [vmem:[#allocation3 + $0x20] sm:$0xff] (%p2479_p10) }
 0x249   : > { %v2222_v50 = vsub.f32 %v2126_v39, %v2158_v41  ;;  %v2573_v32 = vld [vmem:[#allocation3 + $0x18] sm:$0xff] (%p2479_p10) }
 0x24a   : > { %v2446_v17 = vadd.f32 %v2414_v27, %v2350_v18  ;;  %v2518_v25 = vadd.f32 (%p2479_p10), %v2517_v52, %v2487_v51  ;;  %v2597_v1 = vadd.f32 (%p2479_p10), %v2596_v40, %v2566_v61  ;;  %v2571_v18 = vld [vmem:[#allocation3 + $0xe0] sm:$0xff] (%p2479_p10)  ;;  %v2574_v51 = vld [vmem:[#allocation3 + $0x68] sm:$0xff] (%p2479_p10)  ;;  %v2505_v52 = vld [vmem:[#allocation2 + $0x90] sm:$0xff] (%p2479_p10) }
 0x24b   : > { %v2254_v45 = vand.u32 2147483647, %v2222_v50  ;;  %2483 = sbr.rel (!%p2479_p10) target bundleno = 850 (0x352), region = 77  ;;  %v2502_v27 = vld [vmem:[#allocation2 + $0x40] sm:$0xff] (%p2479_p10)  ;;  %v2582_v61 = vld [vmem:[#allocation3 + $0xf0] sm:$0xff] (%p2479_p10) }
 0x24c   : > { %2478 = vst [vmem:[#allocation3 + $0x98] sm:$0xff] %v2446_v17  ;;  %v2519_v56 = vadd.f32 (%p2479_p10), %v2518_v25, %v2488_v19  ;;  %v2598_v0 = vadd.f32 (%p2479_p10), %v2597_v1, %v2567_v43  ;;  %v2572_v50 = vld [vmem:[#allocation3 + $0x60] sm:$0xff] (%p2479_p10)  ;;  %v2583_v43 = vld [vmem:[#allocation3 + $0x88] sm:$0xff] (%p2479_p10) }
 0x24d   : > { %v2286_v21 = vadd.f32 %v2254_v45, %v2190_v15  ;;  %v2503_v15 = vld [vmem:[#allocation2 + $0xc8] sm:$0xff] (%p2479_p10) }
 0x24e   : > { %v2520_v57 = vadd.f32 (%p2479_p10), %v2519_v56, %v2489_v55  ;;  %v2599_v38 = vadd.f32 (%p2479_p10), %v2598_v0, %v2568_v30  ;;  %v2575_v55 = vld [vmem:[#allocation3 + $0x10] sm:$0xff] (%p2479_p10)  ;;  %v2584_v30 = vld [vmem:[#allocation3 + $0x48] sm:$0xff] (%p2479_p10) }
 0x24f   : > { %2318 = vst [vmem:[#allocation2 + $0x98] sm:$0xff] %v2286_v21  ;;  %v2506_v56 = vld [vmem:[#allocation2 + $0x70] sm:$0xff] (%p2479_p10) }
 0x250   : > { %v2521_v62 = vadd.f32 %v2520_v57, %v2490_v54  ;;  %v2600_v39 = vadd.f32 %v2599_v38, %v2569_v35  ;;  %v2585_v35 = vld [vmem:[#allocation3 + $0xf8] sm:$0xff] }
 0x252   : > { %v2522_v12 = vadd.f32 %v2521_v62, %v2491_v59  ;;  %v2601_v41 = vadd.f32 %v2600_v39, %v2570_v36  ;;  %v2576_v59 = vld [vmem:[#allocation3 + $0x70] sm:$0xff] }
 0x254   : > { %v2523_v49 = vadd.f32 %v2522_v12, %v2492_v58  ;;  %v2602_v45 = vadd.f32 %v2601_v41, %v2571_v18  ;;  %v2508_v58 = vld [vmem:[#allocation2 + $0xa8] sm:$0xff] }
 0x256   : > { %v2524_v20 = vadd.f32 %v2523_v49, %v2493_v14  ;;  %v2603_v47 = vadd.f32 %v2602_v45, %v2572_v50  ;;  %v2509_v14 = vld [vmem:[#allocation2 + $0xd0] sm:$0xff] }
 0x258   : > { %v2525_v23 = vadd.f32 %v2524_v20, %v2494_v60  ;;  %v2604_v19 = vadd.f32 %v2603_v47, %v2573_v32  ;;  %v2510_v60 = vld [vmem:[#allocation2 + $0x10] sm:$0xff] }
 0x25a   : > { %v2526_v48 = vadd.f32 %v2525_v23, %v2495_v2  ;;  %v2605_v54 = vadd.f32 %v2604_v19, %v2574_v51  ;;  %v2511_v2 = vld [vmem:[#allocation2 + $0x28] sm:$0xff] }
 0x25c   : > { %v2527_v28 = vadd.f32 %v2526_v48, %v2496_v24  ;;  %v2606_v62 = vadd.f32 %v2605_v54, %v2575_v55  ;;  %v2512_v24 = vld [vmem:[#allocation2 + $0xa0] sm:$0xff] }
 0x25e   : > { %v2528_v4 = vadd.f32 %v2527_v28, %v2497_v42  ;;  %v2607_v11 = vadd.f32 %v2606_v62, %v2576_v59  ;;  %v2513_v42 = vld [vmem:[#allocation2 + $0xf8] sm:$0xff] }
 0x260   : > { %v2529_v7 = vadd.f32 %v2528_v4, %v2498_v53  ;;  %v2608_v44 = vadd.f32 %v2607_v11, %v2577_v5  ;;  %v2514_v53 = vld [vmem:[#allocation2 + $0x20] sm:$0xff] }
 0x262   : > { %v2530_v6 = vadd.f32 %v2529_v7, %v2499_v31  ;;  %v2609_v9 = vadd.f32 %v2608_v44, %v2578_v33  ;;  %v2515_v31 = vld [vmem:[#allocation2 + $0x98] sm:$0xff] }
 0x264   : > { %v2531_v34 = vadd.f32 %v2530_v6, %v2500_v10  ;;  %v2610_v22 = vadd.f32 %v2609_v9, %v2579_v37  ;;  %v2586_v6 = vld [vmem:[#allocation3 + $0xc0] sm:$0xff] }
 0x266   : > { %v2532_v17 = vadd.f32 %v2531_v34, %v2501_v29  ;;  %v2611_v26 = vadd.f32 %v2610_v22, %v2580_v13  ;;  %v2587_v29 = vld [vmem:[#allocation3 + $0xb8] sm:$0xff]  ;;  %v2588_v34 = vld [vmem:[#allocation3] sm:$0xff] }
 0x268   : > { %v2533_v21 = vadd.f32 %v2532_v17, %v2502_v27  ;;  %v2612_v40 = vadd.f32 %v2611_v26, %v2581_v63  ;;  %v2589_v27 = vld [vmem:[#allocation3 + $0x28] sm:$0xff]  ;;  %v2590_v17 = vld [vmem:[#allocation3 + $0x98] sm:$0xff] }
 0x26a   : > { %v2534_v16 = vadd.f32 %v2533_v21, %v2503_v15  ;;  %v2613_v1 = vadd.f32 %v2612_v40, %v2582_v61 }
 0x26c   : > { %v2535_v25 = vadd.f32 %v2534_v16, %v2504_v46  ;;  %v2614_v0 = vadd.f32 %v2613_v1, %v2583_v43 }
 0x26e   : > { %v2536_v57 = vadd.f32 %v2535_v25, %v2505_v52  ;;  %v2615_v10 = vadd.f32 %v2614_v0, %v2584_v30 }
 0x270   : > { %v2537_v8 = vadd.f32 %v2536_v57, %v2506_v56  ;;  %v2616_v36 = vadd.f32 %v2615_v10, %v2585_v35 }
 0x272   : > { %v2538_v12 = vadd.f32 %v2537_v8, %v2507_v3  ;;  %v2617_v39 = vadd.f32 %v2616_v36, %v2586_v6 }
 0x274   : > { %v2539_v49 = vadd.f32 %v2538_v12, %v2508_v58  ;;  %v2618_v18 = vadd.f32 %v2617_v39, %v2587_v29 }
 0x276   : > { %v2540_v20 = vadd.f32 %v2539_v49, %v2509_v14  ;;  %v2619_v41 = vadd.f32 %v2618_v18, %v2588_v34 }
 0x278   : > { %v2541_v23 = vadd.f32 %v2540_v20, %v2510_v60  ;;  %v2620_v50 = vadd.f32 %v2619_v41, %v2589_v27 }
 0x27a   : > { %v2542_v48 = vadd.f32 %v2541_v23, %v2511_v2  ;;  %v2621_v15 = vadd.f32 %v2620_v50, %v2590_v17 }
 0x27c   : > { %v2543_v28 = vadd.f32 %v2542_v48, %v2512_v24 }
 0x27e   : > { %v2544_v4 = vadd.f32 %v2543_v28, %v2513_v42 }
 0x280   : > { %v2545_v7 = vadd.f32 %v2544_v4, %v2514_v53 }
 0x282   : > { %v2546_v38 = vadd.f32 %v2545_v7, %v2515_v31 }
 0x284   : > { %2547 = vadd.xlane.f32.xlu0 %v2546_v38 }
 0x288   : > { %2622 = vadd.xlane.f32.xlu0 %v2621_v15 }
 0x30d   : > { %v2548_v45 = vpop.xlane.xlu0 %2547 }
 0x30e   : > { %v2549_v21 = vrot.slane %v2548_v45, 4 }
 0x310   : > { %v2550_v32 = vadd.f32 %v2549_v21, %v2548_v45 }
 0x311   : > { %v2623_v51 = vpop.xlane.xlu0 %2622 }
 0x312   : > { %v2551_v46 = vrot.slane %v2550_v32, 2  ;;  %v2624_v19 = vrot.slane %v2623_v51, 4 }
 0x314   : > { %v2552_v47 = vadd.f32 %v2551_v46, %v2550_v32  ;;  %v2625_v25 = vadd.f32 %v2624_v19, %v2623_v51 }
 0x316   : > { %v2553_v16 = vrot.slane %v2552_v47, 1  ;;  %v2626_v55 = vrot.slane %v2625_v25, 2 }
 0x318   : > { %v2554_v52 = vadd.f32 %v2553_v16, %v2552_v47  ;;  %v2627_v56 = vadd.f32 %v2626_v55, %v2625_v25 }
 0x31a   : > { %2815 = vpush %v2554_v52  ;;  %v2628_v54 = vrot.slane %v2627_v56, 1 }
 0x31c   : > { %v2629_v57 = vadd.f32 %v2628_v54, %v2627_v56 }
 0x31e   : > { %2817 = vpush %v2629_v57 }
 0x34b   : > { %s2816_s14 = spop %2815 }
 0x34c   : > { %v2556_v59 = vstv %s2816_s14 }
 0x34d   : > { %2558 = vst.msk [vmem:[#allocation5] sm:$0x1] %vm2557_vm0, %v2556_v59 }
 0x34f   : > { %s2818_s4 = spop %2817 }
 0x350   : > { %v2631_v3 = vstv %s2818_s4 }
 0x351   : > { %2632 = vst.msk [vmem:[#allocation7] sm:$0x1] %vm2557_vm0, %v2631_v3 }
 0x352 PF: > { %p4430_p11 = scmp.eq.s32.totalorder %s2731_s17, 2  ;;  %s3285_s26 = smov [#allocation5]  }
 0x353   : > { %s2640_s27 = sshll.u32 %s3285_s26, 4  ;;  %s3286_s28 = smov [#allocation7]   ;;  %s2641_s27 = int_to_ptr.vmem [resolvable:$true] %s2640_s27 }
 0x354   : > { %s2651_s29 = sshll.u32 %s3286_s28, 4  ;;  %s3187_s30 = scalar_lea.vmem %s2641_s27, 16  ;;  %s2652_s29 = int_to_ptr.vmem [resolvable:$true] %s2651_s29 }
 0x355   : > { %p3188_p12 = scmp.ne.s32.totalorder %s2641_s27, %s3187_s30  ;;  %s3193_s5 = scalar_lea.vmem %s2641_s27, 32 }
 0x356   : > { %p3194_p1 = scmp.lt.s32.totalorder %s2641_s27, %s2641_s27  ;;  %p3195_p2 = scmp.lt.s32.totalorder %s3193_s5, %s3187_s30 }
 0x357   : > { %p3189_p13 = pnand %p3188_p12, %p4430_p11 }
 0x358   : > { %p3196_p3 = por %p3195_p2, %p3194_p1 }
 0x359   : > { %p3190_p0 = pneg %p3189_p13 }
 0x35b   : > { %p3197_p4 = pnand %p3196_p3, %p3190_p0 }
 0x35d   : > { %3200 = shalt.err (!%p3197_p4)
}
 0x35e   : > { %2820 = dma.vmem_to_hbm [thread:$0]  (%p4430_p11), %s2641_s27, 16, %s4473_s2, [#allocation6]  }
 0x35f   : > { %s3211_s7 = scalar_lea.vmem %s2652_s29, 16  ;;  %s3217_s8 = scalar_lea.vmem %s2652_s29, 32 }
 0x360   : > { %p3212_p5 = scmp.ne.s32.totalorder %s2652_s29, %s3211_s7  ;;  %p3218_p8 = scmp.lt.s32.totalorder %s2652_s29, %s2652_s29 }
 0x361   : > { %p3219_p9 = scmp.lt.s32.totalorder %s3217_s8, %s3211_s7 }
 0x362   : > { %p3213_p6 = pnand %p3212_p5, %p4430_p11 }
 0x363   : > { %p3220_p10 = por %p3219_p9, %p3218_p8 }
 0x364   : > { %p3214_p7 = pneg %p3213_p6 }
 0x366   : > { %p3221_p12 = pnand %p3220_p10, %p3214_p7 }
 0x368   : > { %3224 = shalt.err (!%p3221_p12)
}
 0x369   : > { %2822 = dma.vmem_to_hbm [thread:$0]  (%p4430_p11), %s2652_s29, 16, %s4474_s3, [#allocation8]  }
 0x36a   : > { %3256 = dma.done.wait (%p4430_p11), [#allocation6], 16  }
 0x36b   : > { %3258 = vsyncadd (%p4430_p11), [#allocation6], 4294967280 }
 0x36c   : > { %3260 = dma.done.wait (%p4430_p11), [#allocation8], 16  }
 0x36d   : > { %3262 = vsyncadd (%p4430_p11), [#allocation8], 4294967280 }
 0x36e PF: > { %s16_s16 = sadd.s32 1, %s3281_s16   ;;  %s4476_s12 = smov %s3269_s13 }
 0x36f   : > { %p13_p13 = scmp.ge.s32.totalorder %s16_s16, 5   ;;  %s4477_s13 = smov %s3343_s21 }
 0x370   : > { %s4478_s14 = smov %s3277_s15  ;;  %s4479_s15 = smov %s4481_s18 }
 0x371   :  { %15 = sbr.rel (!%p13_p13) target bundleno = 4 (0x4), region = 120 }
 0x376   :  { %2668 = vsyncpa [#allocation6], 1 }
 0x377   :  { %2670 = vsyncpa [#allocation6 + $0x1], 1 }
 0x378   :  { %2671 = vsyncpa [#allocation8], 1 }

// kernel: multi_scale_stft_loss.2
= control target key start
LH: loop header
LB: loop body
LE: loop exit
PB: predicated region body
PF: predicated region fallthrough
CT: control target
= control target key end

     0   :  { %9 = vsyncpa [#allocation6], 0  ;;  %s7809_s0 = inlined_call_operand.vmem [shape: bf16[2,24,1024], index: 0, kind: input, shape index: {}]   ;;  %s7810_s1 = inlined_call_operand.vmem [shape: bf16[1024,1536], index: 1, kind: input, shape index: {}]   ;;  %s7811_s2 = inlined_call_operand.hbm [shape: f32[1,1], index: 2, kind: output, shape index: {0}]   ;;  %s7812_s3 = inlined_call_operand.hbm [shape: f32[1,1], index: 3, kind: output, shape index: {1}]  }
   0x1   :  { %10 = vsyncpa [#allocation8], 0  ;;  %s5963_s12 = smov 0   ;;  %s5965_s13 = smov 0  }
   0x2   :  { %s5967_s14 = smov 0   ;;  %s5969_s15 = smov 0  }
   0x3   :  { %s5971_s16 = smov 0  }
   0x4 LB: > { %s4710_s17 = sadd.s32 4294967295, %s5938_s16   ;;  %s28_s18 = sadd.s32 1, %s5934_s15  ;;  %s5938_s16 = sphi %s5971_s16, %s16_s16   ;;  %s5934_s15 = sphi %s5969_s15, %s7817_s15   ;;  %s5930_s14 = sphi %s5967_s14, %s7816_s14   ;;  %s5926_s13 = sphi %s5965_s13, %s7815_s13   ;;  %s5922_s12 = sphi %s5963_s12, %s7814_s12  }
   0x5   : > { %p30_p0 = scmp.ge.s32.totalorder %s28_s18, 2  ;;  %p68_p1 = scmp.ne.s32.totalorder %s5926_s13, %s5922_s12 }
   0x6   : > { %p69_p2 = scmp.eq.s32.totalorder %s5938_s16, 0  ;;  %s61_s20 = sadd.s32 1, %s5926_s13 }
   0x7   : > { %s7819_s18 = smov (%p30_p0, %s28_s18), 0  ;;  %p4713_p5 = scmp.ge.s32.totalorder %s5938_s16, 2 }
   0x8   : > { %p70_p3 = por %p69_p2, %p68_p1  ;;  %s58_s19 = ssub.s32 %s5934_s15, %s7819_s18 }
   0x9   : > { %p59_p4 = scmp.eq.s32.totalorder %s58_s19, 0  ;;  %146 = sbr.rel (%p4713_p5) target bundleno = 211 (0xd3), region = 20 }
   0xb   : > { %s5999_s21 = scalar_select %p59_p4, %s5926_s13, %s61_s20  }
   0xe   : > { %149 = sbr.rel (!%p70_p3) target bundleno = 211 (0xd3), region = 24  ;;  %s151_s22 = sand.u32 (%p70_p3), 1, %s5926_s13  }
   0xf   : > { %s5132_s23 = smul.u32 (%p70_p3), 24, %s5934_s15 }
  0x10   : > { %s5135_s24 = smul.u32 (%p70_p3), 3072, %s151_s22 }
  0x11   : > { %s6007_s27 = scalar_lea.vmem (%p70_p3), %s7810_s1, %s5132_s23 }
  0x12   : > { %v169_v0 = vld [vmem:[%s6007_s27] sm:$0xff] (%p70_p3)  ;;  %v171_v1 = vld [vmem:[%s6007_s27 + $0x8] sm:$0xff] (%p70_p3)  ;;  %v173_v2 = vld [vmem:[%s6007_s27 + $0x10] sm:$0xff] (%p70_p3)  ;;  %s6012_s28 = scalar_lea.vmem (%p70_p3), [#allocation4], %s5135_s24 }
  0x13   : > { %170 = vst [vmem:[%s6012_s28] sm:$0xff] %v169_v0  ;;  %172 = vst [vmem:[%s6012_s28 + $0x8] sm:$0xff] %v171_v1  ;;  %v175_v3 = vld [vmem:[%s6007_s27 + $0x30] sm:$0xff]  ;;  %v177_v4 = vld [vmem:[%s6007_s27 + $0x38] sm:$0xff] }
  0x14   : > { %174 = vst [vmem:[%s6012_s28 + $0x10] sm:$0xff] %v173_v2  ;;  %v179_v5 = vld [vmem:[%s6007_s27 + $0x40] sm:$0xff]  ;;  %176 = vst [vmem:[%s6012_s28 + $0x18] sm:$0xff] %v175_v3  ;;  %v183_v7 = vld [vmem:[%s6007_s27 + $0x68] sm:$0xff] }
  0x15   : > { %178 = vst [vmem:[%s6012_s28 + $0x20] sm:$0xff] %v177_v4  ;;  %180 = vst [vmem:[%s6012_s28 + $0x28] sm:$0xff] %v179_v5  ;;  %v181_v6 = vld [vmem:[%s6007_s27 + $0x60] sm:$0xff]  ;;  %v185_v8 = vld [vmem:[%s6007_s27 + $0x70] sm:$0xff] }
  0x16   : > { %182 = vst [vmem:[%s6012_s28 + $0x30] sm:$0xff] %v181_v6  ;;  %184 = vst [vmem:[%s6012_s28 + $0x38] sm:$0xff] %v183_v7  ;;  %v187_v9 = vld [vmem:[%s6007_s27 + $0x90] sm:$0xff]  ;;  %v189_v10 = vld [vmem:[%s6007_s27 + $0x98] sm:$0xff] }
  0x17   : > { %186 = vst [vmem:[%s6012_s28 + $0x40] sm:$0xff] %v185_v8  ;;  %v191_v11 = vld [vmem:[%s6007_s27 + $0xa0] sm:$0xff]  ;;  %188 = vst [vmem:[%s6012_s28 + $0x48] sm:$0xff] %v187_v9  ;;  %v195_v13 = vld [vmem:[%s6007_s27 + $0xc8] sm:$0xff] }
  0x18   : > { %190 = vst [vmem:[%s6012_s28 + $0x50] sm:$0xff] %v189_v10  ;;  %192 = vst [vmem:[%s6012_s28 + $0x58] sm:$0xff] %v191_v11  ;;  %v193_v12 = vld [vmem:[%s6007_s27 + $0xc0] sm:$0xff]  ;;  %v197_v14 = vld [vmem:[%s6007_s27 + $0xd0] sm:$0xff] }
  0x19   : > { %194 = vst [vmem:[%s6012_s28 + $0x60] sm:$0xff] %v193_v12  ;;  %196 = vst [vmem:[%s6012_s28 + $0x68] sm:$0xff] %v195_v13  ;;  %v199_v15 = vld [vmem:[%s6007_s27 + $0xf0] sm:$0xff]  ;;  %v201_v16 = vld [vmem:[%s6007_s27 + $0xf8] sm:$0xff] }
  0x1a   : > { %198 = vst [vmem:[%s6012_s28 + $0x70] sm:$0xff] %v197_v14  ;;  %v203_v17 = vld [vmem:[%s6007_s27 + $0x100] sm:$0xff]  ;;  %200 = vst [vmem:[%s6012_s28 + $0x78] sm:$0xff] %v199_v15  ;;  %v207_v19 = vld [vmem:[%s6007_s27 + $0x128] sm:$0xff] }
  0x1b   : > { %202 = vst [vmem:[%s6012_s28 + $0x80] sm:$0xff] %v201_v16  ;;  %204 = vst [vmem:[%s6012_s28 + $0x88] sm:$0xff] %v203_v17  ;;  %v205_v18 = vld [vmem:[%s6007_s27 + $0x120] sm:$0xff]  ;;  %v209_v20 = vld [vmem:[%s6007_s27 + $0x130] sm:$0xff] }
  0x1c   : > { %206 = vst [vmem:[%s6012_s28 + $0x90] sm:$0xff] %v205_v18  ;;  %208 = vst [vmem:[%s6012_s28 + $0x98] sm:$0xff] %v207_v19  ;;  %v211_v21 = vld [vmem:[%s6007_s27 + $0x150] sm:$0xff]  ;;  %v213_v22 = vld [vmem:[%s6007_s27 + $0x158] sm:$0xff] }
  0x1d   : > { %210 = vst [vmem:[%s6012_s28 + $0xa0] sm:$0xff] %v209_v20  ;;  %v215_v23 = vld [vmem:[%s6007_s27 + $0x160] sm:$0xff]  ;;  %212 = vst [vmem:[%s6012_s28 + $0xa8] sm:$0xff] %v211_v21  ;;  %v219_v25 = vld [vmem:[%s6007_s27 + $0x188] sm:$0xff] }
  0x1e   : > { %214 = vst [vmem:[%s6012_s28 + $0xb0] sm:$0xff] %v213_v22  ;;  %216 = vst [vmem:[%s6012_s28 + $0xb8] sm:$0xff] %v215_v23  ;;  %v217_v24 = vld [vmem:[%s6007_s27 + $0x180] sm:$0xff]  ;;  %v221_v26 = vld [vmem:[%s6007_s27 + $0x190] sm:$0xff] }
  0x1f   : > { %218 = vst [vmem:[%s6012_s28 + $0xc0] sm:$0xff] %v217_v24  ;;  %220 = vst [vmem:[%s6012_s28 + $0xc8] sm:$0xff] %v219_v25  ;;  %v223_v27 = vld [vmem:[%s6007_s27 + $0x1b0] sm:$0xff]  ;;  %v225_v28 = vld [vmem:[%s6007_s27 + $0x1b8] sm:$0xff] }
  0x20   : > { %222 = vst [vmem:[%s6012_s28 + $0xd0] sm:$0xff] %v221_v26  ;;  %v227_v29 = vld [vmem:[%s6007_s27 + $0x1c0] sm:$0xff]  ;;  %224 = vst [vmem:[%s6012_s28 + $0xd8] sm:$0xff] %v223_v27  ;;  %v231_v31 = vld [vmem:[%s6007_s27 + $0x1e8] sm:$0xff] }
  0x21   : > { %226 = vst [vmem:[%s6012_s28 + $0xe0] sm:$0xff] %v225_v28  ;;  %228 = vst [vmem:[%s6012_s28 + $0xe8] sm:$0xff] %v227_v29  ;;  %v229_v30 = vld [vmem:[%s6007_s27 + $0x1e0] sm:$0xff]  ;;  %v233_v32 = vld [vmem:[%s6007_s27 + $0x1f0] sm:$0xff] }
  0x22   : > { %230 = vst [vmem:[%s6012_s28 + $0xf0] sm:$0xff] %v229_v30  ;;  %232 = vst [vmem:[%s6012_s28 + $0xf8] sm:$0xff] %v231_v31  ;;  %v235_v33 = vld [vmem:[%s6007_s27 + $0x210] sm:$0xff]  ;;  %v237_v34 = vld [vmem:[%s6007_s27 + $0x218] sm:$0xff] }
  0x23   : > { %234 = vst [vmem:[%s6012_s28 + $0x100] sm:$0xff] %v233_v32  ;;  %v239_v35 = vld [vmem:[%s6007_s27 + $0x220] sm:$0xff]  ;;  %236 = vst [vmem:[%s6012_s28 + $0x108] sm:$0xff] %v235_v33  ;;  %v243_v37 = vld [vmem:[%s6007_s27 + $0x248] sm:$0xff] }
  0x24   : > { %238 = vst [vmem:[%s6012_s28 + $0x110] sm:$0xff] %v237_v34  ;;  %240 = vst [vmem:[%s6012_s28 + $0x118] sm:$0xff] %v239_v35  ;;  %v241_v36 = vld [vmem:[%s6007_s27 + $0x240] sm:$0xff]  ;;  %v245_v38 = vld [vmem:[%s6007_s27 + $0x250] sm:$0xff] }
  0x25   : > { %242 = vst [vmem:[%s6012_s28 + $0x120] sm:$0xff] %v241_v36  ;;  %244 = vst [vmem:[%s6012_s28 + $0x128] sm:$0xff] %v243_v37  ;;  %v247_v39 = vld [vmem:[%s6007_s27 + $0x270] sm:$0xff]  ;;  %v249_v40 = vld [vmem:[%s6007_s27 + $0x278] sm:$0xff] }
  0x26   : > { %246 = vst [vmem:[%s6012_s28 + $0x130] sm:$0xff] %v245_v38  ;;  %v251_v41 = vld [vmem:[%s6007_s27 + $0x280] sm:$0xff]  ;;  %248 = vst [vmem:[%s6012_s28 + $0x138] sm:$0xff] %v247_v39  ;;  %v255_v43 = vld [vmem:[%s6007_s27 + $0x2a8] sm:$0xff] }
  0x27   : > { %250 = vst [vmem:[%s6012_s28 + $0x140] sm:$0xff] %v249_v40  ;;  %252 = vst [vmem:[%s6012_s28 + $0x148] sm:$0xff] %v251_v41  ;;  %v253_v42 = vld [vmem:[%s6007_s27 + $0x2a0] sm:$0xff]  ;;  %v257_v44 = vld [vmem:[%s6007_s27 + $0x2b0] sm:$0xff] }
  0x28   : > { %254 = vst [vmem:[%s6012_s28 + $0x150] sm:$0xff] %v253_v42  ;;  %256 = vst [vmem:[%s6012_s28 + $0x158] sm:$0xff] %v255_v43  ;;  %v259_v45 = vld [vmem:[%s6007_s27 + $0x2d0] sm:$0xff]  ;;  %v261_v46 = vld [vmem:[%s6007_s27 + $0x2d8] sm:$0xff] }
  0x29   : > { %258 = vst [vmem:[%s6012_s28 + $0x160] sm:$0xff] %v257_v44  ;;  %v263_v47 = vld [vmem:[%s6007_s27 + $0x2e0] sm:$0xff]  ;;  %260 = vst [vmem:[%s6012_s28 + $0x168] sm:$0xff] %v259_v45  ;;  %v267_v49 = vld [vmem:[%s6007_s27 + $0x308] sm:$0xff] }
  0x2a   : > { %262 = vst [vmem:[%s6012_s28 + $0x170] sm:$0xff] %v261_v46  ;;  %264 = vst [vmem:[%s6012_s28 + $0x178] sm:$0xff] %v263_v47  ;;  %v265_v48 = vld [vmem:[%s6007_s27 + $0x300] sm:$0xff]  ;;  %v269_v50 = vld [vmem:[%s6007_s27 + $0x310] sm:$0xff] }
  0x2b   : > { %266 = vst [vmem:[%s6012_s28 + $0x180] sm:$0xff] %v265_v48  ;;  %268 = vst [vmem:[%s6012_s28 + $0x188] sm:$0xff] %v267_v49  ;;  %v271_v51 = vld [vmem:[%s6007_s27 + $0x330] sm:$0xff]  ;;  %v273_v52 = vld [vmem:[%s6007_s27 + $0x338] sm:$0xff] }
  0x2c   : > { %270 = vst [vmem:[%s6012_s28 + $0x190] sm:$0xff] %v269_v50  ;;  %v275_v53 = vld [vmem:[%s6007_s27 + $0x340] sm:$0xff]  ;;  %272 = vst [vmem:[%s6012_s28 + $0x198] sm:$0xff] %v271_v51  ;;  %v279_v55 = vld [vmem:[%s6007_s27 + $0x368] sm:$0xff] }
  0x2d   : > { %274 = vst [vmem:[%s6012_s28 + $0x1a0] sm:$0xff] %v273_v52  ;;  %276 = vst [vmem:[%s6012_s28 + $0x1a8] sm:$0xff] %v275_v53  ;;  %v277_v54 = vld [vmem:[%s6007_s27 + $0x360] sm:$0xff]  ;;  %v281_v56 = vld [vmem:[%s6007_s27 + $0x370] sm:$0xff] }
  0x2e   : > { %278 = vst [vmem:[%s6012_s28 + $0x1b0] sm:$0xff] %v277_v54  ;;  %280 = vst [vmem:[%s6012_s28 + $0x1b8] sm:$0xff] %v279_v55  ;;  %v283_v57 = vld [vmem:[%s6007_s27 + $0x390] sm:$0xff]  ;;  %v285_v58 = vld [vmem:[%s6007_s27 + $0x398] sm:$0xff] }
  0x2f   : > { %282 = vst [vmem:[%s6012_s28 + $0x1c0] sm:$0xff] %v281_v56  ;;  %v287_v59 = vld [vmem:[%s6007_s27 + $0x3a0] sm:$0xff]  ;;  %284 = vst [vmem:[%s6012_s28 + $0x1c8] sm:$0xff] %v283_v57  ;;  %v291_v61 = vld [vmem:[%s6007_s27 + $0x3c8] sm:$0xff] }
  0x30   : > { %286 = vst [vmem:[%s6012_s28 + $0x1d0] sm:$0xff] %v285_v58  ;;  %288 = vst [vmem:[%s6012_s28 + $0x1d8] sm:$0xff] %v287_v59  ;;  %v289_v60 = vld [vmem:[%s6007_s27 + $0x3c0] sm:$0xff]  ;;  %v293_v62 = vld [vmem:[%s6007_s27 + $0x3d0] sm:$0xff] }
  0x31   : > { %290 = vst [vmem:[%s6012_s28 + $0x1e0] sm:$0xff] %v289_v60  ;;  %292 = vst [vmem:[%s6012_s28 + $0x1e8] sm:$0xff] %v291_v61  ;;  %v295_v63 = vld [vmem:[%s6007_s27 + $0x3f0] sm:$0xff]  ;;  %v297_v0 = vld [vmem:[%s6007_s27 + $0x3f8] sm:$0xff] }
  0x32   : > { %294 = vst [vmem:[%s6012_s28 + $0x1f0] sm:$0xff] %v293_v62  ;;  %v299_v1 = vld [vmem:[%s6007_s27 + $0x400] sm:$0xff]  ;;  %296 = vst [vmem:[%s6012_s28 + $0x1f8] sm:$0xff] %v295_v63  ;;  %v303_v3 = vld [vmem:[%s6007_s27 + $0x428] sm:$0xff] }
  0x33   : > { %298 = vst [vmem:[%s6012_s28 + $0x200] sm:$0xff] %v297_v0  ;;  %300 = vst [vmem:[%s6012_s28 + $0x208] sm:$0xff] %v299_v1  ;;  %v301_v2 = vld [vmem:[%s6007_s27 + $0x420] sm:$0xff]  ;;  %v305_v4 = vld [vmem:[%s6007_s27 + $0x430] sm:$0xff] }
  0x34   : > { %302 = vst [vmem:[%s6012_s28 + $0x210] sm:$0xff] %v301_v2  ;;  %304 = vst [vmem:[%s6012_s28 + $0x218] sm:$0xff] %v303_v3  ;;  %v307_v5 = vld [vmem:[%s6007_s27 + $0x450] sm:$0xff]  ;;  %v309_v6 = vld [vmem:[%s6007_s27 + $0x458] sm:$0xff] }
  0x35   : > { %306 = vst [vmem:[%s6012_s28 + $0x220] sm:$0xff] %v305_v4  ;;  %v311_v7 = vld [vmem:[%s6007_s27 + $0x460] sm:$0xff]  ;;  %308 = vst [vmem:[%s6012_s28 + $0x228] sm:$0xff] %v307_v5  ;;  %v315_v9 = vld [vmem:[%s6007_s27 + $0x488] sm:$0xff] }
  0x36   : > { %310 = vst [vmem:[%s6012_s28 + $0x230] sm:$0xff] %v309_v6  ;;  %312 = vst [vmem:[%s6012_s28 + $0x238] sm:$0xff] %v311_v7  ;;  %v313_v8 = vld [vmem:[%s6007_s27 + $0x480] sm:$0xff]  ;;  %v317_v10 = vld [vmem:[%s6007_s27 + $0x490] sm:$0xff] }
  0x37   : > { %314 = vst [vmem:[%s6012_s28 + $0x240] sm:$0xff] %v313_v8  ;;  %316 = vst [vmem:[%s6012_s28 + $0x248] sm:$0xff] %v315_v9  ;;  %v319_v11 = vld [vmem:[%s6007_s27 + $0x4b0] sm:$0xff]  ;;  %v321_v12 = vld [vmem:[%s6007_s27 + $0x4b8] sm:$0xff] }
  0x38   : > { %318 = vst [vmem:[%s6012_s28 + $0x250] sm:$0xff] %v317_v10  ;;  %v323_v13 = vld [vmem:[%s6007_s27 + $0x4c0] sm:$0xff]  ;;  %320 = vst [vmem:[%s6012_s28 + $0x258] sm:$0xff] %v319_v11  ;;  %v327_v15 = vld [vmem:[%s6007_s27 + $0x4e8] sm:$0xff] }
  0x39   : > { %322 = vst [vmem:[%s6012_s28 + $0x260] sm:$0xff] %v321_v12  ;;  %324 = vst [vmem:[%s6012_s28 + $0x268] sm:$0xff] %v323_v13  ;;  %v325_v14 = vld [vmem:[%s6007_s27 + $0x4e0] sm:$0xff]  ;;  %v329_v16 = vld [vmem:[%s6007_s27 + $0x4f0] sm:$0xff] }
  0x3a   : > { %326 = vst [vmem:[%s6012_s28 + $0x270] sm:$0xff] %v325_v14  ;;  %328 = vst [vmem:[%s6012_s28 + $0x278] sm:$0xff] %v327_v15  ;;  %v331_v17 = vld [vmem:[%s6007_s27 + $0x510] sm:$0xff]  ;;  %v333_v18 = vld [vmem:[%s6007_s27 + $0x518] sm:$0xff] }
  0x3b   : > { %330 = vst [vmem:[%s6012_s28 + $0x280] sm:$0xff] %v329_v16  ;;  %v335_v19 = vld [vmem:[%s6007_s27 + $0x520] sm:$0xff]  ;;  %332 = vst [vmem:[%s6012_s28 + $0x288] sm:$0xff] %v331_v17  ;;  %v339_v21 = vld [vmem:[%s6007_s27 + $0x548] sm:$0xff] }
  0x3c   : > { %334 = vst [vmem:[%s6012_s28 + $0x290] sm:$0xff] %v333_v18  ;;  %336 = vst [vmem:[%s6012_s28 + $0x298] sm:$0xff] %v335_v19  ;;  %v337_v20 = vld [vmem:[%s6007_s27 + $0x540] sm:$0xff]  ;;  %v341_v22 = vld [vmem:[%s6007_s27 + $0x550] sm:$0xff] }
  0x3d   : > { %338 = vst [vmem:[%s6012_s28 + $0x2a0] sm:$0xff] %v337_v20  ;;  %340 = vst [vmem:[%s6012_s28 + $0x2a8] sm:$0xff] %v339_v21  ;;  %v343_v23 = vld [vmem:[%s6007_s27 + $0x570] sm:$0xff]  ;;  %v345_v24 = vld [vmem:[%s6007_s27 + $0x578] sm:$0xff] }
  0x3e   : > { %342 = vst [vmem:[%s6012_s28 + $0x2b0] sm:$0xff] %v341_v22  ;;  %v347_v25 = vld [vmem:[%s6007_s27 + $0x580] sm:$0xff]  ;;  %344 = vst [vmem:[%s6012_s28 + $0x2b8] sm:$0xff] %v343_v23  ;;  %v351_v27 = vld [vmem:[%s6007_s27 + $0x5a8] sm:$0xff] }
  0x3f   : > { %346 = vst [vmem:[%s6012_s28 + $0x2c0] sm:$0xff] %v345_v24  ;;  %348 = vst [vmem:[%s6012_s28 + $0x2c8] sm:$0xff] %v347_v25  ;;  %v349_v26 = vld [vmem:[%s6007_s27 + $0x5a0] sm:$0xff]  ;;  %v353_v28 = vld [vmem:[%s6007_s27 + $0x5b0] sm:$0xff] }
  0x40   : > { %350 = vst [vmem:[%s6012_s28 + $0x2d0] sm:$0xff] %v349_v26  ;;  %352 = vst [vmem:[%s6012_s28 + $0x2d8] sm:$0xff] %v351_v27  ;;  %v355_v29 = vld [vmem:[%s6007_s27 + $0x5d0] sm:$0xff]  ;;  %v357_v30 = vld [vmem:[%s6007_s27 + $0x5d8] sm:$0xff] }
  0x41   : > { %354 = vst [vmem:[%s6012_s28 + $0x2e0] sm:$0xff] %v353_v28  ;;  %v359_v31 = vld [vmem:[%s6007_s27 + $0x5e0] sm:$0xff]  ;;  %356 = vst [vmem:[%s6012_s28 + $0x2e8] sm:$0xff] %v355_v29  ;;  %v363_v33 = vld [vmem:[%s6007_s27 + $0x608] sm:$0xff] }
  0x42   : > { %358 = vst [vmem:[%s6012_s28 + $0x2f0] sm:$0xff] %v357_v30  ;;  %360 = vst [vmem:[%s6012_s28 + $0x2f8] sm:$0xff] %v359_v31  ;;  %v361_v32 = vld [vmem:[%s6007_s27 + $0x600] sm:$0xff]  ;;  %v365_v34 = vld [vmem:[%s6007_s27 + $0x610] sm:$0xff] }
  0x43   : > { %362 = vst [vmem:[%s6012_s28 + $0x300] sm:$0xff] %v361_v32  ;;  %364 = vst [vmem:[%s6012_s28 + $0x308] sm:$0xff] %v363_v33  ;;  %v367_v35 = vld [vmem:[%s6007_s27 + $0x630] sm:$0xff]  ;;  %v369_v36 = vld [vmem:[%s6007_s27 + $0x638] sm:$0xff] }
  0x44   : > { %366 = vst [vmem:[%s6012_s28 + $0x310] sm:$0xff] %v365_v34  ;;  %v371_v37 = vld [vmem:[%s6007_s27 + $0x640] sm:$0xff]  ;;  %368 = vst [vmem:[%s6012_s28 + $0x318] sm:$0xff] %v367_v35  ;;  %v375_v39 = vld [vmem:[%s6007_s27 + $0x668] sm:$0xff] }
  0x45   : > { %370 = vst [vmem:[%s6012_s28 + $0x320] sm:$0xff] %v369_v36  ;;  %372 = vst [vmem:[%s6012_s28 + $0x328] sm:$0xff] %v371_v37  ;;  %v373_v38 = vld [vmem:[%s6007_s27 + $0x660] sm:$0xff]  ;;  %v377_v40 = vld [vmem:[%s6007_s27 + $0x670] sm:$0xff] }
  0x46   : > { %374 = vst [vmem:[%s6012_s28 + $0x330] sm:$0xff] %v373_v38  ;;  %376 = vst [vmem:[%s6012_s28 + $0x338] sm:$0xff] %v375_v39  ;;  %v379_v41 = vld [vmem:[%s6007_s27 + $0x690] sm:$0xff]  ;;  %v381_v42 = vld [vmem:[%s6007_s27 + $0x698] sm:$0xff] }
  0x47   : > { %378 = vst [vmem:[%s6012_s28 + $0x340] sm:$0xff] %v377_v40  ;;  %v383_v43 = vld [vmem:[%s6007_s27 + $0x6a0] sm:$0xff]  ;;  %380 = vst [vmem:[%s6012_s28 + $0x348] sm:$0xff] %v379_v41  ;;  %v387_v45 = vld [vmem:[%s6007_s27 + $0x6c8] sm:$0xff] }
  0x48   : > { %382 = vst [vmem:[%s6012_s28 + $0x350] sm:$0xff] %v381_v42  ;;  %384 = vst [vmem:[%s6012_s28 + $0x358] sm:$0xff] %v383_v43  ;;  %v385_v44 = vld [vmem:[%s6007_s27 + $0x6c0] sm:$0xff]  ;;  %v389_v46 = vld [vmem:[%s6007_s27 + $0x6d0] sm:$0xff] }
  0x49   : > { %386 = vst [vmem:[%s6012_s28 + $0x360] sm:$0xff] %v385_v44  ;;  %388 = vst [vmem:[%s6012_s28 + $0x368] sm:$0xff] %v387_v45  ;;  %v391_v47 = vld [vmem:[%s6007_s27 + $0x6f0] sm:$0xff]  ;;  %v393_v48 = vld [vmem:[%s6007_s27 + $0x6f8] sm:$0xff] }
  0x4a   : > { %390 = vst [vmem:[%s6012_s28 + $0x370] sm:$0xff] %v389_v46  ;;  %v395_v49 = vld [vmem:[%s6007_s27 + $0x700] sm:$0xff]  ;;  %392 = vst [vmem:[%s6012_s28 + $0x378] sm:$0xff] %v391_v47  ;;  %v399_v51 = vld [vmem:[%s6007_s27 + $0x728] sm:$0xff] }
  0x4b   : > { %394 = vst [vmem:[%s6012_s28 + $0x380] sm:$0xff] %v393_v48  ;;  %396 = vst [vmem:[%s6012_s28 + $0x388] sm:$0xff] %v395_v49  ;;  %v397_v50 = vld [vmem:[%s6007_s27 + $0x720] sm:$0xff]  ;;  %v401_v52 = vld [vmem:[%s6007_s27 + $0x730] sm:$0xff] }
  0x4c   : > { %398 = vst [vmem:[%s6012_s28 + $0x390] sm:$0xff] %v397_v50  ;;  %400 = vst [vmem:[%s6012_s28 + $0x398] sm:$0xff] %v399_v51  ;;  %v403_v53 = vld [vmem:[%s6007_s27 + $0x750] sm:$0xff]  ;;  %v405_v54 = vld [vmem:[%s6007_s27 + $0x758] sm:$0xff] }
  0x4d   : > { %402 = vst [vmem:[%s6012_s28 + $0x3a0] sm:$0xff] %v401_v52  ;;  %v407_v55 = vld [vmem:[%s6007_s27 + $0x760] sm:$0xff]  ;;  %404 = vst [vmem:[%s6012_s28 + $0x3a8] sm:$0xff] %v403_v53  ;;  %v411_v57 = vld [vmem:[%s6007_s27 + $0x788] sm:$0xff] }
  0x4e   : > { %406 = vst [vmem:[%s6012_s28 + $0x3b0] sm:$0xff] %v405_v54  ;;  %408 = vst [vmem:[%s6012_s28 + $0x3b8] sm:$0xff] %v407_v55  ;;  %v409_v56 = vld [vmem:[%s6007_s27 + $0x780] sm:$0xff]  ;;  %v413_v58 = vld [vmem:[%s6007_s27 + $0x790] sm:$0xff] }
  0x4f   : > { %410 = vst [vmem:[%s6012_s28 + $0x3c0] sm:$0xff] %v409_v56  ;;  %412 = vst [vmem:[%s6012_s28 + $0x3c8] sm:$0xff] %v411_v57  ;;  %v415_v59 = vld [vmem:[%s6007_s27 + $0x7b0] sm:$0xff]  ;;  %v417_v60 = vld [vmem:[%s6007_s27 + $0x7b8] sm:$0xff] }
  0x50   : > { %414 = vst [vmem:[%s6012_s28 + $0x3d0] sm:$0xff] %v413_v58  ;;  %v419_v61 = vld [vmem:[%s6007_s27 + $0x7c0] sm:$0xff]  ;;  %416 = vst [vmem:[%s6012_s28 + $0x3d8] sm:$0xff] %v415_v59  ;;  %v423_v63 = vld [vmem:[%s6007_s27 + $0x7e8] sm:$0xff] }
  0x51   : > { %418 = vst [vmem:[%s6012_s28 + $0x3e0] sm:$0xff] %v417_v60  ;;  %420 = vst [vmem:[%s6012_s28 + $0x3e8] sm:$0xff] %v419_v61  ;;  %v421_v62 = vld [vmem:[%s6007_s27 + $0x7e0] sm:$0xff]  ;;  %v425_v0 = vld [vmem:[%s6007_s27 + $0x7f0] sm:$0xff] }
  0x52   : > { %422 = vst [vmem:[%s6012_s28 + $0x3f0] sm:$0xff] %v421_v62  ;;  %424 = vst [vmem:[%s6012_s28 + $0x3f8] sm:$0xff] %v423_v63  ;;  %v427_v1 = vld [vmem:[%s6007_s27 + $0x810] sm:$0xff]  ;;  %v429_v2 = vld [vmem:[%s6007_s27 + $0x818] sm:$0xff] }
  0x53   : > { %426 = vst [vmem:[%s6012_s28 + $0x400] sm:$0xff] %v425_v0  ;;  %v431_v3 = vld [vmem:[%s6007_s27 + $0x820] sm:$0xff]  ;;  %428 = vst [vmem:[%s6012_s28 + $0x408] sm:$0xff] %v427_v1  ;;  %v435_v5 = vld [vmem:[%s6007_s27 + $0x848] sm:$0xff] }
  0x54   : > { %430 = vst [vmem:[%s6012_s28 + $0x410] sm:$0xff] %v429_v2  ;;  %432 = vst [vmem:[%s6012_s28 + $0x418] sm:$0xff] %v431_v3  ;;  %v433_v4 = vld [vmem:[%s6007_s27 + $0x840] sm:$0xff]  ;;  %v437_v6 = vld [vmem:[%s6007_s27 + $0x850] sm:$0xff] }
  0x55   : > { %434 = vst [vmem:[%s6012_s28 + $0x420] sm:$0xff] %v433_v4  ;;  %436 = vst [vmem:[%s6012_s28 + $0x428] sm:$0xff] %v435_v5  ;;  %v439_v7 = vld [vmem:[%s6007_s27 + $0x870] sm:$0xff]  ;;  %v441_v8 = vld [vmem:[%s6007_s27 + $0x878] sm:$0xff] }
  0x56   : > { %438 = vst [vmem:[%s6012_s28 + $0x430] sm:$0xff] %v437_v6  ;;  %v443_v9 = vld [vmem:[%s6007_s27 + $0x880] sm:$0xff]  ;;  %440 = vst [vmem:[%s6012_s28 + $0x438] sm:$0xff] %v439_v7  ;;  %v447_v11 = vld [vmem:[%s6007_s27 + $0x8a8] sm:$0xff] }
  0x57   : > { %442 = vst [vmem:[%s6012_s28 + $0x440] sm:$0xff] %v441_v8  ;;  %444 = vst [vmem:[%s6012_s28 + $0x448] sm:$0xff] %v443_v9  ;;  %v445_v10 = vld [vmem:[%s6007_s27 + $0x8a0] sm:$0xff]  ;;  %v449_v12 = vld [vmem:[%s6007_s27 + $0x8b0] sm:$0xff] }
  0x58   : > { %446 = vst [vmem:[%s6012_s28 + $0x450] sm:$0xff] %v445_v10  ;;  %448 = vst [vmem:[%s6012_s28 + $0x458] sm:$0xff] %v447_v11  ;;  %v451_v13 = vld [vmem:[%s6007_s27 + $0x8d0] sm:$0xff]  ;;  %v453_v14 = vld [vmem:[%s6007_s27 + $0x8d8] sm:$0xff] }
  0x59   : > { %450 = vst [vmem:[%s6012_s28 + $0x460] sm:$0xff] %v449_v12  ;;  %v455_v15 = vld [vmem:[%s6007_s27 + $0x8e0] sm:$0xff]  ;;  %452 = vst [vmem:[%s6012_s28 + $0x468] sm:$0xff] %v451_v13  ;;  %v459_v17 = vld [vmem:[%s6007_s27 + $0x908] sm:$0xff] }
  0x5a   : > { %454 = vst [vmem:[%s6012_s28 + $0x470] sm:$0xff] %v453_v14  ;;  %456 = vst [vmem:[%s6012_s28 + $0x478] sm:$0xff] %v455_v15  ;;  %v457_v16 = vld [vmem:[%s6007_s27 + $0x900] sm:$0xff]  ;;  %v461_v18 = vld [vmem:[%s6007_s27 + $0x910] sm:$0xff] }
  0x5b   : > { %458 = vst [vmem:[%s6012_s28 + $0x480] sm:$0xff] %v457_v16  ;;  %460 = vst [vmem:[%s6012_s28 + $0x488] sm:$0xff] %v459_v17  ;;  %v463_v19 = vld [vmem:[%s6007_s27 + $0x930] sm:$0xff]  ;;  %v465_v20 = vld [vmem:[%s6007_s27 + $0x938] sm:$0xff] }
  0x5c   : > { %462 = vst [vmem:[%s6012_s28 + $0x490] sm:$0xff] %v461_v18  ;;  %v467_v21 = vld [vmem:[%s6007_s27 + $0x940] sm:$0xff]  ;;  %464 = vst [vmem:[%s6012_s28 + $0x498] sm:$0xff] %v463_v19  ;;  %v471_v23 = vld [vmem:[%s6007_s27 + $0x968] sm:$0xff] }
  0x5d   : > { %466 = vst [vmem:[%s6012_s28 + $0x4a0] sm:$0xff] %v465_v20  ;;  %468 = vst [vmem:[%s6012_s28 + $0x4a8] sm:$0xff] %v467_v21  ;;  %v469_v22 = vld [vmem:[%s6007_s27 + $0x960] sm:$0xff]  ;;  %v473_v24 = vld [vmem:[%s6007_s27 + $0x970] sm:$0xff] }
  0x5e   : > { %470 = vst [vmem:[%s6012_s28 + $0x4b0] sm:$0xff] %v469_v22  ;;  %472 = vst [vmem:[%s6012_s28 + $0x4b8] sm:$0xff] %v471_v23  ;;  %v475_v25 = vld [vmem:[%s6007_s27 + $0x990] sm:$0xff]  ;;  %v477_v26 = vld [vmem:[%s6007_s27 + $0x998] sm:$0xff] }
  0x5f   : > { %474 = vst [vmem:[%s6012_s28 + $0x4c0] sm:$0xff] %v473_v24  ;;  %v479_v27 = vld [vmem:[%s6007_s27 + $0x9a0] sm:$0xff]  ;;  %476 = vst [vmem:[%s6012_s28 + $0x4c8] sm:$0xff] %v475_v25  ;;  %v483_v29 = vld [vmem:[%s6007_s27 + $0x9c8] sm:$0xff] }
  0x60   : > { %478 = vst [vmem:[%s6012_s28 + $0x4d0] sm:$0xff] %v477_v26  ;;  %480 = vst [vmem:[%s6012_s28 + $0x4d8] sm:$0xff] %v479_v27  ;;  %v481_v28 = vld [vmem:[%s6007_s27 + $0x9c0] sm:$0xff]  ;;  %v485_v30 = vld [vmem:[%s6007_s27 + $0x9d0] sm:$0xff] }
  0x61   : > { %482 = vst [vmem:[%s6012_s28 + $0x4e0] sm:$0xff] %v481_v28  ;;  %484 = vst [vmem:[%s6012_s28 + $0x4e8] sm:$0xff] %v483_v29  ;;  %v487_v31 = vld [vmem:[%s6007_s27 + $0x9f0] sm:$0xff]  ;;  %v489_v32 = vld [vmem:[%s6007_s27 + $0x9f8] sm:$0xff] }
  0x62   : > { %486 = vst [vmem:[%s6012_s28 + $0x4f0] sm:$0xff] %v485_v30  ;;  %v491_v33 = vld [vmem:[%s6007_s27 + $0xa00] sm:$0xff]  ;;  %488 = vst [vmem:[%s6012_s28 + $0x4f8] sm:$0xff] %v487_v31  ;;  %v495_v35 = vld [vmem:[%s6007_s27 + $0xa28] sm:$0xff] }
  0x63   : > { %490 = vst [vmem:[%s6012_s28 + $0x500] sm:$0xff] %v489_v32  ;;  %492 = vst [vmem:[%s6012_s28 + $0x508] sm:$0xff] %v491_v33  ;;  %v493_v34 = vld [vmem:[%s6007_s27 + $0xa20] sm:$0xff]  ;;  %v497_v36 = vld [vmem:[%s6007_s27 + $0xa30] sm:$0xff] }
  0x64   : > { %494 = vst [vmem:[%s6012_s28 + $0x510] sm:$0xff] %v493_v34  ;;  %496 = vst [vmem:[%s6012_s28 + $0x518] sm:$0xff] %v495_v35  ;;  %v499_v37 = vld [vmem:[%s6007_s27 + $0xa50] sm:$0xff]  ;;  %v501_v38 = vld [vmem:[%s6007_s27 + $0xa58] sm:$0xff] }
  0x65   : > { %498 = vst [vmem:[%s6012_s28 + $0x520] sm:$0xff] %v497_v36  ;;  %v503_v39 = vld [vmem:[%s6007_s27 + $0xa60] sm:$0xff]  ;;  %500 = vst [vmem:[%s6012_s28 + $0x528] sm:$0xff] %v499_v37  ;;  %v507_v41 = vld [vmem:[%s6007_s27 + $0xa88] sm:$0xff] }
  0x66   : > { %502 = vst [vmem:[%s6012_s28 + $0x530] sm:$0xff] %v501_v38  ;;  %504 = vst [vmem:[%s6012_s28 + $0x538] sm:$0xff] %v503_v39  ;;  %v505_v40 = vld [vmem:[%s6007_s27 + $0xa80] sm:$0xff]  ;;  %v509_v42 = vld [vmem:[%s6007_s27 + $0xa90] sm:$0xff] }
  0x67   : > { %506 = vst [vmem:[%s6012_s28 + $0x540] sm:$0xff] %v505_v40  ;;  %508 = vst [vmem:[%s6012_s28 + $0x548] sm:$0xff] %v507_v41  ;;  %v511_v43 = vld [vmem:[%s6007_s27 + $0xab0] sm:$0xff]  ;;  %v513_v44 = vld [vmem:[%s6007_s27 + $0xab8] sm:$0xff] }
  0x68   : > { %510 = vst [vmem:[%s6012_s28 + $0x550] sm:$0xff] %v509_v42  ;;  %v515_v45 = vld [vmem:[%s6007_s27 + $0xac0] sm:$0xff]  ;;  %512 = vst [vmem:[%s6012_s28 + $0x558] sm:$0xff] %v511_v43  ;;  %v519_v47 = vld [vmem:[%s6007_s27 + $0xae8] sm:$0xff] }
  0x69   : > { %514 = vst [vmem:[%s6012_s28 + $0x560] sm:$0xff] %v513_v44  ;;  %516 = vst [vmem:[%s6012_s28 + $0x568] sm:$0xff] %v515_v45  ;;  %v517_v46 = vld [vmem:[%s6007_s27 + $0xae0] sm:$0xff]  ;;  %v521_v48 = vld [vmem:[%s6007_s27 + $0xaf0] sm:$0xff] }
  0x6a   : > { %518 = vst [vmem:[%s6012_s28 + $0x570] sm:$0xff] %v517_v46  ;;  %520 = vst [vmem:[%s6012_s28 + $0x578] sm:$0xff] %v519_v47  ;;  %v523_v49 = vld [vmem:[%s6007_s27 + $0xb10] sm:$0xff]  ;;  %v525_v50 = vld [vmem:[%s6007_s27 + $0xb18] sm:$0xff] }
  0x6b   : > { %522 = vst [vmem:[%s6012_s28 + $0x580] sm:$0xff] %v521_v48  ;;  %v527_v51 = vld [vmem:[%s6007_s27 + $0xb20] sm:$0xff]  ;;  %524 = vst [vmem:[%s6012_s28 + $0x588] sm:$0xff] %v523_v49  ;;  %v531_v53 = vld [vmem:[%s6007_s27 + $0xb48] sm:$0xff] }
  0x6c   : > { %526 = vst [vmem:[%s6012_s28 + $0x590] sm:$0xff] %v525_v50  ;;  %528 = vst [vmem:[%s6012_s28 + $0x598] sm:$0xff] %v527_v51  ;;  %v529_v52 = vld [vmem:[%s6007_s27 + $0xb40] sm:$0xff]  ;;  %v533_v54 = vld [vmem:[%s6007_s27 + $0xb50] sm:$0xff] }
  0x6d   : > { %530 = vst [vmem:[%s6012_s28 + $0x5a0] sm:$0xff] %v529_v52  ;;  %532 = vst [vmem:[%s6012_s28 + $0x5a8] sm:$0xff] %v531_v53  ;;  %v535_v55 = vld [vmem:[%s6007_s27 + $0xb70] sm:$0xff]  ;;  %v537_v56 = vld [vmem:[%s6007_s27 + $0xb78] sm:$0xff] }
  0x6e   : > { %534 = vst [vmem:[%s6012_s28 + $0x5b0] sm:$0xff] %v533_v54  ;;  %v539_v57 = vld [vmem:[%s6007_s27 + $0xb80] sm:$0xff]  ;;  %536 = vst [vmem:[%s6012_s28 + $0x5b8] sm:$0xff] %v535_v55  ;;  %v543_v59 = vld [vmem:[%s6007_s27 + $0xba8] sm:$0xff] }
  0x6f   : > { %538 = vst [vmem:[%s6012_s28 + $0x5c0] sm:$0xff] %v537_v56  ;;  %540 = vst [vmem:[%s6012_s28 + $0x5c8] sm:$0xff] %v539_v57  ;;  %v541_v58 = vld [vmem:[%s6007_s27 + $0xba0] sm:$0xff]  ;;  %v545_v60 = vld [vmem:[%s6007_s27 + $0xbb0] sm:$0xff] }
  0x70   : > { %542 = vst [vmem:[%s6012_s28 + $0x5d0] sm:$0xff] %v541_v58  ;;  %544 = vst [vmem:[%s6012_s28 + $0x5d8] sm:$0xff] %v543_v59  ;;  %v547_v61 = vld [vmem:[%s6007_s27 + $0xbd0] sm:$0xff]  ;;  %v549_v62 = vld [vmem:[%s6007_s27 + $0xbd8] sm:$0xff] }
  0x71   : > { %546 = vst [vmem:[%s6012_s28 + $0x5e0] sm:$0xff] %v545_v60  ;;  %v551_v63 = vld [vmem:[%s6007_s27 + $0xbe0] sm:$0xff]  ;;  %548 = vst [vmem:[%s6012_s28 + $0x5e8] sm:$0xff] %v547_v61  ;;  %v555_v1 = vld [vmem:[%s6007_s27 + $0xc08] sm:$0xff] }
  0x72   : > { %550 = vst [vmem:[%s6012_s28 + $0x5f0] sm:$0xff] %v549_v62  ;;  %552 = vst [vmem:[%s6012_s28 + $0x5f8] sm:$0xff] %v551_v63  ;;  %v553_v0 = vld [vmem:[%s6007_s27 + $0xc00] sm:$0xff]  ;;  %v557_v2 = vld [vmem:[%s6007_s27 + $0xc10] sm:$0xff] }
  0x73   : > { %554 = vst [vmem:[%s6012_s28 + $0x600] sm:$0xff] %v553_v0  ;;  %556 = vst [vmem:[%s6012_s28 + $0x608] sm:$0xff] %v555_v1  ;;  %v559_v3 = vld [vmem:[%s6007_s27 + $0xc30] sm:$0xff]  ;;  %v561_v4 = vld [vmem:[%s6007_s27 + $0xc38] sm:$0xff] }
  0x74   : > { %558 = vst [vmem:[%s6012_s28 + $0x610] sm:$0xff] %v557_v2  ;;  %v563_v5 = vld [vmem:[%s6007_s27 + $0xc40] sm:$0xff]  ;;  %560 = vst [vmem:[%s6012_s28 + $0x618] sm:$0xff] %v559_v3  ;;  %v567_v7 = vld [vmem:[%s6007_s27 + $0xc68] sm:$0xff] }
  0x75   : > { %562 = vst [vmem:[%s6012_s28 + $0x620] sm:$0xff] %v561_v4  ;;  %564 = vst [vmem:[%s6012_s28 + $0x628] sm:$0xff] %v563_v5  ;;  %v565_v6 = vld [vmem:[%s6007_s27 + $0xc60] sm:$0xff]  ;;  %v569_v8 = vld [vmem:[%s6007_s27 + $0xc70] sm:$0xff] }
  0x76   : > { %566 = vst [vmem:[%s6012_s28 + $0x630] sm:$0xff] %v565_v6  ;;  %568 = vst [vmem:[%s6012_s28 + $0x638] sm:$0xff] %v567_v7  ;;  %v571_v9 = vld [vmem:[%s6007_s27 + $0xc90] sm:$0xff]  ;;  %v573_v10 = vld [vmem:[%s6007_s27 + $0xc98] sm:$0xff] }
  0x77   : > { %570 = vst [vmem:[%s6012_s28 + $0x640] sm:$0xff] %v569_v8  ;;  %v575_v11 = vld [vmem:[%s6007_s27 + $0xca0] sm:$0xff]  ;;  %572 = vst [vmem:[%s6012_s28 + $0x648] sm:$0xff] %v571_v9  ;;  %v579_v13 = vld [vmem:[%s6007_s27 + $0xcc8] sm:$0xff] }
  0x78   : > { %574 = vst [vmem:[%s6012_s28 + $0x650] sm:$0xff] %v573_v10  ;;  %576 = vst [vmem:[%s6012_s28 + $0x658] sm:$0xff] %v575_v11  ;;  %v577_v12 = vld [vmem:[%s6007_s27 + $0xcc0] sm:$0xff]  ;;  %v581_v14 = vld [vmem:[%s6007_s27 + $0xcd0] sm:$0xff] }
  0x79   : > { %578 = vst [vmem:[%s6012_s28 + $0x660] sm:$0xff] %v577_v12  ;;  %580 = vst [vmem:[%s6012_s28 + $0x668] sm:$0xff] %v579_v13  ;;  %v583_v15 = vld [vmem:[%s6007_s27 + $0xcf0] sm:$0xff]  ;;  %v585_v16 = vld [vmem:[%s6007_s27 + $0xcf8] sm:$0xff] }
  0x7a   : > { %582 = vst [vmem:[%s6012_s28 + $0x670] sm:$0xff] %v581_v14  ;;  %v587_v17 = vld [vmem:[%s6007_s27 + $0xd00] sm:$0xff]  ;;  %584 = vst [vmem:[%s6012_s28 + $0x678] sm:$0xff] %v583_v15  ;;  %v591_v19 = vld [vmem:[%s6007_s27 + $0xd28] sm:$0xff] }
  0x7b   : > { %586 = vst [vmem:[%s6012_s28 + $0x680] sm:$0xff] %v585_v16  ;;  %588 = vst [vmem:[%s6012_s28 + $0x688] sm:$0xff] %v587_v17  ;;  %v589_v18 = vld [vmem:[%s6007_s27 + $0xd20] sm:$0xff]  ;;  %v593_v20 = vld [vmem:[%s6007_s27 + $0xd30] sm:$0xff] }
  0x7c   : > { %590 = vst [vmem:[%s6012_s28 + $0x690] sm:$0xff] %v589_v18  ;;  %592 = vst [vmem:[%s6012_s28 + $0x698] sm:$0xff] %v591_v19  ;;  %v595_v21 = vld [vmem:[%s6007_s27 + $0xd50] sm:$0xff]  ;;  %v597_v22 = vld [vmem:[%s6007_s27 + $0xd58] sm:$0xff] }
  0x7d   : > { %594 = vst [vmem:[%s6012_s28 + $0x6a0] sm:$0xff] %v593_v20  ;;  %v599_v23 = vld [vmem:[%s6007_s27 + $0xd60] sm:$0xff]  ;;  %596 = vst [vmem:[%s6012_s28 + $0x6a8] sm:$0xff] %v595_v21  ;;  %v603_v25 = vld [vmem:[%s6007_s27 + $0xd88] sm:$0xff] }
  0x7e   : > { %598 = vst [vmem:[%s6012_s28 + $0x6b0] sm:$0xff] %v597_v22  ;;  %600 = vst [vmem:[%s6012_s28 + $0x6b8] sm:$0xff] %v599_v23  ;;  %v601_v24 = vld [vmem:[%s6007_s27 + $0xd80] sm:$0xff]  ;;  %v605_v26 = vld [vmem:[%s6007_s27 + $0xd90] sm:$0xff] }
  0x7f   : > { %602 = vst [vmem:[%s6012_s28 + $0x6c0] sm:$0xff] %v601_v24  ;;  %604 = vst [vmem:[%s6012_s28 + $0x6c8] sm:$0xff] %v603_v25  ;;  %v607_v27 = vld [vmem:[%s6007_s27 + $0xdb0] sm:$0xff]  ;;  %v609_v28 = vld [vmem:[%s6007_s27 + $0xdb8] sm:$0xff] }
  0x80   : > { %606 = vst [vmem:[%s6012_s28 + $0x6d0] sm:$0xff] %v605_v26  ;;  %v611_v29 = vld [vmem:[%s6007_s27 + $0xdc0] sm:$0xff]  ;;  %608 = vst [vmem:[%s6012_s28 + $0x6d8] sm:$0xff] %v607_v27  ;;  %v615_v31 = vld [vmem:[%s6007_s27 + $0xde8] sm:$0xff] }
  0x81   : > { %610 = vst [vmem:[%s6012_s28 + $0x6e0] sm:$0xff] %v609_v28  ;;  %612 = vst [vmem:[%s6012_s28 + $0x6e8] sm:$0xff] %v611_v29  ;;  %v613_v30 = vld [vmem:[%s6007_s27 + $0xde0] sm:$0xff]  ;;  %v617_v32 = vld [vmem:[%s6007_s27 + $0xdf0] sm:$0xff] }
  0x82   : > { %614 = vst [vmem:[%s6012_s28 + $0x6f0] sm:$0xff] %v613_v30  ;;  %616 = vst [vmem:[%s6012_s28 + $0x6f8] sm:$0xff] %v615_v31  ;;  %v619_v33 = vld [vmem:[%s6007_s27 + $0xe10] sm:$0xff]  ;;  %v621_v34 = vld [vmem:[%s6007_s27 + $0xe18] sm:$0xff] }
  0x83   : > { %618 = vst [vmem:[%s6012_s28 + $0x700] sm:$0xff] %v617_v32  ;;  %v623_v35 = vld [vmem:[%s6007_s27 + $0xe20] sm:$0xff]  ;;  %620 = vst [vmem:[%s6012_s28 + $0x708] sm:$0xff] %v619_v33  ;;  %v627_v37 = vld [vmem:[%s6007_s27 + $0xe48] sm:$0xff] }
  0x84   : > { %622 = vst [vmem:[%s6012_s28 + $0x710] sm:$0xff] %v621_v34  ;;  %624 = vst [vmem:[%s6012_s28 + $0x718] sm:$0xff] %v623_v35  ;;  %v625_v36 = vld [vmem:[%s6007_s27 + $0xe40] sm:$0xff]  ;;  %v629_v38 = vld [vmem:[%s6007_s27 + $0xe50] sm:$0xff] }
  0x85   : > { %626 = vst [vmem:[%s6012_s28 + $0x720] sm:$0xff] %v625_v36  ;;  %628 = vst [vmem:[%s6012_s28 + $0x728] sm:$0xff] %v627_v37  ;;  %v631_v39 = vld [vmem:[%s6007_s27 + $0xe70] sm:$0xff]  ;;  %v633_v40 = vld [vmem:[%s6007_s27 + $0xe78] sm:$0xff] }
  0x86   : > { %630 = vst [vmem:[%s6012_s28 + $0x730] sm:$0xff] %v629_v38  ;;  %v635_v41 = vld [vmem:[%s6007_s27 + $0xe80] sm:$0xff]  ;;  %632 = vst [vmem:[%s6012_s28 + $0x738] sm:$0xff] %v631_v39  ;;  %v639_v43 = vld [vmem:[%s6007_s27 + $0xea8] sm:$0xff] }
  0x87   : > { %634 = vst [vmem:[%s6012_s28 + $0x740] sm:$0xff] %v633_v40  ;;  %636 = vst [vmem:[%s6012_s28 + $0x748] sm:$0xff] %v635_v41  ;;  %v637_v42 = vld [vmem:[%s6007_s27 + $0xea0] sm:$0xff]  ;;  %v641_v44 = vld [vmem:[%s6007_s27 + $0xeb0] sm:$0xff] }
  0x88   : > { %638 = vst [vmem:[%s6012_s28 + $0x750] sm:$0xff] %v637_v42  ;;  %640 = vst [vmem:[%s6012_s28 + $0x758] sm:$0xff] %v639_v43  ;;  %v643_v45 = vld [vmem:[%s6007_s27 + $0xed0] sm:$0xff]  ;;  %v645_v46 = vld [vmem:[%s6007_s27 + $0xed8] sm:$0xff] }
  0x89   : > { %642 = vst [vmem:[%s6012_s28 + $0x760] sm:$0xff] %v641_v44  ;;  %v647_v47 = vld [vmem:[%s6007_s27 + $0xee0] sm:$0xff]  ;;  %644 = vst [vmem:[%s6012_s28 + $0x768] sm:$0xff] %v643_v45  ;;  %v651_v49 = vld [vmem:[%s6007_s27 + $0xf08] sm:$0xff] }
  0x8a   : > { %646 = vst [vmem:[%s6012_s28 + $0x770] sm:$0xff] %v645_v46  ;;  %648 = vst [vmem:[%s6012_s28 + $0x778] sm:$0xff] %v647_v47  ;;  %v649_v48 = vld [vmem:[%s6007_s27 + $0xf00] sm:$0xff]  ;;  %v653_v50 = vld [vmem:[%s6007_s27 + $0xf10] sm:$0xff] }
  0x8b   : > { %650 = vst [vmem:[%s6012_s28 + $0x780] sm:$0xff] %v649_v48  ;;  %652 = vst [vmem:[%s6012_s28 + $0x788] sm:$0xff] %v651_v49  ;;  %v655_v51 = vld [vmem:[%s6007_s27 + $0xf30] sm:$0xff]  ;;  %v657_v52 = vld [vmem:[%s6007_s27 + $0xf38] sm:$0xff] }
  0x8c   : > { %654 = vst [vmem:[%s6012_s28 + $0x790] sm:$0xff] %v653_v50  ;;  %v659_v53 = vld [vmem:[%s6007_s27 + $0xf40] sm:$0xff]  ;;  %656 = vst [vmem:[%s6012_s28 + $0x798] sm:$0xff] %v655_v51  ;;  %v663_v55 = vld [vmem:[%s6007_s27 + $0xf68] sm:$0xff] }
  0x8d   : > { %658 = vst [vmem:[%s6012_s28 + $0x7a0] sm:$0xff] %v657_v52  ;;  %660 = vst [vmem:[%s6012_s28 + $0x7a8] sm:$0xff] %v659_v53  ;;  %v661_v54 = vld [vmem:[%s6007_s27 + $0xf60] sm:$0xff]  ;;  %v665_v56 = vld [vmem:[%s6007_s27 + $0xf70] sm:$0xff] }
  0x8e   : > { %662 = vst [vmem:[%s6012_s28 + $0x7b0] sm:$0xff] %v661_v54  ;;  %664 = vst [vmem:[%s6012_s28 + $0x7b8] sm:$0xff] %v663_v55  ;;  %v667_v57 = vld [vmem:[%s6007_s27 + $0xf90] sm:$0xff]  ;;  %v669_v58 = vld [vmem:[%s6007_s27 + $0xf98] sm:$0xff] }
  0x8f   : > { %666 = vst [vmem:[%s6012_s28 + $0x7c0] sm:$0xff] %v665_v56  ;;  %v671_v59 = vld [vmem:[%s6007_s27 + $0xfa0] sm:$0xff]  ;;  %668 = vst [vmem:[%s6012_s28 + $0x7c8] sm:$0xff] %v667_v57  ;;  %v675_v61 = vld [vmem:[%s6007_s27 + $0xfc8] sm:$0xff] }
  0x90   : > { %670 = vst [vmem:[%s6012_s28 + $0x7d0] sm:$0xff] %v669_v58  ;;  %672 = vst [vmem:[%s6012_s28 + $0x7d8] sm:$0xff] %v671_v59  ;;  %v673_v60 = vld [vmem:[%s6007_s27 + $0xfc0] sm:$0xff]  ;;  %v677_v62 = vld [vmem:[%s6007_s27 + $0xfd0] sm:$0xff] }
  0x91   : > { %674 = vst [vmem:[%s6012_s28 + $0x7e0] sm:$0xff] %v673_v60  ;;  %676 = vst [vmem:[%s6012_s28 + $0x7e8] sm:$0xff] %v675_v61  ;;  %v679_v63 = vld [vmem:[%s6007_s27 + $0xff0] sm:$0xff]  ;;  %v681_v0 = vld [vmem:[%s6007_s27 + $0xff8] sm:$0xff] }
  0x92   : > { %678 = vst [vmem:[%s6012_s28 + $0x7f0] sm:$0xff] %v677_v62  ;;  %v683_v1 = vld [vmem:[%s6007_s27 + $0x1000] sm:$0xff]  ;;  %680 = vst [vmem:[%s6012_s28 + $0x7f8] sm:$0xff] %v679_v63  ;;  %v687_v3 = vld [vmem:[%s6007_s27 + $0x1028] sm:$0xff] }
  0x93   : > { %682 = vst [vmem:[%s6012_s28 + $0x800] sm:$0xff] %v681_v0  ;;  %684 = vst [vmem:[%s6012_s28 + $0x808] sm:$0xff] %v683_v1  ;;  %v685_v2 = vld [vmem:[%s6007_s27 + $0x1020] sm:$0xff]  ;;  %v689_v4 = vld [vmem:[%s6007_s27 + $0x1030] sm:$0xff] }
  0x94   : > { %686 = vst [vmem:[%s6012_s28 + $0x810] sm:$0xff] %v685_v2  ;;  %688 = vst [vmem:[%s6012_s28 + $0x818] sm:$0xff] %v687_v3  ;;  %v691_v5 = vld [vmem:[%s6007_s27 + $0x1050] sm:$0xff]  ;;  %v693_v6 = vld [vmem:[%s6007_s27 + $0x1058] sm:$0xff] }
  0x95   : > { %690 = vst [vmem:[%s6012_s28 + $0x820] sm:$0xff] %v689_v4  ;;  %v695_v7 = vld [vmem:[%s6007_s27 + $0x1060] sm:$0xff]  ;;  %692 = vst [vmem:[%s6012_s28 + $0x828] sm:$0xff] %v691_v5  ;;  %v699_v9 = vld [vmem:[%s6007_s27 + $0x1088] sm:$0xff] }
  0x96   : > { %694 = vst [vmem:[%s6012_s28 + $0x830] sm:$0xff] %v693_v6  ;;  %696 = vst [vmem:[%s6012_s28 + $0x838] sm:$0xff] %v695_v7  ;;  %v697_v8 = vld [vmem:[%s6007_s27 + $0x1080] sm:$0xff]  ;;  %v701_v10 = vld [vmem:[%s6007_s27 + $0x1090] sm:$0xff] }
  0x97   : > { %698 = vst [vmem:[%s6012_s28 + $0x840] sm:$0xff] %v697_v8  ;;  %700 = vst [vmem:[%s6012_s28 + $0x848] sm:$0xff] %v699_v9  ;;  %v703_v11 = vld [vmem:[%s6007_s27 + $0x10b0] sm:$0xff]  ;;  %v705_v12 = vld [vmem:[%s6007_s27 + $0x10b8] sm:$0xff] }
  0x98   : > { %702 = vst [vmem:[%s6012_s28 + $0x850] sm:$0xff] %v701_v10  ;;  %v707_v13 = vld [vmem:[%s6007_s27 + $0x10c0] sm:$0xff]  ;;  %704 = vst [vmem:[%s6012_s28 + $0x858] sm:$0xff] %v703_v11  ;;  %v711_v15 = vld [vmem:[%s6007_s27 + $0x10e8] sm:$0xff] }
  0x99   : > { %706 = vst [vmem:[%s6012_s28 + $0x860] sm:$0xff] %v705_v12  ;;  %708 = vst [vmem:[%s6012_s28 + $0x868] sm:$0xff] %v707_v13  ;;  %v709_v14 = vld [vmem:[%s6007_s27 + $0x10e0] sm:$0xff]  ;;  %v713_v16 = vld [vmem:[%s6007_s27 + $0x10f0] sm:$0xff] }
  0x9a   : > { %710 = vst [vmem:[%s6012_s28 + $0x870] sm:$0xff] %v709_v14  ;;  %712 = vst [vmem:[%s6012_s28 + $0x878] sm:$0xff] %v711_v15  ;;  %v715_v17 = vld [vmem:[%s6007_s27 + $0x1110] sm:$0xff]  ;;  %v717_v18 = vld [vmem:[%s6007_s27 + $0x1118] sm:$0xff] }
  0x9b   : > { %714 = vst [vmem:[%s6012_s28 + $0x880] sm:$0xff] %v713_v16  ;;  %v719_v19 = vld [vmem:[%s6007_s27 + $0x1120] sm:$0xff]  ;;  %716 = vst [vmem:[%s6012_s28 + $0x888] sm:$0xff] %v715_v17  ;;  %v723_v21 = vld [vmem:[%s6007_s27 + $0x1148] sm:$0xff] }
  0x9c   : > { %718 = vst [vmem:[%s6012_s28 + $0x890] sm:$0xff] %v717_v18  ;;  %720 = vst [vmem:[%s6012_s28 + $0x898] sm:$0xff] %v719_v19  ;;  %v721_v20 = vld [vmem:[%s6007_s27 + $0x1140] sm:$0xff]  ;;  %v725_v22 = vld [vmem:[%s6007_s27 + $0x1150] sm:$0xff] }
  0x9d   : > { %722 = vst [vmem:[%s6012_s28 + $0x8a0] sm:$0xff] %v721_v20  ;;  %724 = vst [vmem:[%s6012_s28 + $0x8a8] sm:$0xff] %v723_v21  ;;  %v727_v23 = vld [vmem:[%s6007_s27 + $0x1170] sm:$0xff]  ;;  %v729_v24 = vld [vmem:[%s6007_s27 + $0x1178] sm:$0xff] }
  0x9e   : > { %726 = vst [vmem:[%s6012_s28 + $0x8b0] sm:$0xff] %v725_v22  ;;  %v731_v25 = vld [vmem:[%s6007_s27 + $0x1180] sm:$0xff]  ;;  %728 = vst [vmem:[%s6012_s28 + $0x8b8] sm:$0xff] %v727_v23  ;;  %v735_v27 = vld [vmem:[%s6007_s27 + $0x11a8] sm:$0xff] }
  0x9f   : > { %730 = vst [vmem:[%s6012_s28 + $0x8c0] sm:$0xff] %v729_v24  ;;  %732 = vst [vmem:[%s6012_s28 + $0x8c8] sm:$0xff] %v731_v25  ;;  %v733_v26 = vld [vmem:[%s6007_s27 + $0x11a0] sm:$0xff]  ;;  %v737_v28 = vld [vmem:[%s6007_s27 + $0x11b0] sm:$0xff] }
  0xa0   : > { %734 = vst [vmem:[%s6012_s28 + $0x8d0] sm:$0xff] %v733_v26  ;;  %736 = vst [vmem:[%s6012_s28 + $0x8d8] sm:$0xff] %v735_v27  ;;  %v739_v29 = vld [vmem:[%s6007_s27 + $0x11d0] sm:$0xff]  ;;  %v741_v30 = vld [vmem:[%s6007_s27 + $0x11d8] sm:$0xff] }
  0xa1   : > { %738 = vst [vmem:[%s6012_s28 + $0x8e0] sm:$0xff] %v737_v28  ;;  %v743_v31 = vld [vmem:[%s6007_s27 + $0x11e0] sm:$0xff]  ;;  %740 = vst [vmem:[%s6012_s28 + $0x8e8] sm:$0xff] %v739_v29  ;;  %v747_v33 = vld [vmem:[%s6007_s27 + $0x1208] sm:$0xff] }
  0xa2   : > { %742 = vst [vmem:[%s6012_s28 + $0x8f0] sm:$0xff] %v741_v30  ;;  %744 = vst [vmem:[%s6012_s28 + $0x8f8] sm:$0xff] %v743_v31  ;;  %v745_v32 = vld [vmem:[%s6007_s27 + $0x1200] sm:$0xff]  ;;  %v749_v34 = vld [vmem:[%s6007_s27 + $0x1210] sm:$0xff] }
  0xa3   : > { %746 = vst [vmem:[%s6012_s28 + $0x900] sm:$0xff] %v745_v32  ;;  %748 = vst [vmem:[%s6012_s28 + $0x908] sm:$0xff] %v747_v33  ;;  %v751_v35 = vld [vmem:[%s6007_s27 + $0x1230] sm:$0xff]  ;;  %v753_v36 = vld [vmem:[%s6007_s27 + $0x1238] sm:$0xff] }
  0xa4   : > { %750 = vst [vmem:[%s6012_s28 + $0x910] sm:$0xff] %v749_v34  ;;  %v755_v37 = vld [vmem:[%s6007_s27 + $0x1240] sm:$0xff]  ;;  %752 = vst [vmem:[%s6012_s28 + $0x918] sm:$0xff] %v751_v35  ;;  %v759_v39 = vld [vmem:[%s6007_s27 + $0x1268] sm:$0xff] }
  0xa5   : > { %754 = vst [vmem:[%s6012_s28 + $0x920] sm:$0xff] %v753_v36  ;;  %756 = vst [vmem:[%s6012_s28 + $0x928] sm:$0xff] %v755_v37  ;;  %v757_v38 = vld [vmem:[%s6007_s27 + $0x1260] sm:$0xff]  ;;  %v761_v40 = vld [vmem:[%s6007_s27 + $0x1270] sm:$0xff] }
  0xa6   : > { %758 = vst [vmem:[%s6012_s28 + $0x930] sm:$0xff] %v757_v38  ;;  %760 = vst [vmem:[%s6012_s28 + $0x938] sm:$0xff] %v759_v39  ;;  %v763_v41 = vld [vmem:[%s6007_s27 + $0x1290] sm:$0xff]  ;;  %v765_v42 = vld [vmem:[%s6007_s27 + $0x1298] sm:$0xff] }
  0xa7   : > { %762 = vst [vmem:[%s6012_s28 + $0x940] sm:$0xff] %v761_v40  ;;  %v767_v43 = vld [vmem:[%s6007_s27 + $0x12a0] sm:$0xff]  ;;  %764 = vst [vmem:[%s6012_s28 + $0x948] sm:$0xff] %v763_v41  ;;  %v771_v45 = vld [vmem:[%s6007_s27 + $0x12c8] sm:$0xff] }
  0xa8   : > { %766 = vst [vmem:[%s6012_s28 + $0x950] sm:$0xff] %v765_v42  ;;  %768 = vst [vmem:[%s6012_s28 + $0x958] sm:$0xff] %v767_v43  ;;  %v769_v44 = vld [vmem:[%s6007_s27 + $0x12c0] sm:$0xff]  ;;  %v773_v46 = vld [vmem:[%s6007_s27 + $0x12d0] sm:$0xff] }
  0xa9   : > { %770 = vst [vmem:[%s6012_s28 + $0x960] sm:$0xff] %v769_v44  ;;  %772 = vst [vmem:[%s6012_s28 + $0x968] sm:$0xff] %v771_v45  ;;  %v775_v47 = vld [vmem:[%s6007_s27 + $0x12f0] sm:$0xff]  ;;  %v777_v48 = vld [vmem:[%s6007_s27 + $0x12f8] sm:$0xff] }
  0xaa   : > { %774 = vst [vmem:[%s6012_s28 + $0x970] sm:$0xff] %v773_v46  ;;  %v779_v49 = vld [vmem:[%s6007_s27 + $0x1300] sm:$0xff]  ;;  %776 = vst [vmem:[%s6012_s28 + $0x978] sm:$0xff] %v775_v47  ;;  %v783_v51 = vld [vmem:[%s6007_s27 + $0x1328] sm:$0xff] }
  0xab   : > { %778 = vst [vmem:[%s6012_s28 + $0x980] sm:$0xff] %v777_v48  ;;  %780 = vst [vmem:[%s6012_s28 + $0x988] sm:$0xff] %v779_v49  ;;  %v781_v50 = vld [vmem:[%s6007_s27 + $0x1320] sm:$0xff]  ;;  %v785_v52 = vld [vmem:[%s6007_s27 + $0x1330] sm:$0xff] }
  0xac   : > { %782 = vst [vmem:[%s6012_s28 + $0x990] sm:$0xff] %v781_v50  ;;  %784 = vst [vmem:[%s6012_s28 + $0x998] sm:$0xff] %v783_v51  ;;  %v787_v53 = vld [vmem:[%s6007_s27 + $0x1350] sm:$0xff]  ;;  %v789_v54 = vld [vmem:[%s6007_s27 + $0x1358] sm:$0xff] }
  0xad   : > { %786 = vst [vmem:[%s6012_s28 + $0x9a0] sm:$0xff] %v785_v52  ;;  %v791_v55 = vld [vmem:[%s6007_s27 + $0x1360] sm:$0xff]  ;;  %788 = vst [vmem:[%s6012_s28 + $0x9a8] sm:$0xff] %v787_v53  ;;  %v795_v57 = vld [vmem:[%s6007_s27 + $0x1388] sm:$0xff] }
  0xae   : > { %790 = vst [vmem:[%s6012_s28 + $0x9b0] sm:$0xff] %v789_v54  ;;  %792 = vst [vmem:[%s6012_s28 + $0x9b8] sm:$0xff] %v791_v55  ;;  %v793_v56 = vld [vmem:[%s6007_s27 + $0x1380] sm:$0xff]  ;;  %v797_v58 = vld [vmem:[%s6007_s27 + $0x1390] sm:$0xff] }
  0xaf   : > { %794 = vst [vmem:[%s6012_s28 + $0x9c0] sm:$0xff] %v793_v56  ;;  %796 = vst [vmem:[%s6012_s28 + $0x9c8] sm:$0xff] %v795_v57  ;;  %v799_v59 = vld [vmem:[%s6007_s27 + $0x13b0] sm:$0xff]  ;;  %v801_v60 = vld [vmem:[%s6007_s27 + $0x13b8] sm:$0xff] }
  0xb0   : > { %798 = vst [vmem:[%s6012_s28 + $0x9d0] sm:$0xff] %v797_v58  ;;  %v803_v61 = vld [vmem:[%s6007_s27 + $0x13c0] sm:$0xff]  ;;  %800 = vst [vmem:[%s6012_s28 + $0x9d8] sm:$0xff] %v799_v59  ;;  %v807_v63 = vld [vmem:[%s6007_s27 + $0x13e8] sm:$0xff] }
  0xb1   : > { %802 = vst [vmem:[%s6012_s28 + $0x9e0] sm:$0xff] %v801_v60  ;;  %804 = vst [vmem:[%s6012_s28 + $0x9e8] sm:$0xff] %v803_v61  ;;  %v805_v62 = vld [vmem:[%s6007_s27 + $0x13e0] sm:$0xff]  ;;  %v809_v0 = vld [vmem:[%s6007_s27 + $0x13f0] sm:$0xff] }
  0xb2   : > { %806 = vst [vmem:[%s6012_s28 + $0x9f0] sm:$0xff] %v805_v62  ;;  %808 = vst [vmem:[%s6012_s28 + $0x9f8] sm:$0xff] %v807_v63  ;;  %v811_v1 = vld [vmem:[%s6007_s27 + $0x1410] sm:$0xff]  ;;  %v813_v2 = vld [vmem:[%s6007_s27 + $0x1418] sm:$0xff] }
  0xb3   : > { %810 = vst [vmem:[%s6012_s28 + $0xa00] sm:$0xff] %v809_v0  ;;  %v815_v3 = vld [vmem:[%s6007_s27 + $0x1420] sm:$0xff]  ;;  %812 = vst [vmem:[%s6012_s28 + $0xa08] sm:$0xff] %v811_v1  ;;  %v819_v5 = vld [vmem:[%s6007_s27 + $0x1448] sm:$0xff] }
  0xb4   : > { %814 = vst [vmem:[%s6012_s28 + $0xa10] sm:$0xff] %v813_v2  ;;  %816 = vst [vmem:[%s6012_s28 + $0xa18] sm:$0xff] %v815_v3  ;;  %v817_v4 = vld [vmem:[%s6007_s27 + $0x1440] sm:$0xff]  ;;  %v821_v6 = vld [vmem:[%s6007_s27 + $0x1450] sm:$0xff] }
  0xb5   : > { %818 = vst [vmem:[%s6012_s28 + $0xa20] sm:$0xff] %v817_v4  ;;  %820 = vst [vmem:[%s6012_s28 + $0xa28] sm:$0xff] %v819_v5  ;;  %v823_v7 = vld [vmem:[%s6007_s27 + $0x1470] sm:$0xff]  ;;  %v825_v8 = vld [vmem:[%s6007_s27 + $0x1478] sm:$0xff] }
  0xb6   : > { %822 = vst [vmem:[%s6012_s28 + $0xa30] sm:$0xff] %v821_v6  ;;  %v827_v9 = vld [vmem:[%s6007_s27 + $0x1480] sm:$0xff]  ;;  %824 = vst [vmem:[%s6012_s28 + $0xa38] sm:$0xff] %v823_v7  ;;  %v831_v11 = vld [vmem:[%s6007_s27 + $0x14a8] sm:$0xff] }
  0xb7   : > { %826 = vst [vmem:[%s6012_s28 + $0xa40] sm:$0xff] %v825_v8  ;;  %828 = vst [vmem:[%s6012_s28 + $0xa48] sm:$0xff] %v827_v9  ;;  %v829_v10 = vld [vmem:[%s6007_s27 + $0x14a0] sm:$0xff]  ;;  %v833_v12 = vld [vmem:[%s6007_s27 + $0x14b0] sm:$0xff] }
  0xb8   : > { %830 = vst [vmem:[%s6012_s28 + $0xa50] sm:$0xff] %v829_v10  ;;  %832 = vst [vmem:[%s6012_s28 + $0xa58] sm:$0xff] %v831_v11  ;;  %v835_v13 = vld [vmem:[%s6007_s27 + $0x14d0] sm:$0xff]  ;;  %v837_v14 = vld [vmem:[%s6007_s27 + $0x14d8] sm:$0xff] }
  0xb9   : > { %834 = vst [vmem:[%s6012_s28 + $0xa60] sm:$0xff] %v833_v12  ;;  %v839_v15 = vld [vmem:[%s6007_s27 + $0x14e0] sm:$0xff]  ;;  %836 = vst [vmem:[%s6012_s28 + $0xa68] sm:$0xff] %v835_v13  ;;  %v843_v17 = vld [vmem:[%s6007_s27 + $0x1508] sm:$0xff] }
  0xba   : > { %838 = vst [vmem:[%s6012_s28 + $0xa70] sm:$0xff] %v837_v14  ;;  %840 = vst [vmem:[%s6012_s28 + $0xa78] sm:$0xff] %v839_v15  ;;  %v841_v16 = vld [vmem:[%s6007_s27 + $0x1500] sm:$0xff]  ;;  %v845_v18 = vld [vmem:[%s6007_s27 + $0x1510] sm:$0xff] }
  0xbb   : > { %842 = vst [vmem:[%s6012_s28 + $0xa80] sm:$0xff] %v841_v16  ;;  %844 = vst [vmem:[%s6012_s28 + $0xa88] sm:$0xff] %v843_v17  ;;  %v847_v19 = vld [vmem:[%s6007_s27 + $0x1530] sm:$0xff]  ;;  %v849_v20 = vld [vmem:[%s6007_s27 + $0x1538] sm:$0xff] }
  0xbc   : > { %846 = vst [vmem:[%s6012_s28 + $0xa90] sm:$0xff] %v845_v18  ;;  %v851_v21 = vld [vmem:[%s6007_s27 + $0x1540] sm:$0xff]  ;;  %848 = vst [vmem:[%s6012_s28 + $0xa98] sm:$0xff] %v847_v19  ;;  %v855_v23 = vld [vmem:[%s6007_s27 + $0x1568] sm:$0xff] }
  0xbd   : > { %850 = vst [vmem:[%s6012_s28 + $0xaa0] sm:$0xff] %v849_v20  ;;  %852 = vst [vmem:[%s6012_s28 + $0xaa8] sm:$0xff] %v851_v21  ;;  %v853_v22 = vld [vmem:[%s6007_s27 + $0x1560] sm:$0xff]  ;;  %v857_v24 = vld [vmem:[%s6007_s27 + $0x1570] sm:$0xff] }
  0xbe   : > { %854 = vst [vmem:[%s6012_s28 + $0xab0] sm:$0xff] %v853_v22  ;;  %856 = vst [vmem:[%s6012_s28 + $0xab8] sm:$0xff] %v855_v23  ;;  %v859_v25 = vld [vmem:[%s6007_s27 + $0x1590] sm:$0xff]  ;;  %v861_v26 = vld [vmem:[%s6007_s27 + $0x1598] sm:$0xff] }
  0xbf   : > { %858 = vst [vmem:[%s6012_s28 + $0xac0] sm:$0xff] %v857_v24  ;;  %v863_v27 = vld [vmem:[%s6007_s27 + $0x15a0] sm:$0xff]  ;;  %860 = vst [vmem:[%s6012_s28 + $0xac8] sm:$0xff] %v859_v25  ;;  %v867_v29 = vld [vmem:[%s6007_s27 + $0x15c8] sm:$0xff] }
  0xc0   : > { %862 = vst [vmem:[%s6012_s28 + $0xad0] sm:$0xff] %v861_v26  ;;  %864 = vst [vmem:[%s6012_s28 + $0xad8] sm:$0xff] %v863_v27  ;;  %v865_v28 = vld [vmem:[%s6007_s27 + $0x15c0] sm:$0xff]  ;;  %v869_v30 = vld [vmem:[%s6007_s27 + $0x15d0] sm:$0xff] }
  0xc1   : > { %866 = vst [vmem:[%s6012_s28 + $0xae0] sm:$0xff] %v865_v28  ;;  %868 = vst [vmem:[%s6012_s28 + $0xae8] sm:$0xff] %v867_v29  ;;  %v871_v31 = vld [vmem:[%s6007_s27 + $0x15f0] sm:$0xff]  ;;  %v873_v32 = vld [vmem:[%s6007_s27 + $0x15f8] sm:$0xff] }
  0xc2   : > { %870 = vst [vmem:[%s6012_s28 + $0xaf0] sm:$0xff] %v869_v30  ;;  %v875_v33 = vld [vmem:[%s6007_s27 + $0x1600] sm:$0xff]  ;;  %872 = vst [vmem:[%s6012_s28 + $0xaf8] sm:$0xff] %v871_v31  ;;  %v879_v35 = vld [vmem:[%s6007_s27 + $0x1628] sm:$0xff] }
  0xc3   : > { %874 = vst [vmem:[%s6012_s28 + $0xb00] sm:$0xff] %v873_v32  ;;  %876 = vst [vmem:[%s6012_s28 + $0xb08] sm:$0xff] %v875_v33  ;;  %v877_v34 = vld [vmem:[%s6007_s27 + $0x1620] sm:$0xff]  ;;  %v881_v36 = vld [vmem:[%s6007_s27 + $0x1630] sm:$0xff] }
  0xc4   : > { %878 = vst [vmem:[%s6012_s28 + $0xb10] sm:$0xff] %v877_v34  ;;  %880 = vst [vmem:[%s6012_s28 + $0xb18] sm:$0xff] %v879_v35  ;;  %v883_v37 = vld [vmem:[%s6007_s27 + $0x1650] sm:$0xff]  ;;  %v885_v38 = vld [vmem:[%s6007_s27 + $0x1658] sm:$0xff] }
  0xc5   : > { %882 = vst [vmem:[%s6012_s28 + $0xb20] sm:$0xff] %v881_v36  ;;  %v887_v39 = vld [vmem:[%s6007_s27 + $0x1660] sm:$0xff]  ;;  %884 = vst [vmem:[%s6012_s28 + $0xb28] sm:$0xff] %v883_v37  ;;  %v891_v41 = vld [vmem:[%s6007_s27 + $0x1688] sm:$0xff] }
  0xc6   : > { %886 = vst [vmem:[%s6012_s28 + $0xb30] sm:$0xff] %v885_v38  ;;  %888 = vst [vmem:[%s6012_s28 + $0xb38] sm:$0xff] %v887_v39  ;;  %v889_v40 = vld [vmem:[%s6007_s27 + $0x1680] sm:$0xff]  ;;  %v893_v42 = vld [vmem:[%s6007_s27 + $0x1690] sm:$0xff] }
  0xc7   : > { %890 = vst [vmem:[%s6012_s28 + $0xb40] sm:$0xff] %v889_v40  ;;  %892 = vst [vmem:[%s6012_s28 + $0xb48] sm:$0xff] %v891_v41  ;;  %v895_v43 = vld [vmem:[%s6007_s27 + $0x16b0] sm:$0xff]  ;;  %v897_v44 = vld [vmem:[%s6007_s27 + $0x16b8] sm:$0xff] }
  0xc8   : > { %894 = vst [vmem:[%s6012_s28 + $0xb50] sm:$0xff] %v893_v42  ;;  %v899_v45 = vld [vmem:[%s6007_s27 + $0x16c0] sm:$0xff]  ;;  %896 = vst [vmem:[%s6012_s28 + $0xb58] sm:$0xff] %v895_v43  ;;  %v903_v47 = vld [vmem:[%s6007_s27 + $0x16e8] sm:$0xff] }
  0xc9   : > { %898 = vst [vmem:[%s6012_s28 + $0xb60] sm:$0xff] %v897_v44  ;;  %900 = vst [vmem:[%s6012_s28 + $0xb68] sm:$0xff] %v899_v45  ;;  %v901_v46 = vld [vmem:[%s6007_s27 + $0x16e0] sm:$0xff]  ;;  %v905_v48 = vld [vmem:[%s6007_s27 + $0x16f0] sm:$0xff] }
  0xca   : > { %902 = vst [vmem:[%s6012_s28 + $0xb70] sm:$0xff] %v901_v46  ;;  %904 = vst [vmem:[%s6012_s28 + $0xb78] sm:$0xff] %v903_v47  ;;  %v907_v49 = vld [vmem:[%s6007_s27 + $0x1710] sm:$0xff]  ;;  %v909_v50 = vld [vmem:[%s6007_s27 + $0x1718] sm:$0xff] }
  0xcb   : > { %906 = vst [vmem:[%s6012_s28 + $0xb80] sm:$0xff] %v905_v48  ;;  %v911_v51 = vld [vmem:[%s6007_s27 + $0x1720] sm:$0xff]  ;;  %908 = vst [vmem:[%s6012_s28 + $0xb88] sm:$0xff] %v907_v49  ;;  %v915_v53 = vld [vmem:[%s6007_s27 + $0x1748] sm:$0xff] }
  0xcc   : > { %910 = vst [vmem:[%s6012_s28 + $0xb90] sm:$0xff] %v909_v50  ;;  %912 = vst [vmem:[%s6012_s28 + $0xb98] sm:$0xff] %v911_v51  ;;  %v913_v52 = vld [vmem:[%s6007_s27 + $0x1740] sm:$0xff]  ;;  %v917_v54 = vld [vmem:[%s6007_s27 + $0x1750] sm:$0xff] }
  0xcd   : > { %914 = vst [vmem:[%s6012_s28 + $0xba0] sm:$0xff] %v913_v52  ;;  %916 = vst [vmem:[%s6012_s28 + $0xba8] sm:$0xff] %v915_v53  ;;  %v919_v55 = vld [vmem:[%s6007_s27 + $0x1770] sm:$0xff]  ;;  %v921_v56 = vld [vmem:[%s6007_s27 + $0x1778] sm:$0xff] }
  0xce   : > { %918 = vst [vmem:[%s6012_s28 + $0xbb0] sm:$0xff] %v917_v54  ;;  %v923_v57 = vld [vmem:[%s6007_s27 + $0x1780] sm:$0xff]  ;;  %920 = vst [vmem:[%s6012_s28 + $0xbb8] sm:$0xff] %v919_v55  ;;  %v927_v59 = vld [vmem:[%s6007_s27 + $0x17a8] sm:$0xff] }
  0xcf   : > { %922 = vst [vmem:[%s6012_s28 + $0xbc0] sm:$0xff] %v921_v56  ;;  %924 = vst [vmem:[%s6012_s28 + $0xbc8] sm:$0xff] %v923_v57  ;;  %v925_v58 = vld [vmem:[%s6007_s27 + $0x17a0] sm:$0xff]  ;;  %v929_v60 = vld [vmem:[%s6007_s27 + $0x17b0] sm:$0xff] }
  0xd0   : > { %926 = vst [vmem:[%s6012_s28 + $0xbd0] sm:$0xff] %v925_v58  ;;  %928 = vst [vmem:[%s6012_s28 + $0xbd8] sm:$0xff] %v927_v59  ;;  %v931_v61 = vld [vmem:[%s6007_s27 + $0x17d0] sm:$0xff]  ;;  %v933_v62 = vld [vmem:[%s6007_s27 + $0x17d8] sm:$0xff] }
  0xd1   : > { %930 = vst [vmem:[%s6012_s28 + $0xbe0] sm:$0xff] %v929_v60  ;;  %v935_v63 = vld [vmem:[%s6007_s27 + $0x17e0] sm:$0xff]  ;;  %932 = vst [vmem:[%s6012_s28 + $0xbe8] sm:$0xff] %v931_v61 }
  0xd2   : > { %934 = vst [vmem:[%s6012_s28 + $0xbf0] sm:$0xff] %v933_v62  ;;  %936 = vst [vmem:[%s6012_s28 + $0xbf8] sm:$0xff] %v935_v63 }
  0xd3 PF: > { %p4715_p6 = scmp.ge.s32.totalorder %s5938_s16, 1  ;;  %p941_p7 = scmp.lt.s32.totalorder %s5938_s16, 3 }
  0xd5   : > { %p942_p8 = pnand %p4715_p6, %p941_p7 }
  0xd6   : > { %s948_s29 = sand.u32 (!%p942_p8), 1, %s5922_s12   ;;  %p980_p9 = scmp.eq.s32.totalorder (!%p942_p8), %s5930_s14, 0 }
  0xd7   : > { %945 = sbr.rel (%p942_p8) target bundleno = 1124 (0x464), region = 47 }
  0xd8   : > { %s5136_s30 = smul.u32 (!%p942_p8), 3072, %s948_s29 }
  0xda   : > { %s6783_s4 = scalar_lea.vmem (!%p942_p8), [#allocation4], %s5136_s30 }
  0xdc   : > { %985 = sbr.rel (!%p980_p9) target bundleno = 230 (0xe6), region = 55  ;;  %v5940_v0 = vmov (%p980_p9), 0.0  }
  0xdd   : > { %986 = vst [vmem:[#allocation2 + $0x30] sm:$0xff] (%p980_p9), %v5940_v0  ;;  %987 = vst [vmem:[#allocation2] sm:$0xff] (%p980_p9), %v5940_v0 }
  0xde   : > { %988 = vst [vmem:[#allocation2 + $0x18] sm:$0xff] (%p980_p9), %v5940_v0  ;;  %989 = vst [vmem:[#allocation2 + $0x10] sm:$0xff] (%p980_p9), %v5940_v0 }
  0xdf   : > { %990 = vst [vmem:[#allocation2 + $0x20] sm:$0xff] (%p980_p9), %v5940_v0  ;;  %991 = vst [vmem:[#allocation2 + $0x28] sm:$0xff] (%p980_p9), %v5940_v0 }
  0xe0   : > { %992 = vst [vmem:[#allocation2 + $0x40] sm:$0xff] (%p980_p9), %v5940_v0  ;;  %993 = vst [vmem:[#allocation2 + $0x38] sm:$0xff] (%p980_p9), %v5940_v0 }
  0xe1   : > { %994 = vst [vmem:[#allocation2 + $0x8] sm:$0xff] %v5940_v0  ;;  %995 = vst [vmem:[#allocation3 + $0x40] sm:$0xff] %v5940_v0 }
  0xe2   : > { %996 = vst [vmem:[#allocation3 + $0x8] sm:$0xff] %v5940_v0  ;;  %997 = vst [vmem:[#allocation3 + $0x38] sm:$0xff] %v5940_v0 }
  0xe3   : > { %998 = vst [vmem:[#allocation3 + $0x30] sm:$0xff] %v5940_v0  ;;  %999 = vst [vmem:[#allocation3] sm:$0xff] %v5940_v0 }
  0xe4   : > { %1000 = vst [vmem:[#allocation3 + $0x28] sm:$0xff] %v5940_v0  ;;  %1001 = vst [vmem:[#allocation3 + $0x10] sm:$0xff] %v5940_v0 }
  0xe5   : > { %1002 = vst [vmem:[#allocation3 + $0x20] sm:$0xff] %v5940_v0  ;;  %1003 = vst [vmem:[#allocation3 + $0x18] sm:$0xff] %v5940_v0 }
  0xe6 PF: > { %v5196_v1 = vld [vmem:[%s6783_s4 + $0x154] ss:$24 sps:$4 sm:$0xff]   ;;  %v5200_v3 = vld [vmem:[%s6783_s4 + $0x150] ss:$24 sps:$4 sm:$0xff]   ;;  %v5202_v5 = vld [vmem:[%s6783_s4 + $0x124] ss:$24 sps:$4 sm:$0xff]  }
  0xe7   : > { %v5198_v2 = vld [vmem:[%s6783_s4 + $0x454] ss:$24 sps:$4 sm:$0xff]   ;;  %3452 = vmatprep.subr.bf16.mxu0 %v5196_v1  ;;  %v5201_v4 = vld [vmem:[%s6783_s4 + $0x450] ss:$24 sps:$4 sm:$0xff]   ;;  %v5204_v6 = vld [vmem:[%s6783_s4 + $0x424] ss:$24 sps:$4 sm:$0xff]  }
  0xe8   : > { %3515 = vmatprep.subr.bf16.mxu1 %v5198_v2  ;;  %3453 = vmatpush1.bf16.msra.mxu0 %v5200_v3  ;;  %v5206_v7 = vld [vmem:[%s6783_s4 + $0x120] ss:$24 sps:$4 sm:$0xff]   ;;  %v5208_v9 = vld [vmem:[%s6783_s4 + $0xf4] ss:$24 sps:$4 sm:$0xff]   ;;  %v5212_v11 = vld [vmem:[%s6783_s4 + $0xf0] ss:$24 sps:$4 sm:$0xff]  }
  0xe9   : > { %3516 = vmatpush1.bf16.msra.mxu1 %v5201_v4  ;;  %3454 = vmatprep.subr.bf16.mxu0 %v5202_v5  ;;  %v5207_v8 = vld [vmem:[%s6783_s4 + $0x420] ss:$24 sps:$4 sm:$0xff]   ;;  %v5210_v10 = vld [vmem:[%s6783_s4 + $0x3f4] ss:$24 sps:$4 sm:$0xff]   ;;  %v5213_v12 = vld [vmem:[%s6783_s4 + $0x3f0] ss:$24 sps:$4 sm:$0xff]  }
  0xea   : > { %3517 = vmatprep.subr.bf16.mxu1 %v5204_v6  ;;  %v5214_v13 = vld [vmem:[%s6783_s4 + $0xc4] ss:$24 sps:$4 sm:$0xff]   ;;  %v5218_v15 = vld [vmem:[%s6783_s4 + $0xc0] ss:$24 sps:$4 sm:$0xff]   ;;  %v5220_v17 = vld [vmem:[%s6783_s4 + $0x94] ss:$24 sps:$4 sm:$0xff]  }
  0xeb   : > { %v5216_v14 = vld [vmem:[%s6783_s4 + $0x3c4] ss:$24 sps:$4 sm:$0xff]   ;;  %v5219_v16 = vld [vmem:[%s6783_s4 + $0x3c0] ss:$24 sps:$4 sm:$0xff]   ;;  %v5222_v18 = vld [vmem:[%s6783_s4 + $0x394] ss:$24 sps:$4 sm:$0xff]  }
  0xec   : > { %3455 = vmatpush1.bf16.msra.mxu0 %v5206_v7  ;;  %v5224_v19 = vld [vmem:[%s6783_s4 + $0x90] ss:$24 sps:$4 sm:$0xff]   ;;  %v5226_v21 = vld [vmem:[%s6783_s4 + $0x64] ss:$24 sps:$4 sm:$0xff]   ;;  %v5230_v23 = vld [vmem:[%s6783_s4 + $0x60] ss:$24 sps:$4 sm:$0xff]  }
  0xed   : > { %3518 = vmatpush1.bf16.msra.mxu1 %v5207_v8  ;;  %3456 = vmatprep.subr.bf16.mxu0 %v5208_v9  ;;  %v5225_v20 = vld [vmem:[%s6783_s4 + $0x390] ss:$24 sps:$4 sm:$0xff]   ;;  %v5228_v22 = vld [vmem:[%s6783_s4 + $0x364] ss:$24 sps:$4 sm:$0xff]   ;;  %v5231_v24 = vld [vmem:[%s6783_s4 + $0x360] ss:$24 sps:$4 sm:$0xff]  }
  0xee   : > { %3519 = vmatprep.subr.bf16.mxu1 %v5210_v10  ;;  %v5232_v25 = vld [vmem:[%s6783_s4 + $0x34] ss:$24 sps:$4 sm:$0xff]   ;;  %v5236_v27 = vld [vmem:[%s6783_s4 + $0x30] ss:$24 sps:$4 sm:$0xff]   ;;  %v5238_v29 = vld [vmem:[%s6783_s4 + $0x4] ss:$24 sps:$4 sm:$0xff]  }
  0xef   : > { %v5234_v26 = vld [vmem:[%s6783_s4 + $0x334] ss:$24 sps:$4 sm:$0xff]   ;;  %v5237_v28 = vld [vmem:[%s6783_s4 + $0x330] ss:$24 sps:$4 sm:$0xff]   ;;  %v5240_v30 = vld [vmem:[%s6783_s4 + $0x304] ss:$24 sps:$4 sm:$0xff]  }
  0xf0   : > { %3457 = vmatpush1.bf16.msra.mxu0 %v5212_v11  ;;  %v5242_v31 = vld [vmem:[%s6783_s4] ss:$24 sps:$4 sm:$0xff]   ;;  %v5244_v33 = vld [vmem:[%s6783_s4 + $0x2d4] ss:$24 sps:$4 sm:$0xff]   ;;  %v5248_v35 = vld [vmem:[%s6783_s4 + $0x2d0] ss:$24 sps:$4 sm:$0xff]  }
  0xf1   : > { %3520 = vmatpush1.bf16.msra.mxu1 %v5213_v12  ;;  %3458 = vmatprep.subr.bf16.mxu0 %v5214_v13  ;;  %v5243_v32 = vld [vmem:[%s6783_s4 + $0x300] ss:$24 sps:$4 sm:$0xff]   ;;  %v5246_v34 = vld [vmem:[%s6783_s4 + $0x5d4] ss:$24 sps:$4 sm:$0xff]   ;;  %v5249_v36 = vld [vmem:[%s6783_s4 + $0x5d0] ss:$24 sps:$4 sm:$0xff]  }
  0xf2   : > { %3521 = vmatprep.subr.bf16.mxu1 %v5216_v14  ;;  %v5250_v37 = vld [vmem:[%s6783_s4 + $0x2a4] ss:$24 sps:$4 sm:$0xff]   ;;  %v5254_v39 = vld [vmem:[%s6783_s4 + $0x2a0] ss:$24 sps:$4 sm:$0xff]   ;;  %v5256_v41 = vld [vmem:[%s6783_s4 + $0x274] ss:$24 sps:$4 sm:$0xff]  }
  0xf3   : > { %v5252_v38 = vld [vmem:[%s6783_s4 + $0x5a4] ss:$24 sps:$4 sm:$0xff]   ;;  %v5255_v40 = vld [vmem:[%s6783_s4 + $0x5a0] ss:$24 sps:$4 sm:$0xff]   ;;  %v5258_v42 = vld [vmem:[%s6783_s4 + $0x574] ss:$24 sps:$4 sm:$0xff]  }
  0xf4   : > { %3459 = vmatpush1.bf16.msra.mxu0 %v5218_v15  ;;  %v5260_v43 = vld [vmem:[%s6783_s4 + $0x270] ss:$24 sps:$4 sm:$0xff]   ;;  %v5262_v45 = vld [vmem:[%s6783_s4 + $0x244] ss:$24 sps:$4 sm:$0xff]   ;;  %v5266_v47 = vld [vmem:[%s6783_s4 + $0x240] ss:$24 sps:$4 sm:$0xff]  }
  0xf5   : > { %3522 = vmatpush1.bf16.msra.mxu1 %v5219_v16  ;;  %3460 = vmatprep.subr.bf16.mxu0 %v5220_v17  ;;  %v5261_v44 = vld [vmem:[%s6783_s4 + $0x570] ss:$24 sps:$4 sm:$0xff]   ;;  %v5264_v46 = vld [vmem:[%s6783_s4 + $0x544] ss:$24 sps:$4 sm:$0xff]   ;;  %v5267_v48 = vld [vmem:[%s6783_s4 + $0x540] ss:$24 sps:$4 sm:$0xff]  }
  0xf6   : > { %3523 = vmatprep.subr.bf16.mxu1 %v5222_v18  ;;  %v1004_v49 = vld [vmem:[%s7809_s0] sm:$0xff]  ;;  %v1005_v51 = vld [vmem:[%s7809_s0 + $0x8] sm:$0xff]  ;;  %p4550_p10 = scmp.eq.s32.totalorder %s5930_s14, 1 }
  0xf7   : > { %v1008_v50 = vld [vmem:[%s7809_s0 + $0x20] sm:$0xff]  ;;  %v1009_v52 = vld [vmem:[%s7809_s0 + $0x28] sm:$0xff] }
  0xf8   : > { %3461 = vmatpush1.bf16.msra.mxu0 %v5224_v19  ;;  %v5268_v53 = vld [vmem:[%s6783_s4 + $0x214] ss:$24 sps:$4 sm:$0xff]   ;;  %v6846_v54 = vcombine.high %v1004_v49, %v1008_v50  ;;  %v6848_v55 = vcombine.high %v1005_v51, %v1009_v52  ;;  %v5272_v57 = vld [vmem:[%s6783_s4 + $0x210] ss:$24 sps:$4 sm:$0xff]   ;;  %v5274_v59 = vld [vmem:[%s6783_s4 + $0x1e4] ss:$24 sps:$4 sm:$0xff]   ;;  %v6869_v9 = vcombine.low %v1004_v49, %v1008_v50  ;;  %v6871_v10 = vcombine.low %v1005_v51, %v1009_v52 }
  0xf9   : > { %3524 = vmatpush1.bf16.msra.mxu1 %v5225_v20  ;;  %3462 = vmatprep.subr.bf16.mxu0 %v5226_v21  ;;  %v5270_v56 = vld [vmem:[%s6783_s4 + $0x514] ss:$24 sps:$4 sm:$0xff]   ;;  %v5273_v58 = vld [vmem:[%s6783_s4 + $0x510] ss:$24 sps:$4 sm:$0xff]   ;;  %v5276_v60 = vld [vmem:[%s6783_s4 + $0x4e4] ss:$24 sps:$4 sm:$0xff]  }
  0xfa   : > { %3525 = vmatprep.subr.bf16.mxu1 %v5228_v22  ;;  %3484 = vmatprep.mubr.bf16.mxu0 %v6846_v54  ;;  %v5278_v61 = vld [vmem:[%s6783_s4 + $0x1e0] ss:$24 sps:$4 sm:$0xff]   ;;  %v5280_v63 = vld [vmem:[%s6783_s4 + $0x1b4] ss:$24 sps:$4 sm:$0xff]   ;;  %v5284_v1 = vld [vmem:[%s6783_s4 + $0x1b0] ss:$24 sps:$4 sm:$0xff]  }
  0xfb   : > { %3547 = vmatprep.mubr.bf16.mxu1 %v6848_v55  ;;  %v5279_v62 = vld [vmem:[%s6783_s4 + $0x4e0] ss:$24 sps:$4 sm:$0xff]   ;;  %v5282_v0 = vld [vmem:[%s6783_s4 + $0x4b4] ss:$24 sps:$4 sm:$0xff]   ;;  %v5285_v2 = vld [vmem:[%s6783_s4 + $0x4b0] ss:$24 sps:$4 sm:$0xff]  }
  0xfc   : > { %3463 = vmatpush1.bf16.msra.mxu0 %v5230_v23  ;;  %v5286_v3 = vld [vmem:[%s6783_s4 + $0x184] ss:$24 sps:$4 sm:$0xff]   ;;  %v5290_v5 = vld [vmem:[%s6783_s4 + $0x180] ss:$24 sps:$4 sm:$0xff]   ;;  %v5294_v7 = vld [vmem:[%s6783_s4 + $0x754] ss:$24 sps:$4 sm:$0xff]  }
  0xfd   : > { %3526 = vmatpush1.bf16.msra.mxu1 %v5231_v24  ;;  %3464 = vmatprep.subr.bf16.mxu0 %v5232_v25  ;;  %v5288_v4 = vld [vmem:[%s6783_s4 + $0x484] ss:$24 sps:$4 sm:$0xff]   ;;  %v5291_v6 = vld [vmem:[%s6783_s4 + $0x480] ss:$24 sps:$4 sm:$0xff]   ;;  %v5297_v8 = vld [vmem:[%s6783_s4 + $0xa54] ss:$24 sps:$4 sm:$0xff]  }
  0xfe   : > { %3527 = vmatprep.subr.bf16.mxu1 %v5234_v26  ;;  %v5292_v11 = vld [vmem:[%s6783_s4 + $0x750] ss:$24 sps:$4 sm:$0xff]   ;;  %v5300_v13 = vld [vmem:[%s6783_s4 + $0x724] ss:$24 sps:$4 sm:$0xff]   ;;  %v5298_v15 = vld [vmem:[%s6783_s4 + $0x720] ss:$24 sps:$4 sm:$0xff]  }
  0xff   : > { %v5295_v12 = vld [vmem:[%s6783_s4 + $0xa50] ss:$24 sps:$4 sm:$0xff]   ;;  %v5303_v14 = vld [vmem:[%s6783_s4 + $0xa24] ss:$24 sps:$4 sm:$0xff]   ;;  %v5301_v16 = vld [vmem:[%s6783_s4 + $0xa20] ss:$24 sps:$4 sm:$0xff]  }
 0x100   : > { %3465 = vmatpush1.bf16.msra.mxu0 %v5236_v27  ;;  %v5306_v17 = vld [vmem:[%s6783_s4 + $0x6f4] ss:$24 sps:$4 sm:$0xff]   ;;  %v5304_v19 = vld [vmem:[%s6783_s4 + $0x6f0] ss:$24 sps:$4 sm:$0xff]   ;;  %v5312_v21 = vld [vmem:[%s6783_s4 + $0x6c4] ss:$24 sps:$4 sm:$0xff]  }
 0x101   : > { %3528 = vmatpush1.bf16.msra.mxu1 %v5237_v28  ;;  %3466 = vmatprep.subr.bf16.mxu0 %v5238_v29  ;;  %v5309_v18 = vld [vmem:[%s6783_s4 + $0x9f4] ss:$24 sps:$4 sm:$0xff]   ;;  %v5307_v20 = vld [vmem:[%s6783_s4 + $0x9f0] ss:$24 sps:$4 sm:$0xff]   ;;  %v5315_v22 = vld [vmem:[%s6783_s4 + $0x9c4] ss:$24 sps:$4 sm:$0xff]  }
 0x102   : > { %3529 = vmatprep.subr.bf16.mxu1 %v5240_v30  ;;  %v1012_v23 = vld [vmem:[%s7809_s0 + $0x40] sm:$0xff]  ;;  %v1013_v26 = vld [vmem:[%s7809_s0 + $0x48] sm:$0xff] }
 0x103   : > { %v1016_v24 = vld [vmem:[%s7809_s0 + $0x60] sm:$0xff]  ;;  %v1017_v27 = vld [vmem:[%s7809_s0 + $0x68] sm:$0xff] }
 0x104   : > { %3467 = vmatpush1.bf16.msra.mxu0 %v5242_v31  ;;  %v6893_v25 = vcombine.high %v1012_v23, %v1016_v24  ;;  %v5310_v28 = vld [vmem:[%s6783_s4 + $0x6c0] ss:$24 sps:$4 sm:$0xff]   ;;  %v6903_v30 = vcombine.high %v1013_v26, %v1017_v27  ;;  %v6905_v31 = vcombine.low %v1012_v23, %v1016_v24  ;;  %v5330_v49 = vld [vmem:[%s6783_s4 + $0x634] ss:$24 sps:$4 sm:$0xff]   ;;  %v5328_v51 = vld [vmem:[%s6783_s4 + $0x630] ss:$24 sps:$4 sm:$0xff]  }
 0x105   : > { %3530 = vmatpush1.bf16.msra.mxu1 %v5243_v32  ;;  %3468 = vmatprep.subr.bf16.mxu0 %v5244_v33  ;;  %v5313_v29 = vld [vmem:[%s6783_s4 + $0x9c0] ss:$24 sps:$4 sm:$0xff]   ;;  %v6907_v32 = vcombine.low %v1013_v26, %v1017_v27  ;;  %v5318_v33 = vld [vmem:[%s6783_s4 + $0x694] ss:$24 sps:$4 sm:$0xff]   ;;  %v5331_v52 = vld [vmem:[%s6783_s4 + $0x930] ss:$24 sps:$4 sm:$0xff]  }
 0x106   : > { %3531 = vmatprep.subr.bf16.mxu1 %v5246_v34  ;;  %v5321_v34 = vld [vmem:[%s6783_s4 + $0x994] ss:$24 sps:$4 sm:$0xff]   ;;  %v5372_v23 = vld [vmem:[%s6783_s4 + $0x7e4] ss:$24 sps:$4 sm:$0xff]   ;;  %v5370_v26 = vld [vmem:[%s6783_s4 + $0x7e0] ss:$24 sps:$4 sm:$0xff]  }
 0x107   : > { %v5333_v50 = vld [vmem:[%s6783_s4 + $0x934] ss:$24 sps:$4 sm:$0xff]   ;;  %v5375_v24 = vld [vmem:[%s6783_s4 + $0xae4] ss:$24 sps:$4 sm:$0xff]   ;;  %v5373_v27 = vld [vmem:[%s6783_s4 + $0xae0] ss:$24 sps:$4 sm:$0xff]  }
 0x108   : > { %3469 = vmatpush2.bf16.msra.mxu0 %v5248_v35  ;;  %v5316_v35 = vld [vmem:[%s6783_s4 + $0x690] ss:$24 sps:$4 sm:$0xff]  }
 0x109   : > { %3532 = vmatpush2.bf16.msra.mxu1 %v5249_v36  ;;  %3470 = vmatprep.subr.bf16.mxu0 %v5250_v37  ;;  %v5319_v36 = vld [vmem:[%s6783_s4 + $0x990] ss:$24 sps:$4 sm:$0xff]   ;;  %v5324_v37 = vld [vmem:[%s6783_s4 + $0x664] ss:$24 sps:$4 sm:$0xff]  }
 0x10a   : > { %3533 = vmatprep.subr.bf16.mxu1 %v5252_v38  ;;  %v5327_v38 = vld [vmem:[%s6783_s4 + $0x964] ss:$24 sps:$4 sm:$0xff]  }
 0x10c   : > { %3471 = vmatpush2.bf16.msra.mxu0 %v5254_v39  ;;  %v1020_v39 = vld [vmem:[%s7809_s0 + $0x80] sm:$0xff] }
 0x10d   : > { %3534 = vmatpush2.bf16.msra.mxu1 %v5255_v40  ;;  %3472 = vmatprep.subr.bf16.mxu0 %v5256_v41  ;;  %v1024_v40 = vld [vmem:[%s7809_s0 + $0xa0] sm:$0xff]  ;;  %v1021_v41 = vld [vmem:[%s7809_s0 + $0x88] sm:$0xff] }
 0x10e   : > { %3535 = vmatprep.subr.bf16.mxu1 %v5258_v42  ;;  %v6928_v42 = vcombine.high %v1020_v39, %v1024_v40 }
 0x110   : > { %3473 = vmatpush2.bf16.msra.mxu0 %v5260_v43  ;;  %v1025_v43 = vld [vmem:[%s7809_s0 + $0xa8] sm:$0xff] }
 0x111   : > { %3536 = vmatpush2.bf16.msra.mxu1 %v5261_v44  ;;  %3474 = vmatprep.subr.bf16.mxu0 %v5262_v45  ;;  %v6933_v44 = vcombine.high %v1021_v41, %v1025_v43  ;;  %v5322_v45 = vld [vmem:[%s6783_s4 + $0x660] ss:$24 sps:$4 sm:$0xff]  }
 0x112   : > { %3537 = vmatprep.subr.bf16.mxu1 %v5264_v46  ;;  %v5325_v46 = vld [vmem:[%s6783_s4 + $0x960] ss:$24 sps:$4 sm:$0xff]  }
 0x114   : > { %3475 = vmatpush2.bf16.msra.mxu0 %v5266_v47  ;;  %v6938_v47 = vcombine.low %v1020_v39, %v1024_v40  ;;  %v5390_v39 = vld [vmem:[%s6783_s4 + $0x15c] ss:$24 sps:$4 sm:$0xff]  }
 0x115   : > { %3538 = vmatpush2.bf16.msra.mxu1 %v5267_v48  ;;  %3476 = vmatprep.subr.bf16.mxu0 %v5268_v53  ;;  %v6940_v48 = vcombine.low %v1021_v41, %v1025_v43  ;;  %v5336_v53 = vld [vmem:[%s6783_s4 + $0x604] ss:$24 sps:$4 sm:$0xff]   ;;  %v5388_v41 = vld [vmem:[%s6783_s4 + $0x158] ss:$24 sps:$4 sm:$0xff]  }
 0x116   : > { %3539 = vmatprep.subr.bf16.mxu1 %v5270_v56  ;;  %v5339_v56 = vld [vmem:[%s6783_s4 + $0x904] ss:$24 sps:$4 sm:$0xff]   ;;  %v5391_v43 = vld [vmem:[%s6783_s4 + $0x458] ss:$24 sps:$4 sm:$0xff]  }
 0x117   : > { %v5393_v40 = vld [vmem:[%s6783_s4 + $0x45c] ss:$24 sps:$4 sm:$0xff]  }
 0x118   : > { %3477 = vmatpush2.bf16.msra.mxu0 %v5272_v57  ;;  %v6954_v57 = vld [vmem:[%s7809_s0 + $0x10] sm:$0xff] }
 0x119   : > { %3540 = vmatpush2.bf16.msra.mxu1 %v5273_v58  ;;  %3478 = vmatprep.subr.bf16.mxu0 %v5274_v59  ;;  %v6959_v58 = vld [vmem:[%s7809_s0 + $0x30] sm:$0xff] }
 0x11a   : > { %3541 = vmatprep.subr.bf16.mxu1 %v5276_v60  ;;  %v6963_v59 = vcombine.high %v6954_v57, %v6959_v58  ;;  %v6968_v60 = vld [vmem:[%s7809_s0 + $0x18] sm:$0xff] }
 0x11c   : > { %3479 = vmatpush2.bf16.msra.mxu0 %v5278_v61  ;;  %v6973_v61 = vld [vmem:[%s7809_s0 + $0x38] sm:$0xff] }
 0x11d   : > { %3542 = vmatpush2.bf16.msra.mxu1 %v5279_v62  ;;  %3480 = vmatprep.subr.bf16.mxu0 %v5280_v63  ;;  %v5334_v62 = vld [vmem:[%s6783_s4 + $0x600] ss:$24 sps:$4 sm:$0xff]  }
 0x11e   : > { %3543 = vmatprep.subr.bf16.mxu1 %v5282_v0  ;;  %v5337_v63 = vld [vmem:[%s6783_s4 + $0x900] ss:$24 sps:$4 sm:$0xff]   ;;  %v6979_v0 = vcombine.high %v6968_v60, %v6973_v61 }
 0x120   : > { %3481 = vmatpush2.bf16.msra.mxu0 %v5284_v1  ;;  %v5342_v1 = vld [vmem:[%s6783_s4 + $0x8d4] ss:$24 sps:$4 sm:$0xff]  }
 0x121   : > { %3544 = vmatpush2.bf16.msra.mxu1 %v5285_v2  ;;  %3482 = vmatprep.subr.bf16.mxu0 %v5286_v3  ;;  %v5345_v2 = vld [vmem:[%s6783_s4 + $0xbd4] ss:$24 sps:$4 sm:$0xff]   ;;  %v5340_v3 = vld [vmem:[%s6783_s4 + $0x8d0] ss:$24 sps:$4 sm:$0xff]  }
 0x122   : > { %3545 = vmatprep.subr.bf16.mxu1 %v5288_v4  ;;  %v5343_v4 = vld [vmem:[%s6783_s4 + $0xbd0] ss:$24 sps:$4 sm:$0xff]  }
 0x124   : > { %3483 = vmatpush2.bf16.msra.mxu0 %v5290_v5  ;;  %v5348_v5 = vld [vmem:[%s6783_s4 + $0x8a4] ss:$24 sps:$4 sm:$0xff]  }
 0x125   : > { %3546 = vmatpush2.bf16.msra.mxu1 %v5291_v6  ;;  %3578 = vmatprep.subr.bf16.mxu0 %v5294_v7  ;;  %v5351_v6 = vld [vmem:[%s6783_s4 + $0xba4] ss:$24 sps:$4 sm:$0xff]   ;;  %v5346_v7 = vld [vmem:[%s6783_s4 + $0x8a0] ss:$24 sps:$4 sm:$0xff]  }
 0x126   : > { %3641 = vmatprep.subr.bf16.mxu1 %v5297_v8  ;;  %v5349_v8 = vld [vmem:[%s6783_s4 + $0xba0] ss:$24 sps:$4 sm:$0xff]  }
 0x127   : > { %3485 = vmatmul.mubr.bf16.vlgmr.msra.gmra.mxu0 %v6869_v9 }
 0x128   : > { %3548 = vmatmul.mubr.bf16.vlgmr.msra.gmra.mxu1 %v6871_v10  ;;  %3579 = vmatpush1.bf16.msra.mxu0 %v5292_v11  ;;  %v5354_v11 = vld [vmem:[%s6783_s4 + $0x874] ss:$24 sps:$4 sm:$0xff]  }
 0x129   : > { %3642 = vmatpush1.bf16.msra.mxu1 %v5295_v12  ;;  %3580 = vmatprep.subr.bf16.mxu0 %v5300_v13  ;;  %v5357_v12 = vld [vmem:[%s6783_s4 + $0xb74] ss:$24 sps:$4 sm:$0xff]   ;;  %v5352_v13 = vld [vmem:[%s6783_s4 + $0x870] ss:$24 sps:$4 sm:$0xff]  }
 0x12a   : > { %3643 = vmatprep.subr.bf16.mxu1 %v5303_v14  ;;  %3494 = vmatprep.mubr.bf16.mxu0 %v6893_v25  ;;  %v5355_v14 = vld [vmem:[%s6783_s4 + $0xb70] ss:$24 sps:$4 sm:$0xff]  }
 0x12b   : > { %3557 = vmatprep.mubr.bf16.mxu1 %v6903_v30 }
 0x12c   : > { %3581 = vmatpush1.bf16.msra.mxu0 %v5298_v15  ;;  %v5360_v15 = vld [vmem:[%s6783_s4 + $0x844] ss:$24 sps:$4 sm:$0xff]  }
 0x12d   : > { %3644 = vmatpush1.bf16.msra.mxu1 %v5301_v16  ;;  %3582 = vmatprep.subr.bf16.mxu0 %v5306_v17  ;;  %v5363_v16 = vld [vmem:[%s6783_s4 + $0xb44] ss:$24 sps:$4 sm:$0xff]   ;;  %v5358_v17 = vld [vmem:[%s6783_s4 + $0x840] ss:$24 sps:$4 sm:$0xff]  }
 0x12e   : > { %3645 = vmatprep.subr.bf16.mxu1 %v5309_v18  ;;  %v5361_v18 = vld [vmem:[%s6783_s4 + $0xb40] ss:$24 sps:$4 sm:$0xff]  }
 0x12f   : > { %3495 = vmatmul.mubr.bf16.gmra.mxu0 %v6905_v31 }
 0x130   : > { %3583 = vmatpush1.bf16.msra.mxu0 %v5304_v19  ;;  %3558 = vmatmul.mubr.bf16.gmra.mxu1 %v6907_v32  ;;  %v5366_v19 = vld [vmem:[%s6783_s4 + $0x814] ss:$24 sps:$4 sm:$0xff]  }
 0x131   : > { %3646 = vmatpush1.bf16.msra.mxu1 %v5307_v20  ;;  %3584 = vmatprep.subr.bf16.mxu0 %v5312_v21  ;;  %v5369_v20 = vld [vmem:[%s6783_s4 + $0xb14] ss:$24 sps:$4 sm:$0xff]   ;;  %v5364_v21 = vld [vmem:[%s6783_s4 + $0x810] ss:$24 sps:$4 sm:$0xff]  }
 0x132   : > { %3647 = vmatprep.subr.bf16.mxu1 %v5315_v22  ;;  %3504 = vmatprep.mubr.bf16.mxu0 %v6928_v42  ;;  %v5367_v22 = vld [vmem:[%s6783_s4 + $0xb10] ss:$24 sps:$4 sm:$0xff]  }
 0x133   : > { %3567 = vmatprep.mubr.bf16.mxu1 %v6933_v44 }
 0x134   : > { %3585 = vmatpush1.bf16.msra.mxu0 %v5310_v28  ;;  %v5378_v28 = vld [vmem:[%s6783_s4 + $0x7b4] ss:$24 sps:$4 sm:$0xff]  }
 0x135   : > { %3648 = vmatpush1.bf16.msra.mxu1 %v5313_v29  ;;  %3586 = vmatprep.subr.bf16.mxu0 %v5318_v33  ;;  %v5381_v29 = vld [vmem:[%s6783_s4 + $0xab4] ss:$24 sps:$4 sm:$0xff]   ;;  %v5376_v33 = vld [vmem:[%s6783_s4 + $0x7b0] ss:$24 sps:$4 sm:$0xff]  }
 0x136   : > { %3649 = vmatprep.subr.bf16.mxu1 %v5321_v34  ;;  %v5379_v34 = vld [vmem:[%s6783_s4 + $0xab0] ss:$24 sps:$4 sm:$0xff]  }
 0x137   : > { %3505 = vmatmul.mubr.bf16.gmra.mxu0 %v6938_v47 }
 0x138   : > { %3587 = vmatpush1.bf16.msra.mxu0 %v5316_v35  ;;  %3568 = vmatmul.mubr.bf16.gmra.mxu1 %v6940_v48  ;;  %v5384_v35 = vld [vmem:[%s6783_s4 + $0x784] ss:$24 sps:$4 sm:$0xff]  }
 0x139   : > { %3650 = vmatpush1.bf16.msra.mxu1 %v5319_v36  ;;  %3588 = vmatprep.subr.bf16.mxu0 %v5324_v37  ;;  %v5387_v36 = vld [vmem:[%s6783_s4 + $0xa84] ss:$24 sps:$4 sm:$0xff]   ;;  %v5382_v37 = vld [vmem:[%s6783_s4 + $0x780] ss:$24 sps:$4 sm:$0xff]  }
 0x13a   : > { %3651 = vmatprep.subr.bf16.mxu1 %v5327_v38  ;;  %3610 = vmatprep.mubr.bf16.mxu0 %v6963_v59  ;;  %v5385_v38 = vld [vmem:[%s6783_s4 + $0xa80] ss:$24 sps:$4 sm:$0xff]  }
 0x13b   : > { %3673 = vmatprep.mubr.bf16.mxu1 %v6979_v0 }
 0x13c   : > { %3589 = vmatpush1.bf16.msra.mxu0 %v5322_v45  ;;  %v1014_v45 = vld [vmem:[%s7809_s0 + $0x50] sm:$0xff] }
 0x13d   : > { %3652 = vmatpush1.bf16.msra.mxu1 %v5325_v46  ;;  %3590 = vmatprep.subr.bf16.mxu0 %v5330_v49  ;;  %v1018_v46 = vld [vmem:[%s7809_s0 + $0x70] sm:$0xff]  ;;  %v7027_v49 = vcombine.low %v6954_v57, %v6959_v58 }
 0x13e   : > { %3653 = vmatprep.subr.bf16.mxu1 %v5333_v50  ;;  %v7031_v50 = vcombine.low %v6968_v60, %v6973_v61  ;;  %v7041_v57 = vcombine.high %v1014_v45, %v1018_v46  ;;  %v5394_v60 = vld [vmem:[%s6783_s4 + $0x128] ss:$24 sps:$4 sm:$0xff]  }
 0x13f   : > { %v5397_v61 = vld [vmem:[%s6783_s4 + $0x428] ss:$24 sps:$4 sm:$0xff]  }
 0x140   : > { %3591 = vmatpush1.bf16.msra.mxu0 %v5328_v51  ;;  %v1015_v51 = vld [vmem:[%s7809_s0 + $0x58] sm:$0xff] }
 0x141   : > { %3654 = vmatpush1.bf16.msra.mxu1 %v5331_v52  ;;  %3592 = vmatprep.subr.bf16.mxu0 %v5336_v53  ;;  %v1019_v52 = vld [vmem:[%s7809_s0 + $0x78] sm:$0xff] }
 0x142   : > { %3655 = vmatprep.subr.bf16.mxu1 %v5339_v56  ;;  %v5396_v53 = vld [vmem:[%s6783_s4 + $0x12c] ss:$24 sps:$4 sm:$0xff]   ;;  %v7043_v58 = vcombine.high %v1015_v51, %v1019_v52 }
 0x143   : > { %v5399_v56 = vld [vmem:[%s6783_s4 + $0x42c] ss:$24 sps:$4 sm:$0xff]  }
 0x144   : > { %3593 = vmatpush1.bf16.msra.mxu0 %v5334_v62  ;;  %v5402_v62 = vld [vmem:[%s6783_s4 + $0xfc] ss:$24 sps:$4 sm:$0xff]  }
 0x145   : > { %3656 = vmatpush1.bf16.msra.mxu1 %v5337_v63  ;;  %3594 = vmatprep.subr.bf16.mxu0 %v5342_v1  ;;  %v5405_v63 = vld [vmem:[%s6783_s4 + $0x3fc] ss:$24 sps:$4 sm:$0xff]   ;;  %v5400_v1 = vld [vmem:[%s6783_s4 + $0xf8] ss:$24 sps:$4 sm:$0xff]  }
 0x146   : > { %3657 = vmatprep.subr.bf16.mxu1 %v5345_v2  ;;  %v5403_v2 = vld [vmem:[%s6783_s4 + $0x3f8] ss:$24 sps:$4 sm:$0xff]  }
 0x148   : > { %3595 = vmatpush2.bf16.msra.mxu0 %v5340_v3  ;;  %v1022_v3 = vld [vmem:[%s7809_s0 + $0x90] sm:$0xff] }
 0x149   : > { %3658 = vmatpush2.bf16.msra.mxu1 %v5343_v4  ;;  %3596 = vmatprep.subr.bf16.mxu0 %v5348_v5  ;;  %v1026_v4 = vld [vmem:[%s7809_s0 + $0xb0] sm:$0xff]  ;;  %v7061_v5 = vcombine.low %v1014_v45, %v1018_v46 }
 0x14a   : > { %3659 = vmatprep.subr.bf16.mxu1 %v5351_v6  ;;  %v7063_v6 = vcombine.low %v1015_v51, %v1019_v52  ;;  %v5444_v45 = vld [vmem:[%s6783_s4 + $0x2ac] ss:$24 sps:$4 sm:$0xff]   ;;  %v5442_v51 = vld [vmem:[%s6783_s4 + $0x2a8] ss:$24 sps:$4 sm:$0xff]  }
 0x14b   : > { %v5447_v46 = vld [vmem:[%s6783_s4 + $0x5ac] ss:$24 sps:$4 sm:$0xff]   ;;  %v5445_v52 = vld [vmem:[%s6783_s4 + $0x5a8] ss:$24 sps:$4 sm:$0xff]  }
 0x14c   : > { %3597 = vmatpush2.bf16.msra.mxu0 %v5346_v7  ;;  %v1023_v7 = vld [vmem:[%s7809_s0 + $0x98] sm:$0xff] }
 0x14d   : > { %3660 = vmatpush2.bf16.msra.mxu1 %v5349_v8  ;;  %3598 = vmatprep.subr.bf16.mxu0 %v5354_v11  ;;  %v1027_v8 = vld [vmem:[%s7809_s0 + $0xb8] sm:$0xff] }
 0x14e   : > { %3661 = vmatprep.subr.bf16.mxu1 %v5357_v12  ;;  %v5408_v11 = vld [vmem:[%s6783_s4 + $0xcc] ss:$24 sps:$4 sm:$0xff]  }
 0x14f   : > { %v5411_v12 = vld [vmem:[%s6783_s4 + $0x3cc] ss:$24 sps:$4 sm:$0xff]  }
 0x150   : > { %3599 = vmatpush2.bf16.msra.mxu0 %v5352_v13  ;;  %v7073_v13 = vcombine.high %v1022_v3, %v1026_v4 }
 0x151   : > { %3662 = vmatpush2.bf16.msra.mxu1 %v5355_v14  ;;  %3600 = vmatprep.subr.bf16.mxu0 %v5360_v15  ;;  %v7075_v14 = vcombine.high %v1023_v7, %v1027_v8  ;;  %v5406_v15 = vld [vmem:[%s6783_s4 + $0xc8] ss:$24 sps:$4 sm:$0xff]  }
 0x152   : > { %3663 = vmatprep.subr.bf16.mxu1 %v5363_v16  ;;  %v5409_v16 = vld [vmem:[%s6783_s4 + $0x3c8] ss:$24 sps:$4 sm:$0xff]  }
 0x154   : > { %3601 = vmatpush2.bf16.msra.mxu0 %v5358_v17  ;;  %v5414_v17 = vld [vmem:[%s6783_s4 + $0x9c] ss:$24 sps:$4 sm:$0xff]  }
 0x155   : > { %3664 = vmatpush2.bf16.msra.mxu1 %v5361_v18  ;;  %3602 = vmatprep.subr.bf16.mxu0 %v5366_v19  ;;  %v5417_v18 = vld [vmem:[%s6783_s4 + $0x39c] ss:$24 sps:$4 sm:$0xff]   ;;  %v7085_v19 = vcombine.low %v1022_v3, %v1026_v4 }
 0x156   : > { %3665 = vmatprep.subr.bf16.mxu1 %v5369_v20  ;;  %v5412_v20 = vld [vmem:[%s6783_s4 + $0x98] ss:$24 sps:$4 sm:$0xff]   ;;  %v5462_v3 = vld [vmem:[%s6783_s4 + $0x21c] ss:$24 sps:$4 sm:$0xff]  }
 0x157   : > { %v5465_v4 = vld [vmem:[%s6783_s4 + $0x51c] ss:$24 sps:$4 sm:$0xff]  }
 0x158   : > { %3603 = vmatpush2.bf16.msra.mxu0 %v5364_v21  ;;  %v5415_v21 = vld [vmem:[%s6783_s4 + $0x398] ss:$24 sps:$4 sm:$0xff]  }
 0x159   : > { %3666 = vmatpush2.bf16.msra.mxu1 %v5367_v22  ;;  %3604 = vmatprep.subr.bf16.mxu0 %v5372_v23  ;;  %v7089_v22 = vcombine.low %v1023_v7, %v1027_v8  ;;  %v5420_v23 = vld [vmem:[%s6783_s4 + $0x6c] ss:$24 sps:$4 sm:$0xff]   ;;  %v5460_v7 = vld [vmem:[%s6783_s4 + $0x218] ss:$24 sps:$4 sm:$0xff]  }
 0x15a   : > { %3667 = vmatprep.subr.bf16.mxu1 %v5375_v24  ;;  %v5423_v24 = vld [vmem:[%s6783_s4 + $0x36c] ss:$24 sps:$4 sm:$0xff]   ;;  %v5463_v8 = vld [vmem:[%s6783_s4 + $0x518] ss:$24 sps:$4 sm:$0xff]  }
 0x15c   : > { %3605 = vmatpush2.bf16.msra.mxu0 %v5370_v26  ;;  %v5418_v26 = vld [vmem:[%s6783_s4 + $0x68] ss:$24 sps:$4 sm:$0xff]  }
 0x15d   : > { %3668 = vmatpush2.bf16.msra.mxu1 %v5373_v27  ;;  %3606 = vmatprep.subr.bf16.mxu0 %v5378_v28  ;;  %v5421_v27 = vld [vmem:[%s6783_s4 + $0x368] ss:$24 sps:$4 sm:$0xff]   ;;  %v5426_v28 = vld [vmem:[%s6783_s4 + $0x3c] ss:$24 sps:$4 sm:$0xff]  }
 0x15e   : > { %3669 = vmatprep.subr.bf16.mxu1 %v5381_v29  ;;  %v5429_v29 = vld [vmem:[%s6783_s4 + $0x33c] ss:$24 sps:$4 sm:$0xff]  }
 0x160   : > { %3607 = vmatpush2.bf16.msra.mxu0 %v5376_v33  ;;  %v5424_v33 = vld [vmem:[%s6783_s4 + $0x38] ss:$24 sps:$4 sm:$0xff]  }
 0x161   : > { %3670 = vmatpush2.bf16.msra.mxu1 %v5379_v34  ;;  %3608 = vmatprep.subr.bf16.mxu0 %v5384_v35  ;;  %v5427_v34 = vld [vmem:[%s6783_s4 + $0x338] ss:$24 sps:$4 sm:$0xff]   ;;  %v5432_v35 = vld [vmem:[%s6783_s4 + $0xc] ss:$24 sps:$4 sm:$0xff]  }
 0x162   : > { %3671 = vmatprep.subr.bf16.mxu1 %v5387_v36  ;;  %v5435_v36 = vld [vmem:[%s6783_s4 + $0x30c] ss:$24 sps:$4 sm:$0xff]  }
 0x164   : > { %3609 = vmatpush2.bf16.msra.mxu0 %v5382_v37  ;;  %v5430_v37 = vld [vmem:[%s6783_s4 + $0x8] ss:$24 sps:$4 sm:$0xff]  }
 0x165   : > { %3672 = vmatpush2.bf16.msra.mxu1 %v5385_v38  ;;  %3704 = vmatprep.subr.bf16.mxu0 %v5390_v39  ;;  %v5433_v38 = vld [vmem:[%s6783_s4 + $0x308] ss:$24 sps:$4 sm:$0xff]   ;;  %v5438_v39 = vld [vmem:[%s6783_s4 + $0x2dc] ss:$24 sps:$4 sm:$0xff]  }
 0x166   : > { %3767 = vmatprep.subr.bf16.mxu1 %v5393_v40  ;;  %v5441_v40 = vld [vmem:[%s6783_s4 + $0x5dc] ss:$24 sps:$4 sm:$0xff]  }
 0x167   : > { %3611 = vmatmul.mubr.bf16.vlgmr.msra.gmra.mxu0 %v7027_v49 }
 0x168   : > { %3674 = vmatmul.mubr.bf16.vlgmr.msra.gmra.mxu1 %v7031_v50  ;;  %3705 = vmatpush1.bf16.msra.mxu0 %v5388_v41  ;;  %v5436_v41 = vld [vmem:[%s6783_s4 + $0x2d8] ss:$24 sps:$4 sm:$0xff]  }
 0x169   : > { %3768 = vmatpush1.bf16.msra.mxu1 %v5391_v43  ;;  %3706 = vmatprep.subr.bf16.mxu0 %v5396_v53  ;;  %v5439_v43 = vld [vmem:[%s6783_s4 + $0x5d8] ss:$24 sps:$4 sm:$0xff]   ;;  %v5450_v53 = vld [vmem:[%s6783_s4 + $0x27c] ss:$24 sps:$4 sm:$0xff]  }
 0x16a   : > { %3769 = vmatprep.subr.bf16.mxu1 %v5399_v56  ;;  %3620 = vmatprep.mubr.bf16.mxu0 %v7041_v57  ;;  %v5453_v56 = vld [vmem:[%s6783_s4 + $0x57c] ss:$24 sps:$4 sm:$0xff]  }
 0x16b   : > { %3683 = vmatprep.mubr.bf16.mxu1 %v7043_v58 }
 0x16c   : > { %3707 = vmatpush1.bf16.msra.mxu0 %v5394_v60  ;;  %v5448_v60 = vld [vmem:[%s6783_s4 + $0x278] ss:$24 sps:$4 sm:$0xff]  }
 0x16d   : > { %3770 = vmatpush1.bf16.msra.mxu1 %v5397_v61  ;;  %3708 = vmatprep.subr.bf16.mxu0 %v5402_v62  ;;  %v5451_v61 = vld [vmem:[%s6783_s4 + $0x578] ss:$24 sps:$4 sm:$0xff]   ;;  %v5456_v62 = vld [vmem:[%s6783_s4 + $0x24c] ss:$24 sps:$4 sm:$0xff]  }
 0x16e   : > { %3771 = vmatprep.subr.bf16.mxu1 %v5405_v63  ;;  %v5459_v63 = vld [vmem:[%s6783_s4 + $0x54c] ss:$24 sps:$4 sm:$0xff]  }
 0x16f   : > { %3621 = vmatmul.mubr.bf16.gmra.mxu0 %v7061_v5 }
 0x170   : > { %3684 = vmatmul.mubr.bf16.gmra.mxu1 %v7063_v6  ;;  %3709 = vmatpush1.bf16.msra.mxu0 %v5400_v1  ;;  %v5454_v1 = vld [vmem:[%s6783_s4 + $0x248] ss:$24 sps:$4 sm:$0xff]  }
 0x171   : > { %3772 = vmatpush1.bf16.msra.mxu1 %v5403_v2  ;;  %3710 = vmatprep.subr.bf16.mxu0 %v5408_v11  ;;  %v5457_v2 = vld [vmem:[%s6783_s4 + $0x548] ss:$24 sps:$4 sm:$0xff]   ;;  %v5468_v11 = vld [vmem:[%s6783_s4 + $0x1ec] ss:$24 sps:$4 sm:$0xff]  }
 0x172   : > { %3773 = vmatprep.subr.bf16.mxu1 %v5411_v12  ;;  %3630 = vmatprep.mubr.bf16.mxu0 %v7073_v13  ;;  %v5471_v12 = vld [vmem:[%s6783_s4 + $0x4ec] ss:$24 sps:$4 sm:$0xff]  }
 0x173   : > { %3693 = vmatprep.mubr.bf16.mxu1 %v7075_v14 }
 0x174   : > { %3711 = vmatpush1.bf16.msra.mxu0 %v5406_v15  ;;  %v5466_v15 = vld [vmem:[%s6783_s4 + $0x1e8] ss:$24 sps:$4 sm:$0xff]  }
 0x175   : > { %3774 = vmatpush1.bf16.msra.mxu1 %v5409_v16  ;;  %3712 = vmatprep.subr.bf16.mxu0 %v5414_v17  ;;  %v5469_v16 = vld [vmem:[%s6783_s4 + $0x4e8] ss:$24 sps:$4 sm:$0xff]   ;;  %v5474_v17 = vld [vmem:[%s6783_s4 + $0x1bc] ss:$24 sps:$4 sm:$0xff]  }
 0x176   : > { %3775 = vmatprep.subr.bf16.mxu1 %v5417_v18  ;;  %v5477_v18 = vld [vmem:[%s6783_s4 + $0x4bc] ss:$24 sps:$4 sm:$0xff]  }
 0x177   : > { %3631 = vmatmul.mubr.bf16.gmra.mxu0 %v7085_v19 }
 0x178   : > { %3694 = vmatmul.mubr.bf16.gmra.mxu1 %v7089_v22  ;;  %3713 = vmatpush1.bf16.msra.mxu0 %v5412_v20  ;;  %v5472_v20 = vld [vmem:[%s6783_s4 + $0x1b8] ss:$24 sps:$4 sm:$0xff]  }
 0x179   : > { %3776 = vmatpush1.bf16.msra.mxu1 %v5415_v21  ;;  %3714 = vmatprep.subr.bf16.mxu0 %v5420_v23  ;;  %v5475_v21 = vld [vmem:[%s6783_s4 + $0x4b8] ss:$24 sps:$4 sm:$0xff]   ;;  %v5480_v23 = vld [vmem:[%s6783_s4 + $0x18c] ss:$24 sps:$4 sm:$0xff]  }
 0x17a   : > { %3777 = vmatprep.subr.bf16.mxu1 %v5423_v24  ;;  %3736 = vmatprep.mubr.bf16.mxu0 %v6846_v54  ;;  %v5483_v24 = vld [vmem:[%s6783_s4 + $0x48c] ss:$24 sps:$4 sm:$0xff]  }
 0x17b   : > { %3799 = vmatprep.mubr.bf16.mxu1 %v6848_v55 }
 0x17c   : > { %3715 = vmatpush1.bf16.msra.mxu0 %v5418_v26  ;;  %v5478_v26 = vld [vmem:[%s6783_s4 + $0x188] ss:$24 sps:$4 sm:$0xff]  }
 0x17d   : > { %3778 = vmatpush1.bf16.msra.mxu1 %v5421_v27  ;;  %3716 = vmatprep.subr.bf16.mxu0 %v5426_v28  ;;  %v5481_v27 = vld [vmem:[%s6783_s4 + $0x488] ss:$24 sps:$4 sm:$0xff]   ;;  %v5486_v28 = vld [vmem:[%s6783_s4 + $0x75c] ss:$24 sps:$4 sm:$0xff]  }
 0x17e   : > { %3779 = vmatprep.subr.bf16.mxu1 %v5429_v29  ;;  %v5489_v29 = vld [vmem:[%s6783_s4 + $0xa5c] ss:$24 sps:$4 sm:$0xff]  }
 0x180   : > { %3717 = vmatpush1.bf16.msra.mxu0 %v5424_v33  ;;  %v5484_v33 = vld [vmem:[%s6783_s4 + $0x758] ss:$24 sps:$4 sm:$0xff]  }
 0x181   : > { %3780 = vmatpush1.bf16.msra.mxu1 %v5427_v34  ;;  %3718 = vmatprep.subr.bf16.mxu0 %v5432_v35  ;;  %v5487_v34 = vld [vmem:[%s6783_s4 + $0xa58] ss:$24 sps:$4 sm:$0xff]   ;;  %v5492_v35 = vld [vmem:[%s6783_s4 + $0x72c] ss:$24 sps:$4 sm:$0xff]  }
 0x182   : > { %3781 = vmatprep.subr.bf16.mxu1 %v5435_v36  ;;  %v5495_v36 = vld [vmem:[%s6783_s4 + $0xa2c] ss:$24 sps:$4 sm:$0xff]  }
 0x184   : > { %3719 = vmatpush1.bf16.msra.mxu0 %v5430_v37  ;;  %v5490_v37 = vld [vmem:[%s6783_s4 + $0x728] ss:$24 sps:$4 sm:$0xff]  }
 0x185   : > { %3782 = vmatpush1.bf16.msra.mxu1 %v5433_v38  ;;  %3720 = vmatprep.subr.bf16.mxu0 %v5438_v39  ;;  %v5493_v38 = vld [vmem:[%s6783_s4 + $0xa28] ss:$24 sps:$4 sm:$0xff]   ;;  %v5498_v39 = vld [vmem:[%s6783_s4 + $0x6fc] ss:$24 sps:$4 sm:$0xff]  }
 0x186   : > { %3783 = vmatprep.subr.bf16.mxu1 %v5441_v40  ;;  %v5501_v40 = vld [vmem:[%s6783_s4 + $0x9fc] ss:$24 sps:$4 sm:$0xff]  }
 0x188   : > { %3721 = vmatpush2.bf16.msra.mxu0 %v5436_v41  ;;  %v5496_v41 = vld [vmem:[%s6783_s4 + $0x6f8] ss:$24 sps:$4 sm:$0xff]  }
 0x189   : > { %3784 = vmatpush2.bf16.msra.mxu1 %v5439_v43  ;;  %3722 = vmatprep.subr.bf16.mxu0 %v5444_v45  ;;  %v5499_v43 = vld [vmem:[%s6783_s4 + $0x9f8] ss:$24 sps:$4 sm:$0xff]   ;;  %v5504_v45 = vld [vmem:[%s6783_s4 + $0x6cc] ss:$24 sps:$4 sm:$0xff]  }
 0x18a   : > { %3785 = vmatprep.subr.bf16.mxu1 %v5447_v46  ;;  %v5507_v46 = vld [vmem:[%s6783_s4 + $0x9cc] ss:$24 sps:$4 sm:$0xff]  }
 0x18c   : > { %3723 = vmatpush2.bf16.msra.mxu0 %v5442_v51  ;;  %v5502_v51 = vld [vmem:[%s6783_s4 + $0x6c8] ss:$24 sps:$4 sm:$0xff]  }
 0x18d   : > { %3786 = vmatpush2.bf16.msra.mxu1 %v5445_v52  ;;  %3724 = vmatprep.subr.bf16.mxu0 %v5450_v53  ;;  %v5505_v52 = vld [vmem:[%s6783_s4 + $0x9c8] ss:$24 sps:$4 sm:$0xff]   ;;  %v5510_v53 = vld [vmem:[%s6783_s4 + $0x69c] ss:$24 sps:$4 sm:$0xff]  }
 0x18e   : > { %3787 = vmatprep.subr.bf16.mxu1 %v5453_v56  ;;  %v5513_v56 = vld [vmem:[%s6783_s4 + $0x99c] ss:$24 sps:$4 sm:$0xff]  }
 0x190   : > { %3725 = vmatpush2.bf16.msra.mxu0 %v5448_v60  ;;  %v5508_v60 = vld [vmem:[%s6783_s4 + $0x698] ss:$24 sps:$4 sm:$0xff]  }
 0x191   : > { %3788 = vmatpush2.bf16.msra.mxu1 %v5451_v61  ;;  %3726 = vmatprep.subr.bf16.mxu0 %v5456_v62  ;;  %v5511_v61 = vld [vmem:[%s6783_s4 + $0x998] ss:$24 sps:$4 sm:$0xff]   ;;  %v5516_v62 = vld [vmem:[%s6783_s4 + $0x66c] ss:$24 sps:$4 sm:$0xff]  }
 0x192   : > { %3789 = vmatprep.subr.bf16.mxu1 %v5459_v63  ;;  %v5519_v63 = vld [vmem:[%s6783_s4 + $0x96c] ss:$24 sps:$4 sm:$0xff]  }
 0x194   : > { %3727 = vmatpush2.bf16.msra.mxu0 %v5454_v1  ;;  %v5514_v1 = vld [vmem:[%s6783_s4 + $0x668] ss:$24 sps:$4 sm:$0xff]  }
 0x195   : > { %3790 = vmatpush2.bf16.msra.mxu1 %v5457_v2  ;;  %3728 = vmatprep.subr.bf16.mxu0 %v5462_v3  ;;  %v5517_v2 = vld [vmem:[%s6783_s4 + $0x968] ss:$24 sps:$4 sm:$0xff]   ;;  %v5522_v3 = vld [vmem:[%s6783_s4 + $0x63c] ss:$24 sps:$4 sm:$0xff]  }
 0x196   : > { %3791 = vmatprep.subr.bf16.mxu1 %v5465_v4  ;;  %v5525_v4 = vld [vmem:[%s6783_s4 + $0x93c] ss:$24 sps:$4 sm:$0xff]  }
 0x198   : > { %3729 = vmatpush2.bf16.msra.mxu0 %v5460_v7  ;;  %v5520_v7 = vld [vmem:[%s6783_s4 + $0x638] ss:$24 sps:$4 sm:$0xff]  }
 0x199   : > { %3792 = vmatpush2.bf16.msra.mxu1 %v5463_v8  ;;  %3730 = vmatprep.subr.bf16.mxu0 %v5468_v11  ;;  %v5523_v8 = vld [vmem:[%s6783_s4 + $0x938] ss:$24 sps:$4 sm:$0xff]   ;;  %v5528_v11 = vld [vmem:[%s6783_s4 + $0x60c] ss:$24 sps:$4 sm:$0xff]  }
 0x19a   : > { %3793 = vmatprep.subr.bf16.mxu1 %v5471_v12  ;;  %v5531_v12 = vld [vmem:[%s6783_s4 + $0x90c] ss:$24 sps:$4 sm:$0xff]  }
 0x19c   : > { %3731 = vmatpush2.bf16.msra.mxu0 %v5466_v15  ;;  %v5526_v15 = vld [vmem:[%s6783_s4 + $0x608] ss:$24 sps:$4 sm:$0xff]  }
 0x19d   : > { %3794 = vmatpush2.bf16.msra.mxu1 %v5469_v16  ;;  %3732 = vmatprep.subr.bf16.mxu0 %v5474_v17  ;;  %v5529_v16 = vld [vmem:[%s6783_s4 + $0x908] ss:$24 sps:$4 sm:$0xff]   ;;  %v5534_v17 = vld [vmem:[%s6783_s4 + $0x8dc] ss:$24 sps:$4 sm:$0xff]  }
 0x19e   : > { %3795 = vmatprep.subr.bf16.mxu1 %v5477_v18  ;;  %v5537_v18 = vld [vmem:[%s6783_s4 + $0xbdc] ss:$24 sps:$4 sm:$0xff]  }
 0x1a0   : > { %3733 = vmatpush2.bf16.msra.mxu0 %v5472_v20  ;;  %v5532_v20 = vld [vmem:[%s6783_s4 + $0x8d8] ss:$24 sps:$4 sm:$0xff]  }
 0x1a1   : > { %3796 = vmatpush2.bf16.msra.mxu1 %v5475_v21  ;;  %3734 = vmatprep.subr.bf16.mxu0 %v5480_v23  ;;  %v5535_v21 = vld [vmem:[%s6783_s4 + $0xbd8] ss:$24 sps:$4 sm:$0xff]   ;;  %v5540_v23 = vld [vmem:[%s6783_s4 + $0x8ac] ss:$24 sps:$4 sm:$0xff]  }
 0x1a2   : > { %3797 = vmatprep.subr.bf16.mxu1 %v5483_v24  ;;  %v5543_v24 = vld [vmem:[%s6783_s4 + $0xbac] ss:$24 sps:$4 sm:$0xff]  }
 0x1a4   : > { %3735 = vmatpush2.bf16.msra.mxu0 %v5478_v26  ;;  %v5538_v26 = vld [vmem:[%s6783_s4 + $0x8a8] ss:$24 sps:$4 sm:$0xff]  }
 0x1a5   : > { %3798 = vmatpush2.bf16.msra.mxu1 %v5481_v27  ;;  %3830 = vmatprep.subr.bf16.mxu0 %v5486_v28  ;;  %v5541_v27 = vld [vmem:[%s6783_s4 + $0xba8] ss:$24 sps:$4 sm:$0xff]   ;;  %v5546_v28 = vld [vmem:[%s6783_s4 + $0x87c] ss:$24 sps:$4 sm:$0xff]  }
 0x1a6   : > { %3893 = vmatprep.subr.bf16.mxu1 %v5489_v29  ;;  %v5549_v29 = vld [vmem:[%s6783_s4 + $0xb7c] ss:$24 sps:$4 sm:$0xff]  }
 0x1a7   : > { %3737 = vmatmul.mubr.bf16.vlgmr.msra.gmra.mxu0 %v6869_v9 }
 0x1a8   : > { %3800 = vmatmul.mubr.bf16.vlgmr.msra.gmra.mxu1 %v6871_v10  ;;  %3831 = vmatpush1.bf16.msra.mxu0 %v5484_v33  ;;  %v5544_v33 = vld [vmem:[%s6783_s4 + $0x878] ss:$24 sps:$4 sm:$0xff]  }
 0x1a9   : > { %3894 = vmatpush1.bf16.msra.mxu1 %v5487_v34  ;;  %3832 = vmatprep.subr.bf16.mxu0 %v5492_v35  ;;  %v5547_v34 = vld [vmem:[%s6783_s4 + $0xb78] ss:$24 sps:$4 sm:$0xff]   ;;  %v5552_v35 = vld [vmem:[%s6783_s4 + $0x84c] ss:$24 sps:$4 sm:$0xff]  }
 0x1aa   : > { %3895 = vmatprep.subr.bf16.mxu1 %v5495_v36  ;;  %3746 = vmatprep.mubr.bf16.mxu0 %v6893_v25  ;;  %v5555_v36 = vld [vmem:[%s6783_s4 + $0xb4c] ss:$24 sps:$4 sm:$0xff]  }
 0x1ab   : > { %3809 = vmatprep.mubr.bf16.mxu1 %v6903_v30 }
 0x1ac   : > { %3833 = vmatpush1.bf16.msra.mxu0 %v5490_v37  ;;  %v5550_v37 = vld [vmem:[%s6783_s4 + $0x848] ss:$24 sps:$4 sm:$0xff]  }
 0x1ad   : > { %3896 = vmatpush1.bf16.msra.mxu1 %v5493_v38  ;;  %3834 = vmatprep.subr.bf16.mxu0 %v5498_v39  ;;  %v5553_v38 = vld [vmem:[%s6783_s4 + $0xb48] ss:$24 sps:$4 sm:$0xff]   ;;  %v5558_v39 = vld [vmem:[%s6783_s4 + $0x81c] ss:$24 sps:$4 sm:$0xff]  }
 0x1ae   : > { %3897 = vmatprep.subr.bf16.mxu1 %v5501_v40  ;;  %v5561_v40 = vld [vmem:[%s6783_s4 + $0xb1c] ss:$24 sps:$4 sm:$0xff]  }
 0x1af   : > { %3747 = vmatmul.mubr.bf16.gmra.mxu0 %v6905_v31 }
 0x1b0   : > { %3810 = vmatmul.mubr.bf16.gmra.mxu1 %v6907_v32  ;;  %3835 = vmatpush1.bf16.msra.mxu0 %v5496_v41  ;;  %v5556_v41 = vld [vmem:[%s6783_s4 + $0x818] ss:$24 sps:$4 sm:$0xff]  }
 0x1b1   : > { %3898 = vmatpush1.bf16.msra.mxu1 %v5499_v43  ;;  %3836 = vmatprep.subr.bf16.mxu0 %v5504_v45  ;;  %v5559_v43 = vld [vmem:[%s6783_s4 + $0xb18] ss:$24 sps:$4 sm:$0xff]   ;;  %v5564_v45 = vld [vmem:[%s6783_s4 + $0x7ec] ss:$24 sps:$4 sm:$0xff]  }
 0x1b2   : > { %3899 = vmatprep.subr.bf16.mxu1 %v5507_v46  ;;  %3756 = vmatprep.mubr.bf16.mxu0 %v6928_v42  ;;  %v5567_v46 = vld [vmem:[%s6783_s4 + $0xaec] ss:$24 sps:$4 sm:$0xff]  }
 0x1b3   : > { %3819 = vmatprep.mubr.bf16.mxu1 %v6933_v44 }
 0x1b4   : > { %3837 = vmatpush1.bf16.msra.mxu0 %v5502_v51  ;;  %v5562_v51 = vld [vmem:[%s6783_s4 + $0x7e8] ss:$24 sps:$4 sm:$0xff]  }
 0x1b5   : > { %3900 = vmatpush1.bf16.msra.mxu1 %v5505_v52  ;;  %3838 = vmatprep.subr.bf16.mxu0 %v5510_v53  ;;  %v5565_v52 = vld [vmem:[%s6783_s4 + $0xae8] ss:$24 sps:$4 sm:$0xff]   ;;  %v5570_v53 = vld [vmem:[%s6783_s4 + $0x7bc] ss:$24 sps:$4 sm:$0xff]  }
 0x1b6   : > { %3901 = vmatprep.subr.bf16.mxu1 %v5513_v56  ;;  %v5573_v56 = vld [vmem:[%s6783_s4 + $0xabc] ss:$24 sps:$4 sm:$0xff]  }
 0x1b7   : > { %3757 = vmatmul.mubr.bf16.gmra.mxu0 %v6938_v47 }
 0x1b8   : > { %3820 = vmatmul.mubr.bf16.gmra.mxu1 %v6940_v48  ;;  %3839 = vmatpush1.bf16.msra.mxu0 %v5508_v60  ;;  %v5568_v60 = vld [vmem:[%s6783_s4 + $0x7b8] ss:$24 sps:$4 sm:$0xff]  }
 0x1b9   : > { %3902 = vmatpush1.bf16.msra.mxu1 %v5511_v61  ;;  %3840 = vmatprep.subr.bf16.mxu0 %v5516_v62  ;;  %v5571_v61 = vld [vmem:[%s6783_s4 + $0xab8] ss:$24 sps:$4 sm:$0xff]   ;;  %v5576_v62 = vld [vmem:[%s6783_s4 + $0x78c] ss:$24 sps:$4 sm:$0xff]  }
 0x1ba   : > { %3903 = vmatprep.subr.bf16.mxu1 %v5519_v63  ;;  %3862 = vmatprep.mubr.bf16.mxu0 %v6963_v59  ;;  %v5579_v63 = vld [vmem:[%s6783_s4 + $0xa8c] ss:$24 sps:$4 sm:$0xff]  }
 0x1bb   : > { %3925 = vmatprep.mubr.bf16.mxu1 %v6979_v0 }
 0x1bc   : > { %3841 = vmatpush1.bf16.msra.mxu0 %v5514_v1  ;;  %v5574_v1 = vld [vmem:[%s6783_s4 + $0x788] ss:$24 sps:$4 sm:$0xff]  }
 0x1bd   : > { %3904 = vmatpush1.bf16.msra.mxu1 %v5517_v2  ;;  %3842 = vmatprep.subr.bf16.mxu0 %v5522_v3  ;;  %v5577_v2 = vld [vmem:[%s6783_s4 + $0xa88] ss:$24 sps:$4 sm:$0xff]   ;;  %v5582_v3 = vld [vmem:[%s6783_s4 + $0x164] ss:$24 sps:$4 sm:$0xff]  }
 0x1be   : > { %3905 = vmatprep.subr.bf16.mxu1 %v5525_v4  ;;  %v5585_v4 = vld [vmem:[%s6783_s4 + $0x464] ss:$24 sps:$4 sm:$0xff]  }
 0x1c0   : > { %3843 = vmatpush1.bf16.msra.mxu0 %v5520_v7  ;;  %v5580_v7 = vld [vmem:[%s6783_s4 + $0x160] ss:$24 sps:$4 sm:$0xff]  }
 0x1c1   : > { %3906 = vmatpush1.bf16.msra.mxu1 %v5523_v8  ;;  %3844 = vmatprep.subr.bf16.mxu0 %v5528_v11  ;;  %v5583_v8 = vld [vmem:[%s6783_s4 + $0x460] ss:$24 sps:$4 sm:$0xff]   ;;  %v5588_v11 = vld [vmem:[%s6783_s4 + $0x134] ss:$24 sps:$4 sm:$0xff]  }
 0x1c2   : > { %3907 = vmatprep.subr.bf16.mxu1 %v5531_v12  ;;  %v5591_v12 = vld [vmem:[%s6783_s4 + $0x434] ss:$24 sps:$4 sm:$0xff]  }
 0x1c4   : > { %3845 = vmatpush1.bf16.msra.mxu0 %v5526_v15 }
 0x1c5   : > { %3908 = vmatpush1.bf16.msra.mxu1 %v5529_v16  ;;  %3846 = vmatprep.subr.bf16.mxu0 %v5534_v17  ;;  %v5586_v17 = vld [vmem:[%s6783_s4 + $0x130] ss:$24 sps:$4 sm:$0xff]  }
 0x1c6   : > { %3909 = vmatprep.subr.bf16.mxu1 %v5537_v18  ;;  %v5589_v18 = vld [vmem:[%s6783_s4 + $0x430] ss:$24 sps:$4 sm:$0xff]  }
 0x1c8   : > { %3847 = vmatpush2.bf16.msra.mxu0 %v5532_v20 }
 0x1c9   : > { %3910 = vmatpush2.bf16.msra.mxu1 %v5535_v21  ;;  %3848 = vmatprep.subr.bf16.mxu0 %v5540_v23  ;;  %v5594_v21 = vld [vmem:[%s6783_s4 + $0x104] ss:$24 sps:$4 sm:$0xff]  }
 0x1ca   : > { %3911 = vmatprep.subr.bf16.mxu1 %v5543_v24 }
 0x1cc   : > { %3849 = vmatpush2.bf16.msra.mxu0 %v5538_v26  ;;  %v5597_v26 = vld [vmem:[%s6783_s4 + $0x404] ss:$24 sps:$4 sm:$0xff]  }
 0x1cd   : > { %3912 = vmatpush2.bf16.msra.mxu1 %v5541_v27  ;;  %3850 = vmatprep.subr.bf16.mxu0 %v5546_v28 }
 0x1ce   : > { %3913 = vmatprep.subr.bf16.mxu1 %v5549_v29 }
 0x1d0   : > { %3851 = vmatpush2.bf16.msra.mxu0 %v5544_v33 }
 0x1d1   : > { %3914 = vmatpush2.bf16.msra.mxu1 %v5547_v34  ;;  %3852 = vmatprep.subr.bf16.mxu0 %v5552_v35  ;;  %v5592_v34 = vld [vmem:[%s6783_s4 + $0x100] ss:$24 sps:$4 sm:$0xff]  }
 0x1d2   : > { %3915 = vmatprep.subr.bf16.mxu1 %v5555_v36  ;;  %v5595_v35 = vld [vmem:[%s6783_s4 + $0x400] ss:$24 sps:$4 sm:$0xff]  }
 0x1d4   : > { %3853 = vmatpush2.bf16.msra.mxu0 %v5550_v37 }
 0x1d5   : > { %3916 = vmatpush2.bf16.msra.mxu1 %v5553_v38  ;;  %3854 = vmatprep.subr.bf16.mxu0 %v5558_v39  ;;  %v5600_v38 = vld [vmem:[%s6783_s4 + $0xd4] ss:$24 sps:$4 sm:$0xff]  }
 0x1d6   : > { %3917 = vmatprep.subr.bf16.mxu1 %v5561_v40  ;;  %v5603_v39 = vld [vmem:[%s6783_s4 + $0x3d4] ss:$24 sps:$4 sm:$0xff]  }
 0x1d8   : > { %3855 = vmatpush2.bf16.msra.mxu0 %v5556_v41  ;;  %v5598_v41 = vld [vmem:[%s6783_s4 + $0xd0] ss:$24 sps:$4 sm:$0xff]  }
 0x1d9   : > { %3918 = vmatpush2.bf16.msra.mxu1 %v5559_v43  ;;  %3856 = vmatprep.subr.bf16.mxu0 %v5564_v45  ;;  %v5601_v43 = vld [vmem:[%s6783_s4 + $0x3d0] ss:$24 sps:$4 sm:$0xff]   ;;  %v5606_v45 = vld [vmem:[%s6783_s4 + $0xa4] ss:$24 sps:$4 sm:$0xff]  }
 0x1da   : > { %3919 = vmatprep.subr.bf16.mxu1 %v5567_v46  ;;  %v5609_v46 = vld [vmem:[%s6783_s4 + $0x3a4] ss:$24 sps:$4 sm:$0xff]  }
 0x1dc   : > { %3857 = vmatpush2.bf16.msra.mxu0 %v5562_v51 }
 0x1dd   : > { %3920 = vmatpush2.bf16.msra.mxu1 %v5565_v52  ;;  %3858 = vmatprep.subr.bf16.mxu0 %v5570_v53  ;;  %v5604_v53 = vld [vmem:[%s6783_s4 + $0xa0] ss:$24 sps:$4 sm:$0xff]  }
 0x1de   : > { %3921 = vmatprep.subr.bf16.mxu1 %v5573_v56  ;;  %v5607_v56 = vld [vmem:[%s6783_s4 + $0x3a0] ss:$24 sps:$4 sm:$0xff]  }
 0x1e0   : > { %3859 = vmatpush2.bf16.msra.mxu0 %v5568_v60 }
 0x1e1   : > { %3922 = vmatpush2.bf16.msra.mxu1 %v5571_v61  ;;  %3860 = vmatprep.subr.bf16.mxu0 %v5576_v62  ;;  %v5612_v61 = vld [vmem:[%s6783_s4 + $0x74] ss:$24 sps:$4 sm:$0xff]  }
 0x1e2   : > { %3923 = vmatprep.subr.bf16.mxu1 %v5579_v63  ;;  %v5615_v62 = vld [vmem:[%s6783_s4 + $0x374] ss:$24 sps:$4 sm:$0xff]  }
 0x1e4   : > { %3861 = vmatpush2.bf16.msra.mxu0 %v5574_v1 }
 0x1e5   : > { %3924 = vmatpush2.bf16.msra.mxu1 %v5577_v2  ;;  %3956 = vmatprep.subr.bf16.mxu0 %v5582_v3 }
 0x1e6   : > { %4019 = vmatprep.subr.bf16.mxu1 %v5585_v4 }
 0x1e7   : > { %v3486_v15 = vpop.f32.mrf.mxu0  ;;  %3863 = vmatmul.mubr.bf16.vlgmr.msra.gmra.mxu0 %v7027_v49 }
 0x1e8   : > { %v3549_v16 = vpop.f32.mrf.mxu1  ;;  %3926 = vmatmul.mubr.bf16.vlgmr.msra.gmra.mxu1 %v7031_v50  ;;  %3957 = vmatpush1.bf16.msra.mxu0 %v5580_v7  ;;  %v5610_v7 = vld [vmem:[%s6783_s4 + $0x70] ss:$24 sps:$4 sm:$0xff]  }
 0x1e9   : > { %v7225_v20 = vadd.f32 %v3549_v16, %v3486_v15  ;;  %4020 = vmatpush1.bf16.msra.mxu1 %v5583_v8  ;;  %v3488_v23 = vpop.f32.mrf.mxu0  ;;  %3958 = vmatprep.subr.bf16.mxu0 %v5588_v11  ;;  %v5613_v8 = vld [vmem:[%s6783_s4 + $0x370] ss:$24 sps:$4 sm:$0xff]   ;;  %v5621_v15 = vld [vmem:[%s6783_s4 + $0x344] ss:$24 sps:$4 sm:$0xff]  }
 0x1ea   : > { %v3551_v24 = vpop.f32.mrf.mxu1  ;;  %4021 = vmatprep.subr.bf16.mxu1 %v5591_v12  ;;  %3872 = vmatprep.mubr.bf16.mxu0 %v7041_v57  ;;  %v5618_v12 = vld [vmem:[%s6783_s4 + $0x44] ss:$24 sps:$4 sm:$0xff]  }
 0x1eb   : > { %v7229_v27 = vadd.f32 %v3551_v24, %v3488_v23  ;;  %3935 = vmatprep.mubr.bf16.mxu1 %v7043_v58  ;;  %v3490_v28 = vpop.f32.mrf.mxu0  ;;  %v5616_v24 = vld [vmem:[%s6783_s4 + $0x40] ss:$24 sps:$4 sm:$0xff]  }
 0x1ec   : > { %v3553_v29 = vpop.f32.mrf.mxu1  ;;  %3959 = vmatpush1.bf16.msra.mxu0 %v5586_v17 }
 0x1ed   : > { %v7233_v33 = vadd.f32 %v3553_v29, %v3490_v28  ;;  %4022 = vmatpush1.bf16.msra.mxu1 %v5589_v18  ;;  %v3492_v36 = vpop.f32.mrf.mxu0  ;;  %3960 = vmatprep.subr.bf16.mxu0 %v5594_v21  ;;  %v5624_v29 = vld [vmem:[%s6783_s4 + $0x14] ss:$24 sps:$4 sm:$0xff]  }
 0x1ee   : > { %v3555_v37 = vpop.f32.mrf.mxu1  ;;  %4023 = vmatprep.subr.bf16.mxu1 %v5597_v26  ;;  %v5619_v26 = vld [vmem:[%s6783_s4 + $0x340] ss:$24 sps:$4 sm:$0xff]  }
 0x1ef   : > { %v7239_v40 = vadd.f32 %v3555_v37, %v3492_v36  ;;  %3873 = vmatmul.mubr.bf16.gmra.mxu0 %v7061_v5  ;;  %v3496_v51 = vpop.f32.mrf.mxu0 }
 0x1f0   : > { %3936 = vmatmul.mubr.bf16.gmra.mxu1 %v7063_v6  ;;  %3961 = vmatpush1.bf16.msra.mxu0 %v5592_v34  ;;  %v3559_v52 = vpop.f32.mrf.mxu1  ;;  %v5627_v34 = vld [vmem:[%s6783_s4 + $0x314] ss:$24 sps:$4 sm:$0xff]  }
 0x1f1   : > { %4024 = vmatpush1.bf16.msra.mxu1 %v5595_v35  ;;  %3962 = vmatprep.subr.bf16.mxu0 %v5600_v38  ;;  %v7251_v60 = vadd.f32 %v3559_v52, %v3496_v51  ;;  %v3498_v63 = vpop.f32.mrf.mxu0  ;;  %v5622_v38 = vld [vmem:[%s6783_s4 + $0x10] ss:$24 sps:$4 sm:$0xff]  }
 0x1f2   : > { %4025 = vmatprep.subr.bf16.mxu1 %v5603_v39  ;;  %3882 = vmatprep.mubr.bf16.mxu0 %v7073_v13  ;;  %v3561_v1 = vpop.f32.mrf.mxu1  ;;  %v5625_v39 = vld [vmem:[%s6783_s4 + $0x310] ss:$24 sps:$4 sm:$0xff]  }
 0x1f3   : > { %3945 = vmatprep.mubr.bf16.mxu1 %v7075_v14  ;;  %v7255_v2 = vadd.f32 %v3561_v1, %v3498_v63  ;;  %v3500_v3 = vpop.f32.mrf.mxu0  ;;  %v5634_v63 = vld [vmem:[%s6783_s4 + $0x2b0] ss:$24 sps:$4 sm:$0xff]  }
 0x1f4   : > { %3963 = vmatpush1.bf16.msra.mxu0 %v5598_v41  ;;  %v3563_v4 = vpop.f32.mrf.mxu1  ;;  %v5637_v1 = vld [vmem:[%s6783_s4 + $0x5b0] ss:$24 sps:$4 sm:$0xff]  }
 0x1f5   : > { %4026 = vmatpush1.bf16.msra.mxu1 %v5601_v43  ;;  %3964 = vmatprep.subr.bf16.mxu0 %v5606_v45  ;;  %v7261_v11 = vadd.f32 %v3563_v4, %v3500_v3  ;;  %v3502_v16 = vpop.f32.mrf.mxu0  ;;  %v5630_v43 = vld [vmem:[%s6783_s4 + $0x2e4] ss:$24 sps:$4 sm:$0xff]  }
 0x1f6   : > { %4027 = vmatprep.subr.bf16.mxu1 %v5609_v46  ;;  %v3565_v17 = vpop.f32.mrf.mxu1  ;;  %v5633_v45 = vld [vmem:[%s6783_s4 + $0x5e4] ss:$24 sps:$4 sm:$0xff]  }
 0x1f7   : > { %3883 = vmatmul.mubr.bf16.gmra.mxu0 %v7085_v19  ;;  %v7265_v18 = vadd.f32 %v3565_v17, %v3502_v16  ;;  %v3506_v21 = vpop.f32.mrf.mxu0  ;;  %v5642_v3 = vld [vmem:[%s6783_s4 + $0x284] ss:$24 sps:$4 sm:$0xff]   ;;  %v5646_v16 = vld [vmem:[%s6783_s4 + $0x250] ss:$24 sps:$4 sm:$0xff]  }
 0x1f8   : > { %3946 = vmatmul.mubr.bf16.gmra.mxu1 %v7089_v22  ;;  %3965 = vmatpush1.bf16.msra.mxu0 %v5604_v53  ;;  %v3569_v23 = vpop.f32.mrf.mxu1  ;;  %v5628_v53 = vld [vmem:[%s6783_s4 + $0x2e0] ss:$24 sps:$4 sm:$0xff]   ;;  %v5645_v4 = vld [vmem:[%s6783_s4 + $0x584] ss:$24 sps:$4 sm:$0xff]   ;;  %v5649_v17 = vld [vmem:[%s6783_s4 + $0x550] ss:$24 sps:$4 sm:$0xff]  }
 0x1f9   : > { %4028 = vmatpush1.bf16.msra.mxu1 %v5607_v56  ;;  %3966 = vmatprep.subr.bf16.mxu0 %v5612_v61  ;;  %v7271_v28 = vadd.f32 %v3569_v23, %v3506_v21  ;;  %v3508_v35 = vpop.f32.mrf.mxu0  ;;  %v5631_v56 = vld [vmem:[%s6783_s4 + $0x5e0] ss:$24 sps:$4 sm:$0xff]   ;;  %v5636_v61 = vld [vmem:[%s6783_s4 + $0x2b4] ss:$24 sps:$4 sm:$0xff]   ;;  %v5654_v21 = vld [vmem:[%s6783_s4 + $0x224] ss:$24 sps:$4 sm:$0xff]  }
 0x1fa   : > { %4029 = vmatprep.subr.bf16.mxu1 %v5615_v62  ;;  %3988 = vmatprep.mubr.bf16.mxu0 %v6846_v54  ;;  %v3571_v54 = vpop.f32.mrf.mxu1  ;;  %v5639_v62 = vld [vmem:[%s6783_s4 + $0x5b4] ss:$24 sps:$4 sm:$0xff]   ;;  %v5657_v23 = vld [vmem:[%s6783_s4 + $0x524] ss:$24 sps:$4 sm:$0xff]  }
 0x1fb   : > { %4051 = vmatprep.mubr.bf16.mxu1 %v6848_v55  ;;  %v7275_v36 = vadd.f32 %v3571_v54, %v3508_v35  ;;  %v3510_v55 = vpop.f32.mrf.mxu0  ;;  %v5658_v35 = vld [vmem:[%s6783_s4 + $0x1f0] ss:$24 sps:$4 sm:$0xff]  }
 0x1fc   : > { %3967 = vmatpush1.bf16.msra.mxu0 %v5610_v7  ;;  %v3573_v37 = vpop.f32.mrf.mxu1  ;;  %v5640_v7 = vld [vmem:[%s6783_s4 + $0x280] ss:$24 sps:$4 sm:$0xff]   ;;  %v5661_v54 = vld [vmem:[%s6783_s4 + $0x4f0] ss:$24 sps:$4 sm:$0xff]  }
 0x1fd   : > { %4030 = vmatpush1.bf16.msra.mxu1 %v5613_v8  ;;  %3968 = vmatprep.subr.bf16.mxu0 %v5618_v12  ;;  %v7279_v41 = vadd.f32 %v3573_v37, %v3510_v55  ;;  %v3512_v46 = vpop.f32.mrf.mxu0  ;;  %v5643_v8 = vld [vmem:[%s6783_s4 + $0x580] ss:$24 sps:$4 sm:$0xff]   ;;  %v5648_v12 = vld [vmem:[%s6783_s4 + $0x254] ss:$24 sps:$4 sm:$0xff]   ;;  %v5666_v55 = vld [vmem:[%s6783_s4 + $0x1c4] ss:$24 sps:$4 sm:$0xff]  }
 0x1fe   : > { %4031 = vmatprep.subr.bf16.mxu1 %v5621_v15  ;;  %v3575_v51 = vpop.f32.mrf.mxu1  ;;  %v5651_v15 = vld [vmem:[%s6783_s4 + $0x554] ss:$24 sps:$4 sm:$0xff]   ;;  %v5669_v37 = vld [vmem:[%s6783_s4 + $0x4c4] ss:$24 sps:$4 sm:$0xff]  }
 0x1ff   : > { %v7283_v52 = vadd.f32 %v3575_v51, %v3512_v46  ;;  %v5670_v46 = vld [vmem:[%s6783_s4 + $0x190] ss:$24 sps:$4 sm:$0xff]  }
 0x200   : > { %3969 = vmatpush1.bf16.msra.mxu0 %v5616_v24  ;;  %v5652_v24 = vld [vmem:[%s6783_s4 + $0x220] ss:$24 sps:$4 sm:$0xff]   ;;  %v5673_v51 = vld [vmem:[%s6783_s4 + $0x490] ss:$24 sps:$4 sm:$0xff]  }
 0x201   : > { %4032 = vmatpush1.bf16.msra.mxu1 %v5619_v26  ;;  %3970 = vmatprep.subr.bf16.mxu0 %v5624_v29  ;;  %v5655_v26 = vld [vmem:[%s6783_s4 + $0x520] ss:$24 sps:$4 sm:$0xff]   ;;  %v5660_v29 = vld [vmem:[%s6783_s4 + $0x1f4] ss:$24 sps:$4 sm:$0xff]  }
 0x202   : > { %4033 = vmatprep.subr.bf16.mxu1 %v5627_v34  ;;  %v5663_v34 = vld [vmem:[%s6783_s4 + $0x4f4] ss:$24 sps:$4 sm:$0xff]  }
 0x204   : > { %3971 = vmatpush1.bf16.msra.mxu0 %v5622_v38  ;;  %v5664_v38 = vld [vmem:[%s6783_s4 + $0x1c0] ss:$24 sps:$4 sm:$0xff]  }
 0x205   : > { %4034 = vmatpush1.bf16.msra.mxu1 %v5625_v39  ;;  %3972 = vmatprep.subr.bf16.mxu0 %v5630_v43  ;;  %v5667_v39 = vld [vmem:[%s6783_s4 + $0x4c0] ss:$24 sps:$4 sm:$0xff]   ;;  %v5672_v43 = vld [vmem:[%s6783_s4 + $0x194] ss:$24 sps:$4 sm:$0xff]  }
 0x206   : > { %4035 = vmatprep.subr.bf16.mxu1 %v5633_v45  ;;  %v5675_v45 = vld [vmem:[%s6783_s4 + $0x494] ss:$24 sps:$4 sm:$0xff]  }
 0x208   : > { %3973 = vmatpush2.bf16.msra.mxu0 %v5628_v53  ;;  %v5678_v53 = vld [vmem:[%s6783_s4 + $0x764] ss:$24 sps:$4 sm:$0xff]  }
 0x209   : > { %4036 = vmatpush2.bf16.msra.mxu1 %v5631_v56  ;;  %3974 = vmatprep.subr.bf16.mxu0 %v5636_v61  ;;  %v5681_v56 = vld [vmem:[%s6783_s4 + $0xa64] ss:$24 sps:$4 sm:$0xff]   ;;  %v5676_v61 = vld [vmem:[%s6783_s4 + $0x760] ss:$24 sps:$4 sm:$0xff]  }
 0x20a   : > { %4037 = vmatprep.subr.bf16.mxu1 %v5639_v62  ;;  %v5679_v62 = vld [vmem:[%s6783_s4 + $0xa60] ss:$24 sps:$4 sm:$0xff]  }
 0x20c   : > { %3975 = vmatpush2.bf16.msra.mxu0 %v5634_v63  ;;  %v5684_v63 = vld [vmem:[%s6783_s4 + $0x734] ss:$24 sps:$4 sm:$0xff]  }
 0x20d   : > { %4038 = vmatpush2.bf16.msra.mxu1 %v5637_v1  ;;  %3976 = vmatprep.subr.bf16.mxu0 %v5642_v3  ;;  %v5687_v1 = vld [vmem:[%s6783_s4 + $0xa34] ss:$24 sps:$4 sm:$0xff]  }
 0x20e   : > { %4039 = vmatprep.subr.bf16.mxu1 %v5645_v4 }
 0x210   : > { %3977 = vmatpush2.bf16.msra.mxu0 %v5640_v7  ;;  %v5682_v7 = vld [vmem:[%s6783_s4 + $0x730] ss:$24 sps:$4 sm:$0xff]  }
 0x211   : > { %4040 = vmatpush2.bf16.msra.mxu1 %v5643_v8  ;;  %3978 = vmatprep.subr.bf16.mxu0 %v5648_v12  ;;  %v5685_v8 = vld [vmem:[%s6783_s4 + $0xa30] ss:$24 sps:$4 sm:$0xff]  }
 0x212   : > { %4041 = vmatprep.subr.bf16.mxu1 %v5651_v15 }
 0x214   : > { %3979 = vmatpush2.bf16.msra.mxu0 %v5646_v16  ;;  %v5690_v16 = vld [vmem:[%s6783_s4 + $0x704] ss:$24 sps:$4 sm:$0xff]  }
 0x215   : > { %4042 = vmatpush2.bf16.msra.mxu1 %v5649_v17  ;;  %3980 = vmatprep.subr.bf16.mxu0 %v5654_v21  ;;  %v5693_v17 = vld [vmem:[%s6783_s4 + $0xa04] ss:$24 sps:$4 sm:$0xff]  }
 0x216   : > { %4043 = vmatprep.subr.bf16.mxu1 %v5657_v23 }
 0x218   : > { %3981 = vmatpush2.bf16.msra.mxu0 %v5652_v24  ;;  %v5688_v24 = vld [vmem:[%s6783_s4 + $0x700] ss:$24 sps:$4 sm:$0xff]  }
 0x219   : > { %4044 = vmatpush2.bf16.msra.mxu1 %v5655_v26  ;;  %3982 = vmatprep.subr.bf16.mxu0 %v5660_v29  ;;  %v5691_v26 = vld [vmem:[%s6783_s4 + $0xa00] ss:$24 sps:$4 sm:$0xff]  }
 0x21a   : > { %4045 = vmatprep.subr.bf16.mxu1 %v5663_v34 }
 0x21c   : > { %3983 = vmatpush2.bf16.msra.mxu0 %v5658_v35 }
 0x21d   : > { %4046 = vmatpush2.bf16.msra.mxu1 %v5661_v54  ;;  %3984 = vmatprep.subr.bf16.mxu0 %v5666_v55 }
 0x21e   : > { %4047 = vmatprep.subr.bf16.mxu1 %v5669_v37  ;;  %v5694_v37 = vld [vmem:[%s6783_s4 + $0x6d0] ss:$24 sps:$4 sm:$0xff]  }
 0x220   : > { %3985 = vmatpush2.bf16.msra.mxu0 %v5664_v38  ;;  %v5697_v38 = vld [vmem:[%s6783_s4 + $0x9d0] ss:$24 sps:$4 sm:$0xff]  }
 0x221   : > { %4048 = vmatpush2.bf16.msra.mxu1 %v5667_v39  ;;  %3986 = vmatprep.subr.bf16.mxu0 %v5672_v43 }
 0x222   : > { %4049 = vmatprep.subr.bf16.mxu1 %v5675_v45  ;;  %v5705_v45 = vld [vmem:[%s6783_s4 + $0x9a4] ss:$24 sps:$4 sm:$0xff]  }
 0x224   : > { %3987 = vmatpush2.bf16.msra.mxu0 %v5670_v46 }
 0x225   : > { %4050 = vmatpush2.bf16.msra.mxu1 %v5673_v51  ;;  %4082 = vmatprep.subr.bf16.mxu0 %v5678_v53  ;;  %v5700_v53 = vld [vmem:[%s6783_s4 + $0x6a0] ss:$24 sps:$4 sm:$0xff]  }
 0x226   : > { %4145 = vmatprep.subr.bf16.mxu1 %v5681_v56  ;;  %v5703_v56 = vld [vmem:[%s6783_s4 + $0x9a0] ss:$24 sps:$4 sm:$0xff]  }
 0x227   : > { %v7321_v3 = vpop.f32.mrf.mxu0  ;;  %3989 = vmatmul.mubr.bf16.vlgmr.msra.gmra.mxu0 %v6869_v9 }
 0x228   : > { %v7323_v4 = vpop.f32.mrf.mxu1  ;;  %4052 = vmatmul.mubr.bf16.vlgmr.msra.gmra.mxu1 %v6871_v10  ;;  %4083 = vmatpush1.bf16.msra.mxu0 %v5676_v61 }
 0x229   : > { %4146 = vmatpush1.bf16.msra.mxu1 %v5679_v62  ;;  %v3614_v12 = vpop.f32.mrf.mxu0  ;;  %4084 = vmatprep.subr.bf16.mxu0 %v5684_v63 }
 0x22a   : > { %v3677_v15 = vpop.f32.mrf.mxu1  ;;  %4147 = vmatprep.subr.bf16.mxu1 %v5687_v1  ;;  %v3615_v21 = vadd.f32 %v3614_v12, %v7229_v27  ;;  %3998 = vmatprep.mubr.bf16.mxu0 %v6893_v25  ;;  %v5696_v27 = vld [vmem:[%s6783_s4 + $0x6d4] ss:$24 sps:$4 sm:$0xff]   ;;  %v5709_v12 = vld [vmem:[%s6783_s4 + $0x970] ss:$24 sps:$4 sm:$0xff]  }
 0x22b   : > { %4061 = vmatprep.mubr.bf16.mxu1 %v6903_v30  ;;  %v7334_v9 = vpop.f32.mrf.mxu0  ;;  %v5699_v25 = vld [vmem:[%s6783_s4 + $0x9d4] ss:$24 sps:$4 sm:$0xff]  }
 0x22c   : > { %v7336_v10 = vpop.f32.mrf.mxu1  ;;  %v7338_v23 = vadd.f32 %v3677_v15, %v3615_v21  ;;  %4085 = vmatpush1.bf16.msra.mxu0 %v5682_v7 }
 0x22d   : > { %4148 = vmatpush1.bf16.msra.mxu1 %v5685_v8  ;;  %v3618_v29 = vpop.f32.mrf.mxu0  ;;  %4086 = vmatprep.subr.bf16.mxu0 %v5690_v16  ;;  %v5706_v8 = vld [vmem:[%s6783_s4 + $0x670] ss:$24 sps:$4 sm:$0xff]  }
 0x22e   : > { %v3681_v34 = vpop.f32.mrf.mxu1  ;;  %4149 = vmatprep.subr.bf16.mxu1 %v5693_v17  ;;  %v3619_v30 = vadd.f32 %v3618_v29, %v7239_v40  ;;  %v5702_v40 = vld [vmem:[%s6783_s4 + $0x6a4] ss:$24 sps:$4 sm:$0xff]   ;;  %v5715_v29 = vld [vmem:[%s6783_s4 + $0x940] ss:$24 sps:$4 sm:$0xff]  }
 0x22f   : > { %v7345_v35 = vpop.f32.mrf.mxu0  ;;  %3999 = vmatmul.mubr.bf16.gmra.mxu0 %v6905_v31  ;;  %v5717_v17 = vld [vmem:[%s6783_s4 + $0x944] ss:$24 sps:$4 sm:$0xff]  }
 0x230   : > { %v7347_v54 = vpop.f32.mrf.mxu1  ;;  %4062 = vmatmul.mubr.bf16.gmra.mxu1 %v6907_v32  ;;  %v7351_v55 = vadd.f32 %v3681_v34, %v3619_v30  ;;  %4087 = vmatpush1.bf16.msra.mxu0 %v5688_v24  ;;  %v5718_v30 = vld [vmem:[%s6783_s4 + $0x610] ss:$24 sps:$4 sm:$0xff]  }
 0x231   : > { %4150 = vmatpush1.bf16.msra.mxu1 %v5691_v26  ;;  %v3624_v39 = vpop.f32.mrf.mxu0  ;;  %4088 = vmatprep.subr.bf16.mxu0 %v5696_v27  ;;  %v5712_v26 = vld [vmem:[%s6783_s4 + $0x640] ss:$24 sps:$4 sm:$0xff]  }
 0x232   : > { %v3687_v43 = vpop.f32.mrf.mxu1  ;;  %4151 = vmatprep.subr.bf16.mxu1 %v5699_v25  ;;  %v3625_v31 = vadd.f32 %v3624_v39, %v7255_v2  ;;  %4008 = vmatprep.mubr.bf16.mxu0 %v6928_v42  ;;  %v5708_v2 = vld [vmem:[%s6783_s4 + $0x674] ss:$24 sps:$4 sm:$0xff]   ;;  %v5729_v39 = vld [vmem:[%s6783_s4 + $0xbe4] ss:$24 sps:$4 sm:$0xff]  }
 0x233   : > { %4071 = vmatprep.mubr.bf16.mxu1 %v6933_v44  ;;  %v7360_v32 = vpop.f32.mrf.mxu0  ;;  %v5711_v42 = vld [vmem:[%s6783_s4 + $0x974] ss:$24 sps:$4 sm:$0xff]  }
 0x234   : > { %v7362_v46 = vpop.f32.mrf.mxu1  ;;  %v7364_v51 = vadd.f32 %v3687_v43, %v3625_v31  ;;  %4089 = vmatpush1.bf16.msra.mxu0 %v5694_v37  ;;  %v5721_v37 = vld [vmem:[%s6783_s4 + $0x910] ss:$24 sps:$4 sm:$0xff]   ;;  %v5724_v43 = vld [vmem:[%s6783_s4 + $0x8e0] ss:$24 sps:$4 sm:$0xff]  }
 0x235   : > { %4152 = vmatpush1.bf16.msra.mxu1 %v5697_v38  ;;  %v3628_v61 = vpop.f32.mrf.mxu0  ;;  %4090 = vmatprep.subr.bf16.mxu0 %v5702_v40  ;;  %v5726_v38 = vld [vmem:[%s6783_s4 + $0x8e4] ss:$24 sps:$4 sm:$0xff]   ;;  %v5732_v40 = vld [vmem:[%s6783_s4 + $0x8b4] ss:$24 sps:$4 sm:$0xff]   ;;  %v5730_v31 = vld [vmem:[%s6783_s4 + $0x8b0] ss:$24 sps:$4 sm:$0xff]  }
 0x236   : > { %v3691_v62 = vpop.f32.mrf.mxu1  ;;  %4153 = vmatprep.subr.bf16.mxu1 %v5705_v45  ;;  %v3629_v44 = vadd.f32 %v3628_v61, %v7265_v18  ;;  %v5714_v18 = vld [vmem:[%s6783_s4 + $0x644] ss:$24 sps:$4 sm:$0xff]   ;;  %v5735_v45 = vld [vmem:[%s6783_s4 + $0xbb4] ss:$24 sps:$4 sm:$0xff]  }
 0x237   : > { %v7371_v63 = vpop.f32.mrf.mxu0  ;;  %4009 = vmatmul.mubr.bf16.gmra.mxu0 %v6938_v47  ;;  %v5741_v61 = vld [vmem:[%s6783_s4 + $0xb84] ss:$24 sps:$4 sm:$0xff]  }
 0x238   : > { %v7373_v1 = vpop.f32.mrf.mxu1  ;;  %4072 = vmatmul.mubr.bf16.gmra.mxu1 %v6940_v48  ;;  %v7377_v7 = vadd.f32 %v3691_v62, %v3629_v44  ;;  %4091 = vmatpush1.bf16.msra.mxu0 %v5700_v53  ;;  %v5733_v53 = vld [vmem:[%s6783_s4 + $0xbb0] ss:$24 sps:$4 sm:$0xff]   ;;  %v5736_v62 = vld [vmem:[%s6783_s4 + $0x880] ss:$24 sps:$4 sm:$0xff]   ;;  %v5747_v44 = vld [vmem:[%s6783_s4 + $0xb54] ss:$24 sps:$4 sm:$0xff]  }
 0x239   : > { %4154 = vmatpush1.bf16.msra.mxu1 %v5703_v56  ;;  %v3634_v15 = vpop.f32.mrf.mxu0  ;;  %4092 = vmatprep.subr.bf16.mxu0 %v5708_v2  ;;  %v5738_v56 = vld [vmem:[%s6783_s4 + $0x884] ss:$24 sps:$4 sm:$0xff]   ;;  %v5739_v2 = vld [vmem:[%s6783_s4 + $0xb80] ss:$24 sps:$4 sm:$0xff]  }
 0x23a   : > { %v3697_v16 = vpop.f32.mrf.mxu1  ;;  %4155 = vmatprep.subr.bf16.mxu1 %v5711_v42  ;;  %v3635_v47 = vadd.f32 %v3634_v15, %v7275_v36  ;;  %4114 = vmatprep.mubr.bf16.mxu0 %v6963_v59  ;;  %v5720_v59 = vld [vmem:[%s6783_s4 + $0x614] ss:$24 sps:$4 sm:$0xff]   ;;  %v5750_v15 = vld [vmem:[%s6783_s4 + $0x824] ss:$24 sps:$4 sm:$0xff]  }
 0x23b   : > { %4177 = vmatprep.mubr.bf16.mxu1 %v6979_v0  ;;  %v7386_v48 = vpop.f32.mrf.mxu0  ;;  %v5723_v0 = vld [vmem:[%s6783_s4 + $0x914] ss:$24 sps:$4 sm:$0xff]  }
 0x23c   : > { %v7388_v21 = vpop.f32.mrf.mxu1  ;;  %v7390_v24 = vadd.f32 %v3697_v16, %v3635_v47  ;;  %4093 = vmatpush1.bf16.msra.mxu0 %v5706_v8  ;;  %v5744_v42 = vld [vmem:[%s6783_s4 + $0x854] ss:$24 sps:$4 sm:$0xff]   ;;  %v5742_v8 = vld [vmem:[%s6783_s4 + $0x850] ss:$24 sps:$4 sm:$0xff]   ;;  %v5753_v16 = vld [vmem:[%s6783_s4 + $0xb24] ss:$24 sps:$4 sm:$0xff]  }
 0x23d   : > { %4156 = vmatpush1.bf16.msra.mxu1 %v5709_v12  ;;  %v3638_v34 = vpop.f32.mrf.mxu0  ;;  %4094 = vmatprep.subr.bf16.mxu0 %v5714_v18  ;;  %v5745_v12 = vld [vmem:[%s6783_s4 + $0xb50] ss:$24 sps:$4 sm:$0xff]   ;;  %v5748_v18 = vld [vmem:[%s6783_s4 + $0x820] ss:$24 sps:$4 sm:$0xff]   ;;  %v5756_v47 = vld [vmem:[%s6783_s4 + $0x7f4] ss:$24 sps:$4 sm:$0xff]  }
 0x23e   : > { %v3701_v36 = vpop.f32.mrf.mxu1  ;;  %4157 = vmatprep.subr.bf16.mxu1 %v5717_v17  ;;  %v3639_v27 = vadd.f32 %v3638_v34, %v7283_v52  ;;  %v5727_v52 = vld [vmem:[%s6783_s4 + $0xbe0] ss:$24 sps:$4 sm:$0xff]   ;;  %v5757_v34 = vld [vmem:[%s6783_s4 + $0xaf0] ss:$24 sps:$4 sm:$0xff]  }
 0x23f   : > { %v5751_v17 = vld [vmem:[%s6783_s4 + $0xb20] ss:$24 sps:$4 sm:$0xff]  }
 0x240   : > { %v7397_v25 = vadd.f32 %v3701_v36, %v3639_v27  ;;  %4095 = vmatpush1.bf16.msra.mxu0 %v5712_v26  ;;  %v5759_v26 = vld [vmem:[%s6783_s4 + $0xaf4] ss:$24 sps:$4 sm:$0xff]   ;;  %v5762_v36 = vld [vmem:[%s6783_s4 + $0x7c4] ss:$24 sps:$4 sm:$0xff]   ;;  %v5763_v27 = vld [vmem:[%s6783_s4 + $0xac0] ss:$24 sps:$4 sm:$0xff]  }
 0x241   : > { %4158 = vmatpush1.bf16.msra.mxu1 %v5715_v29  ;;  %4096 = vmatprep.subr.bf16.mxu0 %v5720_v59  ;;  %v5754_v29 = vld [vmem:[%s6783_s4 + $0x7f0] ss:$24 sps:$4 sm:$0xff]   ;;  %v5765_v59 = vld [vmem:[%s6783_s4 + $0xac4] ss:$24 sps:$4 sm:$0xff]  }
 0x242   : > { %4159 = vmatprep.subr.bf16.mxu1 %v5723_v0  ;;  %v5760_v0 = vld [vmem:[%s6783_s4 + $0x7c0] ss:$24 sps:$4 sm:$0xff]  }
 0x244   : > { %4097 = vmatpush1.bf16.msra.mxu0 %v5718_v30  ;;  %v5768_v30 = vld [vmem:[%s6783_s4 + $0x794] ss:$24 sps:$4 sm:$0xff]  }
 0x245   : > { %4160 = vmatpush1.bf16.msra.mxu1 %v5721_v37  ;;  %4098 = vmatprep.subr.bf16.mxu0 %v5726_v38  ;;  %v5771_v37 = vld [vmem:[%s6783_s4 + $0xa94] ss:$24 sps:$4 sm:$0xff]   ;;  %v5766_v38 = vld [vmem:[%s6783_s4 + $0x790] ss:$24 sps:$4 sm:$0xff]  }
 0x246   : > { %4161 = vmatprep.subr.bf16.mxu1 %v5729_v39  ;;  %v5769_v39 = vld [vmem:[%s6783_s4 + $0xa90] ss:$24 sps:$4 sm:$0xff]  }
 0x248   : > { %4099 = vmatpush2.bf16.msra.mxu0 %v5724_v43 }
 0x249   : > { %4162 = vmatpush2.bf16.msra.mxu1 %v5727_v52  ;;  %4100 = vmatprep.subr.bf16.mxu0 %v5732_v40 }
 0x24a   : > { %4163 = vmatprep.subr.bf16.mxu1 %v5735_v45 }
 0x24c   : > { %4101 = vmatpush2.bf16.msra.mxu0 %v5730_v31 }
 0x24d   : > { %4164 = vmatpush2.bf16.msra.mxu1 %v5733_v53  ;;  %4102 = vmatprep.subr.bf16.mxu0 %v5738_v56 }
 0x24e   : > { %4165 = vmatprep.subr.bf16.mxu1 %v5741_v61 }
 0x250   : > { %4103 = vmatpush2.bf16.msra.mxu0 %v5736_v62 }
 0x251   : > { %4166 = vmatpush2.bf16.msra.mxu1 %v5739_v2  ;;  %4104 = vmatprep.subr.bf16.mxu0 %v5744_v42 }
 0x252   : > { %4167 = vmatprep.subr.bf16.mxu1 %v5747_v44 }
 0x254   : > { %4105 = vmatpush2.bf16.msra.mxu0 %v5742_v8 }
 0x255   : > { %4168 = vmatpush2.bf16.msra.mxu1 %v5745_v12  ;;  %4106 = vmatprep.subr.bf16.mxu0 %v5750_v15 }
 0x256   : > { %4169 = vmatprep.subr.bf16.mxu1 %v5753_v16 }
 0x258   : > { %4107 = vmatpush2.bf16.msra.mxu0 %v5748_v18 }
 0x259   : > { %4170 = vmatpush2.bf16.msra.mxu1 %v5751_v17  ;;  %4108 = vmatprep.subr.bf16.mxu0 %v5756_v47 }
 0x25a   : > { %4171 = vmatprep.subr.bf16.mxu1 %v5759_v26 }
 0x25c   : > { %4109 = vmatpush2.bf16.msra.mxu0 %v5754_v29 }
 0x25d   : > { %4172 = vmatpush2.bf16.msra.mxu1 %v5757_v34  ;;  %4110 = vmatprep.subr.bf16.mxu0 %v5762_v36 }
 0x25e   : > { %4173 = vmatprep.subr.bf16.mxu1 %v5765_v59 }
 0x260   : > { %4111 = vmatpush2.bf16.msra.mxu0 %v5760_v0 }
 0x261   : > { %4174 = vmatpush2.bf16.msra.mxu1 %v5763_v27  ;;  %4112 = vmatprep.subr.bf16.mxu0 %v5768_v30 }
 0x262   : > { %4175 = vmatprep.subr.bf16.mxu1 %v5771_v37 }
 0x264   : > { %4113 = vmatpush2.bf16.msra.mxu0 %v5766_v38 }
 0x265   : > { %4176 = vmatpush2.bf16.msra.mxu1 %v5769_v39 }
 0x267   : > { %v3738_v43 = vpop.f32.mrf.mxu0  ;;  %4115 = vmatmul.mubr.bf16.vlgmr.msra.gmra.mxu0 %v7027_v49 }
 0x268   : > { %v3801_v52 = vpop.f32.mrf.mxu1  ;;  %4178 = vmatmul.mubr.bf16.vlgmr.msra.gmra.mxu1 %v7031_v50  ;;  %4124 = vmatprep.mubr.bf16.mxu0 %v7041_v57 }
 0x269   : > { %v3802_v40 = vadd.f32 %v3801_v52, %v3738_v43  ;;  %4187 = vmatprep.mubr.bf16.mxu1 %v7043_v58  ;;  %v3740_v45 = vpop.f32.mrf.mxu0 }
 0x26a   : > { %v3803_v31 = vpop.f32.mrf.mxu1 }
 0x26b   : > { %v3742_v53 = vpop.f32.mrf.mxu0  ;;  %v3804_v0 = vadd.f32 %v3803_v31, %v3740_v45 }
 0x26c   : > { %v3805_v56 = vpop.f32.mrf.mxu1 }
 0x26d   : > { %v3806_v61 = vadd.f32 %v3805_v56, %v3742_v53  ;;  %v3744_v62 = vpop.f32.mrf.mxu0 }
 0x26e   : > { %v3807_v2 = vpop.f32.mrf.mxu1 }
 0x26f   : > { %4125 = vmatmul.mubr.bf16.gmra.mxu0 %v7061_v5  ;;  %v3748_v42 = vpop.f32.mrf.mxu0  ;;  %v3808_v52 = vadd.f32 %v3807_v2, %v3744_v62 }
 0x270   : > { %4188 = vmatmul.mubr.bf16.gmra.mxu1 %v7063_v6  ;;  %v3811_v49 = vpop.f32.mrf.mxu1  ;;  %4134 = vmatprep.mubr.bf16.mxu0 %v7073_v13 }
 0x271   : > { %4197 = vmatprep.mubr.bf16.mxu1 %v7075_v14  ;;  %v3812_v50 = vadd.f32 %v3811_v49, %v3748_v42  ;;  %v3750_v57 = vpop.f32.mrf.mxu0 }
 0x272   : > { %v3813_v58 = vpop.f32.mrf.mxu1 }
 0x273   : > { %v3752_v44 = vpop.f32.mrf.mxu0 }
 0x274   : > { %v3815_v8 = vpop.f32.mrf.mxu1 }
 0x275   : > { %v3816_v12 = vadd.f32 %v3815_v8, %v3752_v44  ;;  %v3754_v15 = vpop.f32.mrf.mxu0 }
 0x276   : > { %v3817_v16 = vpop.f32.mrf.mxu1 }
 0x277   : > { %4135 = vmatmul.mubr.bf16.gmra.mxu0 %v7085_v19  ;;  %v3758_v5 = vpop.f32.mrf.mxu0 }
 0x278   : > { %4198 = vmatmul.mubr.bf16.gmra.mxu1 %v7089_v22  ;;  %v3821_v6 = vpop.f32.mrf.mxu1  ;;  %v3613_v22 = vadd.f32 %v7321_v3, %v7225_v20 }
 0x279   : > { %v3822_v18 = vadd.f32 %v3821_v6, %v3758_v5  ;;  %v3760_v17 = vpop.f32.mrf.mxu0  ;;  %v3814_v5 = vadd.f32 %v3813_v58, %v3750_v57 }
 0x27a   : > { %v3823_v47 = vpop.f32.mrf.mxu1  ;;  %v3676_v44 = vadd.f32 %v7323_v4, %v3613_v22  ;;  %v3623_v4 = vadd.f32 %v7345_v35, %v7251_v60 }
 0x27b   : > { %v3762_v13 = vpop.f32.mrf.mxu0 }
 0x27c   : > { %v3825_v26 = vpop.f32.mrf.mxu1  ;;  %v3686_v35 = vadd.f32 %v7347_v54, %v3623_v4 }
 0x27d   : > { %v7443_v14 = vadd.f32 %v3825_v26, %v3762_v13  ;;  %v7445_v29 = vpop.f32.mrf.mxu0 }
 0x27e   : > { %v7447_v34 = vpop.f32.mrf.mxu1 }
 0x2a7   : > { %v3864_v36 = vpop.f32.mrf.mxu0 }
 0x2a8   : > { %v3927_v59 = vpop.f32.mrf.mxu1  ;;  %v3865_v27 = vadd.f32 %v3864_v36, %v3802_v40  ;;  %v3617_v40 = vadd.f32 %v7334_v9, %v7233_v33  ;;  %v3627_v33 = vadd.f32 %v7360_v32, %v7261_v11 }
 0x2a9   : > { %v3866_v19 = vpop.f32.mrf.mxu0 }
 0x2aa   : > { %v3929_v30 = vpop.f32.mrf.mxu1  ;;  %v7451_v37 = vadd.f32 %v3927_v59, %v3865_v27  ;;  %v3867_v38 = vadd.f32 %v3866_v19, %v3804_v0  ;;  %v3680_v2 = vadd.f32 %v7336_v10, %v3617_v40  ;;  %v3690_v11 = vadd.f32 %v7362_v46, %v3627_v33 }
 0x2ab   : > { %v3868_v39 = vpop.f32.mrf.mxu0  ;;  %v4214_v46 = vmul.f32 %v3686_v35, %v3686_v35 }
 0x2ac   : > { %v3931_v43 = vpop.f32.mrf.mxu1  ;;  %v3869_v53 = vadd.f32 %v3868_v39, %v3806_v61  ;;  %v3930_v56 = vadd.f32 %v3929_v30, %v3867_v38  ;;  %v4208_v61 = vmul.f32 %v3676_v44, %v3676_v44  ;;  %v4211_v60 = vmul.f32 %v3680_v2, %v3680_v2 }
 0x2ad   : > { %v3870_v42 = vpop.f32.mrf.mxu0  ;;  %v4217_v40 = vmul.f32 %v3690_v11, %v3690_v11 }
 0x2ae   : > { %v3933_v49 = vpop.f32.mrf.mxu1  ;;  %v7456_v45 = vadd.f32 %v3931_v43, %v3869_v53  ;;  %v3871_v31 = vadd.f32 %v3870_v42, %v3808_v52  ;;  %v4226_v6 = vmul.f32 %v3930_v56, %v3930_v56 }
 0x2af   : > { %v3874_v8 = vpop.f32.mrf.mxu0 }
 0x2b0   : > { %v3937_v20 = vpop.f32.mrf.mxu1  ;;  %v3875_v3 = vadd.f32 %v3874_v8, %v3812_v50  ;;  %v3934_v13 = vadd.f32 %v3933_v49, %v3871_v31  ;;  %v3818_v50 = vadd.f32 %v3817_v16, %v3754_v15  ;;  %v7465_v58 = vadd.f32 %v4226_v6, %v4208_v61 }
 0x2b1   : > { %v3876_v26 = vpop.f32.mrf.mxu0  ;;  %v3633_v15 = vadd.f32 %v7371_v63, %v7271_v28  ;;  %v3637_v28 = vadd.f32 %v7386_v48, %v7279_v41  ;;  %v3828_v31 = vadd.f32 %v7447_v34, %v7445_v29 }
 0x2b2   : > { %v3939_v62 = vpop.f32.mrf.mxu1  ;;  %v3877_v9 = vadd.f32 %v3876_v26, %v3814_v5  ;;  %v7463_v36 = vadd.f32 %v3937_v20, %v3875_v3  ;;  %v4229_v27 = vmul.f32 %v3934_v13, %v3934_v13  ;;  %5772 = vrsqrt.f32 %v7465_v58 }
 0x2b3   : > { %v3878_v59 = vpop.f32.mrf.mxu0  ;;  %v4388_v49 = vmax.f32 %v7465_v58, 1e-10  ;;  %v3700_v48 = vadd.f32 %v7388_v21, %v3637_v28  ;;  %vm4264_vm0 = vcmp.eq.f32.partialorder %v7465_v58, inf  ;;  %vm4266_vm1 = vcmp.eq.f32.partialorder %v7465_v58, 0.0 }
 0x2b4   : > { %v3941_v0 = vpop.f32.mrf.mxu1  ;;  %v3879_v57 = vadd.f32 %v3878_v59, %v3816_v12  ;;  %v3940_v19 = vadd.f32 %v3939_v62, %v3877_v9  ;;  %v3824_v12 = vadd.f32 %v3823_v47, %v3760_v17  ;;  %v7474_v43 = vadd.f32 %v4229_v27, %v4211_v60 }
 0x2b5   : > { %v3880_v30 = vpop.f32.mrf.mxu0  ;;  %v3696_v47 = vadd.f32 %v7373_v1, %v3633_v15  ;;  %v4223_v4 = vmul.f32 %v3700_v48, %v3700_v48 }
 0x2b6   : > { %v3943_v22 = vpop.f32.mrf.mxu1  ;;  %v3881_v10 = vadd.f32 %v3880_v30, %v3818_v50  ;;  %v7467_v38 = vadd.f32 %v3941_v0, %v3879_v57  ;;  %v4232_v52 = vmul.f32 %v3940_v19, %v3940_v19  ;;  %5774 = vrsqrt.f32 %v7474_v43 }
 0x2b7   : > { %v3884_v32 = vpop.f32.mrf.mxu0  ;;  %5776 = vlog2.f32 %v4388_v49  ;;  %v4391_v26 = vmax.f32 %v7474_v43, 1e-10  ;;  %v4220_v1 = vmul.f32 %v3696_v47, %v3696_v47  ;;  %vm4285_vm2 = vcmp.eq.f32.partialorder %v7474_v43, inf  ;;  %v4505_v47 = vld [vmem:[#allocation3 + $0x40] sm:$0xff] }
 0x2b8   : > { %v3947_v39 = vpop.f32.mrf.mxu1  ;;  %v3885_v16 = vadd.f32 %v3884_v32, %v3822_v18  ;;  %v3944_v53 = vadd.f32 %v3943_v22, %v3881_v10  ;;  %v7485_v8 = vadd.f32 %v4232_v52, %v4214_v46  ;;  %v4267_v22 = vand.u32 2147483648, %v7465_v58 }
 0x2b9   : > { %v3886_v56 = vpop.f32.mrf.mxu0  ;;  %vm4287_vm3 = vcmp.eq.f32.partialorder %v7474_v43, 0.0  ;;  %v4288_v11 = vand.u32 2147483648, %v7474_v43 }
 0x2ba   : > { %v3949_v42 = vpop.f32.mrf.mxu1  ;;  %v3887_v54 = vadd.f32 %v3886_v56, %v3824_v12  ;;  %v7477_v44 = vadd.f32 %v3947_v39, %v3885_v16  ;;  %v4235_v63 = vmul.f32 %v3944_v53, %v3944_v53  ;;  %vm4306_vm4 = vcmp.eq.f32.partialorder %v7485_v8, inf }
 0x2bb   : > { %v3888_v18 = vpop.f32.mrf.mxu0  ;;  %v4309_v15 = vand.u32 2147483648, %v7485_v8  ;;  %vm4308_vm6 = vcmp.eq.f32.partialorder %v7485_v8, 0.0 }
 0x2bc   : > { %v3951_v17 = vpop.f32.mrf.mxu1  ;;  %v4253_v20 = vadd.f32 %v4235_v63, %v4217_v40  ;;  %v3889_v3 = vadd.f32 %v3888_v18, %v7443_v14  ;;  %v3950_v6 = vadd.f32 %v3949_v42, %v3887_v54  ;;  %v4394_v14 = vmax.f32 %v7485_v8, 1e-10 }
 0x2bd   : > { %v3890_v5 = vpop.f32.mrf.mxu0 }
 0x2be   : > { %v3891_v13 = vadd.f32 %v3890_v5, %v3828_v31  ;;  %v3953_v41 = vpop.f32.mrf.mxu1  ;;  %5778 = vrsqrt.f32 %v4253_v20  ;;  %v4397_v62 = vmax.f32 %v4253_v20, 1e-10  ;;  %v4238_v29 = vmul.f32 %v3950_v6, %v3950_v6 }
 0x2bf   : > { %5780 = vrsqrt.f32 %v7485_v8  ;;  %v7491_v34 = vadd.f32 %v3951_v17, %v3889_v3  ;;  %v5773_v59 = vpop.eup %5772  ;;  %vm4327_vm5 = vcmp.eq.f32.partialorder %v4253_v20, inf  ;;  %v4330_v12 = vand.u32 2147483648, %v4253_v20 }
 0x2c0   : > { %v3954_v61 = vadd.f32 %v3953_v41, %v3891_v13  ;;  %5782 = vlog2.f32 %v4397_v62  ;;  %v7494_v2 = vadd.f32 %v4238_v29, %v4220_v1  ;;  %v4263_v0 = vmul.f32 %v5773_v59, %v7465_v58 }
 0x2c1   : > { %5784 = vlog2.f32 %v4391_v26  ;;  %vm4329_vm7 = vcmp.eq.f32.partialorder %v4253_v20, 0.0  ;;  %v4460_v26 = vld [vmem:[#allocation2 + $0x30] sm:$0xff] }
 0x2c2   : > { %v4241_v33 = vmul.f32 %v3954_v61, %v3954_v61  ;;  %5786 = vrsqrt.f32 %v7494_v2  ;;  %v4400_v21 = vmax.f32 %v7494_v2, 1e-10  ;;  %v4265_v30 = vsel %vm4264_vm0, %v7465_v58, %v4263_v0 }
 0x2c3   : > { %5788 = vlog2.f32 %v4394_v14  ;;  %v5775_v57 = vpop.eup %5774  ;;  %v4268_v52 = vsel %vm4266_vm1, %v4267_v22, %v4265_v30  ;;  %vm4348_vm8 = vcmp.eq.f32.partialorder %v7494_v2, inf  ;;  %vm4350_vm9 = vcmp.eq.f32.partialorder %v7494_v2, 0.0 }
 0x2c4   : > { %v7498_v9 = vadd.f32 %v4241_v33, %v4223_v4  ;;  %5790 = vlog2.f32 %v4400_v21  ;;  %v5777_v27 = vpop.eup %5776  ;;  %v4284_v10 = vmul.f32 %v5775_v57, %v7474_v43  ;;  %v4351_v31 = vand.u32 2147483648, %v7494_v2  ;;  %v4508_v4 = vld [vmem:[#allocation3 + $0x30] sm:$0xff] }
 0x2c5   : > { %v4407_v35 = vmul.f32 0.6931472, %v5777_v27 }
 0x2c6   : > { %5792 = vrsqrt.f32 %v7498_v9  ;;  %v4403_v50 = vmax.f32 %v7498_v9, 1e-10  ;;  %v4286_v49 = vsel %vm4285_vm2, %v7474_v43, %v4284_v10  ;;  %vm4369_vm10 = vcmp.eq.f32.partialorder %v7498_v9, inf }
 0x2c7   : > { %v4442_v40 = vmul.f32 0.4342945, %v4407_v35  ;;  %v4289_v3 = vsel %vm4287_vm3, %v4288_v11, %v4286_v49  ;;  %v4372_v29 = vand.u32 2147483648, %v7498_v9  ;;  %vm4371_vm11 = vcmp.eq.f32.partialorder %v7498_v9, 0.0  ;;  %v4511_v11 = vld [vmem:[#allocation3 + $0x10] sm:$0xff] }
 0x2c8   : > { %5794 = vlog2.f32 %v4403_v50 }
 0x2cb   : > { %v5779_v19 = vpop.eup %5778 }
 0x2cc   : > { %v5781_v60 = vpop.eup %5780  ;;  %v4326_v32 = vmul.f32 %v5779_v19, %v4253_v20 }
 0x2cd   : > { %v5783_v39 = vpop.eup %5782  ;;  %v4305_v54 = vmul.f32 %v5781_v60, %v7485_v8  ;;  %v4463_v60 = vld [vmem:[#allocation2 + $0x10] sm:$0xff] }
 0x2ce   : > { %v5785_v16 = vpop.eup %5784  ;;  %v4328_v53 = vsel %vm4327_vm5, %v4253_v20, %v4326_v32  ;;  %v4425_v56 = vmul.f32 0.6931472, %v5783_v39 }
 0x2cf   : > { %v5787_v42 = vpop.eup %5786  ;;  %v4331_v46 = vsel %vm4329_vm7, %v4330_v12, %v4328_v53  ;;  %v4413_v17 = vmul.f32 0.6931472, %v5785_v16  ;;  %v4307_v48 = vsel %vm4306_vm4, %v7485_v8, %v4305_v54 }
 0x2d0   : > { %v4451_v28 = vmul.f32 0.4342945, %v4425_v56  ;;  %v4514_v63 = vsub.f32 %v4268_v52, %v4331_v46  ;;  %v4347_v58 = vmul.f32 %v5787_v42, %v7494_v2  ;;  %v5789_v18 = vpop.eup %5788  ;;  %v4310_v19 = vsel %vm4308_vm6, %v4309_v15, %v4307_v48 }
 0x2d1   : > { %v5791_v20 = vpop.eup %5790  ;;  %v4445_v21 = vmul.f32 0.4342945, %v4413_v17  ;;  %v4419_v59 = vmul.f32 0.6931472, %v5789_v18 }
 0x2d2   : > { %v4469_v5 = vsub.f32 %v4442_v40, %v4451_v28  ;;  %v4523_v6 = vand.u32 2147483647, %v4514_v63  ;;  %v4349_v13 = vsel %vm4348_vm8, %v7494_v2, %v4347_v58  ;;  %v4431_v62 = vmul.f32 0.6931472, %v5791_v20 }
 0x2d3   : > { %v5793_v41 = vpop.eup %5792  ;;  %v4352_v1 = vsel %vm4350_vm9, %v4351_v31, %v4349_v13  ;;  %v4448_v39 = vmul.f32 0.4342945, %v4419_v59 }
 0x2d4   : > { %v4478_v61 = vand.u32 2147483647, %v4469_v5  ;;  %v4532_v14 = vadd.f32 %v4523_v6, %v4505_v47  ;;  %v4517_v33 = vsub.f32 %v4289_v3, %v4352_v1  ;;  %v4368_v43 = vmul.f32 %v5793_v41, %v7498_v9 }
 0x2d5   : > { %v4454_v0 = vmul.f32 0.4342945, %v4431_v62  ;;  %v5795_v2 = vpop.eup %5794 }
 0x2d6   : > { %v4487_v50 = vadd.f32 %v4478_v61, %v4460_v26  ;;  %4541 = vst [vmem:[#allocation3 + $0x40] sm:$0xff] %v4532_v14  ;;  %v4526_v57 = vand.u32 2147483647, %v4517_v33  ;;  %v4370_v27 = vsel %vm4369_vm10, %v7498_v9, %v4368_v43  ;;  %v4437_v10 = vmul.f32 0.6931472, %v5795_v2  ;;  %v4466_v9 = vld [vmem:[#allocation2 + $0x40] sm:$0xff] }
 0x2d7   : > { %v4472_v30 = vsub.f32 %v4445_v21, %v4454_v0  ;;  %v4373_v22 = vsel %vm4371_vm11, %v4372_v29, %v4370_v27 }
 0x2d8   : > { %4496 = vst [vmem:[#allocation2 + $0x30] sm:$0xff] %v4487_v50  ;;  %v4535_v35 = vadd.f32 %v4526_v57, %v4508_v4  ;;  %v4520_v32 = vsub.f32 %v4310_v19, %v4373_v22  ;;  %v4457_v16 = vmul.f32 0.4342945, %v4437_v10 }
 0x2d9   : > { %v4481_v12 = vand.u32 2147483647, %v4472_v30 }
 0x2da   : > { %4544 = vst [vmem:[#allocation3 + $0x30] sm:$0xff] %v4535_v35  ;;  %v4529_v52 = vand.u32 2147483647, %v4520_v32  ;;  %v4475_v56 = vsub.f32 %v4448_v39, %v4457_v16 }
 0x2db   : > { %v4490_v53 = vadd.f32 %v4481_v12, %v4463_v60 }
 0x2dc   : > { %v4538_v42 = vadd.f32 %v4529_v52, %v4511_v11  ;;  %v4484_v8 = vand.u32 2147483647, %v4475_v56  ;;  %v4209_v11 = vmul.f32 %v7338_v23, %v7338_v23 }
 0x2dd   : > { %4499 = vst [vmem:[#allocation2 + $0x10] sm:$0xff] %v4490_v53  ;;  %v4210_v53 = vmul.f32 %v7451_v37, %v7451_v37 }
 0x2de   : > { %4547 = vst [vmem:[#allocation3 + $0x10] sm:$0xff] %v4538_v42  ;;  %v4493_v15 = vadd.f32 %v4484_v8, %v4466_v9 }
 0x2e0   : > { %4502 = vst [vmem:[#allocation2 + $0x40] sm:$0xff] %v4493_v15 }
 0x2e7   : > { %v3990_v49 = vpop.f32.mrf.mxu0 }
 0x2e8   : > { %v4053_v54 = vpop.f32.mrf.mxu1 }
 0x2e9   : > { %v3992_v46 = vpop.f32.mrf.mxu0  ;;  %v4054_v4 = vadd.f32 %v4053_v54, %v3990_v49 }
 0x2ea   : > { %v4055_v40 = vpop.f32.mrf.mxu1 }
 0x2eb   : > { %v3994_v28 = vpop.f32.mrf.mxu0  ;;  %v4056_v21 = vadd.f32 %v4055_v40, %v3992_v46 }
 0x2ec   : > { %v4057_v63 = vpop.f32.mrf.mxu1 }
 0x2ed   : > { %v3996_v58 = vpop.f32.mrf.mxu0  ;;  %v4058_v50 = vadd.f32 %v4057_v63, %v3994_v28  ;;  %v4212_v28 = vmul.f32 %v7351_v55, %v7351_v55 }
 0x2ee   : > { %v4059_v18 = vpop.f32.mrf.mxu1 }
 0x2ef   : > { %v4000_v17 = vpop.f32.mrf.mxu0  ;;  %v4060_v22 = vadd.f32 %v4059_v18, %v3996_v58 }
 0x2f0   : > { %v4063_v47 = vpop.f32.mrf.mxu1 }
 0x2f1   : > { %v4002_v31 = vpop.f32.mrf.mxu0  ;;  %v4064_v8 = vadd.f32 %v4063_v47, %v4000_v17 }
 0x2f2   : > { %v4065_v20 = vpop.f32.mrf.mxu1 }
 0x2f3   : > { %v4004_v3 = vpop.f32.mrf.mxu0  ;;  %v4066_v15 = vadd.f32 %v4065_v20, %v4002_v31  ;;  %v4213_v31 = vmul.f32 %v7456_v45, %v7456_v45 }
 0x2f4   : > { %v4067_v5 = vpop.f32.mrf.mxu1 }
 0x2f5   : > { %v4006_v6 = vpop.f32.mrf.mxu0  ;;  %v4068_v58 = vadd.f32 %v4067_v5, %v4004_v3 }
 0x2f6   : > { %v4069_v13 = vpop.f32.mrf.mxu1 }
 0x2f7   : > { %v4010_v41 = vpop.f32.mrf.mxu0  ;;  %v4070_v55 = vadd.f32 %v4069_v13, %v4006_v6  ;;  %v4215_v6 = vmul.f32 %v7364_v51, %v7364_v51 }
 0x2f8   : > { %v4073_v48 = vpop.f32.mrf.mxu1 }
 0x2f9   : > { %v7540_v26 = vpop.f32.mrf.mxu0 }
 0x2fa   : > { %v7542_v1 = vpop.f32.mrf.mxu1 }
 0x2fb   : > { %v7544_v62 = vpop.f32.mrf.mxu0  ;;  %v4076_v13 = vadd.f32 %v7542_v1, %v7540_v26  ;;  %v7585_v26 = vmul.f32 %v7397_v25, %v7397_v25  ;;  %v4216_v1 = vmul.f32 %v7463_v36, %v7463_v36 }
 0x2fc   : > { %v7546_v29 = vpop.f32.mrf.mxu1 }
 0x2fd   : > { %v7548_v61 = vpop.f32.mrf.mxu0 }
 0x2fe   : > { %v7550_v14 = vpop.f32.mrf.mxu1 }
 0x327   : > { %v4116_v33 = vpop.f32.mrf.mxu0 }
 0x328   : > { %v4179_v43 = vpop.f32.mrf.mxu1  ;;  %v4117_v59 = vadd.f32 %v4116_v33, %v4054_v4 }
 0x329   : > { %v4118_v0 = vpop.f32.mrf.mxu0 }
 0x32a   : > { %v4181_v2 = vpop.f32.mrf.mxu1  ;;  %v4180_v57 = vadd.f32 %v4179_v43, %v4117_v59  ;;  %v4119_v27 = vadd.f32 %v4118_v0, %v4056_v21  ;;  %v4074_v21 = vadd.f32 %v4073_v48, %v4010_v41 }
 0x32b   : > { %v4120_v19 = vpop.f32.mrf.mxu0 }
 0x32c   : > { %v4183_v30 = vpop.f32.mrf.mxu1  ;;  %v4227_v10 = vmul.f32 %v4180_v57, %v4180_v57  ;;  %v4182_v60 = vadd.f32 %v4181_v2, %v4119_v27  ;;  %v4121_v35 = vadd.f32 %v4120_v19, %v4058_v50 }
 0x32d   : > { %v4122_v32 = vpop.f32.mrf.mxu0 }
 0x32e   : > { %v4185_v39 = vpop.f32.mrf.mxu1  ;;  %v4228_v12 = vmul.f32 %v4182_v60, %v4182_v60  ;;  %v4184_v16 = vadd.f32 %v4183_v30, %v4121_v35  ;;  %v4123_v52 = vadd.f32 %v4122_v32, %v4060_v22  ;;  %v7556_v56 = vadd.f32 %v4227_v10, %v4209_v11 }
 0x32f   : > { %v4126_v9 = vpop.f32.mrf.mxu0  ;;  %v4218_v11 = vmul.f32 %v7377_v7, %v7377_v7  ;;  %v4221_v32 = vmul.f32 %v7390_v24, %v7390_v24  ;;  %v4222_v7 = vmul.f32 %v7477_v44, %v7477_v44  ;;  %v7596_v24 = vmul.f32 %v7491_v34, %v7491_v34 }
 0x330   : > { %v4189_v42 = vpop.f32.mrf.mxu1  ;;  %v7558_v49 = vadd.f32 %v4228_v12, %v4210_v53  ;;  %v4230_v54 = vmul.f32 %v4184_v16, %v4184_v16  ;;  %v4186_v46 = vadd.f32 %v4185_v39, %v4123_v52  ;;  %v4127_v63 = vadd.f32 %v4126_v9, %v4064_v8 }
 0x331   : > { %v4128_v40 = vpop.f32.mrf.mxu0  ;;  %5796 = vrsqrt.f32 %v7556_v56  ;;  %v4389_v37 = vmax.f32 %v7556_v56, 1e-10  ;;  %v4219_v12 = vmul.f32 %v7467_v38, %v7467_v38  ;;  %v4078_v38 = vadd.f32 %v7546_v29, %v7544_v62 }
 0x332   : > { %v4191_v23 = vpop.f32.mrf.mxu1  ;;  %v4129_v18 = vadd.f32 %v4128_v40, %v4066_v15  ;;  %v7564_v17 = vadd.f32 %v4230_v54, %v4212_v28  ;;  %v4231_v47 = vmul.f32 %v4186_v46, %v4186_v46  ;;  %5798 = vrsqrt.f32 %v7558_v49 }
 0x333   : > { %v4130_v4 = vpop.f32.mrf.mxu0  ;;  %v4390_v3 = vmax.f32 %v7558_v49, 1e-10  ;;  %v4190_v5 = vadd.f32 %v4189_v42, %v4127_v63  ;;  %5800 = vlog2.f32 %v4389_v37  ;;  %v7608_v44 = vadd.f32 %v7550_v14, %v7548_v61 }
 0x334   : > { %v4193_v33 = vpop.f32.mrf.mxu1  ;;  %v4131_v20 = vadd.f32 %v4130_v4, %v4068_v58  ;;  %v4392_v0 = vmax.f32 %v7564_v17, 1e-10  ;;  %v4192_v2 = vadd.f32 %v4191_v23, %v4129_v18  ;;  %v7571_v57 = vadd.f32 %v4231_v47, %v4213_v31 }
 0x335   : > { %v4132_v43 = vpop.f32.mrf.mxu0  ;;  %5802 = vrsqrt.f32 %v7564_v17  ;;  %v4233_v41 = vmul.f32 %v4190_v5, %v4190_v5  ;;  %vm4271_vm12 = vcmp.eq.f32.partialorder %v7556_v56, inf  ;;  %vm4273_vm13 = vcmp.eq.f32.partialorder %v7556_v56, 0.0 }
 0x336   : > { %v4195_v59 = vpop.f32.mrf.mxu1  ;;  %v4194_v27 = vadd.f32 %v4193_v33, %v4131_v20  ;;  %v4133_v19 = vadd.f32 %v4132_v43, %v4070_v55  ;;  %5804 = vlog2.f32 %v4390_v3  ;;  %v4234_v22 = vmul.f32 %v4192_v2, %v4192_v2 }
 0x337   : > { %v4136_v50 = vpop.f32.mrf.mxu0  ;;  %5806 = vlog2.f32 %v4392_v0  ;;  %v4393_v51 = vmax.f32 %v7571_v57, 1e-10  ;;  %v7598_v16 = vadd.f32 %v4233_v41, %v4215_v6  ;;  %v4274_v8 = vand.u32 2147483648, %v7556_v56 }
 0x338   : > { %v4137_v45 = vadd.f32 %v4136_v50, %v4074_v21  ;;  %v4199_v48 = vpop.f32.mrf.mxu1  ;;  %v4236_v10 = vmul.f32 %v4194_v27, %v4194_v27  ;;  %v4196_v60 = vadd.f32 %v4195_v59, %v4133_v19  ;;  %5808 = vrsqrt.f32 %v7571_v57 }
 0x339   : > { %v4138_v30 = vpop.f32.mrf.mxu0  ;;  %v7600_v25 = vadd.f32 %v4234_v22, %v4216_v1  ;;  %5810 = vlog2.f32 %v4393_v51  ;;  %v4395_v62 = vmax.f32 %v7598_v16, 1e-10  ;;  %vm4278_vm14 = vcmp.eq.f32.partialorder %v7558_v49, inf }
 0x33a   : > { %v4200_v35 = vadd.f32 %v4199_v48, %v4137_v45  ;;  %v4139_v39 = vadd.f32 %v4138_v30, %v4076_v13  ;;  %v7602_v52 = vadd.f32 %v4236_v10, %v4218_v11  ;;  %v4237_v36 = vmul.f32 %v4196_v60, %v4196_v60  ;;  %v4201_v34 = vpop.f32.mrf.mxu1 }
 0x33b   : > { %v4140_v9 = vpop.f32.mrf.mxu0  ;;  %vm4280_vm15 = vcmp.eq.f32.partialorder %v7558_v49, 0.0  ;;  %v4281_v28 = vand.u32 2147483648, %v7558_v49  ;;  %vm4292_vm0 = vcmp.eq.f32.partialorder %v7564_v17, inf  ;;  %v4396_v4 = vmax.f32 %v7600_v25, 1e-10 }
 0x33c   : > { %v4239_v53 = vmul.f32 %v4200_v35, %v4200_v35  ;;  %5812 = vrsqrt.f32 %v7602_v52  ;;  %v4202_v15 = vadd.f32 %v4201_v34, %v4139_v39  ;;  %v4398_v29 = vmax.f32 %v7602_v52, 1e-10  ;;  %v4203_v37 = vpop.f32.mrf.mxu1 }
 0x33d   : > { %5814 = vrsqrt.f32 %v7598_v16  ;;  %v4141_v61 = vadd.f32 %v4140_v9, %v4078_v38  ;;  %v7619_v46 = vadd.f32 %v4237_v36, %v4219_v12  ;;  %vm4294_vm1 = vcmp.eq.f32.partialorder %v7564_v17, 0.0  ;;  %v4142_v13 = vpop.f32.mrf.mxu0 }
 0x33e   : > { %v5797_v42 = vpop.eup %5796  ;;  %5816 = vrsqrt.f32 %v7600_v25  ;;  %v7621_v40 = vadd.f32 %v4239_v53, %v4221_v32  ;;  %v4240_v58 = vmul.f32 %v4202_v15, %v4202_v15  ;;  %v4295_v43 = vand.u32 2147483648, %v7564_v17 }
 0x33f   : > { %v5799_v54 = vpop.eup %5798  ;;  %v4270_v14 = vmul.f32 %v5797_v42, %v7556_v56  ;;  %5818 = vlog2.f32 %v4398_v29  ;;  %v4399_v33 = vmax.f32 %v7619_v46, 1e-10  ;;  %v4204_v47 = vadd.f32 %v4203_v37, %v4141_v61  ;;  %v4506_v37 = vld [vmem:[#allocation3 + $0x8] sm:$0xff] }
 0x340   : > { %v5801_v23 = vpop.eup %5800  ;;  %v4277_v63 = vmul.f32 %v5799_v54, %v7558_v49  ;;  %5820 = vrsqrt.f32 %v7619_v46  ;;  %vm4299_vm2 = vcmp.eq.f32.partialorder %v7571_v57, inf  ;;  %v4302_v21 = vand.u32 2147483648, %v7571_v57 }
 0x341   : > { %5822 = vlog2.f32 %v4395_v62  ;;  %v4272_v20 = vsel %vm4271_vm12, %v7556_v56, %v4270_v14  ;;  %v4409_v55 = vmul.f32 0.6931472, %v5801_v23  ;;  %v4316_v3 = vand.u32 2147483648, %v7598_v16 }
 0x342   : > { %v5803_v18 = vpop.eup %5802  ;;  %5824 = vrsqrt.f32 %v7621_v40  ;;  %v4279_v59 = vsel %vm4278_vm14, %v7558_v49, %v4277_v63  ;;  %v4401_v2 = vmax.f32 %v7621_v40, 1e-10  ;;  %v7645_v50 = vadd.f32 %v4240_v58, %v4222_v7 }
 0x343   : > { %v5805_v31 = vpop.eup %5804  ;;  %5826 = vlog2.f32 %v4399_v33  ;;  %v4291_v0 = vmul.f32 %v5803_v18, %v7564_v17  ;;  %v4275_v19 = vsel %vm4273_vm13, %v4274_v8, %v4272_v20  ;;  %v4242_v6 = vmul.f32 %v4204_v47, %v4204_v47 }
 0x344   : > { %v5807_v5 = vpop.eup %5806  ;;  %v4411_v45 = vmul.f32 0.6931472, %v5805_v31  ;;  %5828 = vlog2.f32 %v4396_v4  ;;  %vm4301_vm3 = vcmp.eq.f32.partialorder %v7571_v57, 0.0  ;;  %vm4334_vm4 = vcmp.eq.f32.partialorder %v7602_v52, inf }
 0x345   : > { %v5809_v27 = vpop.eup %5808  ;;  %vm4336_vm5 = vcmp.eq.f32.partialorder %v7602_v52, 0.0  ;;  %v4337_v41 = vand.u32 2147483648, %v7602_v52  ;;  %5830 = vlog2.f32 %v4401_v2  ;;  %v7653_v48 = vmul.f32 0.4342945, %v4409_v55 }
 0x346   : > { %v7657_v30 = vsel %vm4280_vm15, %v4281_v28, %v4279_v59  ;;  %v4415_v56 = vmul.f32 0.6931472, %v5807_v5  ;;  %5832 = vrsqrt.f32 %v7645_v50  ;;  %v5811_v22 = vpop.eup %5810  ;;  %v4293_v10 = vsel %vm4292_vm0, %v7564_v17, %v4291_v0  ;;  %v4461_v5 = vld [vmem:[#allocation2] sm:$0xff] }
 0x347   : > { %v4298_v60 = vmul.f32 %v5809_v27, %v7571_v57  ;;  %v4402_v35 = vmax.f32 %v7645_v50, 1e-10  ;;  %v4143_v11 = vadd.f32 %v4142_v13, %v7608_v44  ;;  %v7666_v51 = vmul.f32 0.4342945, %v4411_v45  ;;  %v4507_v45 = vld [vmem:[#allocation3 + $0x38] sm:$0xff] }
 0x348   : > { %vm4341_vm6 = vcmp.eq.f32.partialorder %v7619_v46, inf  ;;  %vm4343_vm7 = vcmp.eq.f32.partialorder %v7619_v46, 0.0  ;;  %v7671_v49 = vadd.f32 %v4242_v6, %v7585_v26  ;;  %v4344_v12 = vand.u32 2147483648, %v7619_v46  ;;  %v4205_v26 = vpop.f32.mrf.mxu1 }
 0x349   : > { %v5813_v32 = vpop.eup %5812  ;;  %vm4355_vm8 = vcmp.eq.f32.partialorder %v7621_v40, inf  ;;  %5834 = vlog2.f32 %v4402_v35  ;;  %v7678_v36 = vsel %vm4294_vm1, %v4295_v43, %v4293_v10  ;;  %v7680_v53 = vmul.f32 0.4342945, %v4415_v56 }
 0x34a   : > { %v5815_v1 = vpop.eup %5814  ;;  %v4333_v39 = vmul.f32 %v5813_v32, %v7602_v52  ;;  %vm4357_vm9 = vcmp.eq.f32.partialorder %v7621_v40, 0.0  ;;  %5836 = vrsqrt.f32 %v7671_v49  ;;  %v4300_v42 = vsel %vm4299_vm2, %v7571_v57, %v4298_v60  ;;  %v4509_v60 = vld [vmem:[#allocation3] sm:$0xff] }
 0x34b   : > { %v5817_v7 = vpop.eup %5816  ;;  %v4404_v17 = vmax.f32 %v7671_v49, 1e-10  ;;  %v4206_v44 = vadd.f32 %v4205_v26, %v4143_v11  ;;  %v4417_v8 = vmul.f32 0.6931472, %v5811_v22  ;;  %v4358_v62 = vand.u32 2147483648, %v7621_v40  ;;  %v4462_v22 = vld [vmem:[#allocation2 + $0x18] sm:$0xff] }
 0x34c   : > { %v5819_v9 = vpop.eup %5818  ;;  %v4335_v38 = vsel %vm4334_vm4, %v7602_v52, %v4333_v39  ;;  %vm4313_vm10 = vcmp.eq.f32.partialorder %v7598_v16, inf  ;;  %v7698_v63 = vsel %vm4301_vm3, %v4302_v21, %v4300_v42  ;;  %v4312_v58 = vmul.f32 %v5815_v1, %v7598_v16 }
 0x34d   : > { %v5821_v34 = vpop.eup %5820  ;;  %v4338_v15 = vsel %vm4336_vm5, %v4337_v41, %v4335_v38  ;;  %v4427_v54 = vmul.f32 0.6931472, %v5819_v9  ;;  %5838 = vlog2.f32 %v4404_v17  ;;  %v4243_v23 = vmul.f32 %v4206_v44, %v4206_v44 }
 0x34e   : > { %v5823_v29 = vpop.eup %5822  ;;  %v4515_v61 = vsub.f32 %v4275_v19, %v4338_v15  ;;  %v4340_v14 = vmul.f32 %v5821_v34, %v7619_v46  ;;  %vm4362_vm11 = vcmp.eq.f32.partialorder %v7645_v50, inf  ;;  %v7709_v57 = vmul.f32 0.4342945, %v4417_v8  ;;  %v4464_v8 = vld [vmem:[#allocation2 + $0x20] sm:$0xff]  ;;  %v4510_v15 = vld [vmem:[#allocation3 + $0x28] sm:$0xff] }
 0x34f   : > { %v5825_v28 = vpop.eup %5824  ;;  %v4452_v52 = vmul.f32 0.4342945, %v4427_v54  ;;  %v7707_v31 = vadd.f32 %v4243_v23, %v7596_v24  ;;  %vm4315_vm12 = vcmp.eq.f32.partialorder %v7598_v16, 0.0  ;;  %v7723_v27 = vmul.f32 %v5817_v7, %v7600_v25 }
 0x350   : > { %v5827_v18 = vpop.eup %5826  ;;  %v4524_v4 = vand.u32 2147483647, %v4515_v61  ;;  %v4342_v33 = vsel %vm4341_vm6, %v7619_v46, %v4340_v14  ;;  %v4354_v47 = vmul.f32 %v5825_v28, %v7621_v40  ;;  %vm4364_vm13 = vcmp.eq.f32.partialorder %v7645_v50, 0.0 }
 0x351   : > { %v4470_v20 = vsub.f32 %v7653_v48, %v4452_v52  ;;  %v4345_v43 = vsel %vm4343_vm7, %v4344_v12, %v4342_v33  ;;  %v4429_v55 = vmul.f32 0.6931472, %v5827_v18  ;;  %v7714_v21 = vpop.eup %5828  ;;  %5840 = vrsqrt.f32 %v7707_v31  ;;  %v4465_v18 = vld [vmem:[#allocation2 + $0x28] sm:$0xff] }
 0x352   : > { %v4533_v59 = vadd.f32 %v4524_v4, %v4506_v37  ;;  %v4516_v0 = vsub.f32 %v7657_v30, %v4345_v43  ;;  %v4356_v24 = vsel %vm4355_vm8, %v7621_v40, %v4354_v47  ;;  %v5831_v2 = vpop.eup %5830  ;;  %v4365_v11 = vand.u32 2147483648, %v7645_v50  ;;  %v4512_v33 = vld [vmem:[#allocation3 + $0x20] sm:$0xff] }
 0x353   : > { %v4479_v46 = vand.u32 2147483647, %v4470_v20  ;;  %v4453_v19 = vmul.f32 0.4342945, %v4429_v55  ;;  %v4359_v6 = vsel %vm4357_vm9, %v4358_v62, %v4356_v24  ;;  %v5833_v13 = vpop.eup %5832  ;;  %v4433_v48 = vmul.f32 0.6931472, %v5831_v2 }
 0x354   : > { %4542 = vst [vmem:[#allocation3 + $0x8] sm:$0xff] %v4533_v59  ;;  %v4525_v41 = vand.u32 2147483647, %v4516_v0  ;;  %v4518_v30 = vsub.f32 %v7678_v36, %v4359_v6  ;;  %v4361_v35 = vmul.f32 %v5833_v13, %v7645_v50  ;;  %v4405_v39 = vmax.f32 %v7707_v31, 1e-10  ;;  %v4467_v24 = vld [vmem:[#allocation2 + $0x38] sm:$0xff] }
 0x355   : > { %v4488_v56 = vadd.f32 %v4479_v46, %v4461_v5  ;;  %v4471_v10 = vsub.f32 %v7666_v51, %v4453_v19  ;;  %v4455_v40 = vmul.f32 0.4342945, %v4433_v48  ;;  %v4314_v7 = vsel %vm4313_vm10, %v7598_v16, %v4312_v58 }
 0x356   : > { %v4534_v32 = vadd.f32 %v4525_v41, %v4507_v45  ;;  %v4527_v1 = vand.u32 2147483647, %v4518_v30  ;;  %v5835_v12 = vpop.eup %5834  ;;  %v4421_v36 = vmul.f32 0.6931472, %v5823_v29  ;;  %v4363_v51 = vsel %vm4362_vm11, %v7645_v50, %v4361_v35  ;;  %v4513_v30 = vld [vmem:[#allocation3 + $0x18] sm:$0xff] }
 0x357   : > { %4497 = vst [vmem:[#allocation2] sm:$0xff] %v4488_v56  ;;  %v4480_v26 = vand.u32 2147483647, %v4471_v10  ;;  %v5837_v9 = vpop.eup %5836  ;;  %v4473_v42 = vsub.f32 %v7680_v53, %v4455_v40  ;;  %v4366_v17 = vsel %vm4364_vm13, %v4365_v11, %v4363_v51  ;;  %v4435_v44 = vmul.f32 0.6931472, %v5835_v12 }
 0x358   : > { %4543 = vst [vmem:[#allocation3 + $0x38] sm:$0xff] %v4534_v32  ;;  %v4536_v38 = vadd.f32 %v4527_v1, %v4509_v60  ;;  %v4519_v54 = vsub.f32 %v7698_v63, %v4366_v17  ;;  %v4375_v62 = vmul.f32 %v5837_v9, %v7671_v49  ;;  %5842 = vlog2.f32 %v4405_v39  ;;  %v4468_v32 = vld [vmem:[#allocation2 + $0x8] sm:$0xff]  ;;  %v4555_v1 = vld [vmem:[#allocation2 + $0x30] sm:$0xff] (%p4550_p10) }
 0x359   : > { %v4489_v34 = vadd.f32 %v4480_v26, %v4462_v22  ;;  %v4482_v29 = vand.u32 2147483647, %v4473_v42  ;;  %v4456_v61 = vmul.f32 0.4342945, %v4435_v44  ;;  %vm4376_vm14 = vcmp.eq.f32.partialorder %v7671_v49, inf  ;;  %v4584_v26 = vld [vmem:[#allocation3 + $0x40] sm:$0xff] (%p4550_p10) }
 0x35a   : > { %4545 = vst [vmem:[#allocation3] sm:$0xff] %v4536_v38  ;;  %v4379_v53 = vand.u32 2147483648, %v7671_v49  ;;  %v5839_v14 = vpop.eup %5838  ;;  %v4317_v50 = vsel %vm4315_vm12, %v4316_v3, %v4314_v7  ;;  %v4528_v23 = vand.u32 2147483647, %v4519_v54  ;;  %v4377_v28 = vsel %vm4376_vm14, %v7671_v49, %v4375_v62  ;;  %v4558_v7 = vld [vmem:[#allocation2 + $0x10] sm:$0xff] (%p4550_p10)  ;;  %v4587_v44 = vld [vmem:[#allocation3 + $0x30] sm:$0xff] (%p4550_p10) }
 0x35b   : > { %4498 = vst [vmem:[#allocation2 + $0x18] sm:$0xff] %v4489_v34  ;;  %vm4378_vm15 = vcmp.eq.f32.partialorder %v7671_v49, 0.0  ;;  %v4491_v63 = vadd.f32 %v4482_v29, %v4464_v8  ;;  %v4474_v58 = vsub.f32 %v7709_v57, %v4456_v61  ;;  %v4439_v37 = vmul.f32 0.6931472, %v5839_v14  ;;  %v4585_v51 = vld [vmem:[#allocation3 + $0x8] sm:$0xff] (%p4550_p10)  ;;  %v4561_v62 = vld [vmem:[#allocation2 + $0x40] sm:$0xff] (%p4550_p10) }
 0x35c   : > { %v4380_v52 = vsel %vm4378_vm15, %v4379_v53, %v4377_v28  ;;  %v4537_v4 = vadd.f32 %v4528_v23, %v4510_v15  ;;  %v4449_v20 = vmul.f32 0.4342945, %v4421_v36  ;;  %vm4320_vm0 = vcmp.eq.f32.partialorder %v7600_v25, inf  ;;  %v4590_v28 = vld [vmem:[#allocation3 + $0x10] sm:$0xff] (%p4550_p10) }
 0x35d   : > { %v4521_v47 = vsub.f32 %v4317_v50, %v4380_v52  ;;  %4500 = vst [vmem:[#allocation2 + $0x20] sm:$0xff] %v4491_v63  ;;  %v4483_v43 = vand.u32 2147483647, %v4474_v58  ;;  %v4458_v16 = vmul.f32 0.4342945, %v4439_v37  ;;  %v4321_v49 = vsel %vm4320_vm0, %v7600_v25, %v7723_v27 }
 0x35e   : > { %v5841_v3 = vpop.eup %5840  ;;  %4546 = vst [vmem:[#allocation3 + $0x28] sm:$0xff] %v4537_v4  ;;  %v4323_v0 = vand.u32 2147483648, %v7600_v25  ;;  %vm4383_vm1 = vcmp.eq.f32.partialorder %v7707_v31, inf  ;;  %v4386_v46 = vand.u32 2147483648, %v7707_v31  ;;  %vm4322_vm2 = vcmp.eq.f32.partialorder %v7600_v25, 0.0  ;;  %v4556_v39 = vld [vmem:[#allocation2] sm:$0xff] (%p4550_p10) }
 0x35f   : > { %v4530_v55 = vand.u32 2147483647, %v4521_v47  ;;  %v4492_v5 = vadd.f32 %v4483_v43, %v4465_v18  ;;  %v4476_v57 = vsub.f32 %v4449_v20, %v4458_v16  ;;  %v4382_v59 = vmul.f32 %v5841_v3, %v7707_v31  ;;  %v4586_v9 = vld [vmem:[#allocation3 + $0x38] sm:$0xff] (%p4550_p10) }
 0x360   : > { %vm4385_vm3 = vcmp.eq.f32.partialorder %v7707_v31, 0.0  ;;  %v4324_v27 = vsel %vm4322_vm2, %v4323_v0, %v4321_v49  ;;  %v4423_v48 = vmul.f32 0.6931472, %v7714_v21  ;;  %v4564_v12 = vadd.f32 (%p4550_p10), %v4556_v39, %v4555_v1 }
 0x361   : > { %v4539_v2 = vadd.f32 %v4530_v55, %v4512_v33  ;;  %4501 = vst [vmem:[#allocation2 + $0x28] sm:$0xff] %v4492_v5  ;;  %v4485_v19 = vand.u32 2147483647, %v4476_v57  ;;  %v4384_v45 = vsel %vm4383_vm1, %v7707_v31, %v4382_v59  ;;  %v4593_v38 = vadd.f32 (%p4550_p10), %v4585_v51, %v4584_v26  ;;  %v4588_v54 = vld [vmem:[#allocation3] sm:$0xff] (%p4550_p10) }
 0x362   : > { %v4387_v6 = vsel %vm4385_vm3, %v4386_v46, %v4384_v45  ;;  %v4450_v25 = vmul.f32 0.4342945, %v4423_v48  ;;  %v4557_v21 = vld [vmem:[#allocation2 + $0x18] sm:$0xff] (%p4550_p10)  ;;  %vm4582_vm4 = vcmask (%p4550_p10), 0  }
 0x363   : > { %4548 = vst [vmem:[#allocation3 + $0x20] sm:$0xff] %v4539_v2  ;;  %v4494_v13 = vadd.f32 %v4485_v19, %v4467_v24  ;;  %v4522_v41 = vsub.f32 %v4324_v27, %v4387_v6  ;;  %v4565_v36 = vadd.f32 (%p4550_p10), %v4564_v12, %v4557_v21  ;;  %v4594_v8 = vadd.f32 (%p4550_p10), %v4593_v38, %v4586_v9 }
 0x364   : > { %v4559_v42 = vld [vmem:[#allocation2 + $0x20] sm:$0xff] (%p4550_p10) }
 0x365   : > { %v5843_v56 = vpop.eup %5842  ;;  %4503 = vst [vmem:[#allocation2 + $0x38] sm:$0xff] %v4494_v13  ;;  %v4531_v22 = vand.u32 2147483647, %v4522_v41  ;;  %v4566_v17 = vadd.f32 (%p4550_p10), %v4565_v36, %v4558_v7  ;;  %v4595_v29 = vadd.f32 (%p4550_p10), %v4594_v8, %v4587_v44  ;;  %v4589_v53 = vld [vmem:[#allocation3 + $0x28] sm:$0xff] (%p4550_p10) }
 0x366   : > { %v4441_v10 = vmul.f32 0.6931472, %v5843_v56 }
 0x367   : > { %v4540_v60 = vadd.f32 %v4531_v22, %v4513_v30  ;;  %v4567_v15 = vadd.f32 (%p4550_p10), %v4566_v17, %v4559_v42  ;;  %v4596_v50 = vadd.f32 (%p4550_p10), %v4595_v29, %v4588_v54 }
 0x368   : > { %v4459_v35 = vmul.f32 0.4342945, %v4441_v10  ;;  %v4560_v34 = vld [vmem:[#allocation2 + $0x28] sm:$0xff] (%p4550_p10) }
 0x369   : > { %4549 = vst [vmem:[#allocation3 + $0x18] sm:$0xff] %v4540_v60  ;;  %v4568_v61 = vadd.f32 (%p4550_p10), %v4567_v15, %v4560_v34  ;;  %v4597_v58 = vadd.f32 (%p4550_p10), %v4596_v50, %v4589_v53 }
 0x36a   : > { %v4477_v11 = vsub.f32 %v4450_v25, %v4459_v35  ;;  %v4591_v37 = vld [vmem:[#allocation3 + $0x20] sm:$0xff] (%p4550_p10) }
 0x36b   : > { %v4569_v23 = vadd.f32 (%p4550_p10), %v4568_v61, %v4561_v62  ;;  %v4598_v18 = vadd.f32 (%p4550_p10), %v4597_v58, %v4590_v28 }
 0x36c   : > { %v4486_v40 = vand.u32 2147483647, %v4477_v11  ;;  %4554 = sbr.rel (!%p4550_p10) target bundleno = 1096 (0x448), region = 59  ;;  %v4562_v14 = vld [vmem:[#allocation2 + $0x38] sm:$0xff] (%p4550_p10) }
 0x36d   : > { %v4570_v52 = vadd.f32 (%p4550_p10), %v4569_v23, %v4562_v14  ;;  %v4599_v47 = vadd.f32 (%p4550_p10), %v4598_v18, %v4591_v37 }
 0x36e   : > { %v4495_v31 = vadd.f32 %v4486_v40, %v4468_v32 }
 0x370   : > { %4504 = vst [vmem:[#allocation2 + $0x8] sm:$0xff] %v4495_v31  ;;  %v4592_v33 = vld [vmem:[#allocation3 + $0x18] sm:$0xff] (%p4550_p10) }
 0x371   : > { %v4600_v20 = vadd.f32 %v4599_v47, %v4592_v33 }
 0x377   : > { %v4563_v63 = vld [vmem:[#allocation2 + $0x8] sm:$0xff] }
 0x378   : > { %v4571_v4 = vadd.f32 %v4570_v52, %v4563_v63 }
 0x37a   : > { %4572 = vadd.xlane.f32.xlu0 %v4571_v4 }
 0x37e   : > { %4601 = vadd.xlane.f32.xlu0 %v4600_v20 }
 0x403   : > { %v4573_v43 = vpop.xlane.xlu0 %4572 }
 0x404   : > { %v4574_v16 = vrot.slane %v4573_v43, 4 }
 0x406   : > { %v4575_v3 = vadd.f32 %v4574_v16, %v4573_v43 }
 0x407   : > { %v4602_v55 = vpop.xlane.xlu0 %4601 }
 0x408   : > { %v4576_v49 = vrot.slane %v4575_v3, 2  ;;  %v4603_v5 = vrot.slane %v4602_v55, 4 }
 0x40a   : > { %v4604_v57 = vadd.f32 %v4603_v5, %v4602_v55  ;;  %v4577_v59 = vadd.f32 %v4576_v49, %v4575_v3 }
 0x40c   : > { %v4605_v0 = vrot.slane %v4604_v57, 2  ;;  %v4578_v24 = vrot.slane %v4577_v59, 1 }
 0x40e   : > { %v4606_v2 = vadd.f32 %v4605_v0, %v4604_v57  ;;  %v4579_v46 = vadd.f32 %v4578_v24, %v4577_v59 }
 0x410   : > { %5137 = vpush %v4579_v46  ;;  %v4607_v19 = vrot.slane %v4606_v2, 1 }
 0x412   : > { %v4608_v45 = vadd.f32 %v4607_v19, %v4606_v2 }
 0x414   : > { %5139 = vpush %v4608_v45 }
 0x441   : > { %s5138_s14 = spop %5137 }
 0x442   : > { %v4581_v27 = vstv %s5138_s14 }
 0x443   : > { %4583 = vst.msk [vmem:[#allocation5] sm:$0x1] %vm4582_vm4, %v4581_v27 }
 0x445   : > { %s5140_s4 = spop %5139 }
 0x446   : > { %v4610_v6 = vstv %s5140_s4 }
 0x447   : > { %4611 = vst.msk [vmem:[#allocation7] sm:$0x1] %vm4582_vm4, %v4610_v6 }
 0x448 PF: > { %p7768_p11 = scmp.eq.s32.totalorder %s4710_s17, 1  ;;  %s5941_s23 = smov [#allocation5]  }
 0x449   : > { %s4619_s24 = sshll.u32 %s5941_s23, 4  ;;  %s5942_s25 = smov [#allocation7]   ;;  %s4620_s24 = int_to_ptr.vmem [resolvable:$true] %s4619_s24 }
 0x44a   : > { %s4630_s26 = sshll.u32 %s5942_s25, 4  ;;  %s5844_s27 = scalar_lea.vmem %s4620_s24, 16  ;;  %s4631_s26 = int_to_ptr.vmem [resolvable:$true] %s4630_s26 }
 0x44b   : > { %p5845_p12 = scmp.ne.s32.totalorder %s4620_s24, %s5844_s27  ;;  %s5850_s28 = scalar_lea.vmem %s4620_s24, 32 }
 0x44c   : > { %p5851_p1 = scmp.lt.s32.totalorder %s4620_s24, %s4620_s24  ;;  %p5852_p2 = scmp.lt.s32.totalorder %s5850_s28, %s5844_s27 }
 0x44d   : > { %p5846_p13 = pnand %p5845_p12, %p7768_p11 }
 0x44e   : > { %p5853_p3 = por %p5852_p2, %p5851_p1 }
 0x44f   : > { %p5847_p0 = pneg %p5846_p13 }
 0x451   : > { %p5854_p4 = pnand %p5853_p3, %p5847_p0 }
 0x453   : > { %5857 = shalt.err (!%p5854_p4)
}
 0x454   : > { %5142 = dma.vmem_to_hbm [thread:$0]  (%p7768_p11), %s4620_s24, 16, %s7811_s2, [#allocation6]  }
 0x455   : > { %s5868_s30 = scalar_lea.vmem %s4631_s26, 16  ;;  %s5874_s5 = scalar_lea.vmem %s4631_s26, 32 }
 0x456   : > { %p5869_p5 = scmp.ne.s32.totalorder %s4631_s26, %s5868_s30  ;;  %p5875_p8 = scmp.lt.s32.totalorder %s4631_s26, %s4631_s26 }
 0x457   : > { %p5876_p9 = scmp.lt.s32.totalorder %s5874_s5, %s5868_s30 }
 0x458   : > { %p5870_p6 = pnand %p5869_p5, %p7768_p11 }
 0x459   : > { %p5877_p10 = por %p5876_p9, %p5875_p8 }
 0x45a   : > { %p5871_p7 = pneg %p5870_p6 }
 0x45c   : > { %p5878_p12 = pnand %p5877_p10, %p5871_p7 }
 0x45e   : > { %5881 = shalt.err (!%p5878_p12)
}
 0x45f   : > { %5144 = dma.vmem_to_hbm [thread:$0]  (%p7768_p11), %s4631_s26, 16, %s7812_s3, [#allocation8]  }
 0x460   : > { %5913 = dma.done.wait (%p7768_p11), [#allocation6], 16  }
 0x461   : > { %5915 = vsyncadd (%p7768_p11), [#allocation6], 4294967280 }
 0x462   : > { %5917 = dma.done.wait (%p7768_p11), [#allocation8], 16  }
 0x463   : > { %5919 = vsyncadd (%p7768_p11), [#allocation8], 4294967280 }
 0x464 PF: > { %s16_s16 = sadd.s32 1, %s5938_s16   ;;  %s7814_s12 = smov %s5926_s13 }
 0x465   : > { %p13_p13 = scmp.ge.s32.totalorder %s16_s16, 4   ;;  %s7815_s13 = smov %s5999_s21 }
 0x466   : > { %s7816_s14 = smov %s5934_s15  ;;  %s7817_s15 = smov %s7819_s18 }
 0x467   :  { %15 = sbr.rel (!%p13_p13) target bundleno = 4 (0x4), region = 102 }
 0x46c   :  { %4647 = vsyncpa [#allocation6], 1 }
 0x46d   :  { %4649 = vsyncpa [#allocation6 + $0x1], 1 }
 0x46e   :  { %4650 = vsyncpa [#allocation8], 1 }

</bundles_post_ra>
